<compile_context>
chip_gen: v5e
topology: v5e:2x2
jax: 0.10.0
libtpu: 0.0.40
codegen_flags: <defaults>
</compile_context>

<pallas_src>
import numpy as np
import jax
import jax.numpy as jnp
from jax import lax
from jax.experimental import pallas as pl
from jax.experimental.pallas import tpu as pltpu

KSIZE = 5
STRIDE = 2
PAD = 2
CHANNELS = (1, 8, 16, 32, 64)
VMEM_LIMIT = 32 * 1024 * 1024


def _conv_out(s):
    return (s + 2 * PAD - KSIZE) // STRIDE + 1


# ------------------------------ fused kernel --------------------------------

def _disc_fused_kernel(x_ref,
                       l1_ref, s1_ref, b1_ref,
                       l2_ref, s2_ref, b2_ref,
                       l3_ref, s3_ref, b3_ref,
                       l4_ref, s4_ref, b4_ref,
                       wt_ref, selt_ref, fcb_ref,
                       o_ref):
    """Whole Discriminator forward on VMEM-resident data (single grid step).

    Per conv layer (activation layout A[ci*Hin+h, n*Win+w]):
        T   = Lcat @ A                      (5*Cout*Ho, N*Win)   bf16 x bf16 -> f32
        Out = bias + sum_kw T[kw] @ S_kw    (Cout*Ho,  N*Wo)     f32 (S is 0/1, exact)
    Tail (exact fold of AdaptiveAvgPool + Flatten + Linear, conv4 output in `acc`):
        logits[n] = sum_{c,h,w} weff[c,h,w] * acc[c*H+h, n*W+w] + fc_bias
        out       = sigmoid(logits)
    """
    layers = ((l1_ref, s1_ref, b1_ref), (l2_ref, s2_ref, b2_ref),
              (l3_ref, s3_ref, b3_ref), (l4_ref, s4_ref, b4_ref))
    a = x_ref[...]                                        # (C0*H0, N*W0) bf16
    acc = None
    for li, (l_ref, s_ref, b_ref) in enumerate(layers):
        rout = b_ref.shape[0]                             # Cout * Ho
        t = jnp.dot(l_ref[...], a, preferred_element_type=jnp.float32)
        acc = b_ref[...]                                  # (rout, 1) f32, broadcasts
        for kw in range(KSIZE):
            acc = acc + jnp.dot(t[kw * rout:(kw + 1) * rout, :], s_ref[kw],
                                preferred_element_type=jnp.float32)
        if li + 1 < len(layers):
            a = acc.astype(jnp.bfloat16)                  # next layer's A (bf16)
    # Tail: pooled-FC + sigmoid on the conv4 output held in `acc` (f32).
    e = acc * wt_ref[...]                                 # (C4*H4, N*W4)
    col = jnp.sum(e, axis=0, keepdims=True)               # (1, N*W4)
    per_b = col * selt_ref[...]                           # (N, N*W4) batch-masked
    logits = jnp.sum(per_b, axis=1, keepdims=True) + fcb_ref[...]   # (N, 1)
    o_ref[...] = (0.5 * (jnp.tanh(0.5 * logits) + 1.0)).astype(o_ref.dtype)


def _full_spec(shape):
    zeros = (0,) * len(shape)
    return pl.BlockSpec(tuple(shape), lambda *_: zeros)


def discriminator_forward(x_nchw, params):
    """params = prepare_params(...); x_nchw: (N, 1, H, W) float32 -> (N, 1) f32."""
    n, c, h, w = x_nchw.shape
    # NCHW -> (C*H, N*W): rows = channel-major H, cols = batch-major W (lane axis).
    a0 = jnp.transpose(x_nchw, (1, 2, 0, 3)).reshape(c * h, n * w).astype(jnp.bfloat16)
    inputs = (a0,) + tuple(params)
    return pl.pallas_call(
        _disc_fused_kernel,
        out_shape=jax.ShapeDtypeStruct((n, 1), jnp.float32),
        grid=(1,),
        in_specs=[_full_spec(v.shape) for v in inputs],
        out_specs=_full_spec((n, 1)),
        compiler_params=pltpu.CompilerParams(
            dimension_semantics=("arbitrary",),
            vmem_limit_bytes=VMEM_LIMIT),
    )(*inputs)


# --------------------- parameter init & hoisted preprocessing ----------------

def adaptive_pool_matrix(in_size, out_size):
    """Exact PyTorch AdaptiveAvgPool windowing along one dimension."""
    P = np.zeros((out_size, in_size), dtype=np.float32)
    for i in range(out_size):
        start = (i * in_size) // out_size
        end = -((-(i + 1) * in_size) // out_size)        # ceil((i+1)*in/out)
        P[i, start:end] = 1.0 / (end - start)
    return P


def _build_layer_mats(w, b, hin, win, batch):
    """Fold one 5x5/stride-2/pad-2 conv into (Lcat, S_stack, bias_col).

    Out2d[co*Ho+oh, n*Wo+ow] = bias[co] + sum_kw (L_kw @ A @ S_kw)[co*Ho+oh, n*Wo+ow]
    with A[ci*Hin+h, n*Win+w] the input activation; zero padding is folded in by
    simply dropping out-of-range taps (they contribute 0).
    """
    w = np.asarray(w, np.float32)
    b = np.asarray(b, np.float32)
    cout, cin, _, _ = w.shape
    ho, wo = _conv_out(hin), _conv_out(win)
    L = np.zeros((KSIZE, cout * ho, cin * hin), np.float32)
    for kw in range(KSIZE):
        for kh in range(KSIZE):
            for oh in range(ho):
                h = STRIDE * oh + kh - PAD
                if 0 <= h < hin:
                    L[kw, oh::ho, h::hin] += w[:, :, kh, kw]
    S = np.zeros((KSIZE, batch * win, batch * wo), np.float32)
    for kw in range(KSIZE):
        for ow in range(wo):
            wc = STRIDE * ow + kw - PAD
            if 0 <= wc < win:
                for nn in range(batch):
                    S[kw, nn * win + wc, nn * wo + ow] = 1.0
    lcat = L.reshape(KSIZE * cout * ho, cin * hin)
    bias_col = np.repeat(b, ho)[:, None]
    return (jnp.asarray(lcat, jnp.bfloat16),
            jnp.asarray(S, jnp.float32),
            jnp.asarray(bias_col, jnp.float32), ho, wo)


def prepare_params(convs, fc, *, nfreqs, adapt_size, batch, height, width):
    """One-time (outside the per-call path) folding of all weights."""
    args = []
    h, w = height, width
    for (cw, cb) in convs:
        lcat, s, bias, h, w = _build_layer_mats(cw, cb, h, w, batch)
        args.extend([lcat, s, bias])
    c_last = convs[-1][0].shape[0]
    fcw, fcb = fc
    # Fold AdaptiveAvgPool2d + Flatten + Linear into a per-position weight (exact,
    # everything after conv4 is linear):
    #   weff[c,h,w] = sum_{i,j} fcw[c,i,j] * Ph[i,h] * Pw[j,w]
    ph = adaptive_pool_matrix(h, nfreqs)                  # (nfreqs, H4)
    pw = adaptive_pool_matrix(w, adapt_size)              # (adapt_size, W4)
    wfc = np.asarray(fcw, np.float32).reshape(c_last, nfreqs, adapt_size)
    weff2d = np.einsum('cij,ih,jw->chw', wfc, ph, pw).reshape(c_last * h, w)
    wt = np.tile(weff2d, (1, batch)).astype(np.float32)   # (C4*H4, N*W4)
    # Batch selector (N, N*W4): selt[n, m] = 1 iff column m belongs to batch n.
    selt = np.kron(np.eye(batch, dtype=np.float32), np.ones((1, w), np.float32))
    fcb2 = np.asarray(fcb, np.float32).reshape(1, 1)
    args.extend([jnp.asarray(wt), jnp.asarray(selt), jnp.asarray(fcb2)])
    return tuple(args)


def init_params(key, nfreqs, adapt_size):
    """Deterministic PyTorch-default-like uniform init (fan_in based)."""
    keys = jax.random.split(key, 10)
    convs = []
    for li in range(4):
        cin, cout = CHANNELS[li], CHANNELS[li + 1]
        bound = 1.0 / np.sqrt(cin * KSIZE * KSIZE)
        w = jax.random.uniform(keys[2 * li], (cout, cin, KSIZE, KSIZE),
                               jnp.float32, -bound, bound)
        b = jax.random.uniform(keys[2 * li + 1], (cout,), jnp.float32, -bound, bound)
        convs.append((w, b))
    in_features = CHANNELS[-1] * nfreqs * adapt_size
    bound = 1.0 / np.sqrt(in_features)
    fcw = jax.random.uniform(keys[8], (1, in_features), jnp.float32, -bound, bound)
    fcb = jax.random.uniform(keys[9], (1,), jnp.float32, -bound, bound)
    return convs, (fcw, fcb)


# ------------------------------ XLA reference --------------------------------

def reference_forward(x, convs, fc, nfreqs, adapt_size):
    """Pure-XLA reference with the same bf16 rounding of input / conv weights."""
    a = x.astype(jnp.bfloat16).astype(jnp.float32)
    for (cw, cb) in convs:
        wq = cw.astype(jnp.bfloat16).astype(jnp.float32)
        a = lax.conv_general_dilated(a, wq, window_strides=(STRIDE, STRIDE),
                                     padding=((PAD, PAD), (PAD, PAD)),
                                     dimension_numbers=('NCHW', 'OIHW', 'NCHW'))
        a = a + cb.reshape(1, -1, 1, 1)
        # nn.LeakyReLU(True): negative_slope == 1.0 -> identity.
    n, c, hc, wc = a.shape
    ph = jnp.asarray(adaptive_pool_matrix(hc, nfreqs))
    pw = jnp.asarray(adaptive_pool_matrix(wc, adapt_size))
    pooled = jnp.einsum('nchw,ih,jw->ncij', a, ph, pw)
    flat = pooled.reshape(n, -1)
    fcw, fcb = fc
    return jax.nn.sigmoid(flat @ fcw.T + fcb)


if __name__ == "__main__":
    nfreqs, adapt_size = 2, 2
    N, H, W = 2, 64, 64                                  # 64 -> 32 -> 16 -> 8 -> 4

    key = jax.random.PRNGKey(0)
    kx, kp = jax.random.split(key)
    x = jax.random.normal(kx, (N, 1, H, W), jnp.float32)

    convs, fc = init_params(kp, nfreqs, adapt_size)
    params = prepare_params(convs, fc, nfreqs=nfreqs, adapt_size=adapt_size,
                            batch=N, height=H, width=W)

    fwd = jax.jit(discriminator_forward)
    y = fwd(x, params)
    jax.block_until_ready(y)

    assert y.shape == (N, 1) and y.dtype == jnp.float32
    assert bool(jnp.all(jnp.isfinite(y)))
    assert bool(jnp.all((y >= 0.0) & (y <= 1.0)))

    # One-shot parity check vs. a pure-XLA reference (catches any ordering bug in
    # the folded L/S/pool matrices).  Tolerance covers bf16 activation rounding.
    y_ref = reference_forward(x, convs, fc, nfreqs, adapt_size)
    np.testing.assert_allclose(np.asarray(y), np.asarray(y_ref), atol=3e-2, rtol=0)
    print("KERNEL_OK")
</pallas_src>

<mosaic_0001>
module attributes {stable_mosaic.version = 11 : i64} {
  func.func @_disc_fused_kernel(%arg0: i32, %arg1: memref<64x128xbf16, #tpu.memory_space<vmem>>, %arg2: memref<1280x64xbf16, #tpu.memory_space<vmem>>, %arg3: memref<5x128x64xf32, #tpu.memory_space<vmem>>, %arg4: memref<256x1xf32, #tpu.memory_space<vmem>>, %arg5: memref<1280x256xbf16, #tpu.memory_space<vmem>>, %arg6: memref<5x64x32xf32, #tpu.memory_space<vmem>>, %arg7: memref<256x1xf32, #tpu.memory_space<vmem>>, %arg8: memref<1280x256xbf16, #tpu.memory_space<vmem>>, %arg9: memref<5x32x16xf32, #tpu.memory_space<vmem>>, %arg10: memref<256x1xf32, #tpu.memory_space<vmem>>, %arg11: memref<1280x256xbf16, #tpu.memory_space<vmem>>, %arg12: memref<5x16x8xf32, #tpu.memory_space<vmem>>, %arg13: memref<256x1xf32, #tpu.memory_space<vmem>>, %arg14: memref<256x8xf32, #tpu.memory_space<vmem>>, %arg15: memref<2x8xf32, #tpu.memory_space<vmem>>, %arg16: memref<1x1xf32, #tpu.memory_space<vmem>>, %arg17: memref<2x1xf32, #tpu.memory_space<vmem>>) attributes {dimension_semantics = [#tpu.dimension_semantics<arbitrary>], iteration_bounds = array<i64: 1>, scalar_prefetch = 0 : i64, scratch_operands = 0 : i64, tpu.core_type = #tpu.core_type<tc>, window_params = [{pipeline_mode = #tpu.pipeline_mode<synchronous>, transform_indices = @transform_0, window_bounds = array<i64: 64, 128>}, {pipeline_mode = #tpu.pipeline_mode<synchronous>, transform_indices = @transform_1, window_bounds = array<i64: 1280, 64>}, {pipeline_mode = #tpu.pipeline_mode<synchronous>, transform_indices = @transform_2, window_bounds = array<i64: 5, 128, 64>}, {pipeline_mode = #tpu.pipeline_mode<synchronous>, transform_indices = @transform_3, window_bounds = array<i64: 256, 1>}, {pipeline_mode = #tpu.pipeline_mode<synchronous>, transform_indices = @transform_4, window_bounds = array<i64: 1280, 256>}, {pipeline_mode = #tpu.pipeline_mode<synchronous>, transform_indices = @transform_5, window_bounds = array<i64: 5, 64, 32>}, {pipeline_mode = #tpu.pipeline_mode<synchronous>, transform_indices = @transform_6, window_bounds = array<i64: 256, 1>}, {pipeline_mode = #tpu.pipeline_mode<synchronous>, transform_indices = @transform_7, window_bounds = array<i64: 1280, 256>}, {pipeline_mode = #tpu.pipeline_mode<synchronous>, transform_indices = @transform_8, window_bounds = array<i64: 5, 32, 16>}, {pipeline_mode = #tpu.pipeline_mode<synchronous>, transform_indices = @transform_9, window_bounds = array<i64: 256, 1>}, {pipeline_mode = #tpu.pipeline_mode<synchronous>, transform_indices = @transform_10, window_bounds = array<i64: 1280, 256>}, {pipeline_mode = #tpu.pipeline_mode<synchronous>, transform_indices = @transform_11, window_bounds = array<i64: 5, 16, 8>}, {pipeline_mode = #tpu.pipeline_mode<synchronous>, transform_indices = @transform_12, window_bounds = array<i64: 256, 1>}, {pipeline_mode = #tpu.pipeline_mode<synchronous>, transform_indices = @transform_13, window_bounds = array<i64: 256, 8>}, {pipeline_mode = #tpu.pipeline_mode<synchronous>, transform_indices = @transform_14, window_bounds = array<i64: 2, 8>}, {pipeline_mode = #tpu.pipeline_mode<synchronous>, transform_indices = @transform_15, window_bounds = array<i64: 1, 1>}, {pipeline_mode = #tpu.pipeline_mode<synchronous>, transform_indices = @transform_16, window_bounds = array<i64: 2, 1>}]} {
    %c0 = arith.constant 0 : index
    %c0_0 = arith.constant 0 : index
    %0 = vector.load %arg1[%c0, %c0_0] : memref<64x128xbf16, #tpu.memory_space<vmem>>, vector<64x128xbf16>
    %c0_1 = arith.constant 0 : index
    %c0_2 = arith.constant 0 : index
    %1 = vector.load %arg2[%c0_1, %c0_2] : memref<1280x64xbf16, #tpu.memory_space<vmem>>, vector<1280x64xbf16>
    %cst = arith.constant dense<0.000000e+00> : vector<1280x128xf32>
    %2 = tpu.matmul %1, %0, %cst {dimension_numbers = #tpu.dot_dimension_numbers<[1], [0], [0], [1], [0, 0, 1, 1], [], []>} : vector<1280x64xbf16>, vector<64x128xbf16>, vector<1280x128xf32> -> vector<1280x128xf32>
    %c0_3 = arith.constant 0 : index
    %c0_4 = arith.constant 0 : index
    %3 = vector.load %arg4[%c0_3, %c0_4] : memref<256x1xf32, #tpu.memory_space<vmem>>, vector<256x1xf32>
    %4 = vector.extract_strided_slice %2 {offsets = [0, 0], sizes = [256, 128], strides = [1, 1]} : vector<1280x128xf32> to vector<256x128xf32>
    %c0_5 = arith.constant 0 : index
    %c0_6 = arith.constant 0 : index
    %c0_7 = arith.constant 0 : index
    %5 = vector.load %arg3[%c0_5, %c0_6, %c0_7] : memref<5x128x64xf32, #tpu.memory_space<vmem>>, vector<1x128x64xf32>
    %6 = vector.shape_cast %5 : vector<1x128x64xf32> to vector<128x64xf32>
    %cst_8 = arith.constant dense<0.000000e+00> : vector<256x64xf32>
    %7 = tpu.matmul %4, %6, %cst_8 {dimension_numbers = #tpu.dot_dimension_numbers<[1], [0], [0], [1], [0, 0, 1, 1], [], []>} : vector<256x128xf32>, vector<128x64xf32>, vector<256x64xf32> -> vector<256x64xf32>
    %8 = vector.broadcast %3 : vector<256x1xf32> to vector<256x64xf32>
    %9 = arith.addf %8, %7 : vector<256x64xf32>
    %10 = vector.extract_strided_slice %2 {offsets = [256, 0], sizes = [256, 128], strides = [1, 1]} : vector<1280x128xf32> to vector<256x128xf32>
    %c1 = arith.constant 1 : index
    %c0_9 = arith.constant 0 : index
    %c0_10 = arith.constant 0 : index
    %11 = vector.load %arg3[%c1, %c0_9, %c0_10] : memref<5x128x64xf32, #tpu.memory_space<vmem>>, vector<1x128x64xf32>
    %12 = vector.shape_cast %11 : vector<1x128x64xf32> to vector<128x64xf32>
    %cst_11 = arith.constant dense<0.000000e+00> : vector<256x64xf32>
    %13 = tpu.matmul %10, %12, %cst_11 {dimension_numbers = #tpu.dot_dimension_numbers<[1], [0], [0], [1], [0, 0, 1, 1], [], []>} : vector<256x128xf32>, vector<128x64xf32>, vector<256x64xf32> -> vector<256x64xf32>
    %14 = arith.addf %9, %13 : vector<256x64xf32>
    %15 = vector.extract_strided_slice %2 {offsets = [512, 0], sizes = [256, 128], strides = [1, 1]} : vector<1280x128xf32> to vector<256x128xf32>
    %c2 = arith.constant 2 : index
    %c0_12 = arith.constant 0 : index
    %c0_13 = arith.constant 0 : index
    %16 = vector.load %arg3[%c2, %c0_12, %c0_13] : memref<5x128x64xf32, #tpu.memory_space<vmem>>, vector<1x128x64xf32>
    %17 = vector.shape_cast %16 : vector<1x128x64xf32> to vector<128x64xf32>
    %cst_14 = arith.constant dense<0.000000e+00> : vector<256x64xf32>
    %18 = tpu.matmul %15, %17, %cst_14 {dimension_numbers = #tpu.dot_dimension_numbers<[1], [0], [0], [1], [0, 0, 1, 1], [], []>} : vector<256x128xf32>, vector<128x64xf32>, vector<256x64xf32> -> vector<256x64xf32>
    %19 = arith.addf %14, %18 : vector<256x64xf32>
    %20 = vector.extract_strided_slice %2 {offsets = [768, 0], sizes = [256, 128], strides = [1, 1]} : vector<1280x128xf32> to vector<256x128xf32>
    %c3 = arith.constant 3 : index
    %c0_15 = arith.constant 0 : index
    %c0_16 = arith.constant 0 : index
    %21 = vector.load %arg3[%c3, %c0_15, %c0_16] : memref<5x128x64xf32, #tpu.memory_space<vmem>>, vector<1x128x64xf32>
    %22 = vector.shape_cast %21 : vector<1x128x64xf32> to vector<128x64xf32>
    %cst_17 = arith.constant dense<0.000000e+00> : vector<256x64xf32>
    %23 = tpu.matmul %20, %22, %cst_17 {dimension_numbers = #tpu.dot_dimension_numbers<[1], [0], [0], [1], [0, 0, 1, 1], [], []>} : vector<256x128xf32>, vector<128x64xf32>, vector<256x64xf32> -> vector<256x64xf32>
    %24 = arith.addf %19, %23 : vector<256x64xf32>
    %25 = vector.extract_strided_slice %2 {offsets = [1024, 0], sizes = [256, 128], strides = [1, 1]} : vector<1280x128xf32> to vector<256x128xf32>
    %c4 = arith.constant 4 : index
    %c0_18 = arith.constant 0 : index
    %c0_19 = arith.constant 0 : index
    %26 = vector.load %arg3[%c4, %c0_18, %c0_19] : memref<5x128x64xf32, #tpu.memory_space<vmem>>, vector<1x128x64xf32>
    %27 = vector.shape_cast %26 : vector<1x128x64xf32> to vector<128x64xf32>
    %cst_20 = arith.constant dense<0.000000e+00> : vector<256x64xf32>
    %28 = tpu.matmul %25, %27, %cst_20 {dimension_numbers = #tpu.dot_dimension_numbers<[1], [0], [0], [1], [0, 0, 1, 1], [], []>} : vector<256x128xf32>, vector<128x64xf32>, vector<256x64xf32> -> vector<256x64xf32>
    %29 = arith.addf %24, %28 : vector<256x64xf32>
    %30 = arith.truncf %29 : vector<256x64xf32> to vector<256x64xbf16>
    %c0_21 = arith.constant 0 : index
    %c0_22 = arith.constant 0 : index
    %31 = vector.load %arg5[%c0_21, %c0_22] : memref<1280x256xbf16, #tpu.memory_space<vmem>>, vector<1280x256xbf16>
    %cst_23 = arith.constant dense<0.000000e+00> : vector<1280x64xf32>
    %32 = tpu.matmul %31, %30, %cst_23 {dimension_numbers = #tpu.dot_dimension_numbers<[1], [0], [0], [1], [0, 0, 1, 1], [], []>} : vector<1280x256xbf16>, vector<256x64xbf16>, vector<1280x64xf32> -> vector<1280x64xf32>
    %c0_24 = arith.constant 0 : index
    %c0_25 = arith.constant 0 : index
    %33 = vector.load %arg7[%c0_24, %c0_25] : memref<256x1xf32, #tpu.memory_space<vmem>>, vector<256x1xf32>
    %34 = vector.extract_strided_slice %32 {offsets = [0, 0], sizes = [256, 64], strides = [1, 1]} : vector<1280x64xf32> to vector<256x64xf32>
    %c0_26 = arith.constant 0 : index
    %c0_27 = arith.constant 0 : index
    %c0_28 = arith.constant 0 : index
    %35 = vector.load %arg6[%c0_26, %c0_27, %c0_28] : memref<5x64x32xf32, #tpu.memory_space<vmem>>, vector<1x64x32xf32>
    %36 = vector.shape_cast %35 : vector<1x64x32xf32> to vector<64x32xf32>
    %cst_29 = arith.constant dense<0.000000e+00> : vector<256x32xf32>
    %37 = tpu.matmul %34, %36, %cst_29 {dimension_numbers = #tpu.dot_dimension_numbers<[1], [0], [0], [1], [0, 0, 1, 1], [], []>} : vector<256x64xf32>, vector<64x32xf32>, vector<256x32xf32> -> vector<256x32xf32>
    %38 = vector.broadcast %33 : vector<256x1xf32> to vector<256x32xf32>
    %39 = arith.addf %38, %37 : vector<256x32xf32>
    %40 = vector.extract_strided_slice %32 {offsets = [256, 0], sizes = [256, 64], strides = [1, 1]} : vector<1280x64xf32> to vector<256x64xf32>
    %c1_30 = arith.constant 1 : index
    %c0_31 = arith.constant 0 : index
    %c0_32 = arith.constant 0 : index
    %41 = vector.load %arg6[%c1_30, %c0_31, %c0_32] : memref<5x64x32xf32, #tpu.memory_space<vmem>>, vector<1x64x32xf32>
    %42 = vector.shape_cast %41 : vector<1x64x32xf32> to vector<64x32xf32>
    %cst_33 = arith.constant dense<0.000000e+00> : vector<256x32xf32>
    %43 = tpu.matmul %40, %42, %cst_33 {dimension_numbers = #tpu.dot_dimension_numbers<[1], [0], [0], [1], [0, 0, 1, 1], [], []>} : vector<256x64xf32>, vector<64x32xf32>, vector<256x32xf32> -> vector<256x32xf32>
    %44 = arith.addf %39, %43 : vector<256x32xf32>
    %45 = vector.extract_strided_slice %32 {offsets = [512, 0], sizes = [256, 64], strides = [1, 1]} : vector<1280x64xf32> to vector<256x64xf32>
    %c2_34 = arith.constant 2 : index
    %c0_35 = arith.constant 0 : index
    %c0_36 = arith.constant 0 : index
    %46 = vector.load %arg6[%c2_34, %c0_35, %c0_36] : memref<5x64x32xf32, #tpu.memory_space<vmem>>, vector<1x64x32xf32>
    %47 = vector.shape_cast %46 : vector<1x64x32xf32> to vector<64x32xf32>
    %cst_37 = arith.constant dense<0.000000e+00> : vector<256x32xf32>
    %48 = tpu.matmul %45, %47, %cst_37 {dimension_numbers = #tpu.dot_dimension_numbers<[1], [0], [0], [1], [0, 0, 1, 1], [], []>} : vector<256x64xf32>, vector<64x32xf32>, vector<256x32xf32> -> vector<256x32xf32>
    %49 = arith.addf %44, %48 : vector<256x32xf32>
    %50 = vector.extract_strided_slice %32 {offsets = [768, 0], sizes = [256, 64], strides = [1, 1]} : vector<1280x64xf32> to vector<256x64xf32>
    %c3_38 = arith.constant 3 : index
    %c0_39 = arith.constant 0 : index
    %c0_40 = arith.constant 0 : index
    %51 = vector.load %arg6[%c3_38, %c0_39, %c0_40] : memref<5x64x32xf32, #tpu.memory_space<vmem>>, vector<1x64x32xf32>
    %52 = vector.shape_cast %51 : vector<1x64x32xf32> to vector<64x32xf32>
    %cst_41 = arith.constant dense<0.000000e+00> : vector<256x32xf32>
    %53 = tpu.matmul %50, %52, %cst_41 {dimension_numbers = #tpu.dot_dimension_numbers<[1], [0], [0], [1], [0, 0, 1, 1], [], []>} : vector<256x64xf32>, vector<64x32xf32>, vector<256x32xf32> -> vector<256x32xf32>
    %54 = arith.addf %49, %53 : vector<256x32xf32>
    %55 = vector.extract_strided_slice %32 {offsets = [1024, 0], sizes = [256, 64], strides = [1, 1]} : vector<1280x64xf32> to vector<256x64xf32>
    %c4_42 = arith.constant 4 : index
    %c0_43 = arith.constant 0 : index
    %c0_44 = arith.constant 0 : index
    %56 = vector.load %arg6[%c4_42, %c0_43, %c0_44] : memref<5x64x32xf32, #tpu.memory_space<vmem>>, vector<1x64x32xf32>
    %57 = vector.shape_cast %56 : vector<1x64x32xf32> to vector<64x32xf32>
    %cst_45 = arith.constant dense<0.000000e+00> : vector<256x32xf32>
    %58 = tpu.matmul %55, %57, %cst_45 {dimension_numbers = #tpu.dot_dimension_numbers<[1], [0], [0], [1], [0, 0, 1, 1], [], []>} : vector<256x64xf32>, vector<64x32xf32>, vector<256x32xf32> -> vector<256x32xf32>
    %59 = arith.addf %54, %58 : vector<256x32xf32>
    %60 = arith.truncf %59 : vector<256x32xf32> to vector<256x32xbf16>
    %c0_46 = arith.constant 0 : index
    %c0_47 = arith.constant 0 : index
    %61 = vector.load %arg8[%c0_46, %c0_47] : memref<1280x256xbf16, #tpu.memory_space<vmem>>, vector<1280x256xbf16>
    %cst_48 = arith.constant dense<0.000000e+00> : vector<1280x32xf32>
    %62 = tpu.matmul %61, %60, %cst_48 {dimension_numbers = #tpu.dot_dimension_numbers<[1], [0], [0], [1], [0, 0, 1, 1], [], []>} : vector<1280x256xbf16>, vector<256x32xbf16>, vector<1280x32xf32> -> vector<1280x32xf32>
    %c0_49 = arith.constant 0 : index
    %c0_50 = arith.constant 0 : index
    %63 = vector.load %arg10[%c0_49, %c0_50] : memref<256x1xf32, #tpu.memory_space<vmem>>, vector<256x1xf32>
    %64 = vector.extract_strided_slice %62 {offsets = [0, 0], sizes = [256, 32], strides = [1, 1]} : vector<1280x32xf32> to vector<256x32xf32>
    %c0_51 = arith.constant 0 : index
    %c0_52 = arith.constant 0 : index
    %c0_53 = arith.constant 0 : index
    %65 = vector.load %arg9[%c0_51, %c0_52, %c0_53] : memref<5x32x16xf32, #tpu.memory_space<vmem>>, vector<1x32x16xf32>
    %66 = vector.shape_cast %65 : vector<1x32x16xf32> to vector<32x16xf32>
    %cst_54 = arith.constant dense<0.000000e+00> : vector<256x16xf32>
    %67 = tpu.matmul %64, %66, %cst_54 {dimension_numbers = #tpu.dot_dimension_numbers<[1], [0], [0], [1], [0, 0, 1, 1], [], []>} : vector<256x32xf32>, vector<32x16xf32>, vector<256x16xf32> -> vector<256x16xf32>
    %68 = vector.broadcast %63 : vector<256x1xf32> to vector<256x16xf32>
    %69 = arith.addf %68, %67 : vector<256x16xf32>
    %70 = vector.extract_strided_slice %62 {offsets = [256, 0], sizes = [256, 32], strides = [1, 1]} : vector<1280x32xf32> to vector<256x32xf32>
    %c1_55 = arith.constant 1 : index
    %c0_56 = arith.constant 0 : index
    %c0_57 = arith.constant 0 : index
    %71 = vector.load %arg9[%c1_55, %c0_56, %c0_57] : memref<5x32x16xf32, #tpu.memory_space<vmem>>, vector<1x32x16xf32>
    %72 = vector.shape_cast %71 : vector<1x32x16xf32> to vector<32x16xf32>
    %cst_58 = arith.constant dense<0.000000e+00> : vector<256x16xf32>
    %73 = tpu.matmul %70, %72, %cst_58 {dimension_numbers = #tpu.dot_dimension_numbers<[1], [0], [0], [1], [0, 0, 1, 1], [], []>} : vector<256x32xf32>, vector<32x16xf32>, vector<256x16xf32> -> vector<256x16xf32>
    %74 = arith.addf %69, %73 : vector<256x16xf32>
    %75 = vector.extract_strided_slice %62 {offsets = [512, 0], sizes = [256, 32], strides = [1, 1]} : vector<1280x32xf32> to vector<256x32xf32>
    %c2_59 = arith.constant 2 : index
    %c0_60 = arith.constant 0 : index
    %c0_61 = arith.constant 0 : index
    %76 = vector.load %arg9[%c2_59, %c0_60, %c0_61] : memref<5x32x16xf32, #tpu.memory_space<vmem>>, vector<1x32x16xf32>
    %77 = vector.shape_cast %76 : vector<1x32x16xf32> to vector<32x16xf32>
    %cst_62 = arith.constant dense<0.000000e+00> : vector<256x16xf32>
    %78 = tpu.matmul %75, %77, %cst_62 {dimension_numbers = #tpu.dot_dimension_numbers<[1], [0], [0], [1], [0, 0, 1, 1], [], []>} : vector<256x32xf32>, vector<32x16xf32>, vector<256x16xf32> -> vector<256x16xf32>
    %79 = arith.addf %74, %78 : vector<256x16xf32>
    %80 = vector.extract_strided_slice %62 {offsets = [768, 0], sizes = [256, 32], strides = [1, 1]} : vector<1280x32xf32> to vector<256x32xf32>
    %c3_63 = arith.constant 3 : index
    %c0_64 = arith.constant 0 : index
    %c0_65 = arith.constant 0 : index
    %81 = vector.load %arg9[%c3_63, %c0_64, %c0_65] : memref<5x32x16xf32, #tpu.memory_space<vmem>>, vector<1x32x16xf32>
    %82 = vector.shape_cast %81 : vector<1x32x16xf32> to vector<32x16xf32>
    %cst_66 = arith.constant dense<0.000000e+00> : vector<256x16xf32>
    %83 = tpu.matmul %80, %82, %cst_66 {dimension_numbers = #tpu.dot_dimension_numbers<[1], [0], [0], [1], [0, 0, 1, 1], [], []>} : vector<256x32xf32>, vector<32x16xf32>, vector<256x16xf32> -> vector<256x16xf32>
    %84 = arith.addf %79, %83 : vector<256x16xf32>
    %85 = vector.extract_strided_slice %62 {offsets = [1024, 0], sizes = [256, 32], strides = [1, 1]} : vector<1280x32xf32> to vector<256x32xf32>
    %c4_67 = arith.constant 4 : index
    %c0_68 = arith.constant 0 : index
    %c0_69 = arith.constant 0 : index
    %86 = vector.load %arg9[%c4_67, %c0_68, %c0_69] : memref<5x32x16xf32, #tpu.memory_space<vmem>>, vector<1x32x16xf32>
    %87 = vector.shape_cast %86 : vector<1x32x16xf32> to vector<32x16xf32>
    %cst_70 = arith.constant dense<0.000000e+00> : vector<256x16xf32>
    %88 = tpu.matmul %85, %87, %cst_70 {dimension_numbers = #tpu.dot_dimension_numbers<[1], [0], [0], [1], [0, 0, 1, 1], [], []>} : vector<256x32xf32>, vector<32x16xf32>, vector<256x16xf32> -> vector<256x16xf32>
    %89 = arith.addf %84, %88 : vector<256x16xf32>
    %90 = arith.truncf %89 : vector<256x16xf32> to vector<256x16xbf16>
    %c0_71 = arith.constant 0 : index
    %c0_72 = arith.constant 0 : index
    %91 = vector.load %arg11[%c0_71, %c0_72] : memref<1280x256xbf16, #tpu.memory_space<vmem>>, vector<1280x256xbf16>
    %cst_73 = arith.constant dense<0.000000e+00> : vector<1280x16xf32>
    %92 = tpu.matmul %91, %90, %cst_73 {dimension_numbers = #tpu.dot_dimension_numbers<[1], [0], [0], [1], [0, 0, 1, 1], [], []>} : vector<1280x256xbf16>, vector<256x16xbf16>, vector<1280x16xf32> -> vector<1280x16xf32>
    %c0_74 = arith.constant 0 : index
    %c0_75 = arith.constant 0 : index
    %93 = vector.load %arg13[%c0_74, %c0_75] : memref<256x1xf32, #tpu.memory_space<vmem>>, vector<256x1xf32>
    %94 = vector.extract_strided_slice %92 {offsets = [0, 0], sizes = [256, 16], strides = [1, 1]} : vector<1280x16xf32> to vector<256x16xf32>
    %c0_76 = arith.constant 0 : index
    %c0_77 = arith.constant 0 : index
    %c0_78 = arith.constant 0 : index
    %95 = vector.load %arg12[%c0_76, %c0_77, %c0_78] : memref<5x16x8xf32, #tpu.memory_space<vmem>>, vector<1x16x8xf32>
    %96 = vector.shape_cast %95 : vector<1x16x8xf32> to vector<16x8xf32>
    %cst_79 = arith.constant dense<0.000000e+00> : vector<256x8xf32>
    %97 = tpu.matmul %94, %96, %cst_79 {dimension_numbers = #tpu.dot_dimension_numbers<[1], [0], [0], [1], [0, 0, 1, 1], [], []>} : vector<256x16xf32>, vector<16x8xf32>, vector<256x8xf32> -> vector<256x8xf32>
    %98 = vector.broadcast %93 : vector<256x1xf32> to vector<256x8xf32>
    %99 = arith.addf %98, %97 : vector<256x8xf32>
    %100 = vector.extract_strided_slice %92 {offsets = [256, 0], sizes = [256, 16], strides = [1, 1]} : vector<1280x16xf32> to vector<256x16xf32>
    %c1_80 = arith.constant 1 : index
    %c0_81 = arith.constant 0 : index
    %c0_82 = arith.constant 0 : index
    %101 = vector.load %arg12[%c1_80, %c0_81, %c0_82] : memref<5x16x8xf32, #tpu.memory_space<vmem>>, vector<1x16x8xf32>
    %102 = vector.shape_cast %101 : vector<1x16x8xf32> to vector<16x8xf32>
    %cst_83 = arith.constant dense<0.000000e+00> : vector<256x8xf32>
    %103 = tpu.matmul %100, %102, %cst_83 {dimension_numbers = #tpu.dot_dimension_numbers<[1], [0], [0], [1], [0, 0, 1, 1], [], []>} : vector<256x16xf32>, vector<16x8xf32>, vector<256x8xf32> -> vector<256x8xf32>
    %104 = arith.addf %99, %103 : vector<256x8xf32>
    %105 = vector.extract_strided_slice %92 {offsets = [512, 0], sizes = [256, 16], strides = [1, 1]} : vector<1280x16xf32> to vector<256x16xf32>
    %c2_84 = arith.constant 2 : index
    %c0_85 = arith.constant 0 : index
    %c0_86 = arith.constant 0 : index
    %106 = vector.load %arg12[%c2_84, %c0_85, %c0_86] : memref<5x16x8xf32, #tpu.memory_space<vmem>>, vector<1x16x8xf32>
    %107 = vector.shape_cast %106 : vector<1x16x8xf32> to vector<16x8xf32>
    %cst_87 = arith.constant dense<0.000000e+00> : vector<256x8xf32>
    %108 = tpu.matmul %105, %107, %cst_87 {dimension_numbers = #tpu.dot_dimension_numbers<[1], [0], [0], [1], [0, 0, 1, 1], [], []>} : vector<256x16xf32>, vector<16x8xf32>, vector<256x8xf32> -> vector<256x8xf32>
    %109 = arith.addf %104, %108 : vector<256x8xf32>
    %110 = vector.extract_strided_slice %92 {offsets = [768, 0], sizes = [256, 16], strides = [1, 1]} : vector<1280x16xf32> to vector<256x16xf32>
    %c3_88 = arith.constant 3 : index
    %c0_89 = arith.constant 0 : index
    %c0_90 = arith.constant 0 : index
    %111 = vector.load %arg12[%c3_88, %c0_89, %c0_90] : memref<5x16x8xf32, #tpu.memory_space<vmem>>, vector<1x16x8xf32>
    %112 = vector.shape_cast %111 : vector<1x16x8xf32> to vector<16x8xf32>
    %cst_91 = arith.constant dense<0.000000e+00> : vector<256x8xf32>
    %113 = tpu.matmul %110, %112, %cst_91 {dimension_numbers = #tpu.dot_dimension_numbers<[1], [0], [0], [1], [0, 0, 1, 1], [], []>} : vector<256x16xf32>, vector<16x8xf32>, vector<256x8xf32> -> vector<256x8xf32>
    %114 = arith.addf %109, %113 : vector<256x8xf32>
    %115 = vector.extract_strided_slice %92 {offsets = [1024, 0], sizes = [256, 16], strides = [1, 1]} : vector<1280x16xf32> to vector<256x16xf32>
    %c4_92 = arith.constant 4 : index
    %c0_93 = arith.constant 0 : index
    %c0_94 = arith.constant 0 : index
    %116 = vector.load %arg12[%c4_92, %c0_93, %c0_94] : memref<5x16x8xf32, #tpu.memory_space<vmem>>, vector<1x16x8xf32>
    %117 = vector.shape_cast %116 : vector<1x16x8xf32> to vector<16x8xf32>
    %cst_95 = arith.constant dense<0.000000e+00> : vector<256x8xf32>
    %118 = tpu.matmul %115, %117, %cst_95 {dimension_numbers = #tpu.dot_dimension_numbers<[1], [0], [0], [1], [0, 0, 1, 1], [], []>} : vector<256x16xf32>, vector<16x8xf32>, vector<256x8xf32> -> vector<256x8xf32>
    %119 = arith.addf %114, %118 : vector<256x8xf32>
    %c0_96 = arith.constant 0 : index
    %c0_97 = arith.constant 0 : index
    %120 = vector.load %arg14[%c0_96, %c0_97] : memref<256x8xf32, #tpu.memory_space<vmem>>, vector<256x8xf32>
    %121 = arith.mulf %119, %120 : vector<256x8xf32>
    %cst_98 = arith.constant dense<0.000000e+00> : vector<8xf32>
    %122 = vector.multi_reduction <add>, %121, %cst_98 [0] : vector<256x8xf32> to vector<8xf32>
    %123 = vector.shape_cast %122 : vector<8xf32> to vector<1x8xf32>
    %c0_99 = arith.constant 0 : index
    %c0_100 = arith.constant 0 : index
    %124 = vector.load %arg15[%c0_99, %c0_100] : memref<2x8xf32, #tpu.memory_space<vmem>>, vector<2x8xf32>
    %125 = vector.broadcast %123 : vector<1x8xf32> to vector<2x8xf32>
    %126 = arith.mulf %125, %124 : vector<2x8xf32>
    %cst_101 = arith.constant dense<0.000000e+00> : vector<2xf32>
    %127 = vector.multi_reduction <add>, %126, %cst_101 [1] : vector<2x8xf32> to vector<2xf32>
    %128 = vector.shape_cast %127 : vector<2xf32> to vector<2x1xf32>
    %c0_102 = arith.constant 0 : index
    %c0_103 = arith.constant 0 : index
    %129 = vector.load %arg16[%c0_102, %c0_103] : memref<1x1xf32, #tpu.memory_space<vmem>>, vector<1x1xf32>
    %130 = vector.broadcast %129 : vector<1x1xf32> to vector<2x1xf32>
    %131 = arith.addf %128, %130 : vector<2x1xf32>
    %cst_104 = arith.constant 5.000000e-01 : f32
    %132 = vector.broadcast %cst_104 : f32 to vector<2x1xf32>
    %133 = arith.mulf %132, %131 : vector<2x1xf32>
    %134 = math.tanh %133 : vector<2x1xf32>
    %cst_105 = arith.constant 1.000000e+00 : f32
    %135 = vector.broadcast %cst_105 : f32 to vector<2x1xf32>
    %136 = arith.addf %134, %135 : vector<2x1xf32>
    %cst_106 = arith.constant 5.000000e-01 : f32
    %137 = vector.broadcast %cst_106 : f32 to vector<2x1xf32>
    %138 = arith.mulf %137, %136 : vector<2x1xf32>
    %c0_107 = arith.constant 0 : index
    %c0_108 = arith.constant 0 : index
    %139 = vector.load %arg17[%c0_107, %c0_108] : memref<2x1xf32, #tpu.memory_space<vmem>>, vector<2x1xf32>
    tpu.vector_store %arg17[%c0_107, %c0_108], %138 {strides = array<i32>} : memref<2x1xf32, #tpu.memory_space<vmem>>, vector<2x1xf32>,
    return
  }
  func.func @transform_0(%arg0: i32) -> (i32, i32) {
    %c0_i32 = arith.constant 0 : i32
    %c0_i32_0 = arith.constant 0 : i32
    %c0_i32_1 = arith.constant 0 : i32
    return %c0_i32, %c0_i32_0 : i32, i32
  }
  func.func @transform_1(%arg0: i32) -> (i32, i32) {
    %c0_i32 = arith.constant 0 : i32
    %c0_i32_0 = arith.constant 0 : i32
    %c0_i32_1 = arith.constant 0 : i32
    return %c0_i32, %c0_i32_0 : i32, i32
  }
  func.func @transform_2(%arg0: i32) -> (i32, i32, i32) {
    %c0_i32 = arith.constant 0 : i32
    %c0_i32_0 = arith.constant 0 : i32
    %c0_i32_1 = arith.constant 0 : i32
    %c0_i32_2 = arith.constant 0 : i32
    return %c0_i32, %c0_i32_0, %c0_i32_1 : i32, i32, i32
  }
  func.func @transform_3(%arg0: i32) -> (i32, i32) {
    %c0_i32 = arith.constant 0 : i32
    %c0_i32_0 = arith.constant 0 : i32
    %c0_i32_1 = arith.constant 0 : i32
    return %c0_i32, %c0_i32_0 : i32, i32
  }
  func.func @transform_4(%arg0: i32) -> (i32, i32) {
    %c0_i32 = arith.constant 0 : i32
    %c0_i32_0 = arith.constant 0 : i32
    %c0_i32_1 = arith.constant 0 : i32
    return %c0_i32, %c0_i32_0 : i32, i32
  }
  func.func @transform_5(%arg0: i32) -> (i32, i32, i32) {
    %c0_i32 = arith.constant 0 : i32
    %c0_i32_0 = arith.constant 0 : i32
    %c0_i32_1 = arith.constant 0 : i32
    %c0_i32_2 = arith.constant 0 : i32
    return %c0_i32, %c0_i32_0, %c0_i32_1 : i32, i32, i32
  }
  func.func @transform_6(%arg0: i32) -> (i32, i32) {
    %c0_i32 = arith.constant 0 : i32
    %c0_i32_0 = arith.constant 0 : i32
    %c0_i32_1 = arith.constant 0 : i32
    return %c0_i32, %c0_i32_0 : i32, i32
  }
  func.func @transform_7(%arg0: i32) -> (i32, i32) {
    %c0_i32 = arith.constant 0 : i32
    %c0_i32_0 = arith.constant 0 : i32
    %c0_i32_1 = arith.constant 0 : i32
    return %c0_i32, %c0_i32_0 : i32, i32
  }
  func.func @transform_8(%arg0: i32) -> (i32, i32, i32) {
    %c0_i32 = arith.constant 0 : i32
    %c0_i32_0 = arith.constant 0 : i32
    %c0_i32_1 = arith.constant 0 : i32
    %c0_i32_2 = arith.constant 0 : i32
    return %c0_i32, %c0_i32_0, %c0_i32_1 : i32, i32, i32
  }
  func.func @transform_9(%arg0: i32) -> (i32, i32) {
    %c0_i32 = arith.constant 0 : i32
    %c0_i32_0 = arith.constant 0 : i32
    %c0_i32_1 = arith.constant 0 : i32
    return %c0_i32, %c0_i32_0 : i32, i32
  }
  func.func @transform_10(%arg0: i32) -> (i32, i32) {
    %c0_i32 = arith.constant 0 : i32
    %c0_i32_0 = arith.constant 0 : i32
    %c0_i32_1 = arith.constant 0 : i32
    return %c0_i32, %c0_i32_0 : i32, i32
  }
  func.func @transform_11(%arg0: i32) -> (i32, i32, i32) {
    %c0_i32 = arith.constant 0 : i32
    %c0_i32_0 = arith.constant 0 : i32
    %c0_i32_1 = arith.constant 0 : i32
    %c0_i32_2 = arith.constant 0 : i32
    return %c0_i32, %c0_i32_0, %c0_i32_1 : i32, i32, i32
  }
  func.func @transform_12(%arg0: i32) -> (i32, i32) {
    %c0_i32 = arith.constant 0 : i32
    %c0_i32_0 = arith.constant 0 : i32
    %c0_i32_1 = arith.constant 0 : i32
    return %c0_i32, %c0_i32_0 : i32, i32
  }
  func.func @transform_13(%arg0: i32) -> (i32, i32) {
    %c0_i32 = arith.constant 0 : i32
    %c0_i32_0 = arith.constant 0 : i32
    %c0_i32_1 = arith.constant 0 : i32
    return %c0_i32, %c0_i32_0 : i32, i32
  }
  func.func @transform_14(%arg0: i32) -> (i32, i32) {
    %c0_i32 = arith.constant 0 : i32
    %c0_i32_0 = arith.constant 0 : i32
    %c0_i32_1 = arith.constant 0 : i32
    return %c0_i32, %c0_i32_0 : i32, i32
  }
  func.func @transform_15(%arg0: i32) -> (i32, i32) {
    %c0_i32 = arith.constant 0 : i32
    %c0_i32_0 = arith.constant 0 : i32
    %c0_i32_1 = arith.constant 0 : i32
    return %c0_i32, %c0_i32_0 : i32, i32
  }
  func.func @transform_16(%arg0: i32) -> (i32, i32) {
    %c0_i32 = arith.constant 0 : i32
    %c0_i32_0 = arith.constant 0 : i32
    %c0_i32_1 = arith.constant 0 : i32
    return %c0_i32, %c0_i32_0 : i32, i32
  }
}

</mosaic_0001>

<bundles_post_ra>
// kernel: discriminator_forward.1
= control target key start
LH: loop header
LB: loop body
LE: loop exit
PB: predicated region body
PF: predicated region fallthrough
CT: control target
= control target key end

     0   :  { %s20493_s0 = inlined_call_operand.vmem [shape: bf16[64,128], index: 0, kind: input, shape index: {}]   ;;  %s20494_s1 = inlined_call_operand.vmem [shape: bf16[1280,64], index: 1, kind: input, shape index: {}]   ;;  %s20495_s2 = inlined_call_operand.vmem [shape: f32[5,128,64], index: 2, kind: input, shape index: {}]   ;;  %s20496_s3 = inlined_call_operand.vmem [shape: f32[256,1], index: 3, kind: input, shape index: {}]   ;;  %s20497_s4 = inlined_call_operand.vmem [shape: bf16[1280,256], index: 4, kind: input, shape index: {}]   ;;  %s20498_s5 = inlined_call_operand.vmem [shape: f32[5,64,32], index: 5, kind: input, shape index: {}]   ;;  %s20499_s6 = inlined_call_operand.vmem [shape: f32[256,1], index: 6, kind: input, shape index: {}]   ;;  %s20500_s7 = inlined_call_operand.hbm [shape: bf16[1280,256], index: 7, kind: input, shape index: {}]   ;;  %s20501_s8 = inlined_call_operand.vmem [shape: f32[5,32,16], index: 8, kind: input, shape index: {}]   ;;  %s20502_s9 = inlined_call_operand.vmem [shape: f32[256,1], index: 9, kind: input, shape index: {}]   ;;  %s20503_s10 = inlined_call_operand.hbm [shape: bf16[1280,256], index: 10, kind: input, shape index: {}]   ;;  %s20504_s11 = inlined_call_operand.vmem [shape: f32[5,16,8], index: 11, kind: input, shape index: {}]   ;;  %s20505_s12 = inlined_call_operand.vmem [shape: f32[256,1], index: 12, kind: input, shape index: {}]   ;;  %s20506_s13 = inlined_call_operand.vmem [shape: f32[256,8], index: 13, kind: input, shape index: {}]   ;;  %s20507_s14 = inlined_call_operand.vmem [shape: f32[2,8], index: 14, kind: input, shape index: {}]   ;;  %s20508_s15 = inlined_call_operand.<no memory space> [shape: f32[1,1], index: 15, kind: input, shape index: {}]   ;;  %s20509_s16 = inlined_call_operand.vmem [shape: f32[2,1], index: 16, kind: output, shape index: {}]  }
   0x1   :  { %20512 = sst [smem:[#allocation80_spill]] %s20493_s0  ;;  %v21_v0 = vstv %s20508_s15 }
   0x2   :  { %22 = vst [vmem:[#allocation2] sm:$0x1] %v21_v0 }
   0x3   :  { %23 = vsyncpa [#allocation4], 0  ;;  %s43_s25 = sshll.u32 %s20500_s7, 4  ;;  %s44_s25 = int_to_ptr.hbm [resolvable:$true] %s43_s25 }
   0x4   :  { %24 = vsyncpa [#allocation6], 0  ;;  %s15754_s26 = smov [#allocation3]   ;;  %s60_s30 = sshll.u32 %s20503_s10, 4  ;;  %s61_s30 = int_to_ptr.hbm [resolvable:$true] %s60_s30 }
   0x5   :  { %s45_s27 = sshll.u32 %s15754_s26, 4  ;;  %s15755_s0 = smov 128   ;;  %s46_s27 = int_to_ptr.vmem [resolvable:$true] %s45_s27 }
   0x6   :  { %s15756_s17 = smov 8   ;;  %s15757_s15 = smov [#allocation5]  }
   0x7   :  { %51 = dma.hbm_to_vmem [thread:$0]  %s44_s25, 20480, %s46_s27, [#allocation4], %s15755_s0, %s15755_s0, %s15756_s17  }
   0x8   :  { %s62_s18 = sshll.u32 %s15757_s15, 4  ;;  %s63_s18 = int_to_ptr.vmem [resolvable:$true] %s62_s18 }
   0x9   :  { %68 = dma.hbm_to_vmem [thread:$0]  %s61_s30, 20480, %s63_s18, [#allocation6], %s15755_s0, %s15755_s0, %s15756_s17  }
   0xa   :  { %15750 = dma.done.wait [#allocation4], 20480  }
   0xb   :  { %15751 = vsyncadd [#allocation4], 4294946816 }
   0xc   :  { %15752 = dma.done.wait [#allocation6], 20480  }
   0xd   :  { %15753 = vsyncadd [#allocation6], 4294946816  ;;  %s20513_s20 = sld [smem:[#allocation80_spill]]  ;;  %v15085_v5 = vld [vmem:[%s20494_s1] sm:$0xff]  ;;  %vm680_vm0 = vcmask 523264   ;;  %v15086_v6 = vld [vmem:[%s20494_s1 + $0x8] sm:$0xff] }
   0xe   :  { %v15087_v7 = vld [vmem:[%s20494_s1 + $0x10] sm:$0xff]  ;;  %v15758_v9 = vmov 0   ;;  %v15088_v10 = vld [vmem:[%s20494_s1 + $0x18] sm:$0xff]  ;;  %v15089_v14 = vld [vmem:[%s20494_s1 + $0x20] sm:$0xff]  ;;  %vm7396_vm1 = vcmask 261120   ;;  %vm10610_vm2 = vcmask 130048  }
   0xf   :  { %v1344_v8 = vld [vmem:[%s20496_s3 + $0x70] sm:$0xff]  ;;  %15696 = vset.pattern.permute.xlu0 %v15758_v9  ;;  %15698 = vset.pattern.permute.xlu2 %v15758_v9  ;;  %v1345_v11 = vld [vmem:[%s20496_s3 + $0x78] sm:$0xff]  ;;  %v1342_v17 = vld [vmem:[%s20496_s3 + $0x60] sm:$0xff]  ;;  %vm12052_vm3 = vcmask 64512   ;;  %vm12124_vm4 = vcmask 58368   ;;  %vm12137_vm5 = vcmask 1024  }
  0x10   :  { %1563 = vperm.xlu0 %15696, %v1344_v8   ;;  %15697 = vset.pattern.permute.xlu1 %v15758_v9  ;;  %v1377_v12 = vld [vmem:[%s20495_s2 + $0x78] sm:$0xff]  ;;  %v1340_v13 = vld [vmem:[%s20496_s3 + $0x50] sm:$0xff]  ;;  %v1359_v18 = vld [vmem:[%s20496_s3 + $0xe8] sm:$0xff] }
  0x11   :  { %1378 = vmatpush.msra.mxu1 %v1377_v12  ;;  %v1376_v15 = vld [vmem:[%s20495_s2 + $0x70] sm:$0xff]  ;;  %v1375_v19 = vld [vmem:[%s20495_s2 + $0x68] sm:$0xff]  ;;  %1553 = vperm.xlu1 %15697, %v1342_v17   ;;  %v1374_v20 = vld [vmem:[%s20495_s2 + $0x60] sm:$0xff] }
  0x12   :  { %v1360_v16 = vld [vmem:[%s20496_s3 + $0xf0] sm:$0xff]  ;;  %v1373_v21 = vld [vmem:[%s20495_s2 + $0x58] sm:$0xff]  ;;  %v1343_v24 = vld [vmem:[%s20496_s3 + $0x68] sm:$0xff] }
  0x13   :  { %v15084_v1 = vld [vmem:[%s20513_s20 + $0x18] sm:$0xff]  ;;  %v15083_v2 = vld [vmem:[%s20513_s20 + $0x10] sm:$0xff]  ;;  %v15082_v3 = vld [vmem:[%s20513_s20 + $0x8] sm:$0xff]  ;;  %1379 = vmatpush.msra.mxu1 %v1376_v15  ;;  %1643 = vperm.xlu2 %15698, %v1360_v16  }
  0x14   :  { %925 = vmatpush.bf16.msra.mxu0 %v15084_v1  ;;  %15645 = vmatpush.bf16.msra.mxu2 %v15084_v1  ;;  %v15081_v4 = vld [vmem:[%s20513_s20] sm:$0xff]  ;;  %v1372_v22 = vld [vmem:[%s20495_s2 + $0x50] sm:$0xff]  ;;  %v1361_v23 = vld [vmem:[%s20496_s3 + $0xf8] sm:$0xff] }
  0x15   :  { %1380 = vmatpush.msra.mxu1 %v1375_v19  ;;  %v1356_v25 = vld [vmem:[%s20496_s3 + $0xd0] sm:$0xff]  ;;  %v1371_v26 = vld [vmem:[%s20495_s2 + $0x48] sm:$0xff]  ;;  %v1370_v27 = vld [vmem:[%s20495_s2 + $0x40] sm:$0xff] }
  0x16   :  { %v15090_v28 = vld [vmem:[%s20494_s1 + $0x28] sm:$0xff]  ;;  %v1369_v29 = vld [vmem:[%s20495_s2 + $0x38] sm:$0xff]  ;;  %v1368_v30 = vld [vmem:[%s20495_s2 + $0x30] sm:$0xff] }
  0x17   :  { %1381 = vmatpush.msra.mxu1 %v1374_v20  ;;  %v1358_v31 = vld [vmem:[%s20496_s3 + $0xe0] sm:$0xff]  ;;  %v1341_v32 = vld [vmem:[%s20496_s3 + $0x58] sm:$0xff]  ;;  %v1367_v34 = vld [vmem:[%s20495_s2 + $0x28] sm:$0xff] }
  0x18   :  { %926 = vmatpush.bf16.msra.mxu0 %v15083_v2  ;;  %15646 = vmatpush.bf16.msra.mxu2 %v15083_v2  ;;  %v1337_v33 = vld [vmem:[%s20496_s3 + $0x38] sm:$0xff]  ;;  %v1366_v35 = vld [vmem:[%s20495_s2 + $0x20] sm:$0xff]  ;;  %v1364_v37 = vld [vmem:[%s20495_s2 + $0x10] sm:$0xff] }
  0x19   :  { %1568 = vperm.xlu0 %15696, %v1345_v11   ;;  %1382 = vmatpush.msra.mxu1 %v1373_v21  ;;  %v1365_v36 = vld [vmem:[%s20495_s2 + $0x18] sm:$0xff]  ;;  %v1339_v38 = vld [vmem:[%s20496_s3 + $0x48] sm:$0xff]  ;;  %v1338_v39 = vld [vmem:[%s20496_s3 + $0x40] sm:$0xff] }
  0x1a   :  { %1558 = vperm.xlu1 %15697, %v1343_v24   ;;  %v1334_v40 = vld [vmem:[%s20496_s3 + $0x20] sm:$0xff]  ;;  %v1363_v41 = vld [vmem:[%s20495_s2 + $0x8] sm:$0xff]  ;;  %v15091_v42 = vld [vmem:[%s20494_s1 + $0x30] sm:$0xff] }
  0x1b   :  { %1383 = vmatpush.msra.mxu1 %v1372_v22  ;;  %1648 = vperm.xlu2 %15698, %v1361_v23   ;;  %v1362_v43 = vld [vmem:[%s20495_s2] sm:$0xff]  ;;  %v1357_v44 = vld [vmem:[%s20496_s3 + $0xd8] sm:$0xff]  ;;  %v1336_v45 = vld [vmem:[%s20496_s3 + $0x30] sm:$0xff] }
  0x1c   :  { %927 = vmatpush.bf16.msra.mxu0 %v15082_v3  ;;  %15647 = vmatpush.bf16.msra.mxu2 %v15082_v3  ;;  %v1353_v46 = vld [vmem:[%s20496_s3 + $0xb8] sm:$0xff]  ;;  %v1355_v47 = vld [vmem:[%s20496_s3 + $0xc8] sm:$0xff]  ;;  %v1354_v48 = vld [vmem:[%s20496_s3 + $0xc0] sm:$0xff] }
  0x1d   :  { %1384 = vmatpush.msra.mxu1 %v1371_v26  ;;  %v1350_v49 = vld [vmem:[%s20496_s3 + $0xa0] sm:$0xff]  ;;  %v15092_v50 = vld [vmem:[%s20494_s1 + $0x38] sm:$0xff]  ;;  %v1352_v51 = vld [vmem:[%s20496_s3 + $0xb0] sm:$0xff] }
  0x1e   :  { %v1335_v52 = vld [vmem:[%s20496_s3 + $0x28] sm:$0xff]  ;;  %v1333_v54 = vld [vmem:[%s20496_s3 + $0x18] sm:$0xff]  ;;  %v1332_v55 = vld [vmem:[%s20496_s3 + $0x10] sm:$0xff] }
  0x1f   :  { %1385 = vmatpush.msra.mxu1 %v1370_v27  ;;  %v1331_v53 = vld [vmem:[%s20496_s3 + $0x8] sm:$0xff]  ;;  %v15093_v56 = vld [vmem:[%s20494_s1 + $0x40] sm:$0xff]  ;;  %v15095_v63 = vld [vmem:[%s20494_s1 + $0x50] sm:$0xff] }
  0x20   :  { %928 = vmatpush.bf16.msra.mxu0 %v15081_v4  ;;  %15648 = vmatpush.bf16.msra.mxu2 %v15081_v4  ;;  %v1330_v58 = vld [vmem:[%s20496_s3] sm:$0xff]  ;;  %v15094_v60 = vld [vmem:[%s20494_s1 + $0x48] sm:$0xff]  ;;  %v15096_v2 = vld [vmem:[%s20494_s1 + $0x58] sm:$0xff] }
  0x21   :  { %1543 = vperm.xlu0 %15696, %v1340_v13   ;;  %1386 = vmatpush.msra.mxu1 %v1369_v29  ;;  %v15098_v8 = vld [vmem:[%s20494_s1 + $0x68] sm:$0xff]  ;;  %v15099_v11 = vld [vmem:[%s20494_s1 + $0x70] sm:$0xff]  ;;  %v1346_v16 = vld [vmem:[%s20496_s3 + $0x80] sm:$0xff] }
  0x22   :  { %1548 = vperm.xlu1 %15697, %v1341_v32   ;;  %v1351_v13 = vld [vmem:[%s20496_s3 + $0xa8] sm:$0xff]  ;;  %v15100_v17 = vld [vmem:[%s20494_s1 + $0x78] sm:$0xff]  ;;  %v15163_v23 = vld [vmem:[%s20494_s1 + $0x270] sm:$0xff] }
  0x23   :  { %12481 = vmatmul.msk.bf16.vlgmr.msra.gmra.mxu0 %vm680_vm0, %v15085_v5  ;;  %1387 = vmatpush.msra.mxu1 %v1368_v30  ;;  %v15097_v5 = vld [vmem:[%s20494_s1 + $0x60] sm:$0xff] }
  0x24   :  { %15649 = vmatpush.msrb.mxu2 %v1377_v12  ;;  %1633 = vperm.xlu2 %15698, %v1358_v31   ;;  %v15103_v31 = vld [vmem:[%s20494_s1 + $0x90] sm:$0xff] }
  0x25   :  { %1388 = vmatpush.msra.mxu1 %v1367_v34 }
  0x26   :  { %15650 = vmatpush.msrb.mxu2 %v1376_v15  ;;  %v1348_v15 = vld [vmem:[%s20496_s3 + $0x90] sm:$0xff] }
  0x27   :  { %1389 = vmatpush.msra.mxu1 %v1366_v35 }
  0x28   :  { %15651 = vmatpush.msrb.mxu2 %v1375_v19 }
  0x29   :  { %1638 = vperm.xlu0 %15696, %v1359_v18   ;;  %1390 = vmatpush.msra.mxu1 %v1365_v36  ;;  %v15162_v18 = vld [vmem:[%s20494_s1 + $0x268] sm:$0xff] }
  0x2a   :  { %15652 = vmatpush.msrb.mxu2 %v1374_v20  ;;  %1533 = vperm.xlu1 %15697, %v1338_v39   ;;  %v1347_v20 = vld [vmem:[%s20496_s3 + $0x88] sm:$0xff]  ;;  %v12576_v39 = vld [vmem:[%s20495_s2 + $0xf8] sm:$0xff] }
  0x2b   :  { %1391 = vmatpush.msra.mxu1 %v1364_v37  ;;  %12558 = vmatmul.msk.bf16.vlgmr.msra.gmra.mxu2 %vm680_vm0, %v15162_v18  ;;  %v15113_v18 = vld [vmem:[%s20494_s1 + $0xe0] sm:$0xff] }
  0x2c   :  { %15653 = vmatpush.msrb.mxu2 %v1373_v21  ;;  %1538 = vperm.xlu2 %15698, %v1339_v38  }
  0x2d   :  { %1392 = vmatpush.msra.mxu1 %v1363_v41 }
  0x2e   :  { %15654 = vmatpush.msrb.mxu2 %v1372_v22  ;;  %v15101_v22 = vld [vmem:[%s20494_s1 + $0x80] sm:$0xff] }
  0x2f   :  { %1393 = vmatpush.msra.mxu1 %v1362_v43 }
  0x30   :  { %15655 = vmatpush.msrb.mxu2 %v1371_v26  ;;  %v15102_v26 = vld [vmem:[%s20494_s1 + $0x88] sm:$0xff] }
  0x31   :  { %1623 = vperm.xlu0 %15696, %v1356_v25  }
  0x32   :  { %15656 = vmatpush.msrb.mxu2 %v1370_v27  ;;  %1628 = vperm.xlu1 %15697, %v1357_v44   ;;  %v15164_v27 = vld [vmem:[%s20494_s1 + $0x278] sm:$0xff] }
  0x33   :  { %12482 = vmatmul.msk.bf16.gmra.mxu0 %vm680_vm0, %v15086_v6  ;;  %v12572_v44 = vld [vmem:[%s20495_s2 + $0xd8] sm:$0xff] }
  0x34   :  { %15657 = vmatpush.msrb.mxu2 %v1369_v29  ;;  %1523 = vperm.xlu2 %15698, %v1336_v45   ;;  %v12571_v45 = vld [vmem:[%s20495_s2 + $0xd0] sm:$0xff] }
  0x36   :  { %15658 = vmatpush.msrb.mxu2 %v1368_v30  ;;  %v1349_v30 = vld [vmem:[%s20496_s3 + $0x98] sm:$0xff] }
  0x38   :  { %15659 = vmatpush.msrb.mxu2 %v1367_v34  ;;  %v15104_v34 = vld [vmem:[%s20494_s1 + $0x98] sm:$0xff] }
  0x39   :  { %1528 = vperm.xlu0 %15696, %v1337_v33  }
  0x3a   :  { %15660 = vmatpush.msrb.mxu2 %v1366_v35  ;;  %1613 = vperm.xlu1 %15697, %v1354_v48   ;;  %v12569_v48 = vld [vmem:[%s20495_s2 + $0xc0] sm:$0xff] }
  0x3b   :  { %12559 = vmatmul.msk.bf16.gmra.mxu2 %vm680_vm0, %v15163_v23 }
  0x3c   :  { %15661 = vmatpush.msrb.mxu2 %v1365_v36  ;;  %1618 = vperm.xlu2 %15698, %v1355_v47   ;;  %v15106_v47 = vld [vmem:[%s20494_s1 + $0xa8] sm:$0xff] }
  0x3e   :  { %15662 = vmatpush.msrb.mxu2 %v1364_v37  ;;  %v15105_v37 = vld [vmem:[%s20494_s1 + $0xa0] sm:$0xff] }
  0x40   :  { %15663 = vmatpush.msrb.mxu2 %v1363_v41  ;;  %v12574_v41 = vld [vmem:[%s20495_s2 + $0xe8] sm:$0xff] }
  0x41   :  { %1513 = vperm.xlu0 %15696, %v1334_v40   ;;  %v12575_v40 = vld [vmem:[%s20495_s2 + $0xf0] sm:$0xff] }
  0x42   :  { %15664 = vmatpush.msrb.mxu2 %v1362_v43  ;;  %1518 = vperm.xlu1 %15697, %v1335_v52   ;;  %v12566_v52 = vld [vmem:[%s20495_s2 + $0xa8] sm:$0xff] }
  0x43   :  { %12483 = vmatmul.msk.bf16.gmra.mxu0 %vm680_vm0, %v15087_v7 }
  0x44   :  { %1603 = vperm.xlu2 %15698, %v1352_v51   ;;  %1700 = vmatpush.msra.mxu2 %v12576_v39  ;;  %v12567_v51 = vld [vmem:[%s20495_s2 + $0xb0] sm:$0xff] }
  0x46   :  { %1701 = vmatpush.msra.mxu2 %v12575_v40 }
  0x48   :  { %1702 = vmatpush.msra.mxu2 %v12574_v41  ;;  %v15118_v41 = vld [vmem:[%s20494_s1 + $0x108] sm:$0xff] }
  0x49   :  { %1608 = vperm.xlu0 %15696, %v1353_v46   ;;  %v12570_v46 = vld [vmem:[%s20495_s2 + $0xc8] sm:$0xff] }
  0x4a   :  { %1503 = vperm.xlu1 %15697, %v1332_v55   ;;  %v12564_v55 = vld [vmem:[%s20495_s2 + $0x98] sm:$0xff] }
  0x4b   :  { %12560 = vmatmul.msk.bf16.gmra.mxu2 %vm680_vm0, %v15164_v27  ;;  %v15115_v27 = vld [vmem:[%s20494_s1 + $0xf0] sm:$0xff] }
  0x4c   :  { %1508 = vperm.xlu2 %15698, %v1333_v54  }
  0x51   :  { %1593 = vperm.xlu0 %15696, %v1350_v49  }
  0x52   :  { %1598 = vperm.xlu1 %15697, %v1351_v13   ;;  %v15112_v13 = vld [vmem:[%s20494_s1 + $0xd8] sm:$0xff] }
  0x53   :  { %12484 = vmatmul.msk.bf16.gmra.mxu0 %vm680_vm0, %v15088_v10 }
  0x54   :  { %1493 = vperm.xlu2 %15698, %v1330_v58   ;;  %v15107_v58 = vld [vmem:[%s20494_s1 + $0xb0] sm:$0xff] }
  0x59   :  { %1498 = vperm.xlu0 %15696, %v1331_v53   ;;  %v12565_v53 = vld [vmem:[%s20495_s2 + $0xa0] sm:$0xff] }
  0x5a   :  { %1583 = vperm.xlu1 %15697, %v1348_v15  }
  0x5c   :  { %1588 = vperm.xlu2 %15698, %v1349_v30  }
  0x61   :  { %1573 = vperm.xlu0 %15696, %v1346_v16  }
  0x62   :  { %1578 = vperm.xlu1 %15697, %v1347_v20  }
  0x63   :  { %12485 = vmatmul.msk.bf16.gmra.mxu0 %vm680_vm0, %v15089_v14 }
  0x73   :  { %12486 = vmatmul.msk.bf16.gmra.mxu0 %vm680_vm0, %v15090_v28 }
  0x83   :  { %12487 = vmatmul.msk.bf16.gmra.mxu0 %vm680_vm0, %v15091_v42  ;;  %v12573_v42 = vld [vmem:[%s20495_s2 + $0xe0] sm:$0xff] }
  0x84   :  { %1703 = vmatpush.msra.mxu2 %v12573_v42 }
  0x86   :  { %1704 = vmatpush.msra.mxu2 %v12572_v44 }
  0x88   :  { %1705 = vmatpush.msra.mxu2 %v12571_v45  ;;  %v15119_v45 = vld [vmem:[%s20494_s1 + $0x110] sm:$0xff] }
  0x8a   :  { %1706 = vmatpush.msra.mxu2 %v12570_v46 }
  0x8c   :  { %1707 = vmatpush.msra.mxu2 %v12569_v48 }
  0x93   :  { %12488 = vmatmul.msk.bf16.gmra.mxu0 %vm680_vm0, %v15092_v50  ;;  %v12568_v50 = vld [vmem:[%s20495_s2 + $0xb8] sm:$0xff] }
  0x94   :  { %1708 = vmatpush.msra.mxu2 %v12568_v50  ;;  %v15120_v50 = vld [vmem:[%s20494_s1 + $0x118] sm:$0xff] }
  0x96   :  { %1709 = vmatpush.msra.mxu2 %v12567_v51 }
  0x98   :  { %1710 = vmatpush.msra.mxu2 %v12566_v52 }
  0x9a   :  { %1711 = vmatpush.msra.mxu2 %v12565_v53 }
  0x9c   :  { %1712 = vmatpush.msra.mxu2 %v12564_v55 }
  0xa0   :  { %v930_v57 = vpop.f32.mrf.mxu0 }
  0xa1   :  { %1394 = vmatmul.f32.vlgmr.msra.gmra.mxu1 %v930_v57  ;;  %v12562_v57 = vld [vmem:[%s20495_s2 + $0x88] sm:$0xff] }
  0xa3   :  { %12489 = vmatmul.msk.bf16.gmra.mxu0 %vm680_vm0, %v15093_v56  ;;  %v12563_v56 = vld [vmem:[%s20495_s2 + $0x90] sm:$0xff] }
  0xa4   :  { %1713 = vmatpush.msra.mxu2 %v12563_v56 }
  0xa6   :  { %1714 = vmatpush.msra.mxu2 %v12562_v57  ;;  %v12592_v57 = vld [vmem:[%s20495_s2 + $0x178] sm:$0xff] }
  0xa7   :  { %15665 = vmatpush.msra.mxu3 %v12592_v57 }
  0xa8   :  { %v932_v59 = vpop.f32.mrf.mxu0 }
  0xa9   :  { %1397 = vmatmul.f32.gmra.mxu1 %v932_v59  ;;  %v12561_v59 = vld [vmem:[%s20495_s2 + $0x80] sm:$0xff] }
  0xaa   :  { %1715 = vmatpush.msra.mxu2 %v12561_v59  ;;  %v12590_v59 = vld [vmem:[%s20495_s2 + $0x168] sm:$0xff] }
  0xb0   :  { %v935_v61 = vpop.f32.mrf.mxu0 }
  0xb1   :  { %1400 = vmatmul.f32.gmra.mxu1 %v935_v61 }
  0xb3   :  { %12490 = vmatmul.msk.bf16.gmra.mxu0 %vm680_vm0, %v15094_v60 }
  0xb8   :  { %v937_v62 = vpop.f32.mrf.mxu0 }
  0xb9   :  { %1403 = vmatmul.f32.gmra.mxu1 %v937_v62  ;;  %v15108_v62 = vld [vmem:[%s20494_s1 + $0xb8] sm:$0xff] }
  0xc0   :  { %v940_v0 = vpop.f32.mrf.mxu0 }
  0xc1   :  { %1406 = vmatmul.f32.gmra.mxu1 %v940_v0 }
  0xc3   :  { %12491 = vmatmul.msk.bf16.gmra.mxu0 %vm680_vm0, %v15095_v63 }
  0xc8   :  { %v942_v1 = vpop.f32.mrf.mxu0 }
  0xc9   :  { %1409 = vmatmul.f32.gmra.mxu1 %v942_v1  ;;  %v15109_v1 = vld [vmem:[%s20494_s1 + $0xc0] sm:$0xff] }
  0xd0   :  { %v945_v3 = vpop.f32.mrf.mxu0 }
  0xd1   :  { %1412 = vmatmul.f32.gmra.mxu1 %v945_v3 }
  0xd3   :  { %12492 = vmatmul.msk.bf16.gmra.mxu0 %vm680_vm0, %v15096_v2 }
  0xd8   :  { %v947_v4 = vpop.f32.mrf.mxu0 }
  0xd9   :  { %1415 = vmatmul.f32.gmra.mxu1 %v947_v4  ;;  %v15110_v4 = vld [vmem:[%s20494_s1 + $0xc8] sm:$0xff] }
  0xe0   :  { %v950_v6 = vpop.f32.mrf.mxu0 }
  0xe1   :  { %1418 = vmatmul.f32.gmra.mxu1 %v950_v6  ;;  %v16173_v6 = vpop.f32.mrf.mxu2 }
  0xe3   :  { %12493 = vmatmul.msk.bf16.gmra.mxu0 %vm680_vm0, %v15097_v5 }
  0xe8   :  { %v952_v7 = vpop.f32.mrf.mxu0 }
  0xe9   :  { %1421 = vmatmul.f32.gmra.mxu1 %v952_v7 }
  0xf0   :  { %v955_v9 = vpop.f32.mrf.mxu0 }
  0xf1   :  { %1424 = vmatmul.f32.gmra.mxu1 %v955_v9 }
  0xf3   :  { %12494 = vmatmul.msk.bf16.gmra.mxu0 %vm680_vm0, %v15098_v8  ;;  %v15111_v8 = vld [vmem:[%s20494_s1 + $0xd0] sm:$0xff] }
  0xf8   :  { %v957_v10 = vpop.f32.mrf.mxu0 }
  0xf9   :  { %1427 = vmatmul.f32.gmra.mxu1 %v957_v10  ;;  %v16178_v10 = vpop.f32.mrf.mxu2 }
  0xfa   :  { %20514 = vst [vmem:[#allocation9_spill] sm:$0xff] %v16178_v10 }
 0x100   :  { %v960_v12 = vpop.f32.mrf.mxu0 }
 0x101   :  { %1430 = vmatmul.f32.gmra.mxu1 %v960_v12  ;;  %v16181_v12 = vpop.f32.mrf.mxu2 }
 0x102   :  { %20515 = vst [vmem:[#allocation10_spill] sm:$0xff] %v16181_v12 }
 0x103   :  { %12495 = vmatmul.msk.bf16.gmra.mxu0 %vm680_vm0, %v15099_v11 }
 0x108   :  { %v962_v14 = vpop.f32.mrf.mxu0 }
 0x109   :  { %1433 = vmatmul.f32.gmra.mxu1 %v962_v14  ;;  %v16187_v15 = vpop.f32.mrf.mxu2 }
 0x10a   :  { %20516 = vst [vmem:[#allocation11_spill] sm:$0xff] %v16187_v15 }
 0x110   :  { %v965_v19 = vpop.f32.mrf.mxu0 }
 0x111   :  { %1436 = vmatmul.f32.gmra.mxu1 %v965_v19 }
 0x113   :  { %12496 = vmatmul.msk.bf16.gmra.mxu0 %vm680_vm0, %v15100_v17  ;;  %v16189_v17 = vpop.f32.mrf.mxu2 }
 0x114   :  { %20517 = vst [vmem:[#allocation12_spill] sm:$0xff] %v16189_v17 }
 0x118   :  { %v967_v21 = vpop.f32.mrf.mxu0 }
 0x119   :  { %1439 = vmatmul.f32.gmra.mxu1 %v967_v21 }
 0x11b   :  { %v16195_v21 = vpop.f32.mrf.mxu2 }
 0x11c   :  { %20518 = vst [vmem:[#allocation13_spill] sm:$0xff] %v16195_v21 }
 0x120   :  { %v970_v24 = vpop.f32.mrf.mxu0 }
 0x121   :  { %1442 = vmatmul.f32.gmra.mxu1 %v970_v24 }
 0x123   :  { %12497 = vmatmul.msk.bf16.gmra.mxu0 %vm680_vm0, %v15101_v22  ;;  %v15114_v22 = vld [vmem:[%s20494_s1 + $0xe8] sm:$0xff] }
 0x128   :  { %v972_v25 = vpop.f32.mrf.mxu0 }
 0x129   :  { %1445 = vmatmul.f32.gmra.mxu1 %v972_v25 }
 0x130   :  { %v975_v28 = vpop.f32.mrf.mxu0 }
 0x131   :  { %1448 = vmatmul.f32.gmra.mxu1 %v975_v28 }
 0x133   :  { %12498 = vmatmul.msk.bf16.gmra.mxu0 %vm680_vm0, %v15102_v26 }
 0x138   :  { %v977_v29 = vpop.f32.mrf.mxu0 }
 0x139   :  { %1451 = vmatmul.f32.gmra.mxu1 %v977_v29 }
 0x140   :  { %v980_v32 = vpop.f32.mrf.mxu0 }
 0x141   :  { %1454 = vmatmul.f32.gmra.mxu1 %v980_v32 }
 0x143   :  { %12499 = vmatmul.msk.bf16.gmra.mxu0 %vm680_vm0, %v15103_v31  ;;  %v15116_v31 = vld [vmem:[%s20494_s1 + $0xf8] sm:$0xff] }
 0x148   :  { %v982_v33 = vpop.f32.mrf.mxu0 }
 0x149   :  { %1457 = vmatmul.f32.gmra.mxu1 %v982_v33 }
 0x150   :  { %v985_v35 = vpop.f32.mrf.mxu0 }
 0x151   :  { %1460 = vmatmul.f32.gmra.mxu1 %v985_v35 }
 0x153   :  { %12500 = vmatmul.msk.bf16.gmra.mxu0 %vm680_vm0, %v15104_v34 }
 0x158   :  { %v987_v36 = vpop.f32.mrf.mxu0 }
 0x159   :  { %1463 = vmatmul.f32.gmra.mxu1 %v987_v36  ;;  %v15117_v36 = vld [vmem:[%s20494_s1 + $0x100] sm:$0xff] }
 0x160   :  { %v990_v38 = vpop.f32.mrf.mxu0 }
 0x161   :  { %1466 = vmatmul.f32.vlgmr.msrb.gmra.mxu2 %v990_v38 }
 0x162   :  { %1862 = vmatpush.msrb.mxu2 %v12592_v57  ;;  %v15128_v57 = vld [vmem:[%s20494_s1 + $0x158] sm:$0xff] }
 0x163   :  { %12501 = vmatmul.msk.bf16.gmra.mxu0 %vm680_vm0, %v15105_v37 }
 0x168   :  { %v992_v43 = vpop.f32.mrf.mxu0 }
 0x169   :  { %1469 = vmatmul.f32.gmra.mxu2 %v992_v43 }
 0x170   :  { %v995_v49 = vpop.f32.mrf.mxu0 }
 0x171   :  { %1472 = vmatmul.f32.gmra.mxu2 %v995_v49 }
 0x173   :  { %12502 = vmatmul.msk.bf16.gmra.mxu0 %vm680_vm0, %v15106_v47 }
 0x178   :  { %v997_v54 = vpop.f32.mrf.mxu0 }
 0x179   :  { %1475 = vmatmul.f32.gmra.mxu2 %v997_v54  ;;  %v15121_v54 = vld [vmem:[%s20494_s1 + $0x120] sm:$0xff] }
 0x180   :  { %v1000_v60 = vpop.f32.mrf.mxu0 }
 0x181   :  { %1478 = vmatmul.f32.gmra.mxu2 %v1000_v60  ;;  %v12589_v60 = vld [vmem:[%s20495_s2 + $0x160] sm:$0xff] }
 0x183   :  { %12503 = vmatmul.msk.bf16.gmra.mxu0 %vm680_vm0, %v15107_v58  ;;  %v12591_v58 = vld [vmem:[%s20495_s2 + $0x170] sm:$0xff] }
 0x184   :  { %1863 = vmatpush.msrb.mxu2 %v12591_v58  ;;  %15666 = vmatpush.msra.mxu3 %v12591_v58 }
 0x186   :  { %1864 = vmatpush.msrb.mxu2 %v12590_v59  ;;  %15667 = vmatpush.msra.mxu3 %v12590_v59 }
 0x188   :  { %v1002_v61 = vpop.f32.mrf.mxu0  ;;  %1865 = vmatpush.msrb.mxu2 %v12589_v60  ;;  %15668 = vmatpush.msra.mxu3 %v12589_v60 }
 0x189   :  { %1481 = vmatmul.f32.gmra.mxu2 %v1002_v61 }
 0x190   :  { %v1005_v63 = vpop.f32.mrf.mxu0 }
 0x191   :  { %1484 = vmatmul.f32.gmra.mxu2 %v1005_v63 }
 0x193   :  { %12504 = vmatmul.msk.bf16.gmra.mxu0 %vm680_vm0, %v15108_v62  ;;  %v12588_v62 = vld [vmem:[%s20495_s2 + $0x158] sm:$0xff] }
 0x194   :  { %1866 = vmatpush.msrb.mxu2 %v12588_v62  ;;  %15669 = vmatpush.msra.mxu3 %v12588_v62 }
 0x198   :  { %v1007_v0 = vpop.f32.mrf.mxu0 }
 0x199   :  { %1487 = vmatmul.f32.gmra.mxu2 %v1007_v0  ;;  %v12587_v0 = vld [vmem:[%s20495_s2 + $0x150] sm:$0xff] }
 0x19a   :  { %1867 = vmatpush.msrb.mxu2 %v12587_v0  ;;  %15670 = vmatpush.msra.mxu3 %v12587_v0 }
 0x1a0   :  { %v1010_v2 = vpop.f32.mrf.mxu0 }
 0x1a1   :  { %1716 = vmatmul.f32.vlgmr.msra.gmra.mxu2 %v1010_v2  ;;  %v15122_v2 = vld [vmem:[%s20494_s1 + $0x128] sm:$0xff] }
 0x1a3   :  { %12505 = vmatmul.msk.bf16.gmra.mxu0 %vm680_vm0, %v15109_v1  ;;  %v12586_v1 = vld [vmem:[%s20495_s2 + $0x148] sm:$0xff] }
 0x1a4   :  { %1868 = vmatpush.msrb.mxu2 %v12586_v1  ;;  %15671 = vmatpush.msra.mxu3 %v12586_v1  ;;  %v15130_v1 = vld [vmem:[%s20494_s1 + $0x168] sm:$0xff] }
 0x1a8   :  { %v1012_v3 = vpop.f32.mrf.mxu0 }
 0x1a9   :  { %1719 = vmatmul.f32.gmra.mxu2 %v1012_v3  ;;  %v12585_v3 = vld [vmem:[%s20495_s2 + $0x140] sm:$0xff] }
 0x1aa   :  { %1869 = vmatpush.msrb.mxu2 %v12585_v3  ;;  %15672 = vmatpush.msra.mxu3 %v12585_v3 }
 0x1b0   :  { %v1015_v5 = vpop.f32.mrf.mxu0 }
 0x1b1   :  { %1722 = vmatmul.f32.gmra.mxu2 %v1015_v5  ;;  %v12584_v5 = vld [vmem:[%s20495_s2 + $0x138] sm:$0xff] }
 0x1b2   :  { %1870 = vmatpush.msrb.mxu2 %v12584_v5  ;;  %15673 = vmatpush.msra.mxu3 %v12584_v5 }
 0x1b3   :  { %12506 = vmatmul.msk.bf16.gmra.mxu0 %vm680_vm0, %v15110_v4 }
 0x1b8   :  { %v1017_v7 = vpop.f32.mrf.mxu0 }
 0x1b9   :  { %1725 = vmatmul.f32.gmra.mxu2 %v1017_v7  ;;  %v12583_v7 = vld [vmem:[%s20495_s2 + $0x130] sm:$0xff] }
 0x1ba   :  { %1871 = vmatpush.msrb.mxu2 %v12583_v7  ;;  %15674 = vmatpush.msra.mxu3 %v12583_v7 }
 0x1c0   :  { %v1020_v9 = vpop.f32.mrf.mxu0 }
 0x1c1   :  { %1728 = vmatmul.f32.gmra.mxu2 %v1020_v9  ;;  %v12582_v9 = vld [vmem:[%s20495_s2 + $0x128] sm:$0xff] }
 0x1c2   :  { %1872 = vmatpush.msrb.mxu2 %v12582_v9  ;;  %15675 = vmatpush.msra.mxu3 %v12582_v9  ;;  %v16365_v9 = vpop.f32.mrf.mxu1 }
 0x1c3   :  { %12507 = vmatmul.msk.bf16.gmra.mxu0 %vm680_vm0, %v15111_v8 }
 0x1c8   :  { %v1022_v11 = vpop.f32.mrf.mxu0 }
 0x1c9   :  { %1731 = vmatmul.f32.gmra.mxu2 %v1022_v11  ;;  %v12581_v11 = vld [vmem:[%s20495_s2 + $0x120] sm:$0xff] }
 0x1ca   :  { %1873 = vmatpush.msrb.mxu2 %v12581_v11  ;;  %15676 = vmatpush.msra.mxu3 %v12581_v11  ;;  %v15132_v11 = vld [vmem:[%s20494_s1 + $0x178] sm:$0xff] }
 0x1d0   :  { %v1025_v14 = vpop.f32.mrf.mxu0 }
 0x1d1   :  { %1734 = vmatmul.f32.gmra.mxu2 %v1025_v14  ;;  %v12580_v14 = vld [vmem:[%s20495_s2 + $0x118] sm:$0xff] }
 0x1d2   :  { %1874 = vmatpush.msrb.mxu2 %v12580_v14  ;;  %15677 = vmatpush.msra.mxu3 %v12580_v14  ;;  %v16371_v14 = vpop.f32.mrf.mxu1 }
 0x1d3   :  { %12508 = vmatmul.msk.bf16.gmra.mxu0 %vm680_vm0, %v15112_v13 }
 0x1d8   :  { %v1027_v16 = vpop.f32.mrf.mxu0 }
 0x1d9   :  { %1737 = vmatmul.f32.gmra.mxu2 %v1027_v16  ;;  %v12579_v16 = vld [vmem:[%s20495_s2 + $0x110] sm:$0xff] }
 0x1da   :  { %1875 = vmatpush.msrb.mxu2 %v12579_v16  ;;  %15678 = vmatpush.msra.mxu3 %v12579_v16 }
 0x1e0   :  { %v1030_v19 = vpop.f32.mrf.mxu0 }
 0x1e1   :  { %1740 = vmatmul.f32.gmra.mxu2 %v1030_v19 }
 0x1e3   :  { %12509 = vmatmul.msk.bf16.gmra.mxu0 %vm680_vm0, %v15113_v18  ;;  %v12578_v18 = vld [vmem:[%s20495_s2 + $0x108] sm:$0xff] }
 0x1e4   :  { %v16200_v24 = vpop.f32.mrf.mxu2  ;;  %1876 = vmatpush.msrb.mxu2 %v12578_v18  ;;  %15679 = vmatpush.msra.mxu3 %v12578_v18  ;;  %v15133_v18 = vld [vmem:[%s20494_s1 + $0x180] sm:$0xff] }
 0x1e8   :  { %v1032_v20 = vpop.f32.mrf.mxu0 }
 0x1e9   :  { %1743 = vmatmul.f32.gmra.mxu2 %v1032_v20  ;;  %v15123_v20 = vld [vmem:[%s20494_s1 + $0x130] sm:$0xff] }
 0x1ec   :  { %v16203_v26 = vpop.f32.mrf.mxu2 }
 0x1ed   :  { %20519 = vst [vmem:[#allocation14_spill] sm:$0xff] %v16203_v26 }
 0x1f0   :  { %v1035_v23 = vpop.f32.mrf.mxu0 }
 0x1f1   :  { %1746 = vmatmul.f32.gmra.mxu2 %v1035_v23 }
 0x1f3   :  { %12510 = vmatmul.msk.bf16.gmra.mxu0 %vm680_vm0, %v15114_v22  ;;  %v12577_v22 = vld [vmem:[%s20495_s2 + $0x100] sm:$0xff] }
 0x1f4   :  { %v16209_v29 = vpop.f32.mrf.mxu2  ;;  %1877 = vmatpush.msrb.mxu2 %v12577_v22  ;;  %15680 = vmatpush.msra.mxu3 %v12577_v22  ;;  %v16376_v22 = vpop.f32.mrf.mxu1 }
 0x1f5   :  { %20520 = vst [vmem:[#allocation15_spill] sm:$0xff] %v16209_v29 }
 0x1f8   :  { %v1037_v25 = vpop.f32.mrf.mxu0 }
 0x1f9   :  { %1749 = vmatmul.f32.gmra.mxu2 %v1037_v25 }
 0x1fc   :  { %v16214_v33 = vpop.f32.mrf.mxu2 }
 0x1fd   :  { %20521 = vst [vmem:[#allocation16_spill] sm:$0xff] %v16214_v33 }
 0x200   :  { %v1040_v28 = vpop.f32.mrf.mxu0 }
 0x201   :  { %1752 = vmatmul.f32.gmra.mxu2 %v1040_v28  ;;  %v15124_v28 = vld [vmem:[%s20494_s1 + $0x138] sm:$0xff] }
 0x203   :  { %12511 = vmatmul.msk.bf16.gmra.mxu0 %vm680_vm0, %v15115_v27 }
 0x204   :  { %v16217_v35 = vpop.f32.mrf.mxu2 }
 0x205   :  { %20522 = vst [vmem:[#allocation17_spill] sm:$0xff] %v16217_v35 }
 0x208   :  { %v1042_v30 = vpop.f32.mrf.mxu0 }
 0x209   :  { %1755 = vmatmul.f32.gmra.mxu2 %v1042_v30 }
 0x20c   :  { %v16223_v38 = vpop.f32.mrf.mxu2 }
 0x20d   :  { %20523 = vst [vmem:[#allocation18_spill] sm:$0xff] %v16223_v38 }
 0x210   :  { %v1045_v32 = vpop.f32.mrf.mxu0 }
 0x211   :  { %1758 = vmatmul.f32.gmra.mxu2 %v1045_v32 }
 0x213   :  { %12512 = vmatmul.msk.bf16.gmra.mxu0 %vm680_vm0, %v15116_v31 }
 0x214   :  { %v16225_v40 = vpop.f32.mrf.mxu2 }
 0x215   :  { %20524 = vst [vmem:[#allocation19_spill] sm:$0xff] %v16225_v40 }
 0x218   :  { %v1047_v34 = vpop.f32.mrf.mxu0 }
 0x219   :  { %1761 = vmatmul.f32.gmra.mxu2 %v1047_v34 }
 0x21c   :  { %v16231_v44 = vpop.f32.mrf.mxu2 }
 0x21d   :  { %20525 = vst [vmem:[#allocation20_spill] sm:$0xff] %v16231_v44 }
 0x220   :  { %v1050_v37 = vpop.f32.mrf.mxu0 }
 0x221   :  { %1764 = vmatmul.f32.gmra.mxu2 %v1050_v37 }
 0x223   :  { %12513 = vmatmul.msk.bf16.gmra.mxu0 %vm680_vm0, %v15117_v36  ;;  %v15125_v36 = vld [vmem:[%s20494_s1 + $0x140] sm:$0xff] }
 0x224   :  { %v16236_v47 = vpop.f32.mrf.mxu2 }
 0x228   :  { %v1052_v39 = vpop.f32.mrf.mxu0 }
 0x229   :  { %1767 = vmatmul.f32.gmra.mxu2 %v1052_v39 }
 0x22c   :  { %v16239_v49 = vpop.f32.mrf.mxu2 }
 0x230   :  { %v1055_v42 = vpop.f32.mrf.mxu0 }
 0x231   :  { %1770 = vmatmul.f32.gmra.mxu2 %v1055_v42  ;;  %v15126_v42 = vld [vmem:[%s20494_s1 + $0x148] sm:$0xff] }
 0x233   :  { %12514 = vmatmul.msk.bf16.gmra.mxu0 %vm680_vm0, %v15118_v41 }
 0x234   :  { %v16245_v52 = vpop.f32.mrf.mxu2 }
 0x238   :  { %v1057_v43 = vpop.f32.mrf.mxu0 }
 0x239   :  { %1773 = vmatmul.f32.gmra.mxu2 %v1057_v43 }
 0x23c   :  { %v16250_v56 = vpop.f32.mrf.mxu2 }
 0x240   :  { %v1060_v46 = vpop.f32.mrf.mxu0 }
 0x241   :  { %1776 = vmatmul.f32.gmra.mxu2 %v1060_v46 }
 0x243   :  { %12515 = vmatmul.msk.bf16.gmra.mxu0 %vm680_vm0, %v15119_v45 }
 0x244   :  { %v16268_v63 = vpop.f32.mrf.mxu2 }
 0x248   :  { %v1062_v48 = vpop.f32.mrf.mxu0 }
 0x249   :  { %1779 = vmatmul.f32.gmra.mxu2 %v1062_v48 }
 0x24c   :  { %v16289_v8 = vpop.f32.mrf.mxu2 }
 0x250   :  { %v1065_v51 = vpop.f32.mrf.mxu0 }
 0x251   :  { %1782 = vmatmul.f32.gmra.mxu2 %v1065_v51 }
 0x253   :  { %12516 = vmatmul.msk.bf16.gmra.mxu0 %vm680_vm0, %v15120_v50  ;;  %v15127_v50 = vld [vmem:[%s20494_s1 + $0x150] sm:$0xff] }
 0x254   :  { %v16306_v19 = vpop.f32.mrf.mxu2 }
 0x258   :  { %v1067_v53 = vpop.f32.mrf.mxu0 }
 0x259   :  { %1785 = vmatmul.f32.gmra.mxu2 %v1067_v53 }
 0x25c   :  { %v16315_v27 = vpop.f32.mrf.mxu2 }
 0x260   :  { %v1070_v55 = vpop.f32.mrf.mxu0 }
 0x261   :  { %1788 = vmatmul.f32.gmra.mxu2 %v1070_v55 }
 0x263   :  { %12517 = vmatmul.msk.bf16.gmra.mxu0 %vm680_vm0, %v15121_v54 }
 0x264   :  { %v16320_v31 = vpop.f32.mrf.mxu2 }
 0x268   :  { %v1072_v61 = vpop.f32.mrf.mxu0 }
 0x269   :  { %1791 = vmatmul.f32.gmra.mxu2 %v1072_v61  ;;  %v15129_v61 = vld [vmem:[%s20494_s1 + $0x160] sm:$0xff] }
 0x26c   :  { %v16323_v34 = vpop.f32.mrf.mxu2 }
 0x270   :  { %v1075_v4 = vpop.f32.mrf.mxu0 }
 0x271   :  { %1794 = vmatmul.f32.gmra.mxu2 %v1075_v4  ;;  %v15131_v4 = vld [vmem:[%s20494_s1 + $0x170] sm:$0xff] }
 0x273   :  { %12518 = vmatmul.msk.bf16.gmra.mxu0 %vm680_vm0, %v15122_v2 }
 0x274   :  { %v16329_v39 = vpop.f32.mrf.mxu2 }
 0x278   :  { %v1077_v13 = vpop.f32.mrf.mxu0 }
 0x279   :  { %1797 = vmatmul.f32.gmra.mxu2 %v1077_v13 }
 0x27c   :  { %v16334_v45 = vpop.f32.mrf.mxu2 }
 0x27d   :  { %20526 = vst [vmem:[#allocation21_spill] sm:$0xff] %v16334_v45 }
 0x280   :  { %v1080_v23 = vpop.f32.mrf.mxu0 }
 0x281   :  { %1800 = vmatmul.f32.gmra.mxu2 %v1080_v23 }
 0x283   :  { %12519 = vmatmul.msk.bf16.gmra.mxu0 %vm680_vm0, %v15123_v20 }
 0x284   :  { %v16337_v48 = vpop.f32.mrf.mxu2 }
 0x285   :  { %20527 = vst [vmem:[#allocation22_spill] sm:$0xff] %v16337_v48  ;;  %v12624_v48 = vld [vmem:[%s20495_s2 + $0x278] sm:$0xff] }
 0x286   :  { %2186 = vmatpush.msra.mxu2 %v12624_v48  ;;  %v12622_v48 = vld [vmem:[%s20495_s2 + $0x268] sm:$0xff] }
 0x288   :  { %v1082_v25 = vpop.f32.mrf.mxu0 }
 0x289   :  { %1803 = vmatmul.f32.gmra.mxu2 %v1082_v25  ;;  %v16379_v25 = vpop.f32.mrf.mxu1 }
 0x28c   :  { %v16343_v53 = vpop.f32.mrf.mxu2 }
 0x28d   :  { %20528 = vst [vmem:[#allocation23_spill] sm:$0xff] %v16343_v53 }
 0x290   :  { %v1085_v30 = vpop.f32.mrf.mxu0 }
 0x291   :  { %1806 = vmatmul.f32.gmra.mxu2 %v1085_v30 }
 0x293   :  { %12520 = vmatmul.msk.bf16.gmra.mxu0 %vm680_vm0, %v15124_v28  ;;  %v15134_v28 = vld [vmem:[%s20494_s1 + $0x188] sm:$0xff] }
 0x294   :  { %v16345_v55 = vpop.f32.mrf.mxu2 }
 0x295   :  { %20529 = vst [vmem:[#allocation24_spill] sm:$0xff] %v16345_v55  ;;  %v15146_v55 = vld [vmem:[%s20494_s1 + $0x1e8] sm:$0xff] }
 0x298   :  { %v1087_v32 = vpop.f32.mrf.mxu0 }
 0x299   :  { %1809 = vmatmul.f32.gmra.mxu2 %v1087_v32  ;;  %v16385_v32 = vpop.f32.mrf.mxu1 }
 0x29c   :  { %v16351_v60 = vpop.f32.mrf.mxu2 }
 0x29d   :  { %20530 = vst [vmem:[#allocation25_spill] sm:$0xff] %v16351_v60 }
 0x2a0   :  { %v1090_v37 = vpop.f32.mrf.mxu0 }
 0x2a1   :  { %1878 = vmatmul.f32.vlgmr.msrb.gmra.mxu2 %v1090_v37  ;;  %v15135_v37 = vld [vmem:[%s20494_s1 + $0x190] sm:$0xff] }
 0x2a3   :  { %12521 = vmatmul.msk.bf16.gmra.mxu0 %vm680_vm0, %v15125_v36 }
 0x2a8   :  { %v1092_v41 = vpop.f32.mrf.mxu0 }
 0x2a9   :  { %1881 = vmatmul.f32.gmra.mxu2 %v1092_v41  ;;  %v16390_v41 = vpop.f32.mrf.mxu1 }
 0x2b0   :  { %v1095_v43 = vpop.f32.mrf.mxu0 }
 0x2b1   :  { %1884 = vmatmul.f32.gmra.mxu2 %v1095_v43  ;;  %v16392_v43 = vpop.permute.xlu1 %1553 }
 0x2b2   :  { %20531 = vst [vmem:[#allocation26_spill] sm:$0xff] %v16392_v43 }
 0x2b3   :  { %12522 = vmatmul.msk.bf16.gmra.mxu0 %vm680_vm0, %v15126_v42 }
 0x2b8   :  { %v1097_v46 = vpop.f32.mrf.mxu0 }
 0x2b9   :  { %1887 = vmatmul.f32.gmra.mxu2 %v1097_v46 }
 0x2c0   :  { %v1100_v51 = vpop.f32.mrf.mxu0 }
 0x2c1   :  { %1890 = vmatmul.f32.gmra.mxu2 %v1100_v51  ;;  %v16397_v51 = vpop.permute.xlu1 %1558 }
 0x2c2   :  { %20532 = vst [vmem:[#allocation27_spill] sm:$0xff] %v16397_v51  ;;  %v15154_v51 = vld [vmem:[%s20494_s1 + $0x228] sm:$0xff] }
 0x2c3   :  { %12523 = vmatmul.msk.bf16.gmra.mxu0 %vm680_vm0, %v15127_v50  ;;  %v16395_v50 = vpop.f32.mrf.mxu1 }
 0x2c8   :  { %v1102_v54 = vpop.f32.mrf.mxu0 }
 0x2c9   :  { %1893 = vmatmul.f32.gmra.mxu2 %v1102_v54  ;;  %v15136_v54 = vld [vmem:[%s20494_s1 + $0x198] sm:$0xff] }
 0x2d0   :  { %v1105_v58 = vpop.f32.mrf.mxu0 }
 0x2d1   :  { %1896 = vmatmul.f32.gmra.mxu2 %v1105_v58  ;;  %v16403_v58 = vpop.f32.mrf.mxu1 }
 0x2d3   :  { %12524 = vmatmul.msk.bf16.gmra.mxu0 %vm680_vm0, %v15128_v57 }
 0x2d8   :  { %v1107_v59 = vpop.f32.mrf.mxu0 }
 0x2d9   :  { %1899 = vmatmul.f32.gmra.mxu2 %v1107_v59  ;;  %v16405_v59 = vpop.permute.xlu1 %1548 }
 0x2e0   :  { %v1110_v62 = vpop.f32.mrf.mxu0 }
 0x2e1   :  { %1902 = vmatmul.f32.vlgmr.msra.gmra.mxu3 %v1110_v62  ;;  %v1419_v62 = vpop.f32.mrf.mxu1 }
 0x2e3   :  { %12525 = vmatmul.msk.bf16.gmra.mxu0 %vm680_vm0, %v15129_v61 }
 0x2e8   :  { %v1112_v0 = vpop.f32.mrf.mxu0 }
 0x2e9   :  { %1905 = vmatmul.f32.gmra.mxu3 %v1112_v0  ;;  %v15137_v0 = vld [vmem:[%s20494_s1 + $0x1a0] sm:$0xff] }
 0x2f0   :  { %v1115_v2 = vpop.f32.mrf.mxu0 }
 0x2f1   :  { %1908 = vmatmul.f32.gmra.mxu3 %v1115_v2 }
 0x2f3   :  { %12526 = vmatmul.msk.bf16.gmra.mxu0 %vm680_vm0, %v15130_v1  ;;  %v1534_v1 = vpop.permute.xlu1 %1533 }
 0x2f8   :  { %v1117_v3 = vpop.f32.mrf.mxu0 }
 0x2f9   :  { %1911 = vmatmul.f32.gmra.mxu3 %v1117_v3  ;;  %v1659_v3 = vadd.f32 %v1534_v1, %v1419_v62  ;;  %v12597_v62 = vld [vmem:[%s20495_s2 + $0x1a0] sm:$0xff]  ;;  %v12596_v1 = vld [vmem:[%s20495_s2 + $0x198] sm:$0xff] }
 0x300   :  { %v1120_v5 = vpop.f32.mrf.mxu0 }
 0x301   :  { %1914 = vmatmul.f32.gmra.mxu3 %v1120_v5  ;;  %v1821_v5 = vadd.f32 %v16320_v31, %v1659_v3 }
 0x303   :  { %12527 = vmatmul.msk.bf16.gmra.mxu0 %vm680_vm0, %v15131_v4  ;;  %v12608_v4 = vld [vmem:[%s20495_s2 + $0x1f8] sm:$0xff] }
 0x304   :  { %2024 = vmatpush.msrb.mxu1 %v12608_v4  ;;  %v12594_v4 = vld [vmem:[%s20495_s2 + $0x188] sm:$0xff] }
 0x308   :  { %v1122_v7 = vpop.f32.mrf.mxu0 }
 0x309   :  { %1917 = vmatmul.f32.gmra.mxu3 %v1122_v7  ;;  %v12607_v7 = vld [vmem:[%s20495_s2 + $0x1f0] sm:$0xff] }
 0x30a   :  { %2025 = vmatpush.msrb.mxu1 %v12607_v7  ;;  %v12593_v7 = vld [vmem:[%s20495_s2 + $0x180] sm:$0xff] }
 0x310   :  { %v1125_v13 = vpop.f32.mrf.mxu0 }
 0x311   :  { %1920 = vmatmul.f32.gmra.mxu3 %v1125_v13 }
 0x313   :  { %12528 = vmatmul.msk.bf16.gmra.mxu0 %vm680_vm0, %v15132_v11 }
 0x318   :  { %v1127_v16 = vpop.f32.mrf.mxu0 }
 0x319   :  { %1923 = vmatmul.f32.gmra.mxu3 %v1127_v16  ;;  %v12606_v16 = vld [vmem:[%s20495_s2 + $0x1e8] sm:$0xff] }
 0x31a   :  { %2026 = vmatpush.msrb.mxu1 %v12606_v16 }
 0x320   :  { %v1130_v20 = vpop.f32.mrf.mxu0 }
 0x321   :  { %1926 = vmatmul.f32.gmra.mxu3 %v1130_v20  ;;  %v12604_v20 = vld [vmem:[%s20495_s2 + $0x1d8] sm:$0xff] }
 0x323   :  { %12529 = vmatmul.msk.bf16.gmra.mxu0 %vm680_vm0, %v15133_v18  ;;  %v12605_v18 = vld [vmem:[%s20495_s2 + $0x1e0] sm:$0xff] }
 0x324   :  { %2027 = vmatpush.msrb.mxu1 %v12605_v18 }
 0x326   :  { %2028 = vmatpush.msrb.mxu1 %v12604_v20 }
 0x328   :  { %v1132_v23 = vpop.f32.mrf.mxu0 }
 0x329   :  { %1929 = vmatmul.f32.gmra.mxu3 %v1132_v23  ;;  %v12603_v23 = vld [vmem:[%s20495_s2 + $0x1d0] sm:$0xff] }
 0x32a   :  { %2029 = vmatpush.msrb.mxu1 %v12603_v23  ;;  %v15140_v23 = vld [vmem:[%s20494_s1 + $0x1b8] sm:$0xff] }
 0x330   :  { %v1135_v30 = vpop.f32.mrf.mxu0 }
 0x331   :  { %1932 = vmatmul.f32.gmra.mxu3 %v1135_v30  ;;  %v12602_v30 = vld [vmem:[%s20495_s2 + $0x1c8] sm:$0xff] }
 0x332   :  { %2030 = vmatpush.msrb.mxu1 %v12602_v30  ;;  %v16485_v30 = vpop.f32.mrf.mxu2 }
 0x333   :  { %12530 = vmatmul.msk.bf16.gmra.mxu0 %vm680_vm0, %v15134_v28 }
 0x338   :  { %v1137_v36 = vpop.f32.mrf.mxu0 }
 0x339   :  { %1935 = vmatmul.f32.gmra.mxu3 %v1137_v36  ;;  %v15138_v36 = vld [vmem:[%s20494_s1 + $0x1a8] sm:$0xff] }
 0x340   :  { %v1140_v42 = vpop.f32.mrf.mxu0 }
 0x341   :  { %1938 = vmatmul.f32.gmra.mxu3 %v1140_v42 }
 0x343   :  { %12531 = vmatmul.msk.bf16.gmra.mxu0 %vm680_vm0, %v15135_v37  ;;  %v12601_v37 = vld [vmem:[%s20495_s2 + $0x1c0] sm:$0xff] }
 0x344   :  { %2031 = vmatpush.msrb.mxu1 %v12601_v37 }
 0x348   :  { %v1142_v46 = vpop.f32.mrf.mxu0 }
 0x349   :  { %1941 = vmatmul.f32.gmra.mxu3 %v1142_v46  ;;  %v12600_v46 = vld [vmem:[%s20495_s2 + $0x1b8] sm:$0xff] }
 0x34a   :  { %2032 = vmatpush.msrb.mxu1 %v12600_v46 }
 0x350   :  { %v1145_v57 = vpop.f32.mrf.mxu0 }
 0x351   :  { %1944 = vmatmul.f32.gmra.mxu3 %v1145_v57 }
 0x353   :  { %12532 = vmatmul.msk.bf16.gmra.mxu0 %vm680_vm0, %v15136_v54  ;;  %v12599_v54 = vld [vmem:[%s20495_s2 + $0x1b0] sm:$0xff] }
 0x354   :  { %2033 = vmatpush.msrb.mxu1 %v12599_v54  ;;  %v16492_v54 = vpop.f32.mrf.mxu2 }
 0x355   :  { %20538 = vst [vmem:[#allocation33_spill] sm:$0xff] %v16492_v54 }
 0x358   :  { %v1147_v61 = vpop.f32.mrf.mxu0 }
 0x359   :  { %1947 = vmatmul.f32.gmra.mxu3 %v1147_v61  ;;  %v12598_v61 = vld [vmem:[%s20495_s2 + $0x1a8] sm:$0xff] }
 0x35a   :  { %2034 = vmatpush.msrb.mxu1 %v12598_v61 }
 0x35c   :  { %2035 = vmatpush.msrb.mxu1 %v12597_v62 }
 0x35e   :  { %2036 = vmatpush.msrb.mxu1 %v12596_v1 }
 0x360   :  { %v1150_v2 = vpop.f32.mrf.mxu0 }
 0x361   :  { %1950 = vmatmul.f32.gmra.mxu3 %v1150_v2  ;;  %v12595_v2 = vld [vmem:[%s20495_s2 + $0x190] sm:$0xff] }
 0x362   :  { %2037 = vmatpush.msrb.mxu1 %v12595_v2  ;;  %v16502_v2 = vpop.f32.mrf.mxu2 }
 0x363   :  { %12533 = vmatmul.msk.bf16.gmra.mxu0 %vm680_vm0, %v15137_v0 }
 0x364   :  { %v1903_v11 = vpop.f32.mrf.mxu3  ;;  %2038 = vmatpush.msrb.mxu1 %v12594_v4 }
 0x365   :  { %v16418_v13 = vadd.f32 %v1903_v11, %v1821_v5  ;;  %v15139_v5 = vld [vmem:[%s20494_s1 + $0x1b0] sm:$0xff] }
 0x366   :  { %2039 = vmatpush.msrb.mxu1 %v12593_v7 }
 0x368   :  { %v1152_v31 = vpop.f32.mrf.mxu0 }
 0x369   :  { %1953 = vmatmul.f32.gmra.mxu3 %v1152_v31  ;;  %v16478_v31 = vpop.f32.mrf.mxu1 }
 0x36c   :  { %v16432_v28 = vpop.f32.mrf.mxu3 }
 0x370   :  { %v1155_v42 = vpop.f32.mrf.mxu0 }
 0x371   :  { %1956 = vmatmul.f32.gmra.mxu3 %v1155_v42  ;;  %v16488_v37 = vpop.f32.mrf.mxu1 }
 0x373   :  { %12534 = vmatmul.msk.bf16.gmra.mxu0 %vm680_vm0, %v15138_v36 }
 0x374   :  { %v16450_v57 = vpop.f32.mrf.mxu3 }
 0x375   :  { %20533 = vst [vmem:[#allocation28_spill] sm:$0xff] %v16450_v57 }
 0x378   :  { %v1157_v0 = vpop.f32.mrf.mxu0 }
 0x379   :  { %1959 = vmatmul.f32.gmra.mxu3 %v1157_v0  ;;  %v16496_v62 = vpop.f32.mrf.mxu1  ;;  %v15141_v0 = vld [vmem:[%s20494_s1 + $0x1c0] sm:$0xff] }
 0x37c   :  { %v16464_v3 = vpop.f32.mrf.mxu3 }
 0x37d   :  { %20534 = vst [vmem:[#allocation29_spill] sm:$0xff] %v16464_v3  ;;  %v4148_v3 = vld [vmem:[%s20499_s6 + $0xb8] sm:$0xff] }
 0x380   :  { %v1160_v11 = vpop.f32.mrf.mxu0 }
 0x381   :  { %1962 = vmatmul.f32.gmra.mxu3 %v1160_v11 }
 0x383   :  { %12535 = vmatmul.msk.bf16.gmra.mxu0 %vm680_vm0, %v15139_v5  ;;  %v16506_v5 = vpop.f32.mrf.mxu1 }
 0x384   :  { %v16476_v16 = vpop.f32.mrf.mxu3  ;;  %20540 = vst [vmem:[#allocation35_spill] sm:$0xff] %v16506_v5  ;;  %v12610_v5 = vld [vmem:[%s20495_s2 + $0x208] sm:$0xff] }
 0x385   :  { %20535 = vst [vmem:[#allocation30_spill] sm:$0xff] %v16476_v16 }
 0x388   :  { %v1162_v18 = vpop.f32.mrf.mxu0 }
 0x389   :  { %1965 = vmatmul.f32.gmra.mxu3 %v1162_v18  ;;  %v16510_v18 = vpop.f32.mrf.mxu2 }
 0x38a   :  { %20542 = vst [vmem:[#allocation37_spill] sm:$0xff] %v16510_v18  ;;  %v15143_v18 = vld [vmem:[%s20494_s1 + $0x1d0] sm:$0xff] }
 0x38c   :  { %v16480_v20 = vpop.f32.mrf.mxu3 }
 0x38d   :  { %20536 = vst [vmem:[#allocation31_spill] sm:$0xff] %v16480_v20 }
 0x390   :  { %v1165_v36 = vpop.f32.mrf.mxu0 }
 0x391   :  { %1968 = vmatmul.f32.gmra.mxu3 %v1165_v36 }
 0x393   :  { %12536 = vmatmul.msk.bf16.gmra.mxu0 %vm680_vm0, %v15140_v23  ;;  %v15142_v23 = vld [vmem:[%s20494_s1 + $0x1c8] sm:$0xff] }
 0x394   :  { %v16490_v42 = vpop.f32.mrf.mxu3 }
 0x395   :  { %20537 = vst [vmem:[#allocation32_spill] sm:$0xff] %v16490_v42 }
 0x398   :  { %v1167_v46 = vpop.f32.mrf.mxu0 }
 0x399   :  { %1971 = vmatmul.f32.gmra.mxu3 %v1167_v46  ;;  %v16515_v46 = vpop.f32.mrf.mxu1 }
 0x39a   :  { %20543 = vst [vmem:[#allocation38_spill] sm:$0xff] %v16515_v46 }
 0x39c   :  { %v16494_v61 = vpop.f32.mrf.mxu3 }
 0x39d   :  { %20539 = vst [vmem:[#allocation34_spill] sm:$0xff] %v16494_v61  ;;  %v15145_v61 = vld [vmem:[%s20494_s1 + $0x1e0] sm:$0xff] }
 0x3a0   :  { %v1170_v1 = vpop.f32.mrf.mxu0 }
 0x3a1   :  { %2040 = vmatmul.f32.vlgmr.msrb.gmra.mxu1 %v1170_v1  ;;  %v16520_v1 = vpop.f32.mrf.mxu2 }
 0x3a3   :  { %12537 = vmatmul.msk.bf16.gmra.mxu0 %vm680_vm0, %v15141_v0 }
 0x3a4   :  { %v16504_v4 = vpop.f32.mrf.mxu3 }
 0x3a8   :  { %v1172_v7 = vpop.f32.mrf.mxu0 }
 0x3a9   :  { %2043 = vmatmul.f32.gmra.mxu1 %v1172_v7  ;;  %v16522_v7 = vpop.f32.mrf.mxu1 }
 0x3aa   :  { %20544 = vst [vmem:[#allocation39_spill] sm:$0xff] %v16522_v7 }
 0x3ac   :  { %v16508_v11 = vpop.f32.mrf.mxu3 }
 0x3ad   :  { %20541 = vst [vmem:[#allocation36_spill] sm:$0xff] %v16508_v11 }
 0x3b0   :  { %v1175_v36 = vpop.f32.mrf.mxu0 }
 0x3b1   :  { %2046 = vmatmul.f32.gmra.mxu1 %v1175_v36  ;;  %v16529_v36 = vpop.f32.mrf.mxu2  ;;  %v16534_v40 = vpop.f32.mrf.mxu1 }
 0x3b2   :  { %20546 = vst [vmem:[#allocation41_spill] sm:$0xff] %v16529_v36  ;;  %v16548_v36 = vpop.permute.xlu1 %1628 }
 0x3b3   :  { %12538 = vmatmul.msk.bf16.gmra.mxu0 %vm680_vm0, %v15142_v23  ;;  %20547 = vst [vmem:[#allocation42_spill] sm:$0xff] %v16534_v40 }
 0x3b4   :  { %v16518_v0 = vpop.f32.mrf.mxu3  ;;  %20549 = vst [vmem:[#allocation44_spill] sm:$0xff] %v16548_v36 }
 0x3b8   :  { %v1177_v54 = vpop.f32.mrf.mxu0 }
 0x3b9   :  { %2049 = vmatmul.f32.gmra.mxu1 %v1177_v54  ;;  %v16536_v54 = vpop.f32.mrf.mxu2  ;;  %v16543_v33 = vpop.f32.mrf.mxu1 }
 0x3ba   :  { %v1614_v21 = vpop.permute.xlu1 %1613 }
 0x3bc   :  { %v16524_v11 = vpop.f32.mrf.mxu3 }
 0x3bd   :  { %20545 = vst [vmem:[#allocation40_spill] sm:$0xff] %v16524_v11  ;;  %v15144_v11 = vld [vmem:[%s20494_s1 + $0x1d8] sm:$0xff] }
 0x3c0   :  { %v1180_v44 = vpop.f32.mrf.mxu0 }
 0x3c1   :  { %2052 = vmatmul.f32.gmra.mxu1 %v1180_v44  ;;  %v16550_v29 = vpop.f32.mrf.mxu2  ;;  %v16552_v26 = vpop.f32.mrf.mxu1 }
 0x3c2   :  { %20550 = vst [vmem:[#allocation45_spill] sm:$0xff] %v16550_v29 }
 0x3c3   :  { %12539 = vmatmul.msk.bf16.gmra.mxu0 %vm680_vm0, %v15143_v18  ;;  %20551 = vst [vmem:[#allocation46_spill] sm:$0xff] %v16552_v26 }
 0x3c4   :  { %v16532_v23 = vpop.f32.mrf.mxu3 }
 0x3c8   :  { %v1182_v38 = vpop.f32.mrf.mxu0 }
 0x3c9   :  { %2055 = vmatmul.f32.gmra.mxu1 %v1182_v38  ;;  %v16561_v29 = vpop.f32.mrf.mxu1 }
 0x3cc   :  { %v16538_v35 = vpop.f32.mrf.mxu3 }
 0x3cd   :  { %20548 = vst [vmem:[#allocation43_spill] sm:$0xff] %v16538_v35 }
 0x3d0   :  { %v1185_v44 = vpop.f32.mrf.mxu0 }
 0x3d1   :  { %2058 = vmatmul.f32.gmra.mxu1 %v1185_v44  ;;  %v1789_v44 = vpop.f32.mrf.mxu2 }
 0x3d3   :  { %12540 = vmatmul.msk.bf16.gmra.mxu0 %vm680_vm0, %v15144_v11  ;;  %v1675_v11 = vadd.f32 %v1614_v21, %v16200_v24 }
 0x3d4   :  { %v16546_v18 = vpop.f32.mrf.mxu3 }
 0x3d5   :  { %v1837_v60 = vadd.f32 %v1789_v44, %v1675_v11 }
 0x3d8   :  { %v1187_v38 = vpop.f32.mrf.mxu0 }
 0x3d9   :  { %2061 = vmatmul.f32.gmra.mxu1 %v1187_v38 }
 0x3dc   :  { %v16554_v35 = vpop.f32.mrf.mxu3 }
 0x3dd   :  { %20552 = vst [vmem:[#allocation47_spill] sm:$0xff] %v16554_v35  ;;  %v16565_v35 = vpop.f32.mrf.mxu1 }
 0x3de   :  { %20553 = vst [vmem:[#allocation48_spill] sm:$0xff] %v16565_v35 }
 0x3e0   :  { %v1190_v42 = vpop.f32.mrf.mxu0 }
 0x3e1   :  { %2064 = vmatmul.f32.gmra.mxu1 %v1190_v42 }
 0x3e3   :  { %12541 = vmatmul.msk.bf16.gmra.mxu0 %vm680_vm0, %v15145_v61 }
 0x3e4   :  { %v1951_v38 = vpop.f32.mrf.mxu3 }
 0x3e5   :  { %v16563_v36 = vadd.f32 %v1951_v38, %v1837_v60  ;;  %v16571_v21 = vpop.f32.mrf.mxu1  ;;  %v15147_v60 = vld [vmem:[%s20494_s1 + $0x1f0] sm:$0xff] }
 0x3e8   :  { %v1192_v26 = vpop.f32.mrf.mxu0 }
 0x3e9   :  { %2067 = vmatmul.f32.gmra.mxu1 %v1192_v26 }
 0x3ed   :  { %v16576_v26 = vpop.f32.mrf.mxu1 }
 0x3ee   :  { %20554 = vst [vmem:[#allocation49_spill] sm:$0xff] %v16576_v26  ;;  %v16601_v26 = vpop.permute.xlu0 %1563 }
 0x3ef   :  { %20556 = vst [vmem:[#allocation51_spill] sm:$0xff] %v16601_v26 }
 0x3f0   :  { %v1195_v40 = vpop.f32.mrf.mxu0 }
 0x3f1   :  { %2070 = vmatmul.f32.gmra.mxu1 %v1195_v40  ;;  %v15148_v40 = vld [vmem:[%s20494_s1 + $0x1f8] sm:$0xff] }
 0x3f3   :  { %12542 = vmatmul.msk.bf16.gmra.mxu0 %vm680_vm0, %v15146_v55 }
 0x3f5   :  { %v16579_v44 = vpop.f32.mrf.mxu1 }
 0x3f8   :  { %v1197_v24 = vpop.f32.mrf.mxu0 }
 0x3f9   :  { %2073 = vmatmul.f32.gmra.mxu1 %v1197_v24 }
 0x3fd   :  { %v16585_v11 = vpop.f32.mrf.mxu1 }
 0x3fe   :  { %20555 = vst [vmem:[#allocation50_spill] sm:$0xff] %v16585_v11 }
 0x400   :  { %v1200_v42 = vpop.f32.mrf.mxu0 }
 0x401   :  { %2076 = vmatmul.f32.gmra.mxu1 %v1200_v42 }
 0x403   :  { %12543 = vmatmul.msk.bf16.gmra.mxu0 %vm680_vm0, %v15147_v60  ;;  %v15149_v60 = vld [vmem:[%s20494_s1 + $0x200] sm:$0xff] }
 0x408   :  { %v1202_v61 = vpop.f32.mrf.mxu0 }
 0x409   :  { %2079 = vmatmul.f32.gmra.mxu1 %v1202_v61 }
 0x410   :  { %v1205_v55 = vpop.f32.mrf.mxu0 }
 0x411   :  { %2082 = vmatmul.f32.gmra.mxu1 %v1205_v55 }
 0x413   :  { %12544 = vmatmul.msk.bf16.gmra.mxu0 %vm680_vm0, %v15148_v40  ;;  %v15150_v40 = vld [vmem:[%s20494_s1 + $0x208] sm:$0xff] }
 0x418   :  { %v1207_v38 = vpop.f32.mrf.mxu0 }
 0x419   :  { %2085 = vmatmul.f32.gmra.mxu1 %v1207_v38 }
 0x41e   :  { %v16587_v24 = vpop.f32.mrf.mxu1 }
 0x420   :  { %v1210_v42 = vpop.f32.mrf.mxu0 }
 0x421   :  { %2088 = vmatmul.f32.gmra.mxu1 %v1210_v42 }
 0x423   :  { %12545 = vmatmul.msk.bf16.gmra.mxu0 %vm680_vm0, %v15149_v60  ;;  %v16605_v60 = vpop.permute.xlu0 %1568 }
 0x424   :  { %20557 = vst [vmem:[#allocation52_spill] sm:$0xff] %v16605_v60 }
 0x426   :  { %v16593_v61 = vpop.f32.mrf.mxu1 }
 0x428   :  { %v1212_v35 = vpop.f32.mrf.mxu0 }
 0x429   :  { %2091 = vmatmul.f32.gmra.mxu1 %v1212_v35  ;;  %v15151_v35 = vld [vmem:[%s20494_s1 + $0x210] sm:$0xff] }
 0x42e   :  { %v16595_v55 = vpop.f32.mrf.mxu1 }
 0x430   :  { %v1215_v38 = vpop.f32.mrf.mxu0 }
 0x431   :  { %2094 = vmatmul.f32.gmra.mxu1 %v1215_v38 }
 0x433   :  { %12546 = vmatmul.msk.bf16.gmra.mxu0 %vm680_vm0, %v15150_v40  ;;  %v16615_v40 = vpop.permute.xlu0 %1543 }
 0x436   :  { %v16603_v11 = vpop.f32.mrf.mxu1 }
 0x438   :  { %v1217_v42 = vpop.f32.mrf.mxu0 }
 0x439   :  { %2097 = vmatmul.f32.gmra.mxu1 %v1217_v42  ;;  %v15152_v42 = vld [vmem:[%s20494_s1 + $0x218] sm:$0xff] }
 0x43b   :  { %v16622_v20 = vpop.permute.xlu0 %1638 }
 0x43c   :  { %20558 = vst [vmem:[#allocation53_spill] sm:$0xff] %v16622_v20 }
 0x43e   :  { %v16607_v7 = vpop.f32.mrf.mxu1 }
 0x440   :  { %v1220_v17 = vpop.f32.mrf.mxu0 }
 0x441   :  { %2100 = vmatmul.f32.gmra.mxu1 %v1220_v17  ;;  %v4153_v17 = vld [vmem:[%s20499_s6 + $0xe0] sm:$0xff] }
 0x442   :  { %4516 = vperm.xlu1 %15697, %v4153_v17  }
 0x443   :  { %12547 = vmatmul.msk.bf16.gmra.mxu0 %vm680_vm0, %v15151_v35  ;;  %v16639_v20 = vpop.permute.xlu0 %1623 }
 0x444   :  { %20559 = vst [vmem:[#allocation54_spill] sm:$0xff] %v16639_v20 }
 0x446   :  { %v16613_v38 = vpop.f32.mrf.mxu1 }
 0x448   :  { %v1222_v26 = vpop.f32.mrf.mxu0 }
 0x449   :  { %2103 = vmatmul.f32.gmra.mxu1 %v1222_v26  ;;  %v4156_v26 = vld [vmem:[%s20499_s6 + $0xf8] sm:$0xff] }
 0x44a   :  { %4531 = vperm.xlu0 %15696, %v4156_v26  }
 0x44e   :  { %v16617_v15 = vpop.f32.mrf.mxu1 }
 0x450   :  { %v1225_v60 = vpop.f32.mrf.mxu0 }
 0x451   :  { %2106 = vmatmul.f32.gmra.mxu1 %v1225_v60  ;;  %v4140_v60 = vld [vmem:[%s20499_s6 + $0x78] sm:$0xff] }
 0x452   :  { %4451 = vperm.xlu1 %15697, %v4140_v60   ;;  %v12623_v60 = vld [vmem:[%s20495_s2 + $0x270] sm:$0xff] }
 0x453   :  { %12548 = vmatmul.msk.bf16.gmra.mxu0 %vm680_vm0, %v15152_v42  ;;  %v4139_v42 = vld [vmem:[%s20499_s6 + $0x70] sm:$0xff]  ;;  %2187 = vmatpush.msra.mxu2 %v12623_v60  ;;  %v12620_v60 = vld [vmem:[%s20495_s2 + $0x258] sm:$0xff] }
 0x454   :  { %4446 = vperm.xlu0 %15696, %v4139_v42   ;;  %v16663_v42 = vpop.permute.xlu0 %1528 }
 0x455   :  { %2188 = vmatpush.msra.mxu2 %v12622_v48  ;;  %v4149_v48 = vld [vmem:[%s20499_s6 + $0xc0] sm:$0xff] }
 0x456   :  { %v16631_v35 = vpop.f32.mrf.mxu1 }
 0x458   :  { %v1227_v16 = vpop.f32.mrf.mxu0 }
 0x459   :  { %2109 = vmatmul.f32.gmra.mxu1 %v1227_v16  ;;  %v15153_v16 = vld [vmem:[%s20494_s1 + $0x220] sm:$0xff] }
 0x45c   :  { %v16693_v46 = vpop.permute.xlu0 %1513 }
 0x45e   :  { %v2065_v53 = vpop.f32.mrf.mxu1 }
 0x45f   :  { %v16642_v17 = vadd.f32 %v2065_v53, %v16418_v13  ;;  %v4137_v53 = vld [vmem:[%s20499_s6 + $0x60] sm:$0xff]  ;;  %v4152_v13 = vld [vmem:[%s20499_s6 + $0xd8] sm:$0xff] }
 0x460   :  { %v1230_v26 = vpop.f32.mrf.mxu0  ;;  %4436 = vperm.xlu1 %15697, %v4137_v53   ;;  %4511 = vperm.xlu0 %15696, %v4152_v13   ;;  %v12619_v53 = vld [vmem:[%s20495_s2 + $0x250] sm:$0xff]  ;;  %v4150_v13 = vld [vmem:[%s20499_s6 + $0xc8] sm:$0xff] }
 0x461   :  { %2112 = vmatmul.f32.gmra.mxu1 %v1230_v26  ;;  %v12621_v26 = vld [vmem:[%s20495_s2 + $0x260] sm:$0xff] }
 0x462   :  { %2189 = vmatpush.msra.mxu2 %v12621_v26 }
 0x463   :  { %12549 = vmatmul.msk.bf16.gmra.mxu0 %vm680_vm0, %v15153_v16 }
 0x464   :  { %2190 = vmatpush.msra.mxu2 %v12620_v60  ;;  %v12617_v60 = vld [vmem:[%s20495_s2 + $0x240] sm:$0xff] }
 0x466   :  { %v16665_v16 = vpop.f32.mrf.mxu1  ;;  %2191 = vmatpush.msra.mxu2 %v12619_v53 }
 0x468   :  { %v1232_v20 = vpop.f32.mrf.mxu0  ;;  %4501 = vperm.xlu1 %15697, %v4150_v13   ;;  %4496 = vperm.xlu0 %15696, %v4149_v48   ;;  %v4155_v13 = vld [vmem:[%s20499_s6 + $0xf0] sm:$0xff]  ;;  %v12616_v48 = vld [vmem:[%s20495_s2 + $0x238] sm:$0xff] }
 0x469   :  { %2115 = vmatmul.f32.gmra.mxu1 %v1232_v20  ;;  %v12618_v20 = vld [vmem:[%s20495_s2 + $0x248] sm:$0xff]  ;;  %4526 = vperm.xlu2 %15698, %v4155_v13  }
 0x46a   :  { %2192 = vmatpush.msra.mxu2 %v12618_v20  ;;  %v12615_v20 = vld [vmem:[%s20495_s2 + $0x230] sm:$0xff]  ;;  %v12614_v13 = vld [vmem:[%s20495_s2 + $0x228] sm:$0xff] }
 0x46c   :  { %2193 = vmatpush.msra.mxu2 %v12617_v60  ;;  %v4147_v60 = vld [vmem:[%s20499_s6 + $0xb0] sm:$0xff] }
 0x46e   :  { %v16685_v26 = vpop.f32.mrf.mxu1  ;;  %2194 = vmatpush.msra.mxu2 %v12616_v48  ;;  %v12613_v48 = vld [vmem:[%s20495_s2 + $0x220] sm:$0xff] }
 0x46f   :  { %20560 = vst [vmem:[#allocation55_spill] sm:$0xff] %v16685_v26  ;;  %v16781_v26 = vpop.f32.mrf.mxu2 }
 0x470   :  { %v1235_v53 = vpop.f32.mrf.mxu0  ;;  %2195 = vmatpush.msra.mxu2 %v12615_v20  ;;  %4486 = vperm.xlu1 %15697, %v4147_v60   ;;  %v4154_v20 = vld [vmem:[%s20499_s6 + $0xe8] sm:$0xff]  ;;  %v12612_v60 = vld [vmem:[%s20495_s2 + $0x218] sm:$0xff]  ;;  %20567 = vst [vmem:[#allocation62_spill] sm:$0xff] %v16781_v26 }
 0x471   :  { %2118 = vmatmul.f32.gmra.mxu1 %v1235_v53  ;;  %v4136_v53 = vld [vmem:[%s20499_s6 + $0x58] sm:$0xff]  ;;  %4521 = vperm.xlu2 %15698, %v4154_v20   ;;  %v15155_v20 = vld [vmem:[%s20494_s1 + $0x230] sm:$0xff] }
 0x472   :  { %4431 = vperm.xlu0 %15696, %v4136_v53   ;;  %2196 = vmatpush.msra.mxu2 %v12614_v13  ;;  %v12611_v53 = vld [vmem:[%s20495_s2 + $0x210] sm:$0xff]  ;;  %v16728_v13 = vpop.permute.xlu0 %1608 }
 0x473   :  { %12550 = vmatmul.msk.bf16.gmra.mxu0 %vm680_vm0, %v15154_v51  ;;  %20562 = vst [vmem:[#allocation57_spill] sm:$0xff] %v16728_v13 }
 0x474   :  { %2197 = vmatpush.msra.mxu2 %v12613_v48  ;;  %v4133_v48 = vld [vmem:[%s20499_s6 + $0x40] sm:$0xff] }
 0x476   :  { %v16714_v51 = vpop.f32.mrf.mxu1  ;;  %2198 = vmatpush.msra.mxu2 %v12612_v60  ;;  %v12609_v60 = vld [vmem:[%s20495_s2 + $0x200] sm:$0xff] }
 0x477   :  { %20561 = vst [vmem:[#allocation56_spill] sm:$0xff] %v16714_v51  ;;  %v16770_v51 = vpop.permute.xlu2 %1643  ;;  %v16806_v57 = vpop.f32.mrf.mxu2 }
 0x478   :  { %v1237_v43 = vpop.f32.mrf.mxu0  ;;  %2199 = vmatpush.msra.mxu2 %v12611_v53  ;;  %v4151_v53 = vld [vmem:[%s20499_s6 + $0xd0] sm:$0xff]  ;;  %20565 = vst [vmem:[#allocation60_spill] sm:$0xff] %v16770_v51 }
 0x479   :  { %2121 = vmatmul.f32.gmra.mxu1 %v1237_v43  ;;  %v4134_v43 = vld [vmem:[%s20499_s6 + $0x48] sm:$0xff]  ;;  %4506 = vperm.xlu2 %15698, %v4151_v53   ;;  %v4144_v53 = vld [vmem:[%s20499_s6 + $0x98] sm:$0xff]  ;;  %v4135_v51 = vld [vmem:[%s20499_s6 + $0x50] sm:$0xff]  ;;  %20570 = vst [vmem:[#allocation65_spill] sm:$0xff] %v16806_v57 }
 0x47a   :  { %4421 = vperm.xlu1 %15697, %v4134_v43   ;;  %4416 = vperm.xlu0 %15696, %v4133_v48   ;;  %v4146_v43 = vld [vmem:[%s20499_s6 + $0xa8] sm:$0xff]  ;;  %v16757_v48 = vpop.permute.xlu0 %1593  ;;  %v15157_v57 = vld [vmem:[%s20494_s1 + $0x240] sm:$0xff] }
 0x47b   :  { %2200 = vmatpush.msra.mxu2 %v12610_v5  ;;  %v4131_v5 = vld [vmem:[%s20499_s6 + $0x30] sm:$0xff] }
 0x47d   :  { %2201 = vmatpush.msra.mxu2 %v12609_v60 }
 0x47e   :  { %v16739_v12 = vpop.f32.mrf.mxu1 }
 0x47f   :  { %20563 = vst [vmem:[#allocation58_spill] sm:$0xff] %v16739_v12  ;;  %v4143_v12 = vld [vmem:[%s20499_s6 + $0x90] sm:$0xff] }
 0x480   :  { %v1240_v13 = vpop.f32.mrf.mxu0 }
 0x481   :  { %2124 = vmatmul.f32.gmra.mxu1 %v1240_v13 }
 0x482   :  { %4406 = vperm.xlu1 %15697, %v4131_v5   ;;  %4481 = vperm.xlu0 %15696, %v4146_v43   ;;  %v16772_v5 = vpop.permute.xlu1 %1518  ;;  %v16774_v43 = vpop.permute.xlu0 %1498 }
 0x483   :  { %12551 = vmatmul.msk.bf16.gmra.mxu0 %vm680_vm0, %v15155_v20  ;;  %v4138_v20 = vld [vmem:[%s20499_s6 + $0x68] sm:$0xff] }
 0x484   :  { %4441 = vperm.xlu2 %15698, %v4138_v20  }
 0x486   :  { %v16759_v13 = vpop.f32.mrf.mxu1 }
 0x487   :  { %20564 = vst [vmem:[#allocation59_spill] sm:$0xff] %v16759_v13  ;;  %v15156_v13 = vld [vmem:[%s20494_s1 + $0x238] sm:$0xff] }
 0x488   :  { %v1242_v60 = vpop.f32.mrf.mxu0 }
 0x489   :  { %2127 = vmatmul.f32.gmra.mxu1 %v1242_v60 }
 0x48a   :  { %4471 = vperm.xlu1 %15697, %v4144_v53   ;;  %4466 = vperm.xlu0 %15696, %v4143_v12   ;;  %v4141_v12 = vld [vmem:[%s20499_s6 + $0x80] sm:$0xff]  ;;  %v4130_v53 = vld [vmem:[%s20499_s6 + $0x28] sm:$0xff]  ;;  %v16795_v26 = vpop.permute.xlu1 %1503 }
 0x48c   :  { %4426 = vperm.xlu2 %15698, %v4135_v51  }
 0x48e   :  { %v16776_v60 = vpop.f32.mrf.mxu1 }
 0x48f   :  { %20566 = vst [vmem:[#allocation61_spill] sm:$0xff] %v16776_v60  ;;  %v16793_v60 = vpop.permute.xlu2 %1648 }
 0x490   :  { %v1245_v20 = vpop.f32.mrf.mxu0  ;;  %20568 = vst [vmem:[#allocation63_spill] sm:$0xff] %v16793_v60 }
 0x491   :  { %2130 = vmatmul.f32.gmra.mxu1 %v1245_v20  ;;  %v1574_v20 = vpop.permute.xlu0 %1573 }
 0x492   :  { %4456 = vperm.xlu1 %15697, %v4141_v12   ;;  %4401 = vperm.xlu0 %15696, %v4130_v53   ;;  %v4128_v12 = vld [vmem:[%s20499_s6 + $0x18] sm:$0xff]  ;;  %v4127_v53 = vld [vmem:[%s20499_s6 + $0x10] sm:$0xff] }
 0x493   :  { %12552 = vmatmul.msk.bf16.gmra.mxu0 %vm680_vm0, %v15156_v13  ;;  %v1667_v13 = vadd.f32 %v1574_v20, %v16543_v33  ;;  %v16813_v20 = vpop.permute.xlu1 %1598 }
 0x494   :  { %4491 = vperm.xlu2 %15698, %v4148_v3   ;;  %20571 = vst [vmem:[#allocation66_spill] sm:$0xff] %v16813_v20  ;;  %v4129_v20 = vld [vmem:[%s20499_s6 + $0x20] sm:$0xff] }
 0x495   :  { %v1829_v60 = vadd.f32 %v16485_v30, %v1667_v13  ;;  %v4145_v30 = vld [vmem:[%s20499_s6 + $0xa0] sm:$0xff]  ;;  %v16832_v13 = vpop.f32.mrf.mxu2 }
 0x496   :  { %v16797_v10 = vpop.f32.mrf.mxu1 }
 0x497   :  { %20569 = vst [vmem:[#allocation64_spill] sm:$0xff] %v16797_v10  ;;  %v1991_v33 = vadd.f32 %v16504_v4, %v1829_v60  ;;  %v16820_v3 = vpop.permute.xlu2 %1633  ;;  %v7390_v4 = vld [vmem:[%s20502_s9 + $0xf0] sm:$0xff]  ;;  %v4126_v60 = vld [vmem:[%s20499_s6 + $0x8] sm:$0xff] }
 0x498   :  { %v1247_v51 = vpop.f32.mrf.mxu0  ;;  %20573 = vst [vmem:[#allocation68_spill] sm:$0xff] %v16820_v3 }
 0x499   :  { %2133 = vmatmul.f32.gmra.mxu1 %v1247_v51 }
 0x49a   :  { %4391 = vperm.xlu1 %15697, %v4128_v12   ;;  %4386 = vperm.xlu0 %15696, %v4127_v53  }
 0x49b   :  { %v1584_v12 = vpop.permute.xlu1 %1583 }
 0x49c   :  { %4476 = vperm.xlu2 %15698, %v4145_v30  }
 0x49e   :  { %v2089_v51 = vpop.f32.mrf.mxu1 }
 0x49f   :  { %v16815_v10 = vadd.f32 %v2089_v51, %v1991_v33  ;;  %v1669_v33 = vadd.f32 %v1584_v12, %v16561_v29  ;;  %v7389_v51 = vld [vmem:[%s20502_s9 + $0xe8] sm:$0xff]  ;;  %v16843_v30 = vpop.permute.xlu2 %1538  ;;  %v16850_v12 = vpop.f32.mrf.mxu2 }
 0x4a0   :  { %v1250_v45 = vpop.f32.mrf.mxu0  ;;  %20575 = vst [vmem:[#allocation70_spill] sm:$0xff] %v16850_v12  ;;  %v1652_v12 = vadd.f32 %v16774_v43, %v16371_v14  ;;  %v10581_v14 = vld [vmem:[%s20505_s12 + $0x28] sm:$0xff] }
 0x4a1   :  { %20572 = vst [vmem:[#allocation67_spill] sm:$0xff] %v16815_v10  ;;  %2202 = vmatmul.f32.vlgmr.msra.gmra.mxu2 %v1250_v45 }
 0x4a2   :  { %7758 = vperm.xlu1 %15697, %v7390_v4   ;;  %4381 = vperm.xlu0 %15696, %v4126_v60   ;;  %v7388_v4 = vld [vmem:[%s20502_s9 + $0xe0] sm:$0xff]  ;;  %v1831_v60 = vadd.f32 %v16502_v2, %v1669_v33  ;;  %v7386_v2 = vld [vmem:[%s20502_s9 + $0xd0] sm:$0xff] }
 0x4a3   :  { %12553 = vmatmul.msk.bf16.gmra.mxu0 %vm680_vm0, %v15157_v57  ;;  %v4132_v57 = vld [vmem:[%s20499_s6 + $0x38] sm:$0xff] }
 0x4a4   :  { %4411 = vperm.xlu2 %15698, %v4132_v57   ;;  %v1993_v29 = vadd.f32 %v16518_v0, %v1831_v60  ;;  %v7375_v0 = vld [vmem:[%s20502_s9 + $0x78] sm:$0xff] }
 0x4a6   :  { %v16834_v45 = vpop.f32.mrf.mxu1 }
 0x4a7   :  { %20574 = vst [vmem:[#allocation69_spill] sm:$0xff] %v16834_v45  ;;  %v15158_v45 = vld [vmem:[%s20494_s1 + $0x248] sm:$0xff]  ;;  %v16867_v33 = vpop.permute.xlu2 %1523 }
 0x4a8   :  { %v1252_v53 = vpop.f32.mrf.mxu0 }
 0x4a9   :  { %2205 = vmatmul.f32.gmra.mxu2 %v1252_v53 }
 0x4aa   :  { %7753 = vperm.xlu1 %15697, %v7389_v51   ;;  %7748 = vperm.xlu0 %15696, %v7388_v4   ;;  %v16871_v4 = vpop.f32.mrf.mxu2 }
 0x4ab   :  { %20578 = vst [vmem:[#allocation73_spill] sm:$0xff] %v16871_v4 }
 0x4ac   :  { %4396 = vperm.xlu2 %15698, %v4129_v20   ;;  %v1671_v20 = vadd.f32 %v16757_v48, %v16571_v21 }
 0x4ae   :  { %v2095_v53 = vpop.f32.mrf.mxu1 }
 0x4af   :  { %v16852_v10 = vadd.f32 %v2095_v53, %v1993_v29  ;;  %v7373_v29 = vld [vmem:[%s20502_s9 + $0x68] sm:$0xff]  ;;  %v7372_v53 = vld [vmem:[%s20502_s9 + $0x60] sm:$0xff]  ;;  %v16886_v21 = vpop.permute.xlu2 %1618 }
 0x4b0   :  { %v1255_v57 = vpop.f32.mrf.mxu0 }
 0x4b1   :  { %20576 = vst [vmem:[#allocation71_spill] sm:$0xff] %v16852_v10  ;;  %2208 = vmatmul.f32.gmra.mxu2 %v1255_v57  ;;  %v1833_v57 = vadd.f32 %v16520_v1, %v1671_v20  ;;  %v4125_v10 = vld [vmem:[%s20499_s6] sm:$0xff]  ;;  %v7385_v20 = vld [vmem:[%s20502_s9 + $0xc8] sm:$0xff] }
 0x4b2   :  { %7738 = vperm.xlu1 %15697, %v7386_v2   ;;  %7683 = vperm.xlu0 %15696, %v7375_v0   ;;  %v16896_v1 = vpop.f32.mrf.mxu2 }
 0x4b3   :  { %12554 = vmatmul.msk.bf16.gmra.mxu0 %vm680_vm0, %v15158_v45  ;;  %v4142_v45 = vld [vmem:[%s20499_s6 + $0x88] sm:$0xff]  ;;  %v1995_v2 = vadd.f32 %v16532_v23, %v1833_v57  ;;  %20580 = vst [vmem:[#allocation75_spill] sm:$0xff] %v16896_v1  ;;  %v7370_v23 = vld [vmem:[%s20502_s9 + $0x50] sm:$0xff] }
 0x4b4   :  { %4461 = vperm.xlu2 %15698, %v4142_v45   ;;  %v10589_v1 = vld [vmem:[%s20505_s12 + $0x68] sm:$0xff] }
 0x4b6   :  { %v16869_v51 = vpop.f32.mrf.mxu1 }
 0x4b7   :  { %20577 = vst [vmem:[#allocation72_spill] sm:$0xff] %v16869_v51 }
 0x4b8   :  { %v1257_v60 = vpop.f32.mrf.mxu0 }
 0x4b9   :  { %2211 = vmatmul.f32.gmra.mxu2 %v1257_v60  ;;  %v15159_v60 = vld [vmem:[%s20494_s1 + $0x250] sm:$0xff] }
 0x4ba   :  { %7673 = vperm.xlu1 %15697, %v7373_v29   ;;  %7668 = vperm.xlu0 %15696, %v7372_v53   ;;  %v1604_v53 = vpop.permute.xlu2 %1603 }
 0x4bc   :  { %4376 = vperm.xlu2 %15698, %v4125_v10   ;;  %v7391_v10 = vld [vmem:[%s20502_s9 + $0xf8] sm:$0xff] }
 0x4be   :  { %v2101_v48 = vpop.f32.mrf.mxu1 }
 0x4bf   :  { %v16888_v0 = vadd.f32 %v2101_v48, %v1995_v2  ;;  %v1673_v2 = vadd.f32 %v1604_v53, %v16579_v44  ;;  %v7383_v48 = vld [vmem:[%s20502_s9 + $0xb8] sm:$0xff] }
 0x4c0   :  { %v1260_v45 = vpop.f32.mrf.mxu0 }
 0x4c1   :  { %20579 = vst [vmem:[#allocation74_spill] sm:$0xff] %v16888_v0  ;;  %2214 = vmatmul.f32.gmra.mxu2 %v1260_v45  ;;  %v1835_v45 = vadd.f32 %v16536_v54, %v1673_v2  ;;  %v7374_v0 = vld [vmem:[%s20502_s9 + $0x70] sm:$0xff]  ;;  %v7380_v54 = vld [vmem:[%s20502_s9 + $0xa0] sm:$0xff] }
 0x4c2   :  { %7658 = vperm.xlu1 %15697, %v7370_v23   ;;  %7733 = vperm.xlu0 %15696, %v7385_v20   ;;  %v16918_v23 = vpop.f32.mrf.mxu2 }
 0x4c3   :  { %12555 = vmatmul.msk.bf16.gmra.mxu0 %vm680_vm0, %v15159_v60  ;;  %v7382_v60 = vld [vmem:[%s20502_s9 + $0xb0] sm:$0xff]  ;;  %20582 = vst [vmem:[#allocation77_spill] sm:$0xff] %v16918_v23  ;;  %v1997_v44 = vadd.f32 %v16546_v18, %v1835_v45  ;;  %v7369_v18 = vld [vmem:[%s20502_s9 + $0x48] sm:$0xff]  ;;  %v7387_v45 = vld [vmem:[%s20502_s9 + $0xd8] sm:$0xff] }
 0x4c4   :  { %7763 = vperm.xlu2 %15698, %v7391_v10  }
 0x4c6   :  { %v16905_v29 = vpop.f32.mrf.mxu1 }
 0x4c7   :  { %20581 = vst [vmem:[#allocation76_spill] sm:$0xff] %v16905_v29 }
 0x4c8   :  { %v1262_v57 = vpop.f32.mrf.mxu0 }
 0x4c9   :  { %2217 = vmatmul.f32.gmra.mxu2 %v1262_v57  ;;  %v15160_v57 = vld [vmem:[%s20494_s1 + $0x258] sm:$0xff] }
 0x4ca   :  { %7723 = vperm.xlu1 %15697, %v7383_v48   ;;  %7718 = vperm.xlu0 %15696, %v7382_v60   ;;  %v16936_v2 = vpop.f32.mrf.mxu2 }
 0x4cc   :  { %7678 = vperm.xlu2 %15698, %v7374_v0   ;;  %v7367_v0 = vld [vmem:[%s20502_s9 + $0x38] sm:$0xff] }
 0x4ce   :  { %v2107_v20 = vpop.f32.mrf.mxu1 }
 0x4cf   :  { %v16921_v53 = vadd.f32 %v2107_v20, %v1997_v44  ;;  %v7366_v44 = vld [vmem:[%s20502_s9 + $0x30] sm:$0xff] }
 0x4d0   :  { %v1265_v10 = vpop.f32.mrf.mxu0 }
 0x4d1   :  { %20583 = vst [vmem:[#allocation78_spill] sm:$0xff] %v16921_v53  ;;  %2220 = vmatmul.f32.gmra.mxu2 %v1265_v10  ;;  %v15161_v10 = vld [vmem:[%s20494_s1 + $0x260] sm:$0xff]  ;;  %v10582_v53 = vld [vmem:[%s20505_s12 + $0x30] sm:$0xff] }
 0x4d2   :  { %7708 = vperm.xlu1 %15697, %v7380_v54   ;;  %7653 = vperm.xlu0 %15696, %v7369_v18   ;;  %v16955_v54 = vpop.f32.mrf.mxu2 }
 0x4d3   :  { %12556 = vmatmul.msk.bf16.gmra.mxu0 %vm680_vm0, %v15160_v57 }
 0x4d4   :  { %7743 = vperm.xlu2 %15698, %v7387_v45   ;;  %v7364_v45 = vld [vmem:[%s20502_s9 + $0x20] sm:$0xff] }
 0x4d6   :  { %v16938_v48 = vpop.f32.mrf.mxu1 }
 0x4d7   :  { %20584 = vst [vmem:[#allocation79_spill] sm:$0xff] %v16938_v48  ;;  %v10585_v48 = vld [vmem:[%s20505_s12 + $0x48] sm:$0xff] }
 0x4d8   :  { %v1267_v60 = vpop.f32.mrf.mxu0 }
 0x4d9   :  { %2223 = vmatmul.f32.gmra.mxu2 %v1267_v60  ;;  %v7384_v60 = vld [vmem:[%s20502_s9 + $0xc0] sm:$0xff] }
 0x4da   :  { %7643 = vperm.xlu1 %15697, %v7367_v0   ;;  %7638 = vperm.xlu0 %15696, %v7366_v44   ;;  %v7371_v44 = vld [vmem:[%s20502_s9 + $0x58] sm:$0xff] }
 0x4dc   :  { %7728 = vperm.xlu2 %15698, %v7384_v60   ;;  %v7376_v60 = vld [vmem:[%s20502_s9 + $0x80] sm:$0xff] }
 0x4de   :  { %v2113_v20 = vpop.f32.mrf.mxu1 }
 0x4df   :  { %v16950_v57 = vadd.f32 %v2113_v20, %v16563_v36  ;;  %v7379_v36 = vld [vmem:[%s20502_s9 + $0x98] sm:$0xff]  ;;  %v7377_v20 = vld [vmem:[%s20502_s9 + $0x88] sm:$0xff] }
 0x4e0   :  { %v1270_v18 = vpop.f32.mrf.mxu0 }
 0x4e1   :  { %2226 = vmatmul.f32.gmra.mxu2 %v1270_v18  ;;  %v16973_v18 = vpop.f32.mrf.mxu2 }
 0x4e2   :  { %7628 = vperm.xlu1 %15697, %v7364_v45   ;;  %7703 = vperm.xlu0 %15696, %v7379_v36   ;;  %v7368_v45 = vld [vmem:[%s20502_s9 + $0x40] sm:$0xff] }
 0x4e3   :  { %12557 = vmatmul.msk.bf16.gmra.mxu0 %vm680_vm0, %v15161_v10  ;;  %v7360_v36 = vld [vmem:[%s20502_s9] sm:$0xff] }
 0x4e4   :  { %7663 = vperm.xlu2 %15698, %v7371_v44  }
 0x4e8   :  { %v1272_v0 = vpop.f32.mrf.mxu0 }
 0x4e9   :  { %2229 = vmatmul.f32.gmra.mxu2 %v1272_v0  ;;  %v7363_v0 = vld [vmem:[%s20502_s9 + $0x18] sm:$0xff]  ;;  %v16987_v44 = vpop.f32.mrf.mxu2 }
 0x4ea   :  { %7693 = vperm.xlu1 %15697, %v7377_v20   ;;  %7688 = vperm.xlu0 %15696, %v7376_v60   ;;  %v7381_v60 = vld [vmem:[%s20502_s9 + $0xa8] sm:$0xff] }
 0x4ec   :  { %7648 = vperm.xlu2 %15698, %v7368_v45   ;;  %v10576_v45 = vld [vmem:[%s20505_s12] sm:$0xff] }
 0x4f0   :  { %v1275_v10 = vpop.f32.mrf.mxu0 }
 0x4f1   :  { %2232 = vmatmul.f32.gmra.mxu2 %v1275_v10  ;;  %v10577_v10 = vld [vmem:[%s20505_s12 + $0x8] sm:$0xff]  ;;  %v16998_v51 = vpop.f32.mrf.mxu2 }
 0x4f2   :  { %7608 = vperm.xlu1 %15697, %v7360_v36   ;;  %7623 = vperm.xlu0 %15696, %v7363_v0   ;;  %v7378_v0 = vld [vmem:[%s20502_s9 + $0x90] sm:$0xff] }
 0x4f4   :  { %7713 = vperm.xlu2 %15698, %v7381_v60   ;;  %v10579_v60 = vld [vmem:[%s20505_s12 + $0x18] sm:$0xff] }
 0x4f8   :  { %v1277_v20 = vpop.f32.mrf.mxu0 }
 0x4f9   :  { %2235 = vmatmul.f32.gmra.mxu2 %v1277_v20  ;;  %v10580_v20 = vld [vmem:[%s20505_s12 + $0x20] sm:$0xff] }
 0x4fa   :  { %10827 = vperm.xlu1 %15697, %v10577_v10   ;;  %10822 = vperm.xlu0 %15696, %v10576_v45   ;;  %v17009_v10 = vpop.f32.mrf.mxu2 }
 0x4fc   :  { %7698 = vperm.xlu2 %15698, %v7378_v0   ;;  %v10583_v0 = vld [vmem:[%s20505_s12 + $0x38] sm:$0xff] }
 0x500   :  { %v1280_v36 = vpop.f32.mrf.mxu0 }
 0x501   :  { %2238 = vmatmul.f32.gmra.mxu2 %v1280_v36  ;;  %v7365_v36 = vld [vmem:[%s20502_s9 + $0x28] sm:$0xff] }
 0x502   :  { %10842 = vperm.xlu1 %15697, %v10580_v20   ;;  %10837 = vperm.xlu0 %15696, %v10579_v60   ;;  %v1509_v20 = vpop.permute.xlu2 %1508  ;;  %v17023_v29 = vpop.f32.mrf.mxu2 }
 0x504   :  { %7633 = vperm.xlu2 %15698, %v7365_v36   ;;  %v10586_v36 = vld [vmem:[%s20505_s12 + $0x50] sm:$0xff] }
 0x508   :  { %v1282_v45 = vpop.f32.mrf.mxu0 }
 0x509   :  { %2241 = vmatmul.f32.gmra.mxu2 %v1282_v45  ;;  %v7362_v45 = vld [vmem:[%s20502_s9 + $0x10] sm:$0xff] }
 0x50a   :  { %10857 = vperm.xlu1 %15697, %v10583_v0   ;;  %10852 = vperm.xlu0 %15696, %v10582_v53   ;;  %v7361_v0 = vld [vmem:[%s20502_s9 + $0x8] sm:$0xff]  ;;  %v17034_v23 = vpop.f32.mrf.mxu2 }
 0x50c   :  { %7618 = vperm.xlu2 %15698, %v7362_v45  }
 0x510   :  { %v1285_v60 = vpop.f32.mrf.mxu0 }
 0x511   :  { %2244 = vmatmul.f32.gmra.mxu2 %v1285_v60  ;;  %v1494_v60 = vpop.permute.xlu2 %1493 }
 0x512   :  { %10872 = vperm.xlu1 %15697, %v10586_v36   ;;  %10867 = vperm.xlu0 %15696, %v10585_v48   ;;  %v1651_v45 = vadd.f32 %v1494_v60, %v16365_v9  ;;  %v10588_v48 = vld [vmem:[%s20505_s12 + $0x60] sm:$0xff]  ;;  %v10578_v9 = vld [vmem:[%s20505_s12 + $0x10] sm:$0xff] }
 0x514   :  { %7613 = vperm.xlu2 %15698, %v7361_v0   ;;  %v1813_v36 = vadd.f32 %v16236_v47, %v1651_v45  ;;  %v10592_v47 = vld [vmem:[%s20505_s12 + $0x80] sm:$0xff] }
 0x516   :  { %v1975_v4 = vadd.f32 %v16936_v2, %v1813_v36  ;;  %v1814_v2 = vadd.f32 %v16239_v49, %v1652_v12  ;;  %v10595_v49 = vld [vmem:[%s20505_s12 + $0x98] sm:$0xff]  ;;  %v10594_v12 = vld [vmem:[%s20505_s12 + $0x90] sm:$0xff] }
 0x518   :  { %v1287_v53 = vpop.f32.mrf.mxu0  ;;  %v2137_v0 = vadd.f32 %v16587_v24, %v1975_v4  ;;  %v1976_v24 = vadd.f32 %v16955_v54, %v1814_v2 }
 0x519   :  { %2247 = vmatmul.f32.gmra.mxu2 %v1287_v53 }
 0x51a   :  { %10887 = vperm.xlu1 %15697, %v10589_v1   ;;  %10882 = vperm.xlu0 %15696, %v10588_v48   ;;  %v10591_v1 = vld [vmem:[%s20505_s12 + $0x78] sm:$0xff]  ;;  %v2138_v43 = vadd.f32 %v16593_v61, %v1976_v24  ;;  %v1653_v48 = vadd.f32 %v16795_v26, %v16376_v22  ;;  %v10584_v26 = vld [vmem:[%s20505_s12 + $0x40] sm:$0xff]  ;;  %v1655_v24 = vadd.f32 %v16693_v46, %v16385_v32  ;;  %v10590_v46 = vld [vmem:[%s20505_s12 + $0x70] sm:$0xff] }
 0x51c   :  { %10832 = vperm.xlu2 %15698, %v10578_v9   ;;  %v1815_v54 = vadd.f32 %v16245_v52, %v1653_v48  ;;  %v10598_v52 = vld [vmem:[%s20505_s12 + $0xb0] sm:$0xff] }
 0x51e   :  { %v1977_v22 = vadd.f32 %v16973_v18, %v1815_v54  ;;  %v10597_v18 = vld [vmem:[%s20505_s12 + $0xa8] sm:$0xff] }
 0x520   :  { %v1290_v53 = vpop.f32.mrf.mxu0  ;;  %v2139_v9 = vadd.f32 %v16595_v55, %v1977_v22 }
 0x521   :  { %2250 = vmatmul.f32.gmra.mxu2 %v1290_v53 }
 0x522   :  { %10902 = vperm.xlu1 %15697, %v10592_v47   ;;  %10897 = vperm.xlu0 %15696, %v10591_v1  }
 0x524   :  { %v2203_v60 = vpop.f32.mrf.mxu2  ;;  %10847 = vperm.xlu2 %15698, %v10581_v14  }
 0x525   :  { %v17051_v3 = vadd.f32 %v2203_v60, %v2137_v0  ;;  %v1654_v60 = vadd.f32 %v1509_v20, %v16379_v25  ;;  %v10587_v25 = vld [vmem:[%s20505_s12 + $0x58] sm:$0xff] }
 0x527   :  { %v1816_v1 = vadd.f32 %v16250_v56, %v1654_v60  ;;  %v10601_v56 = vld [vmem:[%s20505_s12 + $0xc8] sm:$0xff] }
 0x528   :  { %v1292_v45 = vpop.f32.mrf.mxu0 }
 0x529   :  { %2253 = vmatmul.f32.gmra.mxu2 %v1292_v45  ;;  %v1978_v55 = vadd.f32 %v16987_v44, %v1816_v1  ;;  %v10600_v44 = vld [vmem:[%s20505_s12 + $0xc0] sm:$0xff] }
 0x52a   :  { %10917 = vperm.xlu1 %15697, %v10595_v49   ;;  %10912 = vperm.xlu0 %15696, %v10594_v12   ;;  %v1656_v12 = vadd.f32 %v16772_v5, %v16390_v41  ;;  %v10593_v41 = vld [vmem:[%s20505_s12 + $0x88] sm:$0xff] }
 0x52b   :  { %v2140_v20 = vadd.f32 %v16603_v11, %v1978_v55 }
 0x52c   :  { %v2206_v4 = vpop.f32.mrf.mxu2  ;;  %10862 = vperm.xlu2 %15698, %v10584_v26  }
 0x52d   :  { %v17067_v36 = vadd.f32 %v2206_v4, %v2138_v43  ;;  %v1817_v43 = vadd.f32 %v16268_v63, %v1655_v24  ;;  %v10604_v63 = vld [vmem:[%s20505_s12 + $0xe0] sm:$0xff] }
 0x52f   :  { %v2331_v61 = vpack.c.bf16 %v17067_v36, %v17051_v3  ;;  %v1979_v32 = vadd.f32 %v16998_v51, %v1817_v43  ;;  %v10603_v51 = vld [vmem:[%s20505_s12 + $0xd8] sm:$0xff] }
 0x530   :  { %v1295_v53 = vpop.f32.mrf.mxu0 }
 0x531   :  { %2256 = vmatmul.f32.gmra.mxu2 %v1295_v53  ;;  %v2141_v48 = vadd.f32 %v16607_v7, %v1979_v32  ;;  %v1818_v53 = vadd.f32 %v16289_v8, %v1656_v12  ;;  %v10607_v8 = vld [vmem:[%s20505_s12 + $0xf8] sm:$0xff] }
 0x532   :  { %10932 = vperm.xlu1 %15697, %v10598_v52   ;;  %10927 = vperm.xlu0 %15696, %v10597_v18  }
 0x533   :  { %v1980_v7 = vadd.f32 %v17009_v10, %v1818_v53  ;;  %v10606_v10 = vld [vmem:[%s20505_s12 + $0xf0] sm:$0xff]  ;;  %v20586_v53 = vld [vmem:[#allocation28_spill] sm:$0xff] }
 0x534   :  { %v2209_v0 = vpop.f32.mrf.mxu2  ;;  %10877 = vperm.xlu2 %15698, %v10587_v25  }
 0x535   :  { %v17084_v47 = vadd.f32 %v2209_v0, %v2139_v9  ;;  %v2142_v5 = vadd.f32 %v16613_v38, %v1980_v7  ;;  %v1657_v9 = vadd.f32 %v16867_v33, %v16395_v50  ;;  %v10596_v33 = vld [vmem:[%s20505_s12 + $0xa0] sm:$0xff] }
 0x537   :  { %v1819_v60 = vadd.f32 %v16306_v19, %v1657_v9 }
 0x538   :  { %v1297_v2 = vpop.f32.mrf.mxu0 }
 0x539   :  { %2259 = vmatmul.f32.gmra.mxu2 %v1297_v2  ;;  %v1981_v50 = vadd.f32 %v17023_v29, %v1819_v60  ;;  %v1658_v2 = vadd.f32 %v16663_v42, %v16403_v58  ;;  %v10599_v29 = vld [vmem:[%s20505_s12 + $0xb8] sm:$0xff] }
 0x53a   :  { %10947 = vperm.xlu1 %15697, %v10601_v56   ;;  %10942 = vperm.xlu0 %15696, %v10600_v44   ;;  %v1660_v56 = vadd.f32 %v16843_v30, %v16478_v31 }
 0x53b   :  { %v2143_v18 = vadd.f32 %v16617_v15, %v1981_v50  ;;  %v1820_v19 = vadd.f32 %v16315_v27, %v1658_v2  ;;  %v10602_v27 = vld [vmem:[%s20505_s12 + $0xd0] sm:$0xff] }
 0x53c   :  { %v2212_v45 = vpop.f32.mrf.mxu2  ;;  %10892 = vperm.xlu2 %15698, %v10590_v46   ;;  %v1822_v44 = vadd.f32 %v16323_v34, %v1660_v56  ;;  %v1661_v34 = vadd.f32 %v16615_v40, %v16488_v37  ;;  %v20595_v50 = vld [vmem:[#allocation27_spill] sm:$0xff] }
 0x53d   :  { %v17100_v14 = vadd.f32 %v2212_v45, %v2140_v20  ;;  %v1982_v20 = vadd.f32 %v17034_v23, %v1820_v19  ;;  %v20597_v2 = vld [vmem:[#allocation23_spill] sm:$0xff] }
 0x53e   :  { %v1984_v43 = vadd.f32 %v16432_v28, %v1822_v44  ;;  %v1662_v28 = vadd.f32 %v16405_v59, %v16496_v62  ;;  %v1823_v30 = vadd.f32 %v16329_v39, %v1661_v34  ;;  %v20592_v39 = vld [vmem:[#allocation35_spill] sm:$0xff]  ;;  %v20593_v62 = vld [vmem:[#allocation26_spill] sm:$0xff] }
 0x53f   :  { %v2332_v11 = vpack.c.bf16 %v17100_v14, %v17084_v47  ;;  %v2144_v45 = vadd.f32 %v16631_v35, %v1982_v20  ;;  %v1663_v60 = vadd.f32 %v20593_v62, %v20592_v39  ;;  %v20606_v34 = vld [vmem:[#allocation42_spill] sm:$0xff] }
 0x540   :  { %v1300_v4 = vpop.f32.mrf.mxu0  ;;  %v2146_v32 = vadd.f32 %v16665_v16, %v1984_v43  ;;  %v1985_v16 = vadd.f32 %v20586_v53, %v1823_v30  ;;  %v20609_v53 = vld [vmem:[#allocation25_spill] sm:$0xff]  ;;  %v20615_v47 = vld [vmem:[#allocation14_spill] sm:$0xff] }
 0x541   :  { %2262 = vmatmul.f32.gmra.mxu2 %v1300_v4  ;;  %v10605_v4 = vld [vmem:[%s20505_s12 + $0xe8] sm:$0xff]  ;;  %v1676_v14 = vadd.f32 %v16886_v21, %v20615_v47  ;;  %v12627_v47 = vld [vmem:[%s20497_s4] sm:$0xf] }
 0x542   :  { %10962 = vperm.xlu1 %15697, %v10604_v63   ;;  %10957 = vperm.xlu0 %15696, %v10603_v51   ;;  %v20585_v63 = vld [vmem:[#allocation21_spill] sm:$0xff] }
 0x543   :  { %v1824_v51 = vadd.f32 %v20585_v63, %v1662_v28  ;;  %v20607_v28 = vld [vmem:[#allocation52_spill] sm:$0xff] }
 0x544   :  { %v2215_v49 = vpop.f32.mrf.mxu2  ;;  %10907 = vperm.xlu2 %15698, %v10593_v41   ;;  %v20589_v41 = vld [vmem:[#allocation55_spill] sm:$0xff]  ;;  %v1666_v30 = vadd.f32 %v20607_v28, %v20606_v34  ;;  %v20608_v63 = vld [vmem:[#allocation24_spill] sm:$0xff] }
 0x545   :  { %v17118_v54 = vadd.f32 %v2215_v49, %v2141_v48 }
 0x548   :  { %v1302_v22 = vpop.f32.mrf.mxu0 }
 0x549   :  { %2265 = vmatmul.f32.gmra.mxu2 %v1302_v22  ;;  %v20587_v22 = vld [vmem:[#allocation29_spill] sm:$0xff] }
 0x54a   :  { %10977 = vperm.xlu1 %15697, %v10607_v8   ;;  %10972 = vperm.xlu0 %15696, %v10606_v10   ;;  %v1986_v7 = vadd.f32 %v20587_v22, %v1824_v51  ;;  %v20591_v10 = vld [vmem:[#allocation10_spill] sm:$0xff]  ;;  %v20610_v22 = vld [vmem:[#allocation32_spill] sm:$0xff] }
 0x54c   :  { %v2218_v26 = vpop.f32.mrf.mxu2  ;;  %10922 = vperm.xlu2 %15698, %v10596_v33  }
 0x54d   :  { %v17134_v0 = vadd.f32 %v2218_v26, %v2142_v5  ;;  %v2147_v5 = vadd.f32 %v20589_v41, %v1985_v16  ;;  %v1828_v16 = vadd.f32 %v20609_v53, %v1666_v30  ;;  %v20622_v53 = vld [vmem:[#allocation17_spill] sm:$0xff] }
 0x54f   :  { %v2333_v38 = vpack.c.bf16 %v17134_v0, %v17118_v54 }
 0x550   :  { %v1305_v52 = vpop.f32.mrf.mxu0 }
 0x551   :  { %2268 = vmatmul.f32.gmra.mxu2 %v1305_v52  ;;  %v20594_v52 = vld [vmem:[#allocation38_spill] sm:$0xff] }
 0x552   :  { %v1664_v33 = vadd.f32 %v20595_v50, %v20594_v52 }
 0x554   :  { %v2221_v1 = vpop.f32.mrf.mxu2  ;;  %10937 = vperm.xlu2 %15698, %v10599_v29   ;;  %v1826_v19 = vadd.f32 %v20597_v2, %v1664_v33  ;;  %v20599_v29 = vld [vmem:[#allocation31_spill] sm:$0xff]  ;;  %v20616_v33 = vld [vmem:[#allocation62_spill] sm:$0xff] }
 0x555   :  { %v17152_v55 = vadd.f32 %v2221_v1, %v2143_v18  ;;  %v20596_v18 = vld [vmem:[#allocation22_spill] sm:$0xff] }
 0x556   :  { %v1825_v1 = vadd.f32 %v20596_v18, %v1663_v60  ;;  %v1838_v18 = vadd.f32 %v20616_v33, %v1676_v14  ;;  %v15166_v14 = vld [vmem:[%s20497_s4 + $0x4] sm:$0xf0] }
 0x558   :  { %v1307_v25 = vpop.f32.mrf.mxu0 }
 0x559   :  { %2271 = vmatmul.f32.gmra.mxu2 %v1307_v25  ;;  %v20598_v25 = vld [vmem:[#allocation30_spill] sm:$0xff] }
 0x55a   :  { %v1987_v20 = vadd.f32 %v20598_v25, %v1825_v1 }
 0x55c   :  { %v2224_v15 = vpop.f32.mrf.mxu2  ;;  %10952 = vperm.xlu2 %15698, %v10602_v27  }
 0x55d   :  { %v17160_v24 = vadd.f32 %v2224_v15, %v2144_v45  ;;  %v1988_v45 = vadd.f32 %v20599_v29, %v1826_v19  ;;  %v20600_v15 = vld [vmem:[#allocation11_spill] sm:$0xff] }
 0x55f   :  { %v2334_v58 = vpack.c.bf16 %v17160_v24, %v17152_v55 }
 0x560   :  { %v1310_v42 = vpop.f32.mrf.mxu0 }
 0x561   :  { %2274 = vmatmul.f32.gmra.mxu2 %v1310_v42  ;;  %v20601_v42 = vld [vmem:[#allocation58_spill] sm:$0xff] }
 0x562   :  { %v2149_v27 = vadd.f32 %v20601_v42, %v1987_v20  ;;  %v20619_v42 = vld [vmem:[#allocation16_spill] sm:$0xff] }
 0x564   :  { %v2227_v23 = vpop.f32.mrf.mxu2  ;;  %10967 = vperm.xlu2 %15698, %v10605_v4  }
 0x565   :  { %v2307_v48 = vadd.f32 %v2227_v23, %v16642_v17  ;;  %v20588_v17 = vld [vmem:[#allocation9_spill] sm:$0xff]  ;;  %v20602_v23 = vld [vmem:[#allocation59_spill] sm:$0xff] }
 0x566   :  { %v2150_v56 = vadd.f32 %v20602_v23, %v1988_v45  ;;  %v20617_v45 = vld [vmem:[#allocation15_spill] sm:$0xff] }
 0x568   :  { %v1312_v35 = vpop.f32.mrf.mxu0 }
 0x569   :  { %2277 = vmatmul.f32.gmra.mxu2 %v1312_v35 }
 0x56c   :  { %v2230_v46 = vpop.f32.mrf.mxu2 }
 0x56d   :  { %v2308_v49 = vadd.f32 %v2230_v46, %v2146_v32  ;;  %v20603_v32 = vld [vmem:[#allocation12_spill] sm:$0xff] }
 0x56f   :  { %v2335_v12 = vpack.c.bf16 %v2308_v49, %v2307_v48  ;;  %v20604_v48 = vld [vmem:[#allocation39_spill] sm:$0xff] }
 0x570   :  { %v20605_v49 = vld [vmem:[#allocation51_spill] sm:$0xff] }
 0x571   :  { %2280 = vmatmul.f32.gmra.mxu2 %v16173_v6  ;;  %v20590_v6 = vld [vmem:[#allocation56_spill] sm:$0xff] }
 0x572   :  { %v2148_v26 = vadd.f32 %v20590_v6, %v1986_v7  ;;  %v20613_v6 = vld [vmem:[#allocation61_spill] sm:$0xff] }
 0x574   :  { %v2233_v31 = vpop.f32.mrf.mxu2 }
 0x575   :  { %v2309_v8 = vadd.f32 %v2233_v31, %v2147_v5  ;;  %v1665_v31 = vadd.f32 %v20605_v49, %v20604_v48  ;;  %v20612_v5 = vld [vmem:[#allocation13_spill] sm:$0xff] }
 0x577   :  { %v1827_v51 = vadd.f32 %v20608_v63, %v1665_v31 }
 0x579   :  { %2283 = vmatmul.f32.gmra.mxu2 %v20588_v17  ;;  %v1989_v7 = vadd.f32 %v20610_v22, %v1827_v51  ;;  %v20611_v17 = vld [vmem:[#allocation34_spill] sm:$0xff] }
 0x57a   :  { %v1990_v41 = vadd.f32 %v20611_v17, %v1828_v16  ;;  %v20623_v16 = vld [vmem:[#allocation68_spill] sm:$0xff]  ;;  %v20625_v17 = vld [vmem:[#allocation53_spill] sm:$0xff] }
 0x57b   :  { %v1679_v22 = vadd.f32 %v20623_v16, %v20622_v53  ;;  %v20637_v53 = vld [vmem:[#allocation49_spill] sm:$0xff]  ;;  %v20638_v16 = vld [vmem:[#allocation66_spill] sm:$0xff] }
 0x57c   :  { %v2236_v9 = vpop.f32.mrf.mxu2 }
 0x57d   :  { %v2310_v37 = vadd.f32 %v2236_v9, %v2148_v26  ;;  %v2151_v26 = vadd.f32 %v20613_v6, %v1989_v7  ;;  %v20614_v9 = vld [vmem:[#allocation64_spill] sm:$0xff]  ;;  %v20624_v7 = vld [vmem:[#allocation18_spill] sm:$0xff]  ;;  %v20627_v6 = vld [vmem:[#allocation73_spill] sm:$0xff] }
 0x57f   :  { %v2336_v40 = vpack.c.bf16 %v2310_v37, %v2309_v8  ;;  %v2152_v8 = vadd.f32 %v20614_v9, %v1990_v41  ;;  %v1680_v41 = vadd.f32 %v20625_v17, %v20624_v7  ;;  %v20639_v7 = vld [vmem:[#allocation47_spill] sm:$0xff] }
 0x581   :  { %2286 = vmatmul.f32.gmra.mxu2 %v20591_v10 }
 0x584   :  { %v2239_v59 = vpop.f32.mrf.mxu2 }
 0x585   :  { %v2311_v35 = vadd.f32 %v2239_v59, %v2149_v27  ;;  %v20620_v27 = vld [vmem:[#allocation44_spill] sm:$0xff] }
 0x586   :  { %v1678_v23 = vadd.f32 %v20620_v27, %v20619_v42 }
 0x589   :  { %2289 = vmatmul.f32.gmra.mxu2 %v20600_v15  ;;  %v20618_v15 = vld [vmem:[#allocation54_spill] sm:$0xff] }
 0x58a   :  { %v1677_v21 = vadd.f32 %v20618_v15, %v20617_v45  ;;  %v20632_v45 = vld [vmem:[#allocation75_spill] sm:$0xff] }
 0x58c   :  { %v2242_v44 = vpop.f32.mrf.mxu2 }
 0x58d   :  { %v2312_v43 = vadd.f32 %v2242_v44, %v2150_v56  ;;  %v20621_v56 = vld [vmem:[#allocation65_spill] sm:$0xff] }
 0x58e   :  { %v1839_v44 = vadd.f32 %v20621_v56, %v1677_v21  ;;  %v20633_v21 = vld [vmem:[#allocation77_spill] sm:$0xff] }
 0x58f   :  { %v2337_v4 = vpack.c.bf16 %v2312_v43, %v2311_v35  ;;  %v1840_v35 = vadd.f32 %v16832_v13, %v1678_v23  ;;  %v20626_v13 = vld [vmem:[#allocation70_spill] sm:$0xff] }
 0x591   :  { %2292 = vmatmul.f32.gmra.mxu2 %v20603_v32 }
 0x594   :  { %v2245_v46 = vpop.f32.mrf.mxu2 }
 0x595   :  { %v2313_v10 = vadd.f32 %v2245_v46, %v2151_v26  ;;  %v1842_v26 = vadd.f32 %v20627_v6, %v1680_v41  ;;  %v1589_v41 = vpop.permute.xlu2 %1588  ;;  %v20641_v6 = vld [vmem:[#allocation79_spill] sm:$0xff] }
 0x599   :  { %2295 = vmatmul.f32.gmra.mxu2 %v20612_v5  ;;  %v1841_v5 = vadd.f32 %v20626_v13, %v1679_v22  ;;  %v1672_v22 = vadd.f32 %v20638_v16, %v20637_v53  ;;  %v20640_v13 = vld [vmem:[#allocation41_spill] sm:$0xff]  ;;  %v12667_v16 = vld [vmem:[%s20497_s4 + $0x50] sm:$0xf] }
 0x59c   :  { %v2248_v37 = vpop.f32.mrf.mxu2 }
 0x59d   :  { %v2314_v59 = vadd.f32 %v2248_v37, %v2152_v8 }
 0x59f   :  { %v2338_v39 = vpack.c.bf16 %v2314_v59, %v2313_v10 }
 0x5a1   :  { %3307 = vmatpush.bf16.msrb.mxu3 %v2338_v39 }
 0x5a4   :  { %v17212_v62 = vpop.f32.mrf.mxu2 }
 0x5a5   :  { %3308 = vmatpush.bf16.msrb.mxu3 %v2337_v4 }
 0x5a9   :  { %3309 = vmatpush.bf16.msrb.mxu3 %v2336_v40  ;;  %v2116_v40 = vpop.f32.mrf.mxu1 }
 0x5ac   :  { %v17214_v60 = vpop.f32.mrf.mxu2 }
 0x5ad   :  { %3310 = vmatpush.bf16.msrb.mxu3 %v2335_v12 }
 0x5b1   :  { %3311 = vmatpush.bf16.msrb.mxu3 %v2334_v58  ;;  %v1954_v58 = vpop.f32.mrf.mxu3 }
 0x5b2   :  { %v2000_v3 = vadd.f32 %v1954_v58, %v1838_v18  ;;  %v20628_v18 = vld [vmem:[#allocation19_spill] sm:$0xff] }
 0x5b4   :  { %v17219_v52 = vpop.f32.mrf.mxu2  ;;  %v2162_v36 = vadd.f32 %v2116_v40, %v2000_v3  ;;  %v20629_v3 = vld [vmem:[#allocation60_spill] sm:$0xff] }
 0x5b5   :  { %3312 = vmatpush.bf16.msrb.mxu3 %v2333_v38 }
 0x5b9   :  { %3313 = vmatpush.bf16.msrb.mxu3 %v2332_v11  ;;  %v1957_v0 = vpop.f32.mrf.mxu3  ;;  %v2119_v11 = vpop.f32.mrf.mxu1 }
 0x5ba   :  { %v2001_v43 = vadd.f32 %v1957_v0, %v1839_v44 }
 0x5bc   :  { %v17227_v50 = vpop.f32.mrf.mxu2  ;;  %v2163_v46 = vadd.f32 %v2119_v11, %v2001_v43  ;;  %v12628_v11 = vor.u32 %v15166_v14, %v12627_v47  ;;  %v20646_v47 = vld [vmem:[#allocation78_spill] sm:$0xff] }
 0x5bd   :  { %3314 = vmatpush.bf16.msrb.mxu3 %v2331_v61 }
 0x5c0   :  { %3315 = vmatmul.bf16.vlgmr.msrb.gmra.mxu3 %v12628_v11  ;;  %v20647_v11 = vld [vmem:[#allocation46_spill] sm:$0xff] }
 0x5c1   :  { %v1960_v19 = vpop.f32.mrf.mxu3  ;;  %v2122_v20 = vpop.f32.mrf.mxu1 }
 0x5c2   :  { %v2002_v4 = vadd.f32 %v1960_v19, %v1840_v35  ;;  %v20631_v19 = vld [vmem:[#allocation63_spill] sm:$0xff] }
 0x5c4   :  { %v17232_v12 = vpop.f32.mrf.mxu2  ;;  %v2164_v48 = vadd.f32 %v2122_v20, %v2002_v4 }
 0x5c9   :  { %v2125_v32 = vpop.f32.mrf.mxu1 }
 0x5cc   :  { %v17234_v55 = vpop.f32.mrf.mxu2 }
 0x5d1   :  { %v2128_v63 = vpop.f32.mrf.mxu1 }
 0x5d4   :  { %v17236_v24 = vpop.f32.mrf.mxu2 }
 0x5d5   :  { %v2321_v14 = vadd.f32 %v17236_v24, %v20646_v47  ;;  %v15182_v47 = vld [vmem:[%s20497_s4 + $0x84] sm:$0xf0] }
 0x5d9   :  { %v2131_v0 = vpop.f32.mrf.mxu1 }
 0x5dc   :  { %v17238_v54 = vpop.f32.mrf.mxu2 }
 0x5e1   :  { %v2134_v27 = vpop.f32.mrf.mxu1 }
 0x5e4   :  { %v2275_v38 = vpop.f32.mrf.mxu2 }
 0x5e5   :  { %v17244_v1 = vadd.f32 %v2275_v38, %v16950_v57  ;;  %v1963_v57 = vpop.f32.mrf.mxu3 }
 0x5e6   :  { %v2003_v9 = vadd.f32 %v1963_v57, %v1841_v5  ;;  %v1834_v5 = vadd.f32 %v20640_v13, %v1672_v22  ;;  %v15176_v22 = vld [vmem:[%s20497_s4 + $0x54] sm:$0xf0] }
 0x5e8   :  { %v2165_v37 = vadd.f32 %v2125_v32, %v2003_v9  ;;  %v20642_v9 = vld [vmem:[#allocation48_spill] sm:$0xff] }
 0x5ec   :  { %v2278_v61 = vpop.f32.mrf.mxu2 }
 0x5ed   :  { %v17246_v2 = vadd.f32 %v2278_v61, %v2162_v36  ;;  %v1966_v30 = vpop.f32.mrf.mxu3  ;;  %v1681_v36 = vadd.f32 %v20629_v3, %v20628_v18  ;;  %v20630_v61 = vld [vmem:[#allocation20_spill] sm:$0xff] }
 0x5ee   :  { %v2004_v8 = vadd.f32 %v1966_v30, %v1842_v26  ;;  %v1682_v20 = vadd.f32 %v20631_v19, %v20630_v61  ;;  %v15170_v61 = vld [vmem:[%s20497_s4 + $0x24] sm:$0xf0] }
 0x5ef   :  { %v2343_v25 = vpack.c.bf16 %v17246_v2, %v17244_v1  ;;  %v1843_v15 = vadd.f32 %v20632_v45, %v1681_v36  ;;  %v20649_v19 = vld [vmem:[#allocation33_spill] sm:$0xff]  ;;  %v20650_v1 = vld [vmem:[#allocation72_spill] sm:$0xff] }
 0x5f0   :  { %v2166_v10 = vadd.f32 %v2128_v63, %v2004_v8  ;;  %v1844_v42 = vadd.f32 %v20633_v21, %v1682_v20  ;;  %v20636_v63 = vld [vmem:[#allocation45_spill] sm:$0xff]  ;;  %v1670_v8 = vadd.f32 %v1589_v41, %v20642_v9  ;;  %v12653_v41 = vld [vmem:[%s20497_s4 + $0x38] sm:$0xf0] }
 0x5f1   :  { %v15173_v9 = vld [vmem:[%s20497_s4 + $0x44] sm:$0xf] }
 0x5f4   :  { %v2281_v29 = vpop.f32.mrf.mxu2 }
 0x5f5   :  { %v2325_v31 = vadd.f32 %v2281_v29, %v2163_v46  ;;  %v1969_v59 = vpop.f32.mrf.mxu3  ;;  %v12635_v46 = vld [vmem:[%s20497_s4 + $0x10] sm:$0xf] }
 0x5f6   :  { %v2005_v23 = vadd.f32 %v1969_v59, %v1843_v15 }
 0x5f8   :  { %v2167_v44 = vadd.f32 %v2131_v0, %v2005_v23  ;;  %v20645_v0 = vld [vmem:[#allocation76_spill] sm:$0xff]  ;;  %v20654_v23 = vld [vmem:[#allocation71_spill] sm:$0xff] }
 0x5fc   :  { %v2284_v49 = vpop.f32.mrf.mxu2 }
 0x5fd   :  { %v2326_v34 = vadd.f32 %v2284_v49, %v2164_v48  ;;  %v1972_v29 = vpop.f32.mrf.mxu3  ;;  %v15168_v48 = vld [vmem:[%s20497_s4 + $0x14] sm:$0xf0] }
 0x5fe   :  { %v2006_v56 = vadd.f32 %v1972_v29, %v1844_v42  ;;  %v12636_v49 = vor.u32 %v15168_v48, %v12635_v46  ;;  %v20653_v42 = vld [vmem:[#allocation69_spill] sm:$0xff]  ;;  %v15167_v46 = vld [vmem:[%s20497_s4 + $0x14] sm:$0xf]  ;;  %v12637_v48 = vld [vmem:[%s20497_s4 + $0x18] sm:$0xf0] }
 0x5ff   :  { %v2344_v28 = vpack.c.bf16 %v2326_v34, %v2325_v31  ;;  %v20634_v31 = vld [vmem:[#allocation50_spill] sm:$0xff]  ;;  %v20635_v34 = vld [vmem:[#allocation57_spill] sm:$0xff] }
 0x600   :  { %v2168_v35 = vadd.f32 %v2134_v27, %v2006_v56  ;;  %3320 = vmatmul.bf16.gmra.mxu3 %v12636_v49  ;;  %v1674_v30 = vadd.f32 %v20635_v34, %v20634_v31  ;;  %v2317_v56 = vadd.f32 %v17219_v52, %v20654_v23  ;;  %v12640_v49 = vor.u32 %v15167_v46, %v12637_v48  ;;  %v12659_v31 = vld [vmem:[%s20497_s4 + $0x40] sm:$0xf]  ;;  %v15174_v34 = vld [vmem:[%s20497_s4 + $0x44] sm:$0xf0] }
 0x601   :  { %v12707_v23 = vld [vmem:[%s20497_s4 + $0xa0] sm:$0xf] }
 0x604   :  { %v2287_v51 = vpop.f32.mrf.mxu2 }
 0x605   :  { %v2327_v58 = vadd.f32 %v2287_v51, %v2165_v37  ;;  %v1836_v51 = vadd.f32 %v20636_v63, %v1674_v30  ;;  %v20643_v37 = vld [vmem:[#allocation43_spill] sm:$0xff]  ;;  %v12660_v30 = vor.u32 %v15174_v34, %v12659_v31  ;;  %v15169_v63 = vld [vmem:[%s20497_s4 + $0x24] sm:$0xf] }
 0x606   :  { %v15183_v34 = vld [vmem:[%s20497_s4 + $0x94] sm:$0xf] }
 0x607   :  { %v1998_v17 = vadd.f32 %v20639_v7, %v1836_v51  ;;  %v12645_v51 = vld [vmem:[%s20497_s4 + $0x28] sm:$0xf0]  ;;  %v12668_v7 = vor.u32 %v15176_v22, %v12667_v16  ;;  %v12723_v22 = vld [vmem:[%s20497_s4 + $0xc0] sm:$0xf] }
 0x608   :  { %v12648_v53 = vor.u32 %v15169_v63, %v12645_v51 }
 0x609   :  { %v2160_v26 = vadd.f32 %v20641_v6, %v1998_v17  ;;  %v15171_v17 = vld [vmem:[%s20497_s4 + $0x34] sm:$0xf]  ;;  %v15178_v6 = vld [vmem:[%s20497_s4 + $0x64] sm:$0xf0] }
 0x60a   :  { %v12656_v13 = vor.u32 %v15171_v17, %v12653_v41 }
 0x60b   :  { %v2322_v59 = vadd.f32 %v17238_v54, %v2160_v26  ;;  %v12643_v54 = vld [vmem:[%s20497_s4 + $0x20] sm:$0xf] }
 0x60c   :  { %v2290_v39 = vpop.f32.mrf.mxu2  ;;  %v12644_v24 = vor.u32 %v15170_v61, %v12643_v54  ;;  %v4159_v54 = vld [vmem:[%s20498_s5 + $0x10] sm:$0xff]  ;;  %v15177_v61 = vld [vmem:[%s20497_s4 + $0x64] sm:$0xf] }
 0x60d   :  { %v2328_v40 = vadd.f32 %v2290_v39, %v2166_v10  ;;  %v1996_v10 = vadd.f32 %v20643_v37, %v1834_v5  ;;  %v1579_v39 = vpop.permute.xlu1 %1578  ;;  %v2342_v36 = vpack.c.bf16 %v2322_v59, %v2321_v14  ;;  %v12675_v5 = vld [vmem:[%s20497_s4 + $0x60] sm:$0xf]  ;;  %v15180_v59 = vld [vmem:[%s20497_s4 + $0x74] sm:$0xf0] }
 0x60e   :  { %v12676_v26 = vor.u32 %v15178_v6, %v12675_v5  ;;  %v4164_v14 = vld [vmem:[%s20498_s5 + $0x38] sm:$0xff]  ;;  %v15185_v6 = vld [vmem:[%s20497_s4 + $0xa4] sm:$0xf] }
 0x60f   :  { %v2345_v38 = vpack.c.bf16 %v2328_v40, %v2327_v58  ;;  %v20644_v58 = vld [vmem:[#allocation37_spill] sm:$0xff]  ;;  %4269 = vmatpush.msrb.mxu2 %v4164_v14  ;;  %v12717_v14 = vld [vmem:[%s20497_s4 + $0xb8] sm:$0xf0] }
 0x610   :  { %v1832_v40 = vadd.f32 %v20644_v58, %v1670_v8  ;;  %3325 = vmatmul.bf16.gmra.mxu3 %v12644_v24  ;;  %v12661_v8 = vld [vmem:[%s20497_s4 + $0x48] sm:$0xf0]  ;;  %v15175_v58 = vld [vmem:[%s20497_s4 + $0x54] sm:$0xf] }
 0x611   :  { %v12664_v37 = vor.u32 %v15173_v9, %v12661_v8  ;;  %v12677_v24 = vld [vmem:[%s20497_s4 + $0x68] sm:$0xf0] }
 0x614   :  { %v2293_v33 = vpop.f32.mrf.mxu2 }
 0x615   :  { %v2329_v43 = vadd.f32 %v2293_v33, %v2167_v44  ;;  %v20648_v33 = vld [vmem:[#allocation40_spill] sm:$0xff] }
 0x616   :  { %v1994_v18 = vadd.f32 %v20648_v33, %v1832_v40  ;;  %v12669_v40 = vld [vmem:[%s20497_s4 + $0x58] sm:$0xf0]  ;;  %v4162_v33 = vld [vmem:[%s20498_s5 + $0x28] sm:$0xff] }
 0x618   :  { %v2156_v2 = vadd.f32 %v20650_v1, %v1994_v18  ;;  %v4161_v18 = vld [vmem:[%s20498_s5 + $0x20] sm:$0xff] }
 0x61a   :  { %v2318_v15 = vadd.f32 %v17227_v50, %v2156_v2  ;;  %v12629_v50 = vld [vmem:[%s20497_s4 + $0x8] sm:$0xf0]  ;;  %v4157_v2 = vld [vmem:[%s20498_s5] sm:$0xff] }
 0x61c   :  { %v2296_v57 = vpop.f32.mrf.mxu2 }
 0x61d   :  { %v2330_v4 = vadd.f32 %v2296_v57, %v2168_v35  ;;  %v2340_v35 = vpack.c.bf16 %v2318_v15, %v2317_v56  ;;  %v20655_v57 = vld [vmem:[#allocation67_spill] sm:$0xff]  ;;  %v15186_v56 = vld [vmem:[%s20497_s4 + $0xa4] sm:$0xf0] }
 0x61e   :  { %v15179_v15 = vld [vmem:[%s20497_s4 + $0x74] sm:$0xf] }
 0x61f   :  { %v2346_v32 = vpack.c.bf16 %v2330_v4, %v2329_v43  ;;  %v2315_v43 = vadd.f32 %v17212_v62, %v20655_v57  ;;  %v15172_v62 = vld [vmem:[%s20497_s4 + $0x34] sm:$0xf0] }
 0x620   :  { %v13384_v57 = vld [vmem:[%s20498_s5 + $0xf8] sm:$0xff] }
 0x621   :  { %3716 = vmatpush.bf16.msra.mxu1 %v2346_v32  ;;  %5179 = vmatpush.msrb.mxu0 %v13384_v57 }
 0x625   :  { %3717 = vmatpush.bf16.msra.mxu1 %v2345_v38  ;;  %v2158_v38 = vadd.f32 %v20645_v0, %v1996_v10  ;;  %v12683_v10 = vld [vmem:[%s20497_s4 + $0x70] sm:$0xf]  ;;  %v12672_v0 = vor.u32 %v15175_v58, %v12669_v40 }
 0x627   :  { %v2320_v3 = vadd.f32 %v17234_v55, %v2158_v38  ;;  %v20652_v55 = vld [vmem:[#allocation36_spill] sm:$0xff] }
 0x628   :  { %v12691_v38 = vld [vmem:[%s20497_s4 + $0x80] sm:$0xf] }
 0x629   :  { %3718 = vmatpush.bf16.msra.mxu1 %v2344_v28  ;;  %v1668_v28 = vadd.f32 %v1579_v39, %v20647_v11  ;;  %v12684_v39 = vor.u32 %v15180_v59, %v12683_v10  ;;  %v12692_v11 = vor.u32 %v15182_v47, %v12691_v38  ;;  %v12731_v59 = vld [vmem:[%s20497_s4 + $0xd0] sm:$0xf]  ;;  %v15187_v47 = vld [vmem:[%s20497_s4 + $0xb4] sm:$0xf] }
 0x62b   :  { %v1830_v20 = vadd.f32 %v20649_v19, %v1668_v28  ;;  %v4163_v28 = vld [vmem:[%s20498_s5 + $0x30] sm:$0xff]  ;;  %v12680_v19 = vor.u32 %v15177_v61, %v12677_v24 }
 0x62c   :  { %4270 = vmatpush.msrb.mxu2 %v4163_v28 }
 0x62d   :  { %3719 = vmatpush.bf16.msra.mxu1 %v2343_v25  ;;  %v20651_v25 = vld [vmem:[#allocation74_spill] sm:$0xff]  ;;  %v1992_v45 = vadd.f32 %v20652_v55, %v1830_v20 }
 0x62e   :  { %v2319_v29 = vadd.f32 %v17232_v12, %v20651_v25  ;;  %v15165_v12 = vld [vmem:[%s20497_s4 + $0x4] sm:$0xf]  ;;  %4271 = vmatpush.msrb.mxu2 %v4162_v33  ;;  %v4158_v20 = vld [vmem:[%s20498_s5 + $0x8] sm:$0xff]  ;;  %v12699_v25 = vld [vmem:[%s20497_s4 + $0x90] sm:$0xf] }
 0x62f   :  { %v2154_v27 = vadd.f32 %v20653_v42, %v1992_v45  ;;  %v12632_v32 = vor.u32 %v15165_v12, %v12629_v50  ;;  %v12693_v12 = vld [vmem:[%s20497_s4 + $0x88] sm:$0xf0] }
 0x630   :  { %v2341_v21 = vpack.c.bf16 %v2320_v3, %v2319_v29  ;;  %4272 = vmatpush.msrb.mxu2 %v4161_v18  ;;  %v15184_v29 = vld [vmem:[%s20497_s4 + $0x94] sm:$0xf0] }
 0x631   :  { %3720 = vmatpush.bf16.msra.mxu1 %v2342_v36  ;;  %v2316_v44 = vadd.f32 %v17214_v60, %v2154_v27  ;;  %v12651_v60 = vld [vmem:[%s20497_s4 + $0x30] sm:$0xf]  ;;  %v4160_v36 = vld [vmem:[%s20498_s5 + $0x18] sm:$0xff]  ;;  %v12700_v55 = vor.u32 %v15184_v29, %v12699_v25 }
 0x632   :  { %v12652_v52 = vor.u32 %v15172_v62, %v12651_v60  ;;  %4273 = vmatpush.msrb.mxu2 %v4160_v36  ;;  %v12715_v62 = vld [vmem:[%s20497_s4 + $0xb0] sm:$0xf]  ;;  %v15194_v36 = vld [vmem:[%s20497_s4 + $0xe4] sm:$0xf0] }
 0x633   :  { %v2339_v4 = vpack.c.bf16 %v2316_v44, %v2315_v43  ;;  %v12708_v44 = vor.u32 %v15186_v56, %v12707_v23  ;;  %v15181_v43 = vld [vmem:[%s20497_s4 + $0x84] sm:$0xf]  ;;  %v15191_v56 = vld [vmem:[%s20497_s4 + $0xd4] sm:$0xf] }
 0x634   :  { %3330 = vmatmul.bf16.gmra.mxu3 %v12652_v52  ;;  %4274 = vmatpush.msrb.mxu2 %v4159_v54  ;;  %v12696_v50 = vor.u32 %v15181_v43, %v12693_v12  ;;  %v15188_v52 = vld [vmem:[%s20497_s4 + $0xb4] sm:$0xf0] }
 0x635   :  { %3721 = vmatpush.bf16.msra.mxu1 %v2341_v21  ;;  %v12685_v21 = vld [vmem:[%s20497_s4 + $0x78] sm:$0xf0]  ;;  %v12716_v46 = vor.u32 %v15188_v52, %v12715_v62 }
 0x636   :  { %4275 = vmatpush.msrb.mxu2 %v4158_v20  ;;  %v12688_v42 = vor.u32 %v15179_v15, %v12685_v21  ;;  %v15189_v20 = vld [vmem:[%s20497_s4 + $0xc4] sm:$0xf]  ;;  %v15196_v15 = vld [vmem:[%s20497_s4 + $0xf4] sm:$0xf0] }
 0x638   :  { %4276 = vmatpush.msrb.mxu2 %v4157_v2 }
 0x639   :  { %3722 = vmatpush.bf16.msra.mxu1 %v2340_v35 }
 0x63d   :  { %3723 = vmatpush.bf16.msra.mxu1 %v2339_v4 }
 0x640   :  { %3724 = vmatmul.bf16.vlgmr.msra.gmra.mxu1 %v12632_v32 }
 0x643   :  { %v3316_v3 = vpop.f32.mrf.mxu3 }
 0x644   :  { %3335 = vmatmul.bf16.gmra.mxu3 %v12660_v30  ;;  %v12701_v30 = vld [vmem:[%s20497_s4 + $0x98] sm:$0xf0] }
 0x645   :  { %v12704_v63 = vor.u32 %v15183_v34, %v12701_v30 }
 0x64b   :  { %v3318_v1 = vpop.f32.mrf.mxu3 }
 0x650   :  { %3729 = vmatmul.bf16.gmra.mxu1 %v12640_v49 }
 0x654   :  { %3340 = vmatmul.bf16.gmra.mxu3 %v12668_v7  ;;  %v15190_v7 = vld [vmem:[%s20497_s4 + $0xc4] sm:$0xf0] }
 0x655   :  { %v12724_v17 = vor.u32 %v15190_v7, %v12723_v22 }
 0x660   :  { %3734 = vmatmul.bf16.gmra.mxu1 %v12648_v53 }
 0x664   :  { %3345 = vmatmul.bf16.gmra.mxu3 %v12676_v26  ;;  %v12709_v26 = vld [vmem:[%s20497_s4 + $0xa8] sm:$0xf0] }
 0x665   :  { %v12712_v9 = vor.u32 %v15185_v6, %v12709_v26 }
 0x670   :  { %3739 = vmatmul.bf16.gmra.mxu1 %v12656_v13 }
 0x674   :  { %3350 = vmatmul.bf16.gmra.mxu3 %v12684_v39  ;;  %v15192_v39 = vld [vmem:[%s20497_s4 + $0xd4] sm:$0xf0] }
 0x675   :  { %v12732_v58 = vor.u32 %v15192_v39, %v12731_v59 }
 0x680   :  { %3744 = vmatmul.bf16.gmra.mxu1 %v12664_v37 }
 0x683   :  { %v3321_v45 = vpop.f32.mrf.mxu3 }
 0x684   :  { %3355 = vmatmul.bf16.gmra.mxu3 %v12692_v11  ;;  %v12720_v11 = vor.u32 %v15187_v47, %v12717_v14 }
 0x68b   :  { %v3323_v27 = vpop.f32.mrf.mxu3 }
 0x690   :  { %3749 = vmatmul.bf16.gmra.mxu1 %v12672_v0 }
 0x693   :  { %v3326_v35 = vpop.f32.mrf.mxu3 }
 0x694   :  { %3360 = vmatmul.bf16.gmra.mxu3 %v12700_v55 }
 0x69b   :  { %v3328_v32 = vpop.f32.mrf.mxu3 }
 0x6a0   :  { %3754 = vmatmul.bf16.gmra.mxu1 %v12680_v19 }
 0x6a4   :  { %3365 = vmatmul.bf16.gmra.mxu3 %v12708_v44  ;;  %v12733_v44 = vld [vmem:[%s20497_s4 + $0xd8] sm:$0xf0] }
 0x6b0   :  { %3759 = vmatmul.bf16.gmra.mxu1 %v12688_v42 }
 0x6b4   :  { %3370 = vmatmul.bf16.gmra.mxu3 %v12716_v46  ;;  %v15193_v46 = vld [vmem:[%s20497_s4 + $0xe4] sm:$0xf] }
 0x6b7   :  { %v3331_v49 = vpop.f32.mrf.mxu3 }
 0x6bd   :  { %v3725_v4 = vpop.f32.mrf.mxu1 }
 0x6be   :  { %v3726_v60 = vadd.f32 %v3725_v4, %v3316_v3  ;;  %v12739_v3 = vld [vmem:[%s20497_s4 + $0xe0] sm:$0xf]  ;;  %v15198_v4 = vld [vmem:[%s20497_s4 + $0x104] sm:$0xf0] }
 0x6bf   :  { %v3333_v53 = vpop.f32.mrf.mxu3  ;;  %v12740_v54 = vor.u32 %v15194_v36, %v12739_v3 }
 0x6c0   :  { %3764 = vmatmul.bf16.gmra.mxu1 %v12696_v50  ;;  %13265 = vmatmul.msk.f32.vlgmr.msrb.gmra.mxu2 %vm680_vm0, %v3726_v60  ;;  %v12755_v50 = vld [vmem:[%s20497_s4 + $0x100] sm:$0xf] }
 0x6c4   :  { %3375 = vmatmul.bf16.gmra.mxu3 %v12724_v17  ;;  %v15195_v17 = vld [vmem:[%s20497_s4 + $0xf4] sm:$0xf] }
 0x6c5   :  { %v3727_v48 = vpop.f32.mrf.mxu1 }
 0x6c6   :  { %v3728_v31 = vadd.f32 %v3727_v48, %v3318_v1  ;;  %v12725_v1 = vld [vmem:[%s20497_s4 + $0xc8] sm:$0xf0] }
 0x6c7   :  { %v3336_v13 = vpop.f32.mrf.mxu3  ;;  %v12728_v2 = vor.u32 %v15189_v20, %v12725_v1  ;;  %v12741_v48 = vld [vmem:[%s20497_s4 + $0xe8] sm:$0xf0] }
 0x6c8   :  { %13266 = vmatmul.msk.f32.gmra.mxu2 %vm680_vm0, %v3728_v31 }
 0x6cd   :  { %v3730_v51 = vpop.f32.mrf.mxu1 }
 0x6ce   :  { %v3731_v16 = vadd.f32 %v3730_v51, %v3321_v45  ;;  %v12747_v45 = vld [vmem:[%s20497_s4 + $0xf0] sm:$0xf]  ;;  %v15200_v51 = vld [vmem:[%s20497_s4 + $0x114] sm:$0xf0] }
 0x6cf   :  { %v3338_v37 = vpop.f32.mrf.mxu3  ;;  %v12748_v21 = vor.u32 %v15196_v15, %v12747_v45  ;;  %v15206_v45 = vld [vmem:[%s20497_s4 + $0x144] sm:$0xf0] }
 0x6d0   :  { %3769 = vmatmul.bf16.gmra.mxu1 %v12704_v63  ;;  %13267 = vmatmul.msk.f32.gmra.mxu2 %vm680_vm0, %v3731_v16  ;;  %v12763_v63 = vld [vmem:[%s20497_s4 + $0x110] sm:$0xf] }
 0x6d4   :  { %3380 = vmatmul.bf16.gmra.mxu3 %v12732_v58  ;;  %v15197_v58 = vld [vmem:[%s20497_s4 + $0x104] sm:$0xf] }
 0x6d5   :  { %v3732_v41 = vpop.f32.mrf.mxu1 }
 0x6d6   :  { %v3733_v5 = vadd.f32 %v3732_v41, %v3323_v27  ;;  %v12749_v41 = vld [vmem:[%s20497_s4 + $0xf8] sm:$0xf0] }
 0x6d7   :  { %v3341_v0 = vpop.f32.mrf.mxu3 }
 0x6d8   :  { %13268 = vmatmul.msk.f32.gmra.mxu2 %vm680_vm0, %v3733_v5 }
 0x6dd   :  { %v3735_v8 = vpop.f32.mrf.mxu1 }
 0x6de   :  { %v3736_v10 = vadd.f32 %v3735_v8, %v3326_v35  ;;  %v12736_v35 = vor.u32 %v15191_v56, %v12733_v44  ;;  %v15202_v8 = vld [vmem:[%s20497_s4 + $0x124] sm:$0xf0]  ;;  %v15201_v56 = vld [vmem:[%s20497_s4 + $0x124] sm:$0xf]  ;;  %v12773_v44 = vld [vmem:[%s20497_s4 + $0x128] sm:$0xf0] }
 0x6df   :  { %v3343_v33 = vpop.f32.mrf.mxu3 }
 0x6e0   :  { %3774 = vmatmul.bf16.gmra.mxu1 %v12712_v9  ;;  %13269 = vmatmul.msk.f32.gmra.mxu2 %vm680_vm0, %v3736_v10  ;;  %v12771_v9 = vld [vmem:[%s20497_s4 + $0x120] sm:$0xf] }
 0x6e4   :  { %3385 = vmatmul.bf16.gmra.mxu3 %v12740_v54 }
 0x6e5   :  { %v3737_v40 = vpop.f32.mrf.mxu1 }
 0x6e6   :  { %v3738_v38 = vadd.f32 %v3737_v40, %v3328_v32  ;;  %v12756_v32 = vor.u32 %v15198_v4, %v12755_v50  ;;  %v12757_v40 = vld [vmem:[%s20497_s4 + $0x108] sm:$0xf0]  ;;  %v12795_v4 = vld [vmem:[%s20497_s4 + $0x150] sm:$0xf] }
 0x6e7   :  { %v3346_v24 = vpop.f32.mrf.mxu3 }
 0x6e8   :  { %13270 = vmatmul.msk.f32.gmra.mxu2 %vm680_vm0, %v3738_v38 }
 0x6ed   :  { %v3740_v28 = vpop.f32.mrf.mxu1 }
 0x6ee   :  { %v3741_v18 = vadd.f32 %v3740_v28, %v3331_v49  ;;  %v12744_v49 = vor.u32 %v15193_v46, %v12741_v48  ;;  %v15204_v28 = vld [vmem:[%s20497_s4 + $0x134] sm:$0xf0] }
 0x6ef   :  { %v3348_v29 = vpop.f32.mrf.mxu3 }
 0x6f0   :  { %3779 = vmatmul.bf16.gmra.mxu1 %v12720_v11  ;;  %13271 = vmatmul.msk.f32.gmra.mxu2 %vm680_vm0, %v3741_v18  ;;  %v12779_v11 = vld [vmem:[%s20497_s4 + $0x130] sm:$0xf] }
 0x6f4   :  { %3390 = vmatmul.bf16.gmra.mxu3 %v12748_v21 }
 0x6f5   :  { %v3742_v61 = vpop.f32.mrf.mxu1 }
 0x6f6   :  { %v3743_v19 = vadd.f32 %v3742_v61, %v3333_v53  ;;  %v12764_v53 = vor.u32 %v15200_v51, %v12763_v63  ;;  %v15199_v61 = vld [vmem:[%s20497_s4 + $0x114] sm:$0xf] }
 0x6f7   :  { %v3351_v27 = vpop.f32.mrf.mxu3 }
 0x6f8   :  { %13272 = vmatmul.msk.f32.gmra.mxu2 %vm680_vm0, %v3743_v19 }
 0x6fd   :  { %v3745_v25 = vpop.f32.mrf.mxu1 }
 0x6fe   :  { %v3746_v55 = vadd.f32 %v3745_v25, %v3336_v13  ;;  %v12752_v13 = vor.u32 %v15195_v17, %v12749_v41 }
 0x6ff   :  { %v3353_v43 = vpop.f32.mrf.mxu3 }
 0x700   :  { %3784 = vmatmul.bf16.gmra.mxu1 %v12728_v2  ;;  %13273 = vmatmul.msk.f32.gmra.mxu2 %vm680_vm0, %v3746_v55  ;;  %v12787_v55 = vld [vmem:[%s20497_s4 + $0x140] sm:$0xf] }
 0x701   :  { %v12788_v15 = vor.u32 %v15206_v45, %v12787_v55  ;;  %v13302_v55 = vld [vmem:[%s20498_s5 + $0x68] sm:$0xff] }
 0x704   :  { %3395 = vmatmul.bf16.gmra.mxu3 %v12756_v32  ;;  %v15208_v32 = vld [vmem:[%s20497_s4 + $0x154] sm:$0xf0] }
 0x705   :  { %v3747_v42 = vpop.f32.mrf.mxu1 }
 0x706   :  { %v3748_v23 = vadd.f32 %v3747_v42, %v3338_v37  ;;  %v12772_v37 = vor.u32 %v15202_v8, %v12771_v9 }
 0x707   :  { %v3356_v62 = vpop.f32.mrf.mxu3 }
 0x708   :  { %13274 = vmatmul.msk.f32.gmra.mxu2 %vm680_vm0, %v3748_v23 }
 0x70d   :  { %v3750_v57 = vpop.f32.mrf.mxu1 }
 0x70e   :  { %v3751_v12 = vadd.f32 %v3750_v57, %v3341_v0  ;;  %v12760_v0 = vor.u32 %v15197_v58, %v12757_v40  ;;  %v12776_v57 = vor.u32 %v15201_v56, %v12773_v44  ;;  %v15212_v58 = vld [vmem:[%s20497_s4 + $0x174] sm:$0xf0]  ;;  %v15209_v56 = vld [vmem:[%s20497_s4 + $0x164] sm:$0xf]  ;;  %v12805_v44 = vld [vmem:[%s20497_s4 + $0x168] sm:$0xf0] }
 0x70f   :  { %v3358_v34 = vpop.f32.mrf.mxu3 }
 0x710   :  { %3789 = vmatmul.bf16.gmra.mxu1 %v12736_v35  ;;  %13275 = vmatmul.msk.f32.gmra.mxu2 %vm680_vm0, %v3751_v12 }
 0x714   :  { %3400 = vmatmul.bf16.gmra.mxu3 %v12764_v53 }
 0x715   :  { %v3752_v60 = vpop.f32.mrf.mxu1 }
 0x716   :  { %v3753_v52 = vadd.f32 %v3752_v60, %v3343_v33  ;;  %v12780_v33 = vor.u32 %v15204_v28, %v12779_v11  ;;  %v12796_v60 = vor.u32 %v15208_v32, %v12795_v4  ;;  %v15207_v11 = vld [vmem:[%s20497_s4 + $0x154] sm:$0xf]  ;;  %v12797_v28 = vld [vmem:[%s20497_s4 + $0x158] sm:$0xf0] }
 0x717   :  { %v3361_v22 = vpop.f32.mrf.mxu3 }
 0x718   :  { %13276 = vmatmul.msk.f32.gmra.mxu2 %vm680_vm0, %v3753_v52 }
 0x71d   :  { %v3755_v31 = vpop.f32.mrf.mxu1 }
 0x71e   :  { %v3756_v30 = vadd.f32 %v3755_v31, %v3346_v24  ;;  %v12765_v24 = vld [vmem:[%s20497_s4 + $0x118] sm:$0xf0] }
 0x71f   :  { %v3363_v6 = vpop.f32.mrf.mxu3  ;;  %v12768_v20 = vor.u32 %v15199_v61, %v12765_v24  ;;  %v12781_v31 = vld [vmem:[%s20497_s4 + $0x138] sm:$0xf0]  ;;  %v12819_v24 = vld [vmem:[%s20497_s4 + $0x180] sm:$0xf] }
 0x720   :  { %3794 = vmatmul.bf16.gmra.mxu1 %v12744_v49  ;;  %13277 = vmatmul.msk.f32.gmra.mxu2 %vm680_vm0, %v3756_v30  ;;  %v15203_v49 = vld [vmem:[%s20497_s4 + $0x134] sm:$0xf] }
 0x721   :  { %v12784_v30 = vor.u32 %v15203_v49, %v12781_v31 }
 0x724   :  { %3405 = vmatmul.bf16.gmra.mxu3 %v12772_v37 }
 0x725   :  { %v3757_v16 = vpop.f32.mrf.mxu1 }
 0x726   :  { %v3758_v7 = vadd.f32 %v3757_v16, %v3348_v29  ;;  %v13383_v29 = vld [vmem:[%s20498_s5 + $0xf0] sm:$0xff]  ;;  %v12803_v16 = vld [vmem:[%s20497_s4 + $0x160] sm:$0xf] }
 0x727   :  { %v3366_v59 = vpop.f32.mrf.mxu3  ;;  %5180 = vmatpush.msrb.mxu0 %v13383_v29 }
 0x728   :  { %13278 = vmatmul.msk.f32.gmra.mxu2 %vm680_vm0, %v3758_v7 }
 0x72d   :  { %v3760_v5 = vpop.f32.mrf.mxu1 }
 0x72e   :  { %v3761_v26 = vadd.f32 %v3760_v5, %v3351_v27 }
 0x72f   :  { %v3368_v47 = vpop.f32.mrf.mxu3 }
 0x730   :  { %3799 = vmatmul.bf16.gmra.mxu1 %v12752_v13  ;;  %13279 = vmatmul.msk.f32.gmra.mxu2 %vm680_vm0, %v3761_v26  ;;  %v12789_v26 = vld [vmem:[%s20497_s4 + $0x148] sm:$0xf0] }
 0x734   :  { %3410 = vmatmul.bf16.gmra.mxu3 %v12780_v33 }
 0x735   :  { %v3762_v10 = vpop.f32.mrf.mxu1 }
 0x736   :  { %v3763_v39 = vadd.f32 %v3762_v10, %v3353_v43 }
 0x737   :  { %v3371_v36 = vpop.f32.mrf.mxu3 }
 0x738   :  { %13280 = vmatmul.msk.f32.gmra.mxu2 %vm680_vm0, %v3763_v39  ;;  %v12811_v39 = vld [vmem:[%s20497_s4 + $0x170] sm:$0xf] }
 0x739   :  { %v12812_v40 = vor.u32 %v15212_v58, %v12811_v39  ;;  %v15213_v58 = vld [vmem:[%s20497_s4 + $0x184] sm:$0xf] }
 0x73d   :  { %v3765_v38 = vpop.f32.mrf.mxu1 }
 0x73e   :  { %v3766_v14 = vadd.f32 %v3765_v38, %v3356_v62 }
 0x73f   :  { %v3373_v2 = vpop.f32.mrf.mxu3 }
 0x740   :  { %3804 = vmatmul.bf16.gmra.mxu1 %v12760_v0  ;;  %13281 = vmatmul.msk.f32.gmra.mxu2 %vm680_vm0, %v3766_v14 }
 0x743   :  { %v17567_v18 = vpop.f32.mrf.mxu2 }
 0x744   :  { %3415 = vmatmul.bf16.gmra.mxu3 %v12788_v15 }
 0x745   :  { %v3767_v3 = vpop.f32.mrf.mxu1 }
 0x746   :  { %v3768_v54 = vadd.f32 %v3767_v3, %v3358_v34  ;;  %v12800_v3 = vor.u32 %v15207_v11, %v12797_v28 }
 0x747   :  { %v3376_v27 = vpop.f32.mrf.mxu3 }
 0x748   :  { %13282 = vmatmul.msk.f32.gmra.mxu2 %vm680_vm0, %v3768_v54 }
 0x74b   :  { %v17576_v19 = vpop.f32.mrf.mxu2 }
 0x74d   :  { %v3770_v1 = vpop.f32.mrf.mxu1 }
 0x74e   :  { %v3771_v25 = vadd.f32 %v3770_v1, %v3361_v22  ;;  %v15210_v22 = vld [vmem:[%s20497_s4 + $0x164] sm:$0xf0]  ;;  %v13304_v1 = vld [vmem:[%s20498_s5 + $0x78] sm:$0xff] }
 0x74f   :  { %v3378_v12 = vpop.f32.mrf.mxu3  ;;  %v12804_v7 = vor.u32 %v15210_v22, %v12803_v16  ;;  %4679 = vmatpush.msra.mxu2 %v13304_v1  ;;  %v12813_v16 = vld [vmem:[%s20497_s4 + $0x178] sm:$0xf0] }
 0x750   :  { %3809 = vmatmul.bf16.gmra.mxu1 %v12768_v20  ;;  %13283 = vmatmul.msk.f32.gmra.mxu2 %vm680_vm0, %v3771_v25  ;;  %v15214_v20 = vld [vmem:[%s20497_s4 + $0x184] sm:$0xf0]  ;;  %v13303_v25 = vld [vmem:[%s20498_s5 + $0x70] sm:$0xff] }
 0x751   :  { %4680 = vmatpush.msra.mxu2 %v13303_v25  ;;  %v12829_v25 = vld [vmem:[%s20497_s4 + $0x198] sm:$0xf0] }
 0x753   :  { %v17588_v21 = vpop.f32.mrf.mxu2  ;;  %4681 = vmatpush.msra.mxu2 %v13302_v55 }
 0x754   :  { %3420 = vmatmul.bf16.gmra.mxu3 %v12796_v60 }
 0x755   :  { %v3772_v42 = vpop.f32.mrf.mxu1 }
 0x756   :  { %v3773_v23 = vadd.f32 %v3772_v42, %v3363_v6  ;;  %v15205_v6 = vld [vmem:[%s20497_s4 + $0x144] sm:$0xf] }
 0x757   :  { %v3381_v46 = vpop.f32.mrf.mxu3  ;;  %v12792_v8 = vor.u32 %v15205_v6, %v12789_v26  ;;  %v12835_v6 = vld [vmem:[%s20497_s4 + $0x1a0] sm:$0xf]  ;;  %v15218_v26 = vld [vmem:[%s20497_s4 + $0x1a4] sm:$0xf0] }
 0x758   :  { %13284 = vmatmul.msk.f32.gmra.mxu2 %vm680_vm0, %v3773_v23  ;;  %v13300_v23 = vld [vmem:[%s20498_s5 + $0x58] sm:$0xff] }
 0x75b   :  { %v17597_v35 = vpop.f32.mrf.mxu2 }
 0x75d   :  { %v3775_v43 = vpop.f32.mrf.mxu1 }
 0x75e   :  { %v3776_v50 = vadd.f32 %v3775_v43, %v3366_v59 }
 0x75f   :  { %v3383_v51 = vpop.f32.mrf.mxu3 }
 0x760   :  { %3814 = vmatmul.bf16.gmra.mxu1 %v12776_v57  ;;  %13285 = vmatmul.msk.f32.gmra.mxu2 %vm680_vm0, %v3776_v50  ;;  %v13299_v57 = vld [vmem:[%s20498_s5 + $0x50] sm:$0xff]  ;;  %v13298_v50 = vld [vmem:[%s20498_s5 + $0x48] sm:$0xff] }
 0x763   :  { %v17606_v62 = vpop.f32.mrf.mxu2 }
 0x764   :  { %3425 = vmatmul.bf16.gmra.mxu3 %v12804_v7 }
 0x765   :  { %v3777_v52 = vpop.f32.mrf.mxu1 }
 0x766   :  { %v3778_v48 = vadd.f32 %v3777_v52, %v3368_v47  ;;  %v13297_v52 = vld [vmem:[%s20498_s5 + $0x40] sm:$0xff] }
 0x767   :  { %v3386_v13 = vpop.f32.mrf.mxu3 }
 0x768   :  { %13286 = vmatmul.msk.f32.gmra.mxu2 %vm680_vm0, %v3778_v48  ;;  %v15216_v48 = vld [vmem:[%s20497_s4 + $0x194] sm:$0xf0] }
 0x76b   :  { %v17615_v34 = vpop.f32.mrf.mxu2 }
 0x76d   :  { %v3780_v63 = vpop.f32.mrf.mxu1 }
 0x76e   :  { %v3781_v53 = vadd.f32 %v3780_v63, %v3371_v36 }
 0x76f   :  { %v17635_v10 = vpop.f32.mrf.mxu3 }
 0x770   :  { %3819 = vmatmul.bf16.gmra.mxu1 %v12784_v30  ;;  %13287 = vmatmul.msk.f32.gmra.mxu2 %vm680_vm0, %v3781_v53  ;;  %v15211_v53 = vld [vmem:[%s20497_s4 + $0x174] sm:$0xf] }
 0x771   :  { %v12816_v7 = vor.u32 %v15211_v53, %v12813_v16  ;;  %v15224_v53 = vld [vmem:[%s20497_s4 + $0x1d4] sm:$0xf0] }
 0x773   :  { %v17624_v17 = vpop.f32.mrf.mxu2 }
 0x774   :  { %3430 = vmatmul.bf16.gmra.mxu3 %v12812_v40  ;;  %v12821_v40 = vld [vmem:[%s20497_s4 + $0x188] sm:$0xf0] }
 0x775   :  { %v3782_v41 = vpop.f32.mrf.mxu1 }
 0x776   :  { %v3783_v5 = vadd.f32 %v3782_v41, %v3373_v2  ;;  %v12820_v2 = vor.u32 %v15214_v20, %v12819_v24 }
 0x777   :  { %v3391_v47 = vpop.f32.mrf.mxu3 }
 0x778   :  { %13288 = vmatmul.msk.f32.gmra.mxu2 %vm680_vm0, %v3783_v5 }
 0x77b   :  { %v17633_v9 = vpop.f32.mrf.mxu2 }
 0x77d   :  { %v3785_v37 = vpop.f32.mrf.mxu1 }
 0x77e   :  { %v3786_v59 = vadd.f32 %v3785_v37, %v3376_v27  ;;  %v13301_v27 = vld [vmem:[%s20498_s5 + $0x60] sm:$0xff] }
 0x77f   :  { %v17655_v54 = vpop.f32.mrf.mxu3  ;;  %4682 = vmatpush.msra.mxu2 %v13301_v27 }
 0x780   :  { %3824 = vmatmul.bf16.gmra.mxu1 %v12792_v8  ;;  %13289 = vmatmul.msk.f32.gmra.mxu2 %vm680_vm0, %v3786_v59  ;;  %v12836_v8 = vor.u32 %v15218_v26, %v12835_v6 }
 0x781   :  { %4683 = vmatpush.msra.mxu2 %v13300_v23  ;;  %v12851_v23 = vld [vmem:[%s20497_s4 + $0x1c0] sm:$0xf] }
 0x783   :  { %v17644_v0 = vpop.f32.mrf.mxu2  ;;  %4684 = vmatpush.msra.mxu2 %v13299_v57 }
 0x784   :  { %3435 = vmatmul.bf16.gmra.mxu3 %v12820_v2  ;;  %v15215_v2 = vld [vmem:[%s20497_s4 + $0x194] sm:$0xf] }
 0x785   :  { %v3787_v38 = vpop.f32.mrf.mxu1  ;;  %4685 = vmatpush.msra.mxu2 %v13298_v50 }
 0x786   :  { %v3788_v14 = vadd.f32 %v3787_v38, %v3378_v12  ;;  %v12808_v12 = vor.u32 %v15209_v56, %v12805_v44  ;;  %v15222_v56 = vld [vmem:[%s20497_s4 + $0x1c4] sm:$0xf0] }
 0x787   :  { %v3396_v15 = vpop.f32.mrf.mxu3  ;;  %4686 = vmatpush.msra.mxu2 %v13297_v52  ;;  %v12852_v44 = vor.u32 %v15222_v56, %v12851_v23 }
 0x788   :  { %13290 = vmatmul.msk.f32.gmra.mxu2 %vm680_vm0, %v3788_v14 }
 0x78b   :  { %v17653_v33 = vpop.f32.mrf.mxu2 }
 0x78d   :  { %v3790_v36 = vpop.f32.mrf.mxu1 }
 0x78e   :  { %v3791_v61 = vadd.f32 %v3790_v36, %v3381_v46  ;;  %v12827_v46 = vld [vmem:[%s20497_s4 + $0x190] sm:$0xf]  ;;  %v15220_v36 = vld [vmem:[%s20497_s4 + $0x1b4] sm:$0xf0] }
 0x78f   :  { %v3398_v32 = vpop.f32.mrf.mxu3  ;;  %v12828_v49 = vor.u32 %v15216_v48, %v12827_v46  ;;  %v17773_v46 = vpop.permute.xlu2 %4526 }
 0x790   :  { %3829 = vmatmul.bf16.gmra.mxu1 %v12800_v3  ;;  %13291 = vmatmul.msk.f32.gmra.mxu2 %vm680_vm0, %v3791_v61  ;;  %v12843_v3 = vld [vmem:[%s20497_s4 + $0x1b0] sm:$0xf]  ;;  %20656 = vst [vmem:[#allocation21_spill] sm:$0xff] %v17773_v46 }
 0x793   :  { %v17670_v29 = vpop.f32.mrf.mxu2 }
 0x794   :  { %3440 = vmatmul.bf16.gmra.mxu3 %v12828_v49 }
 0x795   :  { %v3792_v45 = vpop.f32.mrf.mxu1 }
 0x796   :  { %v3793_v42 = vadd.f32 %v3792_v45, %v3383_v51  ;;  %v12832_v45 = vor.u32 %v15215_v2, %v12829_v25 }
 0x797   :  { %v3401_v63 = vpop.f32.mrf.mxu3  ;;  %v17786_v6 = vpop.permute.xlu2 %4521 }
 0x798   :  { %13292 = vmatmul.msk.f32.gmra.mxu2 %vm680_vm0, %v3793_v42  ;;  %20658 = vst [vmem:[#allocation29_spill] sm:$0xff] %v17786_v6 }
 0x79b   :  { %v17691_v43 = vpop.f32.mrf.mxu2 }
 0x79d   :  { %v3795_v4 = vpop.f32.mrf.mxu1 }
 0x79e   :  { %v3796_v60 = vadd.f32 %v3795_v4, %v3386_v13 }
 0x79f   :  { %v3403_v13 = vpop.f32.mrf.mxu3 }
 0x7a0   :  { %3834 = vmatmul.bf16.gmra.mxu1 %v12808_v12  ;;  %13293 = vmatmul.msk.f32.gmra.mxu2 %vm680_vm0, %v3796_v60  ;;  %v12837_v60 = vld [vmem:[%s20497_s4 + $0x1a8] sm:$0xf0] }
 0x7a3   :  { %v17706_v31 = vpop.f32.mrf.mxu2 }
 0x7a4   :  { %3445 = vmatmul.bf16.gmra.mxu3 %v12836_v8  ;;  %v13382_v8 = vld [vmem:[%s20498_s5 + $0xe8] sm:$0xff] }
 0x7a5   :  { %v3797_v30 = vpop.f32.mrf.mxu1  ;;  %5181 = vmatpush.msrb.mxu0 %v13382_v8  ;;  %v12861_v8 = vld [vmem:[%s20497_s4 + $0x1d8] sm:$0xf0] }
 0x7a6   :  { %v3798_v51 = vadd.f32 %v3797_v30, %v17635_v10 }
 0x7a7   :  { %v3406_v59 = vpop.f32.mrf.mxu3 }
 0x7a8   :  { %13294 = vmatmul.msk.f32.gmra.mxu2 %vm680_vm0, %v3798_v51  ;;  %v12859_v51 = vld [vmem:[%s20497_s4 + $0x1d0] sm:$0xf] }
 0x7a9   :  { %v12860_v16 = vor.u32 %v15224_v53, %v12859_v51 }
 0x7ab   :  { %v17716_v22 = vpop.f32.mrf.mxu2 }
 0x7ad   :  { %v3800_v41 = vpop.f32.mrf.mxu1 }
 0x7ae   :  { %v3801_v5 = vadd.f32 %v3800_v41, %v3391_v47  ;;  %v12824_v47 = vor.u32 %v15213_v58, %v12821_v40  ;;  %v17784_v41 = vpop.permute.xlu0 %4531 }
 0x7af   :  { %v3408_v11 = vpop.f32.mrf.mxu3  ;;  %20657 = vst [vmem:[#allocation28_spill] sm:$0xff] %v17784_v41 }
 0x7b0   :  { %3839 = vmatmul.bf16.gmra.mxu1 %v12816_v7  ;;  %13295 = vmatmul.msk.f32.gmra.mxu2 %vm680_vm0, %v3801_v5 }
 0x7b3   :  { %v17725_v37 = vpop.f32.mrf.mxu2 }
 0x7b5   :  { %v3802_v10 = vpop.f32.mrf.mxu1 }
 0x7b6   :  { %v3803_v39 = vadd.f32 %v3802_v10, %v17655_v54  ;;  %v12844_v54 = vor.u32 %v15220_v36, %v12843_v3  ;;  %v15219_v10 = vld [vmem:[%s20497_s4 + $0x1b4] sm:$0xf]  ;;  %v15226_v3 = vld [vmem:[%s20497_s4 + $0x1e4] sm:$0xf0]  ;;  %v17808_v36 = vpop.permute.xlu2 %4506 }
 0x7b7   :  { %v3411_v20 = vpop.f32.mrf.mxu3  ;;  %20659 = vst [vmem:[#allocation9_spill] sm:$0xff] %v17808_v36 }
 0x7b8   :  { %13296 = vmatmul.msk.f32.gmra.mxu2 %vm680_vm0, %v3803_v39  ;;  %3450 = vmatmul.bf16.gmra.mxu3 %v12844_v54 }
 0x7bb   :  { %v17735_v38 = vpop.f32.mrf.mxu2 }
 0x7bd   :  { %v3805_v14 = vpop.f32.mrf.mxu1 }
 0x7be   :  { %v3806_v28 = vadd.f32 %v3805_v14, %v3396_v15  ;;  %v17800_v14 = vpop.permute.xlu0 %4446 }
 0x7bf   :  { %v3413_v42 = vpop.f32.mrf.mxu3 }
 0x7c0   :  { %3844 = vmatmul.bf16.gmra.mxu1 %v12824_v47  ;;  %13305 = vmatmul.msk.f32.vlgmr.msra.gmra.mxu2 %vm680_vm0, %v3806_v28  ;;  %v12867_v28 = vld [vmem:[%s20497_s4 + $0x1e0] sm:$0xf] }
 0x7c1   :  { %v12868_v54 = vor.u32 %v15226_v3, %v12867_v28  ;;  %v12883_v3 = vld [vmem:[%s20497_s4 + $0x200] sm:$0xf] }
 0x7c3   :  { %v17744_v61 = vpop.f32.mrf.mxu2 }
 0x7c5   :  { %v3807_v24 = vpop.f32.mrf.mxu1 }
 0x7c6   :  { %v3808_v1 = vadd.f32 %v3807_v24, %v3398_v32  ;;  %v15217_v32 = vld [vmem:[%s20497_s4 + $0x1a4] sm:$0xf]  ;;  %v17813_v25 = vpop.permute.xlu0 %4511 }
 0x7c7   :  { %v3416_v50 = vpop.f32.mrf.mxu3  ;;  %v12840_v48 = vor.u32 %v15217_v32, %v12837_v60  ;;  %20660 = vst [vmem:[#allocation55_spill] sm:$0xff] %v17813_v25  ;;  %v12875_v32 = vld [vmem:[%s20497_s4 + $0x1f0] sm:$0xf]  ;;  %v15228_v60 = vld [vmem:[%s20497_s4 + $0x1f4] sm:$0xf0] }
 0x7c8   :  { %13306 = vmatmul.msk.f32.gmra.mxu2 %vm680_vm0, %v3808_v1  ;;  %3455 = vmatmul.bf16.gmra.mxu3 %v12852_v44  ;;  %v15236_v25 = vld [vmem:[%s20497_s4 + $0x234] sm:$0xf0] }
 0x7cb   :  { %v17753_v55 = vpop.f32.mrf.mxu2 }
 0x7cd   :  { %v3810_v15 = vpop.f32.mrf.mxu1 }
 0x7ce   :  { %v3811_v27 = vadd.f32 %v3810_v15, %v3401_v63  ;;  %v12853_v15 = vld [vmem:[%s20497_s4 + $0x1c8] sm:$0xf0] }
 0x7cf   :  { %v3418_v30 = vpop.f32.mrf.mxu3 }
 0x7d0   :  { %3849 = vmatmul.bf16.gmra.mxu1 %v12832_v45  ;;  %13307 = vmatmul.msk.f32.gmra.mxu2 %vm680_vm0, %v3811_v27  ;;  %v15221_v45 = vld [vmem:[%s20497_s4 + $0x1c4] sm:$0xf]  ;;  %v17822_v27 = vpop.permute.xlu2 %4441 }
 0x7d1   :  { %v12856_v56 = vor.u32 %v15221_v45, %v12853_v15 }
 0x7d3   :  { %v17762_v57 = vpop.f32.mrf.mxu2 }
 0x7d5   :  { %v3812_v12 = vpop.f32.mrf.mxu1 }
 0x7d6   :  { %v3813_v4 = vadd.f32 %v3812_v12, %v3403_v13 }
 0x7d7   :  { %v3421_v5 = vpop.f32.mrf.mxu3 }
 0x7d8   :  { %13308 = vmatmul.msk.f32.gmra.mxu2 %vm680_vm0, %v3813_v4  ;;  %3460 = vmatmul.bf16.gmra.mxu3 %v12860_v16  ;;  %v17839_v51 = vpop.permute.xlu2 %4426 }
 0x7db   :  { %v17771_v52 = vpop.f32.mrf.mxu2 }
 0x7dd   :  { %v3815_v49 = vpop.f32.mrf.mxu1 }
 0x7de   :  { %v3816_v63 = vadd.f32 %v3815_v49, %v3406_v59  ;;  %v12845_v59 = vld [vmem:[%s20497_s4 + $0x1b8] sm:$0xf0]  ;;  %v17835_v49 = vpop.permute.xlu0 %4496 }
 0x7df   :  { %v12848_v58 = vor.u32 %v15219_v10, %v12845_v59  ;;  %v3423_v47 = vpop.f32.mrf.mxu3 }
 0x7e0   :  { %3854 = vmatmul.bf16.gmra.mxu1 %v12840_v48  ;;  %13309 = vmatmul.msk.f32.gmra.mxu2 %vm680_vm0, %v3816_v63  ;;  %v12876_v48 = vor.u32 %v15228_v60, %v12875_v32  ;;  %v15225_v32 = vld [vmem:[%s20497_s4 + $0x1e4] sm:$0xf]  ;;  %v12869_v60 = vld [vmem:[%s20497_s4 + $0x1e8] sm:$0xf0] }
 0x7e3   :  { %v17782_v7 = vpop.f32.mrf.mxu2 }
 0x7e5   :  { %v3817_v13 = vpop.f32.mrf.mxu1 }
 0x7e6   :  { %v3818_v26 = vadd.f32 %v3817_v13, %v3408_v11  ;;  %v17852_v59 = vpop.permute.xlu0 %4431 }
 0x7e7   :  { %v3426_v2 = vpop.f32.mrf.mxu3 }
 0x7e8   :  { %13310 = vmatmul.msk.f32.gmra.mxu2 %vm680_vm0, %v3818_v26  ;;  %3465 = vmatmul.bf16.gmra.mxu3 %v12868_v54  ;;  %v15223_v26 = vld [vmem:[%s20497_s4 + $0x1d4] sm:$0xf]  ;;  %v15230_v54 = vld [vmem:[%s20497_s4 + $0x204] sm:$0xf0] }
 0x7eb   :  { %v17798_v39 = vpop.f32.mrf.mxu2 }
 0x7ed   :  { %v3820_v40 = vpop.f32.mrf.mxu1 }
 0x7ee   :  { %v3821_v11 = vadd.f32 %v3820_v40, %v3411_v20 }
 0x7ef   :  { %v3428_v12 = vpop.f32.mrf.mxu3 }
 0x7f0   :  { %3859 = vmatmul.bf16.gmra.mxu1 %v12848_v58  ;;  %13311 = vmatmul.msk.f32.gmra.mxu2 %vm680_vm0, %v3821_v11  ;;  %v12864_v58 = vor.u32 %v15223_v26, %v12861_v8 }
 0x7f3   :  { %v17811_v24 = vpop.f32.mrf.mxu2 }
 0x7f5   :  { %v3822_v1 = vpop.f32.mrf.mxu1 }
 0x7f6   :  { %v3823_v20 = vadd.f32 %v3822_v1, %v3413_v42  ;;  %v17826_v42 = vpop.permute.xlu1 %4516  ;;  %v12884_v1 = vor.u32 %v15230_v54, %v12883_v3 }
 0x7f7   :  { %20661 = vst [vmem:[#allocation56_spill] sm:$0xff] %v17826_v42  ;;  %v3431_v53 = vpop.f32.mrf.mxu3 }
 0x7f8   :  { %13312 = vmatmul.msk.f32.gmra.mxu2 %vm680_vm0, %v3823_v20  ;;  %3470 = vmatmul.bf16.gmra.mxu3 %v12876_v48 }
 0x7fb   :  { %v17824_v23 = vpop.f32.mrf.mxu2 }
 0x7fd   :  { %v3825_v44 = vpop.f32.mrf.mxu1 }
 0x7fe   :  { %v3826_v4 = vadd.f32 %v3825_v44, %v3416_v50  ;;  %v17841_v13 = vpop.permute.xlu1 %4451 }
 0x7ff   :  { %v3433_v11 = vpop.f32.mrf.mxu3 }
 0x800   :  { %3864 = vmatmul.bf16.gmra.mxu1 %v12856_v56  ;;  %13313 = vmatmul.msk.f32.gmra.mxu2 %vm680_vm0, %v3826_v4 }
 0x803   :  { %v17837_v63 = vpop.f32.mrf.mxu2 }
 0x805   :  { %v3827_v50 = vpop.f32.mrf.mxu1 }
 0x806   :  { %v3828_v16 = vadd.f32 %v3827_v50, %v3418_v30  ;;  %v17854_v30 = vpop.permute.xlu2 %4491  ;;  %v17863_v20 = vpop.permute.xlu1 %4436 }
 0x807   :  { %v3436_v56 = vpop.f32.mrf.mxu3 }
 0x808   :  { %13314 = vmatmul.msk.f32.gmra.mxu2 %vm680_vm0, %v3828_v16  ;;  %3475 = vmatmul.bf16.gmra.mxu3 %v12884_v1  ;;  %v12872_v16 = vor.u32 %v15225_v32, %v12869_v60  ;;  %v15227_v60 = vld [vmem:[%s20497_s4 + $0x1f4] sm:$0xf] }
 0x80b   :  { %v17850_v10 = vpop.f32.mrf.mxu2 }
 0x80c   :  { %20662 = vst [vmem:[#allocation10_spill] sm:$0xff] %v17850_v10 }
 0x80d   :  { %v3830_v40 = vpop.f32.mrf.mxu1 }
 0x80e   :  { %v3831_v28 = vadd.f32 %v3830_v40, %v3421_v5  ;;  %v17867_v5 = vpop.permute.xlu0 %4416  ;;  %v17869_v4 = vpop.permute.xlu2 %4476  ;;  %v15232_v40 = vld [vmem:[%s20497_s4 + $0x214] sm:$0xf0] }
 0x80f   :  { %v17880_v50 = vpop.permute.xlu1 %4501  ;;  %v3438_v8 = vpop.f32.mrf.mxu3 }
 0x810   :  { %3869 = vmatmul.bf16.gmra.mxu1 %v12864_v58  ;;  %13315 = vmatmul.msk.f32.gmra.mxu2 %vm680_vm0, %v3831_v28  ;;  %20665 = vst [vmem:[#allocation38_spill] sm:$0xff] %v17880_v50  ;;  %v12891_v58 = vld [vmem:[%s20497_s4 + $0x210] sm:$0xf] }
 0x811   :  { %v12892_v3 = vor.u32 %v15232_v40, %v12891_v58 }
 0x813   :  { %v17865_v45 = vpop.f32.mrf.mxu2 }
 0x814   :  { %20663 = vst [vmem:[#allocation35_spill] sm:$0xff] %v17865_v45 }
 0x815   :  { %v3832_v15 = vpop.f32.mrf.mxu1 }
 0x816   :  { %v3833_v44 = vadd.f32 %v3832_v15, %v3423_v47  ;;  %v17888_v28 = vpop.permute.xlu0 %4481  ;;  %v17891_v54 = vpop.permute.xlu2 %4411 }
 0x817   :  { %v3441_v15 = vpop.f32.mrf.mxu3 }
 0x818   :  { %13316 = vmatmul.msk.f32.gmra.mxu2 %vm680_vm0, %v3833_v44  ;;  %3480 = vmatmul.bf16.gmra.mxu3 %v12892_v3  ;;  %v17895_v44 = vpop.permute.xlu1 %4486 }
 0x81b   :  { %v17878_v48 = vpop.f32.mrf.mxu2 }
 0x81c   :  { %20664 = vst [vmem:[#allocation26_spill] sm:$0xff] %v17878_v48 }
 0x81d   :  { %v3835_v26 = vpop.f32.mrf.mxu1 }
 0x81e   :  { %v3836_v47 = vadd.f32 %v3835_v26, %v3426_v2  ;;  %v17904_v26 = vpop.permute.xlu0 %4466  ;;  %v17908_v58 = vpop.permute.xlu2 %4396 }
 0x81f   :  { %v3443_v41 = vpop.f32.mrf.mxu3 }
 0x820   :  { %3874 = vmatmul.bf16.gmra.mxu1 %v12872_v16  ;;  %13317 = vmatmul.msk.f32.gmra.mxu2 %vm680_vm0, %v3836_v47  ;;  %v12877_v16 = vld [vmem:[%s20497_s4 + $0x1f8] sm:$0xf0]  ;;  %v17916_v46 = vpop.permute.xlu1 %4421 }
 0x821   :  { %v12880_v40 = vor.u32 %v15227_v60, %v12877_v16 }
 0x823   :  { %v17893_v1 = vpop.f32.mrf.mxu2 }
 0x824   :  { %20666 = vst [vmem:[#allocation27_spill] sm:$0xff] %v17893_v1  ;;  %v15229_v1 = vld [vmem:[%s20497_s4 + $0x204] sm:$0xf] }
 0x825   :  { %v3837_v2 = vpop.f32.mrf.mxu1 }
 0x826   :  { %v3838_v32 = vadd.f32 %v3837_v2, %v3428_v12  ;;  %v12899_v2 = vld [vmem:[%s20497_s4 + $0x220] sm:$0xf]  ;;  %v17921_v60 = vpop.permute.xlu0 %4401  ;;  %v17923_v42 = vpop.permute.xlu2 %4461 }
 0x827   :  { %v3446_v16 = vpop.f32.mrf.mxu3 }
 0x828   :  { %13318 = vmatmul.msk.f32.gmra.mxu2 %vm680_vm0, %v3838_v32  ;;  %v15234_v32 = vld [vmem:[%s20497_s4 + $0x224] sm:$0xf0] }
 0x829   :  { %v12900_v6 = vor.u32 %v15234_v32, %v12899_v2 }
 0x82b   :  { %v17906_v47 = vpop.f32.mrf.mxu2  ;;  %3485 = vmatmul.bf16.gmra.mxu3 %v12900_v6  ;;  %v17932_v6 = vpop.permute.xlu1 %4406 }
 0x82c   :  { %20667 = vst [vmem:[#allocation22_spill] sm:$0xff] %v17906_v47 }
 0x82d   :  { %v3840_v3 = vpop.f32.mrf.mxu1 }
 0x82e   :  { %v3841_v12 = vadd.f32 %v3840_v3, %v3431_v53  ;;  %v4377_v36 = vpop.permute.xlu2 %4376 }
 0x830   :  { %3879 = vmatmul.bf16.gmra.mxu1 %v12880_v40  ;;  %13319 = vmatmul.msk.f32.gmra.mxu2 %vm680_vm0, %v3841_v12  ;;  %v12885_v40 = vld [vmem:[%s20497_s4 + $0x208] sm:$0xf0] }
 0x831   :  { %v12888_v2 = vor.u32 %v15229_v1, %v12885_v40  ;;  %v4534_v1 = vadd.f32 %v4377_v36, %v17567_v18  ;;  %v12893_v18 = vld [vmem:[%s20497_s4 + $0x218] sm:$0xf0] }
 0x833   :  { %v17919_v47 = vpop.f32.mrf.mxu2 }
 0x834   :  { %20668 = vst [vmem:[#allocation23_spill] sm:$0xff] %v17919_v47  ;;  %v17936_v47 = vpop.f32.mrf.mxu3 }
 0x835   :  { %v3842_v53 = vpop.f32.mrf.mxu1 }
 0x836   :  { %v3843_v3 = vadd.f32 %v3842_v53, %v3433_v11  ;;  %v4387_v53 = vpop.permute.xlu0 %4386 }
 0x838   :  { %13320 = vmatmul.msk.f32.gmra.mxu2 %vm680_vm0, %v3843_v3  ;;  %v12907_v3 = vld [vmem:[%s20497_s4 + $0x230] sm:$0xf] }
 0x839   :  { %v12908_v48 = vor.u32 %v15236_v25, %v12907_v3 }
 0x83b   :  { %v17934_v12 = vpop.f32.mrf.mxu2  ;;  %3490 = vmatmul.bf16.gmra.mxu3 %v12908_v48 }
 0x83c   :  { %20669 = vst [vmem:[#allocation30_spill] sm:$0xff] %v17934_v12  ;;  %v17946_v12 = vpop.permute.xlu1 %4471  ;;  %v3451_v45 = vpop.f32.mrf.mxu3 }
 0x83d   :  { %v3845_v32 = vpop.f32.mrf.mxu1 }
 0x83e   :  { %v3846_v11 = vadd.f32 %v3845_v32, %v3436_v56  ;;  %v4382_v10 = vpop.permute.xlu0 %4381 }
 0x83f   :  { %v4535_v36 = vadd.f32 %v4382_v10, %v17576_v19  ;;  %v4536_v10 = vadd.f32 %v4387_v53, %v17588_v21 }
 0x840   :  { %3884 = vmatmul.bf16.gmra.mxu1 %v12888_v2  ;;  %13321 = vmatmul.msk.f32.gmra.mxu2 %vm680_vm0, %v3846_v11  ;;  %v15231_v2 = vld [vmem:[%s20497_s4 + $0x214] sm:$0xf] }
 0x841   :  { %v12896_v11 = vor.u32 %v15231_v2, %v12893_v18 }
 0x843   :  { %v4688_v40 = vpop.f32.mrf.mxu2 }
 0x844   :  { %v17948_v56 = vadd.f32 %v4688_v40, %v4534_v1  ;;  %v3453_v1 = vpop.f32.mrf.mxu3  ;;  %v17960_v40 = vpop.permute.xlu1 %4456 }
 0x845   :  { %v3847_v32 = vpop.f32.mrf.mxu1 }
 0x846   :  { %v3848_v50 = vadd.f32 %v3847_v32, %v3438_v8  ;;  %v15238_v32 = vld [vmem:[%s20497_s4 + $0x244] sm:$0xf0] }
 0x848   :  { %13322 = vmatmul.msk.f32.gmra.mxu2 %vm680_vm0, %v3848_v50  ;;  %v12915_v50 = vld [vmem:[%s20497_s4 + $0x240] sm:$0xf] }
 0x849   :  { %v12916_v19 = vor.u32 %v15238_v32, %v12915_v50 }
 0x84b   :  { %v4691_v25 = vpop.f32.mrf.mxu2  ;;  %3495 = vmatmul.bf16.gmra.mxu3 %v12916_v19 }
 0x84c   :  { %v17958_v48 = vadd.f32 %v4691_v25, %v4535_v36  ;;  %v3456_v36 = vpop.f32.mrf.mxu3 }
 0x84d   :  { %v3850_v3 = vpop.f32.mrf.mxu1 }
 0x84e   :  { %20670 = vst [vmem:[#allocation31_spill] sm:$0xff] %v17958_v48  ;;  %v3851_v8 = vadd.f32 %v3850_v3, %v3441_v15  ;;  %v4392_v3 = vpop.permute.xlu1 %4391  ;;  %v15233_v48 = vld [vmem:[%s20497_s4 + $0x224] sm:$0xf] }
 0x84f   :  { %v4537_v21 = vadd.f32 %v4392_v3, %v17597_v35  ;;  %v4538_v35 = vadd.f32 %v17908_v58, %v17606_v62  ;;  %v4539_v62 = vadd.f32 %v17921_v60, %v17615_v34  ;;  %v4540_v60 = vadd.f32 %v17932_v6, %v17624_v17 }
 0x850   :  { %3889 = vmatmul.bf16.gmra.mxu1 %v12896_v11  ;;  %13323 = vmatmul.msk.f32.gmra.mxu2 %vm680_vm0, %v3851_v8  ;;  %v12901_v11 = vld [vmem:[%s20497_s4 + $0x228] sm:$0xf0]  ;;  %v4541_v17 = vadd.f32 %v17891_v54, %v17633_v9  ;;  %v4542_v54 = vadd.f32 %v17867_v5, %v17644_v0  ;;  %v12925_v0 = vld [vmem:[%s20497_s4 + $0x258] sm:$0xf0]  ;;  %v4543_v5 = vadd.f32 %v17916_v46, %v17653_v33 }
 0x851   :  { %v12904_v50 = vor.u32 %v15233_v48, %v12901_v11  ;;  %v13344_v33 = vld [vmem:[%s20498_s5 + $0xb8] sm:$0xff] }
 0x852   :  { %4929 = vmatpush.msrb.mxu2 %v13344_v33  ;;  %v15248_v33 = vld [vmem:[%s20497_s4 + $0x294] sm:$0xf0] }
 0x853   :  { %v4694_v2 = vpop.f32.mrf.mxu2 }
 0x854   :  { %v17970_v18 = vadd.f32 %v4694_v2, %v4536_v10  ;;  %v3458_v19 = vpop.f32.mrf.mxu3  ;;  %v12923_v10 = vld [vmem:[%s20497_s4 + $0x250] sm:$0xf]  ;;  %v15240_v2 = vld [vmem:[%s20497_s4 + $0x254] sm:$0xf0] }
 0x855   :  { %v3852_v15 = vpop.f32.mrf.mxu1 }
 0x856   :  { %v3853_v25 = vadd.f32 %v3852_v15, %v3443_v41  ;;  %v12924_v15 = vor.u32 %v15240_v2, %v12923_v10  ;;  %v12931_v2 = vld [vmem:[%s20497_s4 + $0x260] sm:$0xf] }
 0x858   :  { %13324 = vmatmul.msk.f32.gmra.mxu2 %vm680_vm0, %v3853_v25 }
 0x85b   :  { %v4697_v53 = vpop.f32.mrf.mxu2  ;;  %3500 = vmatmul.bf16.gmra.mxu3 %v12924_v15  ;;  %v15242_v15 = vld [vmem:[%s20497_s4 + $0x264] sm:$0xf0] }
 0x85c   :  { %v17980_v8 = vadd.f32 %v4697_v53, %v4537_v21  ;;  %v3461_v3 = vpop.f32.mrf.mxu3  ;;  %v15235_v21 = vld [vmem:[%s20497_s4 + $0x234] sm:$0xf]  ;;  %v12909_v53 = vld [vmem:[%s20497_s4 + $0x238] sm:$0xf0]  ;;  %v12932_v34 = vor.u32 %v15242_v15, %v12931_v2  ;;  %v15244_v2 = vld [vmem:[%s20497_s4 + $0x274] sm:$0xf0] }
 0x85d   :  { %v3855_v32 = vpop.f32.mrf.mxu1 }
 0x85e   :  { %v3856_v41 = vadd.f32 %v3855_v32, %v3446_v16  ;;  %v12912_v32 = vor.u32 %v15235_v21, %v12909_v53  ;;  %v15237_v21 = vld [vmem:[%s20497_s4 + $0x244] sm:$0xf]  ;;  %v12917_v53 = vld [vmem:[%s20497_s4 + $0x248] sm:$0xf0] }
 0x860   :  { %3894 = vmatmul.bf16.gmra.mxu1 %v12904_v50  ;;  %13325 = vmatmul.msk.f32.gmra.mxu2 %vm680_vm0, %v3856_v41 }
 0x863   :  { %v4700_v48 = vpop.f32.mrf.mxu2 }
 0x864   :  { %v17991_v25 = vadd.f32 %v4700_v48, %v4538_v35  ;;  %v18005_v10 = vpop.f32.mrf.mxu3 }
 0x865   :  { %v3857_v16 = vpop.f32.mrf.mxu1 }
 0x866   :  { %v3858_v11 = vadd.f32 %v3857_v16, %v17936_v47 }
 0x868   :  { %13326 = vmatmul.msk.f32.gmra.mxu2 %vm680_vm0, %v3858_v11 }
 0x86b   :  { %v4703_v58 = vpop.f32.mrf.mxu2  ;;  %3505 = vmatmul.bf16.gmra.mxu3 %v12932_v34 }
 0x86c   :  { %v18003_v50 = vadd.f32 %v4703_v58, %v4539_v62  ;;  %v18018_v16 = vpop.f32.mrf.mxu3  ;;  %v12920_v58 = vor.u32 %v15237_v21, %v12917_v53 }
 0x86d   :  { %v3860_v41 = vpop.f32.mrf.mxu1 }
 0x86e   :  { %v3861_v47 = vadd.f32 %v3860_v41, %v3451_v45 }
 0x870   :  { %3899 = vmatmul.bf16.gmra.mxu1 %v12912_v32  ;;  %13327 = vmatmul.msk.f32.gmra.mxu2 %vm680_vm0, %v3861_v47  ;;  %v12939_v47 = vld [vmem:[%s20497_s4 + $0x270] sm:$0xf] }
 0x871   :  { %v12940_v9 = vor.u32 %v15244_v2, %v12939_v47  ;;  %v13343_v47 = vld [vmem:[%s20498_s5 + $0xb0] sm:$0xff] }
 0x872   :  { %4930 = vmatpush.msrb.mxu2 %v13343_v47 }
 0x873   :  { %v4706_v35 = vpop.f32.mrf.mxu2 }
 0x874   :  { %v18016_v48 = vadd.f32 %v4706_v35, %v4540_v60  ;;  %v18031_v41 = vpop.f32.mrf.mxu3 }
 0x875   :  { %v3862_v45 = vpop.f32.mrf.mxu1 }
 0x876   :  { %v3863_v11 = vadd.f32 %v3862_v45, %v3453_v1 }
 0x878   :  { %13328 = vmatmul.msk.f32.gmra.mxu2 %vm680_vm0, %v3863_v11  ;;  %v15239_v11 = vld [vmem:[%s20497_s4 + $0x254] sm:$0xf] }
 0x87b   :  { %v4709_v6 = vpop.f32.mrf.mxu2  ;;  %3510 = vmatmul.bf16.gmra.mxu3 %v12940_v9 }
 0x87c   :  { %v18029_v62 = vadd.f32 %v4709_v6, %v4541_v17  ;;  %v18047_v35 = vpop.f32.mrf.mxu3  ;;  %v12928_v17 = vor.u32 %v15239_v11, %v12925_v0  ;;  %v12933_v11 = vld [vmem:[%s20497_s4 + $0x268] sm:$0xf0]  ;;  %v13339_v0 = vld [vmem:[%s20498_s5 + $0x90] sm:$0xff] }
 0x87d   :  { %v3865_v32 = vpop.f32.mrf.mxu1 }
 0x87e   :  { %v3866_v1 = vadd.f32 %v3865_v32, %v3456_v36  ;;  %v13381_v36 = vld [vmem:[%s20498_s5 + $0xe0] sm:$0xff] }
 0x87f   :  { %5182 = vmatpush.msrb.mxu0 %v13381_v36  ;;  %v12947_v32 = vld [vmem:[%s20497_s4 + $0x280] sm:$0xf] }
 0x880   :  { %3904 = vmatmul.bf16.gmra.mxu1 %v12920_v58  ;;  %13329 = vmatmul.msk.f32.gmra.mxu2 %vm680_vm0, %v3866_v1  ;;  %v15246_v1 = vld [vmem:[%s20497_s4 + $0x284] sm:$0xf0] }
 0x881   :  { %v12948_v46 = vor.u32 %v15246_v1, %v12947_v32 }
 0x883   :  { %v4712_v15 = vpop.f32.mrf.mxu2 }
 0x884   :  { %v18042_v34 = vadd.f32 %v4712_v15, %v4542_v54  ;;  %v18060_v58 = vpop.f32.mrf.mxu3  ;;  %v13342_v54 = vld [vmem:[%s20498_s5 + $0xa8] sm:$0xff] }
 0x885   :  { %v3867_v60 = vpop.f32.mrf.mxu1  ;;  %4931 = vmatpush.msrb.mxu2 %v13342_v54 }
 0x886   :  { %v3868_v45 = vadd.f32 %v3867_v60, %v3458_v19 }
 0x888   :  { %13330 = vmatmul.msk.f32.gmra.mxu2 %vm680_vm0, %v3868_v45  ;;  %v15241_v45 = vld [vmem:[%s20497_s4 + $0x264] sm:$0xf] }
 0x88b   :  { %v4715_v21 = vpop.f32.mrf.mxu2  ;;  %3515 = vmatmul.bf16.gmra.mxu3 %v12948_v46 }
 0x88c   :  { %v18058_v53 = vadd.f32 %v4715_v21, %v4543_v5  ;;  %v18082_v36 = vpop.f32.mrf.mxu3 }
 0x88d   :  { %v3870_v6 = vpop.f32.mrf.mxu1 }
 0x88e   :  { %v3871_v19 = vadd.f32 %v3870_v6, %v3461_v3  ;;  %v4544_v3 = vadd.f32 %v17839_v51, %v17670_v29  ;;  %v13341_v29 = vld [vmem:[%s20498_s5 + $0xa0] sm:$0xff]  ;;  %v13340_v51 = vld [vmem:[%s20498_s5 + $0x98] sm:$0xff]  ;;  %v13338_v6 = vld [vmem:[%s20498_s5 + $0x88] sm:$0xff] }
 0x88f   :  { %4932 = vmatpush.msrb.mxu2 %v13341_v29  ;;  %v12941_v29 = vld [vmem:[%s20497_s4 + $0x278] sm:$0xf0] }
 0x890   :  { %3909 = vmatmul.bf16.gmra.mxu1 %v12928_v17  ;;  %13331 = vmatmul.msk.f32.gmra.mxu2 %vm680_vm0, %v3871_v19  ;;  %v12936_v17 = vor.u32 %v15241_v45, %v12933_v11 }
 0x891   :  { %4933 = vmatpush.msrb.mxu2 %v13340_v51 }
 0x893   :  { %v4718_v2 = vpop.f32.mrf.mxu2  ;;  %4934 = vmatpush.msrb.mxu2 %v13339_v0  ;;  %v12963_v0 = vld [vmem:[%s20497_s4 + $0x2a0] sm:$0xf] }
 0x894   :  { %v18077_v9 = vadd.f32 %v4718_v2, %v4544_v3  ;;  %v3478_v32 = vpop.f32.mrf.mxu3 }
 0x895   :  { %v3872_v15 = vpop.f32.mrf.mxu1  ;;  %4935 = vmatpush.msrb.mxu2 %v13338_v6 }
 0x896   :  { %v3873_v60 = vadd.f32 %v3872_v15, %v18005_v10  ;;  %v4545_v10 = vadd.f32 %v17852_v59, %v17691_v43  ;;  %v13337_v43 = vld [vmem:[%s20498_s5 + $0x80] sm:$0xff]  ;;  %v12955_v59 = vld [vmem:[%s20497_s4 + $0x290] sm:$0xf] }
 0x897   :  { %4936 = vmatpush.msrb.mxu2 %v13337_v43  ;;  %v12956_v46 = vor.u32 %v15248_v33, %v12955_v59  ;;  %v15245_v43 = vld [vmem:[%s20497_s4 + $0x284] sm:$0xf]  ;;  %v12949_v59 = vld [vmem:[%s20497_s4 + $0x288] sm:$0xf0] }
 0x898   :  { %13332 = vmatmul.msk.f32.gmra.mxu2 %vm680_vm0, %v3873_v60  ;;  %v15243_v60 = vld [vmem:[%s20497_s4 + $0x274] sm:$0xf] }
 0x899   :  { %v12944_v45 = vor.u32 %v15243_v60, %v12941_v29 }
 0x89b   :  { %v4721_v5 = vpop.f32.mrf.mxu2  ;;  %3520 = vmatmul.bf16.gmra.mxu3 %v12956_v46  ;;  %v12952_v46 = vor.u32 %v15245_v43, %v12949_v59 }
 0x89c   :  { %v18103_v21 = vadd.f32 %v4721_v5, %v4545_v10  ;;  %v3481_v54 = vpop.f32.mrf.mxu3  ;;  %v15250_v5 = vld [vmem:[%s20497_s4 + $0x2a4] sm:$0xf0] }
 0x89d   :  { %v3875_v19 = vpop.f32.mrf.mxu1 }
 0x89e   :  { %v3876_v1 = vadd.f32 %v3875_v19, %v18018_v16  ;;  %v4546_v16 = vadd.f32 %v17863_v20, %v17706_v31  ;;  %v4547_v31 = vadd.f32 %v17822_v27, %v17716_v22  ;;  %v12964_v22 = vor.u32 %v15250_v5, %v12963_v0 }
 0x89f   :  { %v4548_v27 = vadd.f32 %v17800_v14, %v17725_v37  ;;  %v4549_v37 = vadd.f32 %v17841_v13, %v17735_v38  ;;  %v4550_v13 = vadd.f32 %v17960_v40, %v17744_v61  ;;  %v4551_v61 = vadd.f32 %v17923_v42, %v17753_v55 }
 0x8a0   :  { %3914 = vmatmul.bf16.gmra.mxu1 %v12936_v17  ;;  %13333 = vmatmul.msk.f32.gmra.mxu2 %vm680_vm0, %v3876_v1  ;;  %v4552_v55 = vadd.f32 %v17904_v26, %v17762_v57  ;;  %v4553_v57 = vadd.f32 %v17946_v12, %v17771_v52  ;;  %v4554_v52 = vadd.f32 %v17869_v4, %v17782_v7 }
 0x8a1   :  { %v4555_v7 = vadd.f32 %v17888_v28, %v17798_v39  ;;  %v4556_v39 = vadd.f32 %v17895_v44, %v17811_v24  ;;  %v4557_v24 = vadd.f32 %v17854_v30, %v17824_v23  ;;  %v4558_v23 = vadd.f32 %v17835_v49, %v17837_v63 }
 0x8a3   :  { %v4724_v3 = vpop.f32.mrf.mxu2 }
 0x8a4   :  { %v18121_v47 = vadd.f32 %v4724_v3, %v4546_v16  ;;  %v3483_v10 = vpop.f32.mrf.mxu3 }
 0x8a5   :  { %v3877_v2 = vpop.f32.mrf.mxu1 }
 0x8a6   :  { %v3878_v15 = vadd.f32 %v3877_v2, %v18031_v41  ;;  %v12971_v2 = vld [vmem:[%s20497_s4 + $0x2b0] sm:$0xf] }
 0x8a8   :  { %13334 = vmatmul.msk.f32.gmra.mxu2 %vm680_vm0, %v3878_v15  ;;  %v15252_v15 = vld [vmem:[%s20497_s4 + $0x2b4] sm:$0xf0] }
 0x8a9   :  { %v12972_v38 = vor.u32 %v15252_v15, %v12971_v2  ;;  %v12987_v15 = vld [vmem:[%s20497_s4 + $0x2d0] sm:$0xf] }
 0x8ab   :  { %v4727_v20 = vpop.f32.mrf.mxu2  ;;  %3525 = vmatmul.bf16.gmra.mxu3 %v12964_v22 }
 0x8ac   :  { %v18133_v51 = vadd.f32 %v4727_v20, %v4547_v31 }
 0x8ad   :  { %v3880_v11 = vpop.f32.mrf.mxu1 }
 0x8ae   :  { %v3881_v41 = vadd.f32 %v3880_v11, %v18047_v35  ;;  %v3486_v19 = vpop.f32.mrf.mxu3  ;;  %v12957_v11 = vld [vmem:[%s20497_s4 + $0x298] sm:$0xf0] }
 0x8b0   :  { %3919 = vmatmul.bf16.gmra.mxu1 %v12944_v45  ;;  %13335 = vmatmul.msk.f32.gmra.mxu2 %vm680_vm0, %v3881_v41  ;;  %v15247_v45 = vld [vmem:[%s20497_s4 + $0x294] sm:$0xf] }
 0x8b1   :  { %v12960_v0 = vor.u32 %v15247_v45, %v12957_v11  ;;  %v15251_v45 = vld [vmem:[%s20497_s4 + $0x2b4] sm:$0xf]  ;;  %v12973_v11 = vld [vmem:[%s20497_s4 + $0x2b8] sm:$0xf0] }
 0x8b3   :  { %v4730_v17 = vpop.f32.mrf.mxu2 }
 0x8b4   :  { %v18145_v6 = vadd.f32 %v4730_v17, %v4548_v27  ;;  %v12979_v27 = vld [vmem:[%s20497_s4 + $0x2c0] sm:$0xf]  ;;  %v15254_v17 = vld [vmem:[%s20497_s4 + $0x2c4] sm:$0xf0] }
 0x8b5   :  { %v3882_v35 = vpop.f32.mrf.mxu1 }
 0x8b6   :  { %v3883_v1 = vadd.f32 %v3882_v35, %v18060_v58  ;;  %v3488_v3 = vpop.f32.mrf.mxu3  ;;  %v12980_v35 = vor.u32 %v15254_v17, %v12979_v27  ;;  %v15258_v27 = vld [vmem:[%s20497_s4 + $0x2e4] sm:$0xf0] }
 0x8b8   :  { %13336 = vmatmul.msk.f32.gmra.mxu2 %vm680_vm0, %v3883_v1 }
 0x8bb   :  { %v4733_v14 = vpop.f32.mrf.mxu2  ;;  %3530 = vmatmul.bf16.gmra.mxu3 %v12972_v38  ;;  %v15256_v38 = vld [vmem:[%s20497_s4 + $0x2d4] sm:$0xf0] }
 0x8bc   :  { %v18157_v33 = vadd.f32 %v4733_v14, %v4549_v37  ;;  %v15249_v37 = vld [vmem:[%s20497_s4 + $0x2a4] sm:$0xf]  ;;  %v12965_v14 = vld [vmem:[%s20497_s4 + $0x2a8] sm:$0xf0] }
 0x8bd   :  { %v3885_v16 = vpop.f32.mrf.mxu1 }
 0x8be   :  { %v3886_v58 = vadd.f32 %v3885_v16, %v18082_v36  ;;  %v3491_v31 = vpop.f32.mrf.mxu3  ;;  %v12968_v16 = vor.u32 %v15249_v37, %v12965_v14 }
 0x8c0   :  { %3924 = vmatmul.bf16.gmra.mxu1 %v12952_v46  ;;  %13345 = vmatmul.msk.f32.vlgmr.msrb.gmra.mxu2 %vm680_vm0, %v3886_v58 }
 0x8c3   :  { %v4736_v60 = vpop.f32.mrf.mxu2 }
 0x8c4   :  { %v18169_v29 = vadd.f32 %v4736_v60, %v4550_v13  ;;  %v12988_v13 = vor.u32 %v15256_v38, %v12987_v15 }
 0x8c5   :  { %v3887_v36 = vpop.f32.mrf.mxu1 }
 0x8c6   :  { %v3888_v20 = vadd.f32 %v3887_v36, %v3478_v32  ;;  %v3493_v22 = vpop.f32.mrf.mxu3 }
 0x8c8   :  { %13346 = vmatmul.msk.f32.gmra.mxu2 %vm680_vm0, %v3888_v20 }
 0x8cb   :  { %v4739_v40 = vpop.f32.mrf.mxu2  ;;  %3535 = vmatmul.bf16.gmra.mxu3 %v12980_v35 }
 0x8cc   :  { %v18180_v41 = vadd.f32 %v4739_v40, %v4551_v61  ;;  %v12976_v40 = vor.u32 %v15251_v45, %v12973_v11 }
 0x8cd   :  { %v3890_v5 = vpop.f32.mrf.mxu1 }
 0x8ce   :  { %v3891_v32 = vadd.f32 %v3890_v5, %v3481_v54  ;;  %v3496_v43 = vpop.f32.mrf.mxu3 }
 0x8d0   :  { %3929 = vmatmul.bf16.gmra.mxu1 %v12960_v0  ;;  %13347 = vmatmul.msk.f32.gmra.mxu2 %vm680_vm0, %v3891_v32  ;;  %v12995_v32 = vld [vmem:[%s20497_s4 + $0x2e0] sm:$0xf] }
 0x8d1   :  { %v12996_v17 = vor.u32 %v15258_v27, %v12995_v32  ;;  %v20677_v32 = vld [vmem:[#allocation35_spill] sm:$0xff]  ;;  %v20678_v27 = vld [vmem:[#allocation9_spill] sm:$0xff] }
 0x8d3   :  { %v4742_v42 = vpop.f32.mrf.mxu2 }
 0x8d4   :  { %v18191_v1 = vadd.f32 %v4742_v42, %v4552_v55 }
 0x8d5   :  { %v3892_v54 = vpop.f32.mrf.mxu1 }
 0x8d6   :  { %v3893_v59 = vadd.f32 %v3892_v54, %v3483_v10  ;;  %v3498_v2 = vpop.f32.mrf.mxu3  ;;  %v15253_v54 = vld [vmem:[%s20497_s4 + $0x2c4] sm:$0xf] }
 0x8d8   :  { %13348 = vmatmul.msk.f32.gmra.mxu2 %vm680_vm0, %v3893_v59  ;;  %v12981_v59 = vld [vmem:[%s20497_s4 + $0x2c8] sm:$0xf0] }
 0x8d9   :  { %v12984_v14 = vor.u32 %v15253_v54, %v12981_v59  ;;  %v15257_v54 = vld [vmem:[%s20497_s4 + $0x2e4] sm:$0xf]  ;;  %v12997_v59 = vld [vmem:[%s20497_s4 + $0x2e8] sm:$0xf0] }
 0x8db   :  { %v4745_v26 = vpop.f32.mrf.mxu2  ;;  %3540 = vmatmul.bf16.gmra.mxu3 %v12988_v13 }
 0x8dc   :  { %v18202_v46 = vadd.f32 %v4745_v26, %v4553_v57 }
 0x8dd   :  { %v3895_v58 = vpop.f32.mrf.mxu1 }
 0x8de   :  { %20671 = vst [vmem:[#allocation11_spill] sm:$0xff] %v18202_v46  ;;  %v3896_v10 = vadd.f32 %v3895_v58, %v3486_v19  ;;  %v3501_v36 = vpop.f32.mrf.mxu3  ;;  %v15260_v58 = vld [vmem:[%s20497_s4 + $0x2f4] sm:$0xf0] }
 0x8e0   :  { %3934 = vmatmul.bf16.gmra.mxu1 %v12968_v16  ;;  %13349 = vmatmul.msk.f32.gmra.mxu2 %vm680_vm0, %v3896_v10  ;;  %v13003_v16 = vld [vmem:[%s20497_s4 + $0x2f0] sm:$0xf] }
 0x8e1   :  { %v13004_v10 = vor.u32 %v15260_v58, %v13003_v16  ;;  %v13000_v16 = vor.u32 %v15257_v54, %v12997_v59  ;;  %v15266_v54 = vld [vmem:[%s20497_s4 + $0x324] sm:$0xf0] }
 0x8e3   :  { %v4748_v12 = vpop.f32.mrf.mxu2 }
 0x8e4   :  { %v18213_v60 = vadd.f32 %v4748_v12, %v4554_v52  ;;  %v15255_v52 = vld [vmem:[%s20497_s4 + $0x2d4] sm:$0xf]  ;;  %v12989_v12 = vld [vmem:[%s20497_s4 + $0x2d8] sm:$0xf0] }
 0x8e5   :  { %v3897_v19 = vpop.f32.mrf.mxu1  ;;  %v12992_v11 = vor.u32 %v15255_v52, %v12989_v12  ;;  %v20683_v52 = vld [vmem:[#allocation27_spill] sm:$0xff]  ;;  %v20684_v12 = vld [vmem:[#allocation56_spill] sm:$0xff] }
 0x8e6   :  { %v3898_v20 = vadd.f32 %v3897_v19, %v3488_v3  ;;  %v3503_v5 = vpop.f32.mrf.mxu3  ;;  %v20674_v19 = vld [vmem:[#allocation10_spill] sm:$0xff] }
 0x8e8   :  { %13350 = vmatmul.msk.f32.gmra.mxu2 %vm680_vm0, %v3898_v20  ;;  %v20675_v20 = vld [vmem:[#allocation38_spill] sm:$0xff] }
 0x8e9   :  { %v4559_v49 = vadd.f32 %v20675_v20, %v20674_v19 }
 0x8eb   :  { %v4751_v4 = vpop.f32.mrf.mxu2  ;;  %3545 = vmatmul.bf16.gmra.mxu3 %v12996_v17  ;;  %v4560_v17 = vadd.f32 %v20678_v27, %v20677_v32 }
 0x8ec   :  { %v18224_v61 = vadd.f32 %v4751_v4, %v4555_v7 }
 0x8ed   :  { %v3900_v0 = vpop.f32.mrf.mxu1 }
 0x8ee   :  { %20672 = vst [vmem:[#allocation58_spill] sm:$0xff] %v18224_v61  ;;  %v3901_v3 = vadd.f32 %v3900_v0, %v3491_v31  ;;  %v3506_v55 = vpop.f32.mrf.mxu3  ;;  %v15262_v0 = vld [vmem:[%s20497_s4 + $0x304] sm:$0xf0] }
 0x8f0   :  { %3939 = vmatmul.bf16.gmra.mxu1 %v12976_v40  ;;  %13351 = vmatmul.msk.f32.gmra.mxu2 %vm680_vm0, %v3901_v3  ;;  %v13011_v40 = vld [vmem:[%s20497_s4 + $0x300] sm:$0xf] }
 0x8f1   :  { %v13012_v3 = vor.u32 %v15262_v0, %v13011_v40  ;;  %v20686_v40 = vld [vmem:[#allocation22_spill] sm:$0xff]  ;;  %v20687_v0 = vld [vmem:[#allocation29_spill] sm:$0xff] }
 0x8f3   :  { %v4754_v28 = vpop.f32.mrf.mxu2 }
 0x8f4   :  { %v18235_v35 = vadd.f32 %v4754_v28, %v4556_v39 }
 0x8f5   :  { %v3902_v31 = vpop.f32.mrf.mxu1 }
 0x8f6   :  { %v3903_v42 = vadd.f32 %v3902_v31, %v3493_v22  ;;  %v3508_v26 = vpop.f32.mrf.mxu3 }
 0x8f8   :  { %13352 = vmatmul.msk.f32.gmra.mxu2 %vm680_vm0, %v3903_v42 }
 0x8fb   :  { %v4757_v44 = vpop.f32.mrf.mxu2  ;;  %3550 = vmatmul.bf16.gmra.mxu3 %v13004_v10 }
 0x8fc   :  { %v18246_v37 = vadd.f32 %v4757_v44, %v4557_v24  ;;  %v20680_v24 = vld [vmem:[#allocation26_spill] sm:$0xff]  ;;  %v20681_v44 = vld [vmem:[#allocation55_spill] sm:$0xff] }
 0x8fd   :  { %v3905_v57 = vpop.f32.mrf.mxu1 }
 0x8fe   :  { %20673 = vst [vmem:[#allocation59_spill] sm:$0xff] %v18246_v37  ;;  %v3906_v22 = vadd.f32 %v3905_v57, %v3496_v43  ;;  %v3511_v38 = vpop.f32.mrf.mxu3 }
 0x900   :  { %3944 = vmatmul.bf16.gmra.mxu1 %v12984_v14  ;;  %13353 = vmatmul.msk.f32.gmra.mxu2 %vm680_vm0, %v3906_v22  ;;  %v4561_v14 = vadd.f32 %v20681_v44, %v20680_v24  ;;  %v20689_v24 = vld [vmem:[#allocation23_spill] sm:$0xff]  ;;  %v20690_v44 = vld [vmem:[#allocation21_spill] sm:$0xff] }
 0x903   :  { %v4760_v30 = vpop.f32.mrf.mxu2 }
 0x904   :  { %v18257_v15 = vadd.f32 %v4760_v30, %v4558_v23  ;;  %v13380_v23 = vld [vmem:[%s20498_s5 + $0xd8] sm:$0xff]  ;;  %v13019_v30 = vld [vmem:[%s20497_s4 + $0x310] sm:$0xf] }
 0x905   :  { %v3907_v43 = vpop.f32.mrf.mxu1  ;;  %5183 = vmatpush.msrb.mxu0 %v13380_v23  ;;  %v15261_v23 = vld [vmem:[%s20497_s4 + $0x304] sm:$0xf] }
 0x906   :  { %v3908_v13 = vadd.f32 %v3907_v43, %v3498_v2  ;;  %v3513_v4 = vpop.f32.mrf.mxu3  ;;  %v15264_v43 = vld [vmem:[%s20497_s4 + $0x314] sm:$0xf0] }
 0x908   :  { %13354 = vmatmul.msk.f32.gmra.mxu2 %vm680_vm0, %v3908_v13  ;;  %v13020_v13 = vor.u32 %v15264_v43, %v13019_v30  ;;  %v13013_v30 = vld [vmem:[%s20497_s4 + $0x308] sm:$0xf0] }
 0x909   :  { %v20692_v43 = vld [vmem:[#allocation30_spill] sm:$0xff] }
 0x90b   :  { %v4763_v63 = vpop.f32.mrf.mxu2  ;;  %3555 = vmatmul.bf16.gmra.mxu3 %v13012_v3  ;;  %v4563_v3 = vadd.f32 %v20687_v0, %v20686_v40 }
 0x90c   :  { %v18268_v45 = vadd.f32 %v4763_v63, %v4559_v49 }
 0x90d   :  { %v3910_v7 = vpop.f32.mrf.mxu1 }
 0x90e   :  { %20676 = vst [vmem:[#allocation12_spill] sm:$0xff] %v18268_v45  ;;  %v3911_v2 = vadd.f32 %v3910_v7, %v3501_v36  ;;  %v3516_v31 = vpop.f32.mrf.mxu3  ;;  %v15259_v7 = vld [vmem:[%s20497_s4 + $0x2f4] sm:$0xf]  ;;  %v15309_v45 = vld [vmem:[%s20497_s4 + $0x484] sm:$0xf] }
 0x910   :  { %3949 = vmatmul.bf16.gmra.mxu1 %v12992_v11  ;;  %13355 = vmatmul.msk.f32.gmra.mxu2 %vm680_vm0, %v3911_v2  ;;  %v13005_v2 = vld [vmem:[%s20497_s4 + $0x2f8] sm:$0xf0] }
 0x913   :  { %v4766_v39 = vpop.f32.mrf.mxu2 }
 0x914   :  { %v18279_v28 = vadd.f32 %v4766_v39, %v4560_v17  ;;  %v13008_v17 = vor.u32 %v15259_v7, %v13005_v2  ;;  %v13035_v7 = vld [vmem:[%s20497_s4 + $0x330] sm:$0xf]  ;;  %v15268_v2 = vld [vmem:[%s20497_s4 + $0x334] sm:$0xf0] }
 0x915   :  { %v3912_v36 = vpop.f32.mrf.mxu1  ;;  %v13036_v40 = vor.u32 %v15268_v2, %v13035_v7  ;;  %v15272_v2 = vld [vmem:[%s20497_s4 + $0x354] sm:$0xf0] }
 0x916   :  { %20679 = vst [vmem:[#allocation39_spill] sm:$0xff] %v18279_v28  ;;  %v3913_v42 = vadd.f32 %v3912_v36, %v3503_v5  ;;  %v3518_v10 = vpop.f32.mrf.mxu3 }
 0x918   :  { %13356 = vmatmul.msk.f32.gmra.mxu2 %vm680_vm0, %v3913_v42  ;;  %v13027_v42 = vld [vmem:[%s20497_s4 + $0x320] sm:$0xf] }
 0x919   :  { %v13028_v59 = vor.u32 %v15266_v54, %v13027_v42  ;;  %v20695_v54 = vld [vmem:[#allocation31_spill] sm:$0xff] }
 0x91b   :  { %v4769_v57 = vpop.f32.mrf.mxu2  ;;  %3560 = vmatmul.bf16.gmra.mxu3 %v13020_v13  ;;  %v20693_v13 = vld [vmem:[#allocation28_spill] sm:$0xff] }
 0x91c   :  { %v18290_v22 = vadd.f32 %v4769_v57, %v4561_v14  ;;  %v4564_v14 = vadd.f32 %v20690_v44, %v20689_v24 }
 0x91d   :  { %v3915_v58 = vpop.f32.mrf.mxu1 }
 0x91e   :  { %20682 = vst [vmem:[#allocation51_spill] sm:$0xff] %v18290_v22  ;;  %v3916_v5 = vadd.f32 %v3915_v58, %v3506_v55  ;;  %v4562_v55 = vadd.f32 %v20684_v12, %v20683_v52  ;;  %v3521_v63 = vpop.f32.mrf.mxu3  ;;  %v4565_v52 = vadd.f32 %v20693_v13, %v20692_v43  ;;  %v15265_v13 = vld [vmem:[%s20497_s4 + $0x324] sm:$0xf] }
 0x920   :  { %3954 = vmatmul.bf16.gmra.mxu1 %v13000_v16  ;;  %13357 = vmatmul.msk.f32.gmra.mxu2 %vm680_vm0, %v3916_v5 }
 0x923   :  { %v4772_v19 = vpop.f32.mrf.mxu2 }
 0x924   :  { %v18304_v20 = vadd.f32 %v4772_v19, %v4562_v55  ;;  %v13016_v19 = vor.u32 %v15261_v23, %v13013_v30 }
 0x925   :  { %v3917_v49 = vpop.f32.mrf.mxu1 }
 0x926   :  { %20685 = vst [vmem:[#allocation42_spill] sm:$0xff] %v18304_v20  ;;  %v3918_v11 = vadd.f32 %v3917_v49, %v3508_v26  ;;  %v3523_v36 = vpop.f32.mrf.mxu3 }
 0x928   :  { %13358 = vmatmul.msk.f32.gmra.mxu2 %vm680_vm0, %v3918_v11 }
 0x92b   :  { %v4775_v32 = vpop.f32.mrf.mxu2  ;;  %3565 = vmatmul.bf16.gmra.mxu3 %v13028_v59 }
 0x92c   :  { %v18315_v27 = vadd.f32 %v4775_v32, %v4563_v3 }
 0x92d   :  { %v3920_v39 = vpop.f32.mrf.mxu1 }
 0x92e   :  { %20688 = vst [vmem:[#allocation52_spill] sm:$0xff] %v18315_v27  ;;  %v3921_v26 = vadd.f32 %v3920_v39, %v3511_v38  ;;  %v3526_v58 = vpop.f32.mrf.mxu3  ;;  %v15263_v39 = vld [vmem:[%s20497_s4 + $0x314] sm:$0xf] }
 0x92f   :  { %v15307_v27 = vld [vmem:[%s20497_s4 + $0x474] sm:$0xf] }
 0x930   :  { %3959 = vmatmul.bf16.gmra.mxu1 %v13008_v17  ;;  %13359 = vmatmul.msk.f32.gmra.mxu2 %vm680_vm0, %v3921_v26  ;;  %v13021_v26 = vld [vmem:[%s20497_s4 + $0x318] sm:$0xf0] }
 0x931   :  { %v13024_v24 = vor.u32 %v15263_v39, %v13021_v26  ;;  %v15267_v39 = vld [vmem:[%s20497_s4 + $0x334] sm:$0xf]  ;;  %v13037_v26 = vld [vmem:[%s20497_s4 + $0x338] sm:$0xf0] }
 0x933   :  { %v4778_v57 = vpop.f32.mrf.mxu2 }
 0x934   :  { %v18326_v16 = vadd.f32 %v4778_v57, %v4564_v14  ;;  %v15270_v57 = vld [vmem:[%s20497_s4 + $0x344] sm:$0xf0] }
 0x935   :  { %v3922_v38 = vpop.f32.mrf.mxu1 }
 0x936   :  { %20691 = vst [vmem:[#allocation24_spill] sm:$0xff] %v18326_v16  ;;  %v3923_v5 = vadd.f32 %v3922_v38, %v3513_v4  ;;  %v3528_v11 = vpop.f32.mrf.mxu3  ;;  %v13417_v16 = vld [vmem:[%s20498_s5 + $0x100] sm:$0xff] }
 0x938   :  { %13360 = vmatmul.msk.f32.gmra.mxu2 %vm680_vm0, %v3923_v5 }
 0x93b   :  { %v4781_v12 = vpop.f32.mrf.mxu2  ;;  %3570 = vmatmul.bf16.gmra.mxu3 %v13036_v40 }
 0x93c   :  { %v18337_v55 = vadd.f32 %v4781_v12, %v4565_v52  ;;  %v13029_v52 = vld [vmem:[%s20497_s4 + $0x328] sm:$0xf0] }
 0x93d   :  { %v3925_v49 = vpop.f32.mrf.mxu1 }
 0x93e   :  { %20694 = vst [vmem:[#allocation25_spill] sm:$0xff] %v18337_v55  ;;  %v3926_v4 = vadd.f32 %v3925_v49, %v3516_v31  ;;  %v3531_v17 = vpop.f32.mrf.mxu3  ;;  %v13032_v49 = vor.u32 %v15265_v13, %v13029_v52  ;;  %v13045_v13 = vld [vmem:[%s20497_s4 + $0x348] sm:$0xf0] }
 0x940   :  { %3964 = vmatmul.bf16.gmra.mxu1 %v13016_v19  ;;  %13361 = vmatmul.msk.f32.gmra.mxu2 %vm680_vm0, %v3926_v4 }
 0x943   :  { %v4938_v0 = vpop.f32.mrf.mxu2 }
 0x944   :  { %v18347_v3 = vadd.f32 %v4938_v0, %v17948_v56 }
 0x945   :  { %v3927_v32 = vpop.f32.mrf.mxu1 }
 0x946   :  { %v3928_v31 = vadd.f32 %v3927_v32, %v3518_v10  ;;  %v3533_v44 = vpop.f32.mrf.mxu3  ;;  %v13043_v10 = vld [vmem:[%s20497_s4 + $0x340] sm:$0xf] }
 0x947   :  { %v13044_v38 = vor.u32 %v15270_v57, %v13043_v10  ;;  %v15274_v10 = vld [vmem:[%s20497_s4 + $0x364] sm:$0xf0] }
 0x948   :  { %13362 = vmatmul.msk.f32.gmra.mxu2 %vm680_vm0, %v3928_v31 }
 0x94b   :  { %v4941_v42 = vpop.f32.mrf.mxu2  ;;  %3575 = vmatmul.bf16.gmra.mxu3 %v13044_v38 }
 0x94c   :  { %v18357_v59 = vadd.f32 %v4941_v42, %v20695_v54 }
 0x94d   :  { %v3930_v56 = vpop.f32.mrf.mxu1 }
 0x94e   :  { %v3931_v14 = vadd.f32 %v3930_v56, %v3521_v63  ;;  %v3536_v43 = vpop.f32.mrf.mxu3 }
 0x950   :  { %3969 = vmatmul.bf16.gmra.mxu1 %v13024_v24  ;;  %13363 = vmatmul.msk.f32.gmra.mxu2 %vm680_vm0, %v3931_v14  ;;  %v13040_v24 = vor.u32 %v15267_v39, %v13037_v26 }
 0x953   :  { %v4944_v5 = vpop.f32.mrf.mxu2 }
 0x954   :  { %v18367_v23 = vadd.f32 %v4944_v5, %v17970_v18 }
 0x955   :  { %v3932_v30 = vpop.f32.mrf.mxu1 }
 0x956   :  { %v3933_v63 = vadd.f32 %v3932_v30, %v3523_v36  ;;  %v3538_v4 = vpop.f32.mrf.mxu3  ;;  %v13051_v36 = vld [vmem:[%s20497_s4 + $0x350] sm:$0xf] }
 0x957   :  { %v13052_v40 = vor.u32 %v15272_v2, %v13051_v36  ;;  %v15276_v36 = vld [vmem:[%s20497_s4 + $0x374] sm:$0xf0] }
 0x958   :  { %13364 = vmatmul.msk.f32.gmra.mxu2 %vm680_vm0, %v3933_v63  ;;  %v15269_v63 = vld [vmem:[%s20497_s4 + $0x344] sm:$0xf] }
 0x95b   :  { %v4947_v12 = vpop.f32.mrf.mxu2  ;;  %3580 = vmatmul.bf16.gmra.mxu3 %v13052_v40 }
 0x95c   :  { %v18377_v19 = vadd.f32 %v4947_v12, %v17980_v8 }
 0x95d   :  { %v3935_v18 = vpop.f32.mrf.mxu1 }
 0x95e   :  { %v3936_v7 = vadd.f32 %v3935_v18, %v3526_v58  ;;  %v3541_v31 = vpop.f32.mrf.mxu3 }
 0x960   :  { %3974 = vmatmul.bf16.gmra.mxu1 %v13032_v49  ;;  %13365 = vmatmul.msk.f32.gmra.mxu2 %vm680_vm0, %v3936_v7  ;;  %v13048_v49 = vor.u32 %v15269_v63, %v13045_v13 }
 0x963   :  { %v4950_v0 = vpop.f32.mrf.mxu2 }
 0x964   :  { %v18387_v8 = vadd.f32 %v4950_v0, %v17991_v25 }
 0x965   :  { %v3937_v32 = vpop.f32.mrf.mxu1 }
 0x966   :  { %v3938_v58 = vadd.f32 %v3937_v32, %v3528_v11  ;;  %v3543_v56 = vpop.f32.mrf.mxu3  ;;  %v13059_v11 = vld [vmem:[%s20497_s4 + $0x360] sm:$0xf]  ;;  %v13053_v32 = vld [vmem:[%s20497_s4 + $0x358] sm:$0xf0] }
 0x967   :  { %v13060_v57 = vor.u32 %v15274_v10, %v13059_v11 }
 0x968   :  { %13366 = vmatmul.msk.f32.gmra.mxu2 %vm680_vm0, %v3938_v58 }
 0x96b   :  { %v4953_v42 = vpop.f32.mrf.mxu2  ;;  %3585 = vmatmul.bf16.gmra.mxu3 %v13060_v57  ;;  %v13061_v57 = vld [vmem:[%s20497_s4 + $0x368] sm:$0xf0] }
 0x96c   :  { %v18397_v54 = vadd.f32 %v4953_v42, %v18003_v50 }
 0x96d   :  { %v3940_v25 = vpop.f32.mrf.mxu1 }
 0x96e   :  { %v3941_v14 = vadd.f32 %v3940_v25, %v3531_v17  ;;  %v3546_v30 = vpop.f32.mrf.mxu3 }
 0x970   :  { %3979 = vmatmul.bf16.gmra.mxu1 %v13040_v24  ;;  %13367 = vmatmul.msk.f32.gmra.mxu2 %vm680_vm0, %v3941_v14  ;;  %v13075_v24 = vld [vmem:[%s20497_s4 + $0x380] sm:$0xf] }
 0x973   :  { %v4956_v38 = vpop.f32.mrf.mxu2 }
 0x974   :  { %v18407_v50 = vadd.f32 %v4956_v38, %v18016_v48  ;;  %v13379_v38 = vld [vmem:[%s20498_s5 + $0xd0] sm:$0xff] }
 0x975   :  { %v3942_v5 = vpop.f32.mrf.mxu1  ;;  %5184 = vmatpush.msrb.mxu0 %v13379_v38 }
 0x976   :  { %v3943_v17 = vadd.f32 %v3942_v5, %v3533_v44  ;;  %v3548_v18 = vpop.f32.mrf.mxu3  ;;  %v13067_v44 = vld [vmem:[%s20497_s4 + $0x370] sm:$0xf] }
 0x977   :  { %v13068_v2 = vor.u32 %v15276_v36, %v13067_v44 }
 0x978   :  { %13368 = vmatmul.msk.f32.gmra.mxu2 %vm680_vm0, %v3943_v17 }
 0x97b   :  { %v4959_v52 = vpop.f32.mrf.mxu2  ;;  %3590 = vmatmul.bf16.gmra.mxu3 %v13068_v2  ;;  %v15275_v2 = vld [vmem:[%s20497_s4 + $0x374] sm:$0xf] }
 0x97c   :  { %v18417_v12 = vadd.f32 %v4959_v52, %v18029_v62  ;;  %v13377_v52 = vld [vmem:[%s20498_s5 + $0xc0] sm:$0xff] }
 0x97d   :  { %v3945_v48 = vpop.f32.mrf.mxu1 }
 0x97e   :  { %v3946_v7 = vadd.f32 %v3945_v48, %v3536_v43  ;;  %v3551_v62 = vpop.f32.mrf.mxu3  ;;  %v15271_v43 = vld [vmem:[%s20497_s4 + $0x354] sm:$0xf]  ;;  %v15280_v48 = vld [vmem:[%s20497_s4 + $0x394] sm:$0xf0] }
 0x97f   :  { %v13056_v58 = vor.u32 %v15271_v43, %v13053_v32 }
 0x980   :  { %3984 = vmatmul.bf16.gmra.mxu1 %v13048_v49  ;;  %13369 = vmatmul.msk.f32.gmra.mxu2 %vm680_vm0, %v3946_v7  ;;  %v13083_v49 = vld [vmem:[%s20497_s4 + $0x390] sm:$0xf] }
 0x981   :  { %v13084_v7 = vor.u32 %v15280_v48, %v13083_v49  ;;  %v13085_v49 = vld [vmem:[%s20497_s4 + $0x398] sm:$0xf0] }
 0x985   :  { %v3947_v40 = vpop.f32.mrf.mxu1 }
 0x986   :  { %v3948_v0 = vadd.f32 %v3947_v40, %v3538_v4  ;;  %v3553_v26 = vpop.f32.mrf.mxu3  ;;  %v15278_v4 = vld [vmem:[%s20497_s4 + $0x384] sm:$0xf0]  ;;  %v13069_v40 = vld [vmem:[%s20497_s4 + $0x378] sm:$0xf0] }
 0x987   :  { %v13076_v25 = vor.u32 %v15278_v4, %v13075_v24 }
 0x988   :  { %13370 = vmatmul.msk.f32.gmra.mxu2 %vm680_vm0, %v3948_v0  ;;  %v13072_v0 = vor.u32 %v15275_v2, %v13069_v40  ;;  %v13107_v2 = vld [vmem:[%s20497_s4 + $0x3c0] sm:$0xf] }
 0x98b   :  { %3595 = vmatmul.bf16.gmra.mxu3 %v13076_v25 }
 0x98d   :  { %v3950_v39 = vpop.f32.mrf.mxu1 }
 0x98e   :  { %v3951_v42 = vadd.f32 %v3950_v39, %v3541_v31  ;;  %v3556_v11 = vpop.f32.mrf.mxu3  ;;  %v15273_v31 = vld [vmem:[%s20497_s4 + $0x364] sm:$0xf]  ;;  %v13091_v39 = vld [vmem:[%s20497_s4 + $0x3a0] sm:$0xf] }
 0x98f   :  { %v13064_v5 = vor.u32 %v15273_v31, %v13061_v57 }
 0x990   :  { %3989 = vmatmul.bf16.gmra.mxu1 %v13056_v58  ;;  %13371 = vmatmul.msk.f32.gmra.mxu2 %vm680_vm0, %v3951_v42 }
 0x995   :  { %v3952_v14 = vpop.f32.mrf.mxu1 }
 0x996   :  { %v3953_v10 = vadd.f32 %v3952_v14, %v3543_v56  ;;  %v13378_v56 = vld [vmem:[%s20498_s5 + $0xc8] sm:$0xff]  ;;  %v3558_v63 = vpop.f32.mrf.mxu3 }
 0x997   :  { %5185 = vmatpush.msrb.mxu0 %v13378_v56  ;;  %v13077_v14 = vld [vmem:[%s20497_s4 + $0x388] sm:$0xf0] }
 0x998   :  { %13372 = vmatmul.msk.f32.gmra.mxu2 %vm680_vm0, %v3953_v10 }
 0x999   :  { %5186 = vmatpush.msrb.mxu0 %v13377_v52 }
 0x99b   :  { %3600 = vmatmul.bf16.gmra.mxu3 %v13084_v7 }
 0x99d   :  { %v3955_v17 = vpop.f32.mrf.mxu1 }
 0x99e   :  { %v3956_v13 = vadd.f32 %v3955_v17, %v3546_v30  ;;  %v3561_v30 = vpop.f32.mrf.mxu3 }
 0x9a0   :  { %3994 = vmatmul.bf16.gmra.mxu1 %v13064_v5  ;;  %13373 = vmatmul.msk.f32.gmra.mxu2 %vm680_vm0, %v3956_v13  ;;  %v13099_v5 = vld [vmem:[%s20497_s4 + $0x3b0] sm:$0xf] }
 0x9a5   :  { %v3957_v44 = vpop.f32.mrf.mxu1 }
 0x9a6   :  { %v3958_v36 = vadd.f32 %v3957_v44, %v3548_v18  ;;  %v3563_v32 = vpop.f32.mrf.mxu3  ;;  %v15282_v18 = vld [vmem:[%s20497_s4 + $0x3a4] sm:$0xf0] }
 0x9a7   :  { %v13092_v42 = vor.u32 %v15282_v18, %v13091_v39  ;;  %v13093_v39 = vld [vmem:[%s20497_s4 + $0x3a8] sm:$0xf0] }
 0x9a8   :  { %13374 = vmatmul.msk.f32.gmra.mxu2 %vm680_vm0, %v3958_v36 }
 0x9ab   :  { %3605 = vmatmul.bf16.gmra.mxu3 %v13092_v42 }
 0x9ad   :  { %v3960_v43 = vpop.f32.mrf.mxu1 }
 0x9ae   :  { %v3961_v58 = vadd.f32 %v3960_v43, %v3551_v62  ;;  %v3566_v4 = vpop.f32.mrf.mxu3  ;;  %v15277_v62 = vld [vmem:[%s20497_s4 + $0x384] sm:$0xf] }
 0x9af   :  { %v13080_v10 = vor.u32 %v15277_v62, %v13077_v14  ;;  %v13115_v62 = vld [vmem:[%s20497_s4 + $0x3d0] sm:$0xf] }
 0x9b0   :  { %3999 = vmatmul.bf16.gmra.mxu1 %v13072_v0  ;;  %13375 = vmatmul.msk.f32.gmra.mxu2 %vm680_vm0, %v3961_v58 }
 0x9b5   :  { %v3962_v24 = vpop.f32.mrf.mxu1 }
 0x9b6   :  { %v3963_v25 = vadd.f32 %v3962_v24, %v3553_v26  ;;  %v3568_v57 = vpop.f32.mrf.mxu3  ;;  %v15284_v26 = vld [vmem:[%s20497_s4 + $0x3b4] sm:$0xf0] }
 0x9b7   :  { %v13100_v56 = vor.u32 %v15284_v26, %v13099_v5  ;;  %v13101_v5 = vld [vmem:[%s20497_s4 + $0x3b8] sm:$0xf0] }
 0x9b8   :  { %13376 = vmatmul.msk.f32.gmra.mxu2 %vm680_vm0, %v3963_v25 }
 0x9bb   :  { %3610 = vmatmul.bf16.gmra.mxu3 %v13100_v56 }
 0x9bd   :  { %v3965_v31 = vpop.f32.mrf.mxu1 }
 0x9be   :  { %v3966_v38 = vadd.f32 %v3965_v31, %v3556_v11  ;;  %v3571_v13 = vpop.f32.mrf.mxu3  ;;  %v15279_v11 = vld [vmem:[%s20497_s4 + $0x394] sm:$0xf] }
 0x9bf   :  { %v13088_v48 = vor.u32 %v15279_v11, %v13085_v49  ;;  %v13123_v11 = vld [vmem:[%s20497_s4 + $0x3e0] sm:$0xf] }
 0x9c0   :  { %4004 = vmatmul.bf16.gmra.mxu1 %v13080_v10  ;;  %13385 = vmatmul.msk.f32.vlgmr.msrb.gmra.mxu0 %vm680_vm0, %v3966_v38 }
 0x9c5   :  { %v3967_v17 = vpop.f32.mrf.mxu1 }
 0x9c6   :  { %v3968_v52 = vadd.f32 %v3967_v17, %v3558_v63  ;;  %v3573_v44 = vpop.f32.mrf.mxu3  ;;  %v15286_v63 = vld [vmem:[%s20497_s4 + $0x3c4] sm:$0xf0] }
 0x9c7   :  { %v13108_v40 = vor.u32 %v15286_v63, %v13107_v2  ;;  %v13109_v2 = vld [vmem:[%s20497_s4 + $0x3c8] sm:$0xf0] }
 0x9c8   :  { %13386 = vmatmul.msk.f32.gmra.mxu0 %vm680_vm0, %v3968_v52 }
 0x9cb   :  { %3615 = vmatmul.bf16.gmra.mxu3 %v13108_v40 }
 0x9cd   :  { %v3970_v7 = vpop.f32.mrf.mxu1 }
 0x9ce   :  { %v3971_v36 = vadd.f32 %v3970_v7, %v3561_v30  ;;  %v3576_v43 = vpop.f32.mrf.mxu3  ;;  %v15281_v30 = vld [vmem:[%s20497_s4 + $0x3a4] sm:$0xf] }
 0x9cf   :  { %v13096_v18 = vor.u32 %v15281_v30, %v13093_v39  ;;  %v13131_v30 = vld [vmem:[%s20497_s4 + $0x3f0] sm:$0xf] }
 0x9d0   :  { %4009 = vmatmul.bf16.gmra.mxu1 %v13088_v48  ;;  %13387 = vmatmul.msk.f32.gmra.mxu0 %vm680_vm0, %v3971_v36 }
 0x9d5   :  { %v3972_v0 = vpop.f32.mrf.mxu1 }
 0x9d6   :  { %v3973_v58 = vadd.f32 %v3972_v0, %v3563_v32  ;;  %v3578_v24 = vpop.f32.mrf.mxu3  ;;  %v15288_v32 = vld [vmem:[%s20497_s4 + $0x3d4] sm:$0xf0] }
 0x9d7   :  { %v13116_v14 = vor.u32 %v15288_v32, %v13115_v62  ;;  %v13117_v62 = vld [vmem:[%s20497_s4 + $0x3d8] sm:$0xf0] }
 0x9d8   :  { %13388 = vmatmul.msk.f32.gmra.mxu0 %vm680_vm0, %v3973_v58 }
 0x9db   :  { %3620 = vmatmul.bf16.gmra.mxu3 %v13116_v14 }
 0x9dd   :  { %v3975_v42 = vpop.f32.mrf.mxu1 }
 0x9de   :  { %v3976_v25 = vadd.f32 %v3975_v42, %v3566_v4  ;;  %v3581_v31 = vpop.f32.mrf.mxu3  ;;  %v15283_v4 = vld [vmem:[%s20497_s4 + $0x3b4] sm:$0xf] }
 0x9df   :  { %v13104_v26 = vor.u32 %v15283_v4, %v13101_v5  ;;  %v13139_v4 = vld [vmem:[%s20497_s4 + $0x400] sm:$0xf] }
 0x9e0   :  { %4014 = vmatmul.bf16.gmra.mxu1 %v13096_v18  ;;  %13389 = vmatmul.msk.f32.gmra.mxu0 %vm680_vm0, %v3976_v25 }
 0x9e5   :  { %v3977_v10 = vpop.f32.mrf.mxu1 }
 0x9e6   :  { %v3978_v38 = vadd.f32 %v3977_v10, %v3568_v57  ;;  %v3583_v17 = vpop.f32.mrf.mxu3  ;;  %v15290_v57 = vld [vmem:[%s20497_s4 + $0x3e4] sm:$0xf0] }
 0x9e7   :  { %v13124_v49 = vor.u32 %v15290_v57, %v13123_v11  ;;  %v13125_v11 = vld [vmem:[%s20497_s4 + $0x3e8] sm:$0xf0] }
 0x9e8   :  { %13390 = vmatmul.msk.f32.gmra.mxu0 %vm680_vm0, %v3978_v38 }
 0x9eb   :  { %3625 = vmatmul.bf16.gmra.mxu3 %v13124_v49 }
 0x9ed   :  { %v3980_v56 = vpop.f32.mrf.mxu1 }
 0x9ee   :  { %v3981_v52 = vadd.f32 %v3980_v56, %v3571_v13  ;;  %v3586_v7 = vpop.f32.mrf.mxu3  ;;  %v15285_v13 = vld [vmem:[%s20497_s4 + $0x3c4] sm:$0xf] }
 0x9ef   :  { %v13112_v63 = vor.u32 %v15285_v13, %v13109_v2  ;;  %v13147_v13 = vld [vmem:[%s20497_s4 + $0x410] sm:$0xf] }
 0x9f0   :  { %4019 = vmatmul.bf16.gmra.mxu1 %v13104_v26  ;;  %13391 = vmatmul.msk.f32.gmra.mxu0 %vm680_vm0, %v3981_v52 }
 0x9f5   :  { %v3982_v48 = vpop.f32.mrf.mxu1 }
 0x9f6   :  { %v3983_v36 = vadd.f32 %v3982_v48, %v3573_v44  ;;  %v3588_v0 = vpop.f32.mrf.mxu3  ;;  %v15292_v44 = vld [vmem:[%s20497_s4 + $0x3f4] sm:$0xf0] }
 0x9f7   :  { %v13132_v39 = vor.u32 %v15292_v44, %v13131_v30  ;;  %v13133_v30 = vld [vmem:[%s20497_s4 + $0x3f8] sm:$0xf0] }
 0x9f8   :  { %13392 = vmatmul.msk.f32.gmra.mxu0 %vm680_vm0, %v3983_v36 }
 0x9fb   :  { %3630 = vmatmul.bf16.gmra.mxu3 %v13132_v39 }
 0x9fd   :  { %v3985_v40 = vpop.f32.mrf.mxu1 }
 0x9fe   :  { %v3986_v58 = vadd.f32 %v3985_v40, %v3576_v43  ;;  %v3591_v42 = vpop.f32.mrf.mxu3  ;;  %v15287_v43 = vld [vmem:[%s20497_s4 + $0x3d4] sm:$0xf] }
 0x9ff   :  { %v13120_v32 = vor.u32 %v15287_v43, %v13117_v62  ;;  %v13155_v43 = vld [vmem:[%s20497_s4 + $0x420] sm:$0xf] }
 0xa00   :  { %4024 = vmatmul.bf16.gmra.mxu1 %v13112_v63  ;;  %13393 = vmatmul.msk.f32.gmra.mxu0 %vm680_vm0, %v3986_v58 }
 0xa05   :  { %v3987_v18 = vpop.f32.mrf.mxu1 }
 0xa06   :  { %v3988_v25 = vadd.f32 %v3987_v18, %v3578_v24  ;;  %v3593_v10 = vpop.f32.mrf.mxu3  ;;  %v15294_v24 = vld [vmem:[%s20497_s4 + $0x404] sm:$0xf0] }
 0xa07   :  { %v13140_v5 = vor.u32 %v15294_v24, %v13139_v4  ;;  %v13141_v4 = vld [vmem:[%s20497_s4 + $0x408] sm:$0xf0] }
 0xa08   :  { %13394 = vmatmul.msk.f32.gmra.mxu0 %vm680_vm0, %v3988_v25 }
 0xa0b   :  { %3635 = vmatmul.bf16.gmra.mxu3 %v13140_v5 }
 0xa0d   :  { %v3990_v14 = vpop.f32.mrf.mxu1 }
 0xa0e   :  { %v3991_v38 = vadd.f32 %v3990_v14, %v3581_v31  ;;  %v3596_v56 = vpop.f32.mrf.mxu3  ;;  %v15289_v31 = vld [vmem:[%s20497_s4 + $0x3e4] sm:$0xf] }
 0xa0f   :  { %v13128_v57 = vor.u32 %v15289_v31, %v13125_v11  ;;  %v15300_v11 = vld [vmem:[%s20497_s4 + $0x434] sm:$0xf0] }
 0xa10   :  { %4029 = vmatmul.bf16.gmra.mxu1 %v13120_v32  ;;  %13395 = vmatmul.msk.f32.gmra.mxu0 %vm680_vm0, %v3991_v38 }
 0xa15   :  { %v3992_v26 = vpop.f32.mrf.mxu1 }
 0xa16   :  { %v3993_v52 = vadd.f32 %v3992_v26, %v3583_v17  ;;  %v3598_v48 = vpop.f32.mrf.mxu3  ;;  %v15296_v17 = vld [vmem:[%s20497_s4 + $0x414] sm:$0xf0] }
 0xa17   :  { %v13148_v2 = vor.u32 %v15296_v17, %v13147_v13 }
 0xa18   :  { %13396 = vmatmul.msk.f32.gmra.mxu0 %vm680_vm0, %v3993_v52 }
 0xa1b   :  { %3640 = vmatmul.bf16.gmra.mxu3 %v13148_v2  ;;  %v13149_v2 = vld [vmem:[%s20497_s4 + $0x418] sm:$0xf0] }
 0xa1d   :  { %v3995_v49 = vpop.f32.mrf.mxu1 }
 0xa1e   :  { %v3996_v36 = vadd.f32 %v3995_v49, %v3586_v7  ;;  %v3601_v40 = vpop.f32.mrf.mxu3  ;;  %v15291_v7 = vld [vmem:[%s20497_s4 + $0x3f4] sm:$0xf] }
 0xa1f   :  { %v13136_v44 = vor.u32 %v15291_v7, %v13133_v30 }
 0xa20   :  { %4034 = vmatmul.bf16.gmra.mxu1 %v13128_v57  ;;  %13397 = vmatmul.msk.f32.gmra.mxu0 %vm680_vm0, %v3996_v36 }
 0xa25   :  { %v3997_v63 = vpop.f32.mrf.mxu1 }
 0xa26   :  { %v3998_v58 = vadd.f32 %v3997_v63, %v3588_v0  ;;  %v3603_v18 = vpop.f32.mrf.mxu3  ;;  %v15298_v0 = vld [vmem:[%s20497_s4 + $0x424] sm:$0xf0] }
 0xa27   :  { %v13156_v62 = vor.u32 %v15298_v0, %v13155_v43  ;;  %v4962_v43 = vpop.f32.mrf.mxu2 }
 0xa28   :  { %13398 = vmatmul.msk.f32.gmra.mxu0 %vm680_vm0, %v3998_v58 }
 0xa2b   :  { %3645 = vmatmul.bf16.gmra.mxu3 %v13156_v62 }
 0xa2d   :  { %v4000_v39 = vpop.f32.mrf.mxu1 }
 0xa2e   :  { %v4001_v25 = vadd.f32 %v4000_v39, %v3591_v42  ;;  %v3606_v14 = vpop.f32.mrf.mxu3  ;;  %v15293_v42 = vld [vmem:[%s20497_s4 + $0x404] sm:$0xf]  ;;  %v15302_v39 = vld [vmem:[%s20497_s4 + $0x444] sm:$0xf0] }
 0xa2f   :  { %v13144_v24 = vor.u32 %v15293_v42, %v13141_v4  ;;  %v13157_v42 = vld [vmem:[%s20497_s4 + $0x428] sm:$0xf0] }
 0xa30   :  { %4039 = vmatmul.bf16.gmra.mxu1 %v13136_v44  ;;  %13399 = vmatmul.msk.f32.gmra.mxu0 %vm680_vm0, %v4001_v25 }
 0xa35   :  { %v4002_v32 = vpop.f32.mrf.mxu1 }
 0xa36   :  { %v4003_v38 = vadd.f32 %v4002_v32, %v3593_v10  ;;  %v3608_v31 = vpop.f32.mrf.mxu3  ;;  %v13163_v10 = vld [vmem:[%s20497_s4 + $0x430] sm:$0xf] }
 0xa37   :  { %v13164_v57 = vor.u32 %v15300_v11, %v13163_v10 }
 0xa38   :  { %13400 = vmatmul.msk.f32.gmra.mxu0 %vm680_vm0, %v4003_v38  ;;  %v15297_v38 = vld [vmem:[%s20497_s4 + $0x424] sm:$0xf] }
 0xa39   :  { %v13160_v4 = vor.u32 %v15297_v38, %v13157_v42  ;;  %v15306_v38 = vld [vmem:[%s20497_s4 + $0x464] sm:$0xf0] }
 0xa3b   :  { %3650 = vmatmul.bf16.gmra.mxu3 %v13164_v57  ;;  %v15304_v57 = vld [vmem:[%s20497_s4 + $0x454] sm:$0xf0] }
 0xa3d   :  { %v4005_v5 = vpop.f32.mrf.mxu1  ;;  %v18596_v26 = vpop.f32.mrf.mxu0 }
 0xa3e   :  { %v4006_v52 = vadd.f32 %v4005_v5, %v3596_v56  ;;  %v3611_v17 = vpop.f32.mrf.mxu3  ;;  %v15295_v56 = vld [vmem:[%s20497_s4 + $0x414] sm:$0xf] }
 0xa3f   :  { %v13152_v63 = vor.u32 %v15295_v56, %v13149_v2 }
 0xa40   :  { %4044 = vmatmul.bf16.gmra.mxu1 %v13144_v24  ;;  %13401 = vmatmul.msk.f32.gmra.mxu0 %vm680_vm0, %v4006_v52  ;;  %v18634_v52 = vpop.f32.mrf.mxu2 }
 0xa45   :  { %v4007_v49 = vpop.f32.mrf.mxu1  ;;  %v18605_v36 = vpop.f32.mrf.mxu0 }
 0xa46   :  { %v4008_v13 = vadd.f32 %v4007_v49, %v3598_v48  ;;  %v3613_v44 = vpop.f32.mrf.mxu3  ;;  %v13171_v48 = vld [vmem:[%s20497_s4 + $0x440] sm:$0xf] }
 0xa47   :  { %v13172_v25 = vor.u32 %v15302_v39, %v13171_v48 }
 0xa48   :  { %13402 = vmatmul.msk.f32.gmra.mxu0 %vm680_vm0, %v4008_v13 }
 0xa4b   :  { %3655 = vmatmul.bf16.gmra.mxu3 %v13172_v25 }
 0xa4d   :  { %v4010_v58 = vpop.f32.mrf.mxu1  ;;  %v18614_v7 = vpop.f32.mrf.mxu0 }
 0xa4e   :  { %v4011_v30 = vadd.f32 %v4010_v58, %v3601_v40  ;;  %v3616_v40 = vpop.f32.mrf.mxu3  ;;  %v15299_v58 = vld [vmem:[%s20497_s4 + $0x434] sm:$0xf] }
 0xa50   :  { %4049 = vmatmul.bf16.gmra.mxu1 %v13152_v63  ;;  %13403 = vmatmul.msk.f32.gmra.mxu0 %vm680_vm0, %v4011_v30  ;;  %v13165_v30 = vld [vmem:[%s20497_s4 + $0x438] sm:$0xf0] }
 0xa51   :  { %v13168_v48 = vor.u32 %v15299_v58, %v13165_v30 }
 0xa55   :  { %v4012_v0 = vpop.f32.mrf.mxu1  ;;  %v18623_v62 = vpop.f32.mrf.mxu0 }
 0xa56   :  { %v4013_v32 = vadd.f32 %v4012_v0, %v3603_v18  ;;  %v3618_v11 = vpop.f32.mrf.mxu3  ;;  %v13179_v18 = vld [vmem:[%s20497_s4 + $0x450] sm:$0xf] }
 0xa57   :  { %v13180_v49 = vor.u32 %v15304_v57, %v13179_v18  ;;  %v15301_v57 = vld [vmem:[%s20497_s4 + $0x444] sm:$0xf] }
 0xa58   :  { %13404 = vmatmul.msk.f32.gmra.mxu0 %vm680_vm0, %v4013_v32 }
 0xa5b   :  { %3660 = vmatmul.bf16.gmra.mxu3 %v13180_v49  ;;  %v13173_v49 = vld [vmem:[%s20497_s4 + $0x448] sm:$0xf0] }
 0xa5c   :  { %v13176_v58 = vor.u32 %v15301_v57, %v13173_v49  ;;  %v15303_v49 = vld [vmem:[%s20497_s4 + $0x454] sm:$0xf] }
 0xa5d   :  { %v4015_v24 = vpop.f32.mrf.mxu1  ;;  %v18632_v5 = vpop.f32.mrf.mxu0 }
 0xa5e   :  { %v4016_v10 = vadd.f32 %v4015_v24, %v3606_v14  ;;  %v3621_v63 = vpop.f32.mrf.mxu3  ;;  %v18645_v14 = vpop.f32.mrf.mxu2 }
 0xa60   :  { %4054 = vmatmul.bf16.gmra.mxu1 %v13160_v4  ;;  %13405 = vmatmul.msk.f32.gmra.mxu0 %vm680_vm0, %v4016_v10 }
 0xa65   :  { %v4017_v13 = vpop.f32.mrf.mxu1  ;;  %v18643_v56 = vpop.f32.mrf.mxu0 }
 0xa66   :  { %v4018_v2 = vadd.f32 %v4017_v13, %v3608_v31  ;;  %v3623_v32 = vpop.f32.mrf.mxu3  ;;  %v13187_v31 = vld [vmem:[%s20497_s4 + $0x460] sm:$0xf]  ;;  %v18663_v4 = vpop.f32.mrf.mxu2  ;;  %v5042_v13 = vadd.f32 %v4962_v43, %v18042_v34  ;;  %v13424_v34 = vld [vmem:[%s20498_s5 + $0x138] sm:$0xff] }
 0xa67   :  { %v13188_v42 = vor.u32 %v15306_v38, %v13187_v31  ;;  %v13195_v31 = vld [vmem:[%s20497_s4 + $0x470] sm:$0xf]  ;;  %v15308_v38 = vld [vmem:[%s20497_s4 + $0x474] sm:$0xf0]  ;;  %5429 = vmatpush.msra.mxu2 %v13424_v34 }
 0xa68   :  { %13406 = vmatmul.msk.f32.gmra.mxu0 %vm680_vm0, %v4018_v2  ;;  %v13196_v43 = vor.u32 %v15308_v38, %v13195_v31  ;;  %v15310_v38 = vld [vmem:[%s20497_s4 + $0x484] sm:$0xf0] }
 0xa6b   :  { %3665 = vmatmul.bf16.gmra.mxu3 %v13188_v42 }
 0xa6d   :  { %v4020_v39 = vpop.f32.mrf.mxu1  ;;  %v18654_v25 = vpop.f32.mrf.mxu0 }
 0xa6e   :  { %v4021_v0 = vadd.f32 %v4020_v39, %v3611_v17  ;;  %v18667_v18 = vpop.f32.mrf.mxu3  ;;  %v18677_v2 = vpop.f32.mrf.mxu2 }
 0xa70   :  { %4059 = vmatmul.bf16.gmra.mxu1 %v13168_v48  ;;  %13407 = vmatmul.msk.f32.gmra.mxu0 %vm680_vm0, %v4021_v0 }
 0xa75   :  { %v4022_v24 = vpop.f32.mrf.mxu1  ;;  %v18665_v10 = vpop.f32.mrf.mxu0 }
 0xa76   :  { %v4023_v17 = vadd.f32 %v4022_v24, %v3613_v44  ;;  %v18681_v0 = vpop.f32.mrf.mxu3  ;;  %v18695_v24 = vpop.f32.mrf.mxu2 }
 0xa78   :  { %13408 = vmatmul.msk.f32.gmra.mxu0 %vm680_vm0, %v4023_v17 }
 0xa7b   :  { %3670 = vmatmul.bf16.gmra.mxu3 %v13196_v43 }
 0xa7d   :  { %v4025_v30 = vpop.f32.mrf.mxu1  ;;  %v5212_v48 = vpop.f32.mrf.mxu0 }
 0xa7e   :  { %v4026_v44 = vadd.f32 %v4025_v30, %v3616_v40  ;;  %v18679_v39 = vadd.f32 %v5212_v48, %v5042_v13  ;;  %v3631_v57 = vpop.f32.mrf.mxu3  ;;  %v13181_v13 = vld [vmem:[%s20497_s4 + $0x458] sm:$0xf0]  ;;  %v18714_v34 = vpop.f32.mrf.mxu2 }
 0xa80   :  { %4064 = vmatmul.bf16.gmra.mxu1 %v13176_v58  ;;  %13409 = vmatmul.msk.f32.gmra.mxu0 %vm680_vm0, %v4026_v44  ;;  %v13184_v58 = vor.u32 %v15303_v49, %v13181_v13 }
 0xa85   :  { %v4027_v40 = vpop.f32.mrf.mxu1  ;;  %v18693_v42 = vpop.f32.mrf.mxu0 }
 0xa86   :  { %v4028_v17 = vadd.f32 %v4027_v40, %v3618_v11  ;;  %v18706_v31 = vpop.f32.mrf.mxu3  ;;  %v13203_v11 = vld [vmem:[%s20497_s4 + $0x480] sm:$0xf]  ;;  %v13422_v40 = vld [vmem:[%s20498_s5 + $0x128] sm:$0xff] }
 0xa87   :  { %v13204_v43 = vor.u32 %v15310_v38, %v13203_v11  ;;  %v13419_v11 = vld [vmem:[%s20498_s5 + $0x110] sm:$0xff]  ;;  %v13189_v38 = vld [vmem:[%s20497_s4 + $0x468] sm:$0xf0] }
 0xa88   :  { %13410 = vmatmul.msk.f32.gmra.mxu0 %vm680_vm0, %v4028_v17 }
 0xa8b   :  { %3675 = vmatmul.bf16.gmra.mxu3 %v13204_v43  ;;  %v18741_v43 = vpop.f32.mrf.mxu2 }
 0xa8d   :  { %v4030_v30 = vpop.f32.mrf.mxu1  ;;  %v18704_v48 = vpop.f32.mrf.mxu0 }
 0xa8e   :  { %v4031_v44 = vadd.f32 %v4030_v30, %v3621_v63  ;;  %v13423_v63 = vld [vmem:[%s20498_s5 + $0x130] sm:$0xff]  ;;  %v3636_v30 = vpop.f32.mrf.mxu3 }
 0xa8f   :  { %5430 = vmatpush.msra.mxu2 %v13423_v63 }
 0xa90   :  { %4069 = vmatmul.bf16.gmra.mxu1 %v13184_v58  ;;  %13411 = vmatmul.msk.f32.gmra.mxu0 %vm680_vm0, %v4031_v44  ;;  %v13421_v58 = vld [vmem:[%s20498_s5 + $0x120] sm:$0xff]  ;;  %v13420_v44 = vld [vmem:[%s20498_s5 + $0x118] sm:$0xff] }
 0xa91   :  { %5431 = vmatpush.msra.mxu2 %v13422_v40  ;;  %v13418_v40 = vld [vmem:[%s20498_s5 + $0x108] sm:$0xff] }
 0xa93   :  { %5432 = vmatpush.msra.mxu2 %v13421_v58 }
 0xa95   :  { %v4032_v17 = vpop.f32.mrf.mxu1  ;;  %v18723_v49 = vpop.f32.mrf.mxu0  ;;  %5433 = vmatpush.msra.mxu2 %v13420_v44  ;;  %v13211_v44 = vld [vmem:[%s20497_s4 + $0x490] sm:$0xf] }
 0xa96   :  { %v4033_v13 = vadd.f32 %v4032_v17, %v3623_v32  ;;  %v15305_v32 = vld [vmem:[%s20497_s4 + $0x464] sm:$0xf]  ;;  %v3638_v55 = vpop.f32.mrf.mxu3 }
 0xa97   :  { %5434 = vmatpush.msra.mxu2 %v13419_v11  ;;  %v13192_v63 = vor.u32 %v15305_v32, %v13189_v38  ;;  %v15312_v11 = vld [vmem:[%s20497_s4 + $0x494] sm:$0xf0] }
 0xa98   :  { %13412 = vmatmul.msk.f32.gmra.mxu0 %vm680_vm0, %v4033_v13  ;;  %v13212_v32 = vor.u32 %v15312_v11, %v13211_v44 }
 0xa99   :  { %5435 = vmatpush.msra.mxu2 %v13418_v40 }
 0xa9b   :  { %5436 = vmatpush.msra.mxu2 %v13417_v16  ;;  %3680 = vmatmul.bf16.gmra.mxu3 %v13212_v32 }
 0xa9d   :  { %v4035_v17 = vpop.f32.mrf.mxu1  ;;  %v18746_v13 = vpop.f32.mrf.mxu0 }
 0xa9e   :  { %v4036_v58 = vadd.f32 %v4035_v17, %v18667_v18  ;;  %v4986_v18 = vpop.f32.mrf.mxu2  ;;  %v3641_v16 = vpop.f32.mrf.mxu3 }
 0xaa0   :  { %4074 = vmatmul.bf16.gmra.mxu1 %v13192_v63  ;;  %13413 = vmatmul.msk.f32.gmra.mxu0 %vm680_vm0, %v4036_v58  ;;  %v13197_v63 = vld [vmem:[%s20497_s4 + $0x478] sm:$0xf0] }
 0xaa1   :  { %v13200_v58 = vor.u32 %v15307_v27, %v13197_v63  ;;  %v15314_v27 = vld [vmem:[%s20497_s4 + $0x4a4] sm:$0xf0] }
 0xaa5   :  { %v4037_v38 = vpop.f32.mrf.mxu1  ;;  %v18759_v40 = vpop.f32.mrf.mxu0 }
 0xaa6   :  { %v4038_v17 = vadd.f32 %v4037_v38, %v18681_v0  ;;  %v18771_v32 = vpop.f32.mrf.mxu2  ;;  %v3643_v22 = vpop.f32.mrf.mxu3  ;;  %v18776_v0 = vld [vmem:[%s20501_s8 + $0x18] sm:$0xff]  ;;  %v13219_v38 = vld [vmem:[%s20497_s4 + $0x4a0] sm:$0xf] }
 0xaa7   :  { %20696 = vst [vmem:[#allocation32_spill] sm:$0xff] %v18776_v0  ;;  %15681 = vmatpush.msra.mxu3 %v18776_v0 }
 0xaa8   :  { %13414 = vmatmul.msk.f32.gmra.mxu0 %vm680_vm0, %v4038_v17 }
 0xaad   :  { %v4040_v44 = vpop.f32.mrf.mxu1  ;;  %v18769_v11 = vpop.f32.mrf.mxu0 }
 0xaae   :  { %v4041_v20 = vadd.f32 %v4040_v44, %v3631_v57  ;;  %v13220_v57 = vor.u32 %v15314_v27, %v13219_v38  ;;  %v3646_v28 = vpop.f32.mrf.mxu3  ;;  %v4992_v0 = vpop.f32.mrf.mxu2 }
 0xab0   :  { %4079 = vmatmul.bf16.gmra.mxu1 %v13200_v58  ;;  %13415 = vmatmul.msk.f32.gmra.mxu0 %vm680_vm0, %v4041_v20  ;;  %v13205_v58 = vld [vmem:[%s20497_s4 + $0x488] sm:$0xf0]  ;;  %v5050_v20 = vadd.f32 %v4986_v18, %v18169_v29 }
 0xab1   :  { %3685 = vmatmul.bf16.gmra.mxu3 %v13220_v57  ;;  %v13208_v38 = vor.u32 %v15309_v45, %v13205_v58 }
 0xab5   :  { %v4042_v17 = vpop.f32.mrf.mxu1  ;;  %v18786_v63 = vpop.f32.mrf.mxu0 }
 0xab6   :  { %v4043_v44 = vadd.f32 %v4042_v17, %v18706_v31  ;;  %v3648_v31 = vpop.f32.mrf.mxu3  ;;  %v13227_v17 = vld [vmem:[%s20497_s4 + $0x4b0] sm:$0xf]  ;;  %v18806_v29 = vpop.f32.mrf.mxu2 }
 0xab7   :  { %20697 = vst [vmem:[#allocation34_spill] sm:$0xff] %v18806_v29 }
 0xab8   :  { %13416 = vmatmul.msk.f32.gmra.mxu0 %vm680_vm0, %v4043_v44  ;;  %v15316_v44 = vld [vmem:[%s20497_s4 + $0x4b4] sm:$0xf0] }
 0xab9   :  { %v13228_v46 = vor.u32 %v15316_v44, %v13227_v17 }
 0xabd   :  { %v4045_v27 = vpop.f32.mrf.mxu1  ;;  %v5236_v57 = vpop.f32.mrf.mxu0 }
 0xabe   :  { %v4046_v37 = vadd.f32 %v4045_v27, %v3636_v30  ;;  %v18797_v61 = vadd.f32 %v5236_v57, %v5050_v20  ;;  %v3651_v58 = vpop.f32.mrf.mxu3  ;;  %v15311_v20 = vld [vmem:[%s20497_s4 + $0x494] sm:$0xf]  ;;  %v4998_v27 = vpop.f32.mrf.mxu2 }
 0xac0   :  { %4084 = vmatmul.bf16.gmra.mxu1 %v13208_v38  ;;  %13425 = vmatmul.msk.f32.vlgmr.msra.gmra.mxu2 %vm680_vm0, %v4046_v37  ;;  %v13213_v38 = vld [vmem:[%s20497_s4 + $0x498] sm:$0xf0]  ;;  %v5052_v37 = vadd.f32 %v4992_v0, %v18191_v1 }
 0xac1   :  { %3690 = vmatmul.bf16.gmra.mxu3 %v13228_v46  ;;  %v13216_v57 = vor.u32 %v15311_v20, %v13213_v38 }
 0xac5   :  { %v4047_v45 = vpop.f32.mrf.mxu1  ;;  %v18808_v30 = vpop.f32.mrf.mxu0 }
 0xac6   :  { %v4048_v18 = vadd.f32 %v4047_v45, %v3638_v55  ;;  %v3653_v55 = vpop.f32.mrf.mxu3  ;;  %v13235_v45 = vld [vmem:[%s20497_s4 + $0x4c0] sm:$0xf] }
 0xac8   :  { %13426 = vmatmul.msk.f32.gmra.mxu2 %vm680_vm0, %v4048_v18  ;;  %v15318_v18 = vld [vmem:[%s20497_s4 + $0x4c4] sm:$0xf0] }
 0xac9   :  { %v13236_v1 = vor.u32 %v15318_v18, %v13235_v45 }
 0xacd   :  { %v4050_v46 = vpop.f32.mrf.mxu1  ;;  %v5242_v17 = vpop.f32.mrf.mxu0 }
 0xace   :  { %v4051_v44 = vadd.f32 %v4050_v46, %v3641_v16  ;;  %v18818_v29 = vadd.f32 %v5242_v17, %v5052_v37  ;;  %v18829_v16 = vpop.f32.mrf.mxu2  ;;  %v3656_v37 = vpop.f32.mrf.mxu3  ;;  %v15313_v46 = vld [vmem:[%s20497_s4 + $0x4a4] sm:$0xf]  ;;  %v5054_v17 = vadd.f32 %v4998_v27, %v18213_v60 }
 0xacf   :  { %20699 = vst [vmem:[#allocation61_spill] sm:$0xff] %v18829_v16 }
 0xad0   :  { %4089 = vmatmul.bf16.gmra.mxu1 %v13216_v57  ;;  %13427 = vmatmul.msk.f32.gmra.mxu2 %vm680_vm0, %v4051_v44  ;;  %v13221_v57 = vld [vmem:[%s20497_s4 + $0x4a8] sm:$0xf0] }
 0xad1   :  { %3695 = vmatmul.bf16.gmra.mxu3 %v13236_v1  ;;  %v13224_v44 = vor.u32 %v15313_v46, %v13221_v57 }
 0xad5   :  { %v4052_v0 = vpop.f32.mrf.mxu1  ;;  %v18827_v20 = vpop.f32.mrf.mxu0 }
 0xad6   :  { %20698 = vst [vmem:[#allocation13_spill] sm:$0xff] %v18827_v20  ;;  %v4053_v38 = vadd.f32 %v4052_v0, %v3643_v22  ;;  %v3658_v22 = vpop.f32.mrf.mxu3  ;;  %v13243_v0 = vld [vmem:[%s20497_s4 + $0x4d0] sm:$0xf]  ;;  %v5004_v16 = vpop.f32.mrf.mxu2 }
 0xad8   :  { %13428 = vmatmul.msk.f32.gmra.mxu2 %vm680_vm0, %v4053_v38  ;;  %v15320_v38 = vld [vmem:[%s20497_s4 + $0x4d4] sm:$0xf0] }
 0xad9   :  { %v13244_v60 = vor.u32 %v15320_v38, %v13243_v0 }
 0xadd   :  { %v4055_v45 = vpop.f32.mrf.mxu1  ;;  %v5248_v18 = vpop.f32.mrf.mxu0 }
 0xade   :  { %v4056_v1 = vadd.f32 %v4055_v45, %v3646_v28  ;;  %v18839_v20 = vadd.f32 %v5248_v18, %v5054_v17  ;;  %v3661_v57 = vpop.f32.mrf.mxu3  ;;  %v15315_v17 = vld [vmem:[%s20497_s4 + $0x4b4] sm:$0xf]  ;;  %v13229_v45 = vld [vmem:[%s20497_s4 + $0x4b8] sm:$0xf0]  ;;  %v5056_v18 = vadd.f32 %v5004_v16, %v18235_v35 }
 0xae0   :  { %4094 = vmatmul.bf16.gmra.mxu1 %v13224_v44  ;;  %13429 = vmatmul.msk.f32.gmra.mxu2 %vm680_vm0, %v4056_v1  ;;  %v18857_v44 = vpop.f32.mrf.mxu2  ;;  %v13232_v1 = vor.u32 %v15315_v17, %v13229_v45 }
 0xae1   :  { %3700 = vmatmul.bf16.gmra.mxu3 %v13244_v60  ;;  %20701 = vst [vmem:[#allocation14_spill] sm:$0xff] %v18857_v44 }
 0xae5   :  { %v4057_v27 = vpop.f32.mrf.mxu1  ;;  %v18848_v46 = vpop.f32.mrf.mxu0 }
 0xae6   :  { %20700 = vst [vmem:[#allocation64_spill] sm:$0xff] %v18848_v46  ;;  %v4058_v28 = vadd.f32 %v4057_v27, %v3648_v31  ;;  %v3663_v27 = vpop.f32.mrf.mxu3  ;;  %v15322_v46 = vld [vmem:[%s20497_s4 + $0x4e4] sm:$0xf0] }
 0xae8   :  { %13430 = vmatmul.msk.f32.gmra.mxu2 %vm680_vm0, %v4058_v28  ;;  %v13251_v28 = vld [vmem:[%s20497_s4 + $0x4e0] sm:$0xf]  ;;  %v5010_v35 = vpop.f32.mrf.mxu2 }
 0xae9   :  { %v13252_v44 = vor.u32 %v15322_v46, %v13251_v28 }
 0xaed   :  { %v4060_v0 = vpop.f32.mrf.mxu1  ;;  %v5254_v38 = vpop.f32.mrf.mxu0 }
 0xaee   :  { %v4061_v60 = vadd.f32 %v4060_v0, %v3651_v58  ;;  %v18860_v31 = vadd.f32 %v5254_v38, %v5056_v18  ;;  %v3666_v45 = vpop.f32.mrf.mxu3  ;;  %v15317_v18 = vld [vmem:[%s20497_s4 + $0x4c4] sm:$0xf]  ;;  %v5058_v0 = vadd.f32 %v5010_v35, %v18257_v15 }
 0xaf0   :  { %4099 = vmatmul.bf16.gmra.mxu1 %v13232_v1  ;;  %13431 = vmatmul.msk.f32.gmra.mxu2 %vm680_vm0, %v4061_v60  ;;  %v13237_v1 = vld [vmem:[%s20497_s4 + $0x4c8] sm:$0xf0] }
 0xaf1   :  { %3705 = vmatmul.bf16.gmra.mxu3 %v13252_v44  ;;  %v13240_v46 = vor.u32 %v15317_v18, %v13237_v1 }
 0xaf5   :  { %v4062_v16 = vpop.f32.mrf.mxu1  ;;  %v18869_v17 = vpop.f32.mrf.mxu0 }
 0xaf6   :  { %v4063_v58 = vadd.f32 %v4062_v16, %v3653_v55  ;;  %v18881_v55 = vpop.f32.mrf.mxu2  ;;  %v13259_v16 = vld [vmem:[%s20497_s4 + $0x4f0] sm:$0xf]  ;;  %v3668_v35 = vpop.f32.mrf.mxu3 }
 0xaf7   :  { %20702 = vst [vmem:[#allocation62_spill] sm:$0xff] %v18881_v55 }
 0xaf8   :  { %13432 = vmatmul.msk.f32.gmra.mxu2 %vm680_vm0, %v4063_v58  ;;  %v15324_v58 = vld [vmem:[%s20497_s4 + $0x4f4] sm:$0xf0] }
 0xaf9   :  { %v13260_v15 = vor.u32 %v15324_v58, %v13259_v16 }
 0xafd   :  { %v4065_v44 = vpop.f32.mrf.mxu1  ;;  %v5260_v38 = vpop.f32.mrf.mxu0 }
 0xafe   :  { %v4066_v60 = vadd.f32 %v4065_v44, %v3656_v37  ;;  %v18879_v28 = vadd.f32 %v5260_v38, %v5058_v0  ;;  %v18891_v1 = vpop.f32.mrf.mxu2  ;;  %v15319_v0 = vld [vmem:[%s20497_s4 + $0x4d4] sm:$0xf]  ;;  %v13245_v44 = vld [vmem:[%s20497_s4 + $0x4d8] sm:$0xf0] }
 0xaff   :  { %20703 = vst [vmem:[#allocation15_spill] sm:$0xff] %v18891_v1  ;;  %v13248_v38 = vor.u32 %v15319_v0, %v13245_v44  ;;  %v13253_v0 = vld [vmem:[%s20497_s4 + $0x4e8] sm:$0xf0] }
 0xb00   :  { %4104 = vmatmul.bf16.gmra.mxu1 %v13240_v46  ;;  %13433 = vmatmul.msk.f32.gmra.mxu2 %vm680_vm0, %v4066_v60  ;;  %v3671_v46 = vpop.f32.mrf.mxu3 }
 0xb01   :  { %3710 = vmatmul.bf16.gmra.mxu3 %v13260_v15 }
 0xb05   :  { %v4067_v18 = vpop.f32.mrf.mxu1 }
 0xb06   :  { %v4068_v37 = vadd.f32 %v4067_v18, %v3658_v22  ;;  %v18900_v22 = vpop.f32.mrf.mxu2 }
 0xb07   :  { %20704 = vst [vmem:[#allocation54_spill] sm:$0xff] %v18900_v22  ;;  %v15323_v22 = vld [vmem:[%s20497_s4 + $0x4f4] sm:$0xf] }
 0xb08   :  { %13434 = vmatmul.msk.f32.gmra.mxu2 %vm680_vm0, %v4068_v37  ;;  %v3673_v15 = vpop.f32.mrf.mxu3  ;;  %v15321_v37 = vld [vmem:[%s20497_s4 + $0x4e4] sm:$0xf] }
 0xb09   :  { %v13256_v44 = vor.u32 %v15321_v37, %v13253_v0  ;;  %v13261_v37 = vld [vmem:[%s20497_s4 + $0x4f8] sm:$0xf0] }
 0xb0d   :  { %v4070_v60 = vpop.f32.mrf.mxu1 }
 0xb0e   :  { %v4071_v16 = vadd.f32 %v4070_v60, %v3661_v57  ;;  %v18909_v57 = vpop.f32.mrf.mxu2 }
 0xb0f   :  { %20705 = vst [vmem:[#allocation16_spill] sm:$0xff] %v18909_v57 }
 0xb10   :  { %4109 = vmatmul.bf16.gmra.mxu1 %v13248_v38  ;;  %13435 = vmatmul.msk.f32.gmra.mxu2 %vm680_vm0, %v4071_v16  ;;  %v3676_v16 = vpop.f32.mrf.mxu3 }
 0xb15   :  { %v4072_v58 = vpop.f32.mrf.mxu1 }
 0xb16   :  { %v4073_v18 = vadd.f32 %v4072_v58, %v3663_v27 }
 0xb18   :  { %13436 = vmatmul.msk.f32.gmra.mxu2 %vm680_vm0, %v4073_v18  ;;  %v18912_v18 = vpop.f32.mrf.mxu2  ;;  %v3678_v0 = vpop.f32.mrf.mxu3 }
 0xb19   :  { %20706 = vst [vmem:[#allocation44_spill] sm:$0xff] %v18912_v18 }
 0xb1d   :  { %v4075_v38 = vpop.f32.mrf.mxu1 }
 0xb1e   :  { %v4076_v60 = vadd.f32 %v4075_v38, %v3666_v45  ;;  %v13264_v45 = vor.u32 %v15323_v22, %v13261_v37 }
 0xb20   :  { %4114 = vmatmul.bf16.gmra.mxu1 %v13256_v44  ;;  %13437 = vmatmul.msk.f32.gmra.mxu2 %vm680_vm0, %v4076_v60  ;;  %v3681_v60 = vpop.f32.mrf.mxu3 }
 0xb25   :  { %v4077_v27 = vpop.f32.mrf.mxu1 }
 0xb26   :  { %v4078_v58 = vadd.f32 %v4077_v27, %v3668_v35  ;;  %v18922_v35 = vpop.f32.mrf.mxu2 }
 0xb28   :  { %13438 = vmatmul.msk.f32.gmra.mxu2 %vm680_vm0, %v4078_v58  ;;  %v3683_v1 = vpop.f32.mrf.mxu3 }
 0xb2d   :  { %v4080_v38 = vpop.f32.mrf.mxu1 }
 0xb2e   :  { %v4081_v44 = vadd.f32 %v4080_v38, %v3671_v46  ;;  %v18925_v18 = vpop.f32.mrf.mxu2  ;;  %v5284_v46 = vadd.f32 %v18596_v26, %v18347_v3  ;;  %v5286_v26 = vadd.f32 %v18614_v7, %v18367_v23  ;;  %v5288_v23 = vadd.f32 %v18632_v5, %v18387_v8 }
 0xb2f   :  { %v5290_v5 = vadd.f32 %v18654_v25, %v18407_v50 }
 0xb30   :  { %4119 = vmatmul.bf16.gmra.mxu1 %v13264_v45  ;;  %13439 = vmatmul.msk.f32.gmra.mxu2 %vm680_vm0, %v4081_v44 }
 0xb34   :  { %v3686_v44 = vpop.f32.mrf.mxu3 }
 0xb35   :  { %v4082_v27 = vpop.f32.mrf.mxu1 }
 0xb36   :  { %v4083_v58 = vadd.f32 %v4082_v27, %v3673_v15  ;;  %v5285_v15 = vadd.f32 %v18605_v36, %v18357_v59  ;;  %v5287_v59 = vadd.f32 %v18623_v62, %v18377_v19  ;;  %v5289_v62 = vadd.f32 %v18643_v56, %v18397_v54 }
 0xb37   :  { %v5291_v56 = vadd.f32 %v18665_v10, %v18417_v12  ;;  %v5043_v12 = vadd.f32 %v18634_v52, %v18058_v53  ;;  %v5044_v53 = vadd.f32 %v18645_v14, %v18077_v9  ;;  %v5045_v52 = vadd.f32 %v18663_v4, %v18103_v21 }
 0xb38   :  { %13440 = vmatmul.msk.f32.gmra.mxu2 %vm680_vm0, %v4083_v58  ;;  %v5046_v21 = vadd.f32 %v18677_v2, %v18121_v47  ;;  %v5047_v4 = vadd.f32 %v18695_v24, %v18133_v51  ;;  %v19007_v47 = vld [vmem:[%s20501_s8 + $0x38] sm:$0xff] }
 0xb39   :  { %v5293_v10 = vadd.f32 %v18693_v42, %v5043_v12  ;;  %v5294_v42 = vadd.f32 %v18704_v48, %v5044_v53  ;;  %7911 = vmatpush.msrb.mxu1 %v19007_v47 }
 0xb3a   :  { %v5296_v48 = vadd.f32 %v18746_v13, %v5046_v21 }
 0xb3c   :  { %v3688_v3 = vpop.f32.mrf.mxu3 }
 0xb3d   :  { %v4085_v57 = vpop.f32.mrf.mxu1 }
 0xb3e   :  { %v4086_v55 = vadd.f32 %v4085_v57, %v3676_v16 }
 0xb40   :  { %13441 = vmatmul.msk.f32.gmra.mxu2 %vm680_vm0, %v4086_v55 }
 0xb43   :  { %v5438_v22 = vpop.f32.mrf.mxu2 }
 0xb44   :  { %v18930_v37 = vadd.f32 %v5438_v22, %v5284_v46 }
 0xb45   :  { %v4087_v45 = vpop.f32.mrf.mxu1 }
 0xb46   :  { %v4088_v38 = vadd.f32 %v4087_v45, %v3678_v0 }
 0xb48   :  { %13442 = vmatmul.msk.f32.gmra.mxu2 %vm680_vm0, %v4088_v38  ;;  %v3691_v38 = vpop.f32.mrf.mxu3 }
 0xb4b   :  { %v5441_v27 = vpop.f32.mrf.mxu2 }
 0xb4c   :  { %v18935_v58 = vadd.f32 %v5441_v27, %v5285_v15 }
 0xb4d   :  { %v4090_v57 = vpop.f32.mrf.mxu1 }
 0xb4e   :  { %v5566_v55 = vpack.c.bf16 %v18935_v58, %v18930_v37  ;;  %v4091_v16 = vadd.f32 %v4090_v57, %v3681_v60  ;;  %v19062_v37 = vld [vmem:[%s20501_s8 + $0x10] sm:$0xff] }
 0xb4f   :  { %15682 = vmatpush.msra.mxu3 %v19062_v37 }
 0xb50   :  { %13443 = vmatmul.msk.f32.gmra.mxu2 %vm680_vm0, %v4091_v16 }
 0xb53   :  { %v5444_v0 = vpop.f32.mrf.mxu2 }
 0xb54   :  { %v18942_v46 = vadd.f32 %v5444_v0, %v5286_v26  ;;  %v3693_v26 = vpop.f32.mrf.mxu3 }
 0xb55   :  { %v4092_v22 = vpop.f32.mrf.mxu1 }
 0xb56   :  { %v4093_v45 = vadd.f32 %v4092_v22, %v3683_v1 }
 0xb58   :  { %13444 = vmatmul.msk.f32.gmra.mxu2 %vm680_vm0, %v4093_v45 }
 0xb5b   :  { %v5447_v36 = vpop.f32.mrf.mxu2 }
 0xb5c   :  { %v18947_v15 = vadd.f32 %v5447_v36, %v5287_v59  ;;  %v3696_v8 = vpop.f32.mrf.mxu3 }
 0xb5d   :  { %v4095_v60 = vpop.f32.mrf.mxu1 }
 0xb5e   :  { %v5567_v27 = vpack.c.bf16 %v18947_v15, %v18942_v46  ;;  %v4096_v57 = vadd.f32 %v4095_v60, %v3686_v44  ;;  %v20712_v15 = vld [vmem:[#allocation64_spill] sm:$0xff] }
 0xb60   :  { %13445 = vmatmul.msk.f32.gmra.mxu2 %vm680_vm0, %v4096_v57 }
 0xb63   :  { %v5450_v7 = vpop.f32.mrf.mxu2 }
 0xb64   :  { %v18954_v1 = vadd.f32 %v5450_v7, %v5288_v23  ;;  %v3698_v54 = vpop.f32.mrf.mxu3 }
 0xb65   :  { %v4097_v16 = vpop.f32.mrf.mxu1 }
 0xb66   :  { %v4098_v19 = vadd.f32 %v4097_v16, %v3688_v3 }
 0xb68   :  { %13446 = vmatmul.msk.f32.gmra.mxu2 %vm680_vm0, %v4098_v19 }
 0xb6b   :  { %v5453_v0 = vpop.f32.mrf.mxu2 }
 0xb6c   :  { %v18959_v22 = vadd.f32 %v5453_v0, %v5289_v62  ;;  %v3701_v25 = vpop.f32.mrf.mxu3 }
 0xb6d   :  { %v4100_v44 = vpop.f32.mrf.mxu1 }
 0xb6e   :  { %v5568_v45 = vpack.c.bf16 %v18959_v22, %v18954_v1  ;;  %v4101_v59 = vadd.f32 %v4100_v44, %v3691_v38 }
 0xb70   :  { %13447 = vmatmul.msk.f32.gmra.mxu2 %vm680_vm0, %v4101_v59 }
 0xb73   :  { %v5456_v3 = vpop.f32.mrf.mxu2 }
 0xb74   :  { %v18966_v36 = vadd.f32 %v5456_v3, %v5290_v5 }
 0xb75   :  { %v4102_v60 = vpop.f32.mrf.mxu1 }
 0xb76   :  { %v4103_v57 = vadd.f32 %v4102_v60, %v3693_v26 }
 0xb78   :  { %13448 = vmatmul.msk.f32.gmra.mxu2 %vm680_vm0, %v4103_v57 }
 0xb7b   :  { %v5459_v23 = vpop.f32.mrf.mxu2 }
 0xb7c   :  { %v18971_v7 = vadd.f32 %v5459_v23, %v5291_v56  ;;  %v5295_v23 = vadd.f32 %v18723_v49, %v5045_v52  ;;  %v5297_v49 = vadd.f32 %v18759_v40, %v5047_v4  ;;  %v5048_v40 = vadd.f32 %v18714_v34, %v18145_v6 }
 0xb7d   :  { %v4105_v38 = vpop.f32.mrf.mxu1  ;;  %v5051_v6 = vadd.f32 %v18771_v32, %v18180_v41  ;;  %v20707_v41 = vld [vmem:[#allocation11_spill] sm:$0xff]  ;;  %v20708_v32 = vld [vmem:[#allocation34_spill] sm:$0xff] }
 0xb7e   :  { %v5569_v16 = vpack.c.bf16 %v18971_v7, %v18966_v36  ;;  %v4106_v19 = vadd.f32 %v4105_v38, %v3696_v8  ;;  %v3703_v8 = vpop.f32.mrf.mxu3  ;;  %v20711_v7 = vld [vmem:[#allocation61_spill] sm:$0xff] }
 0xb80   :  { %13449 = vmatmul.msk.f32.gmra.mxu2 %vm680_vm0, %v4106_v19 }
 0xb83   :  { %v5462_v50 = vpop.f32.mrf.mxu2 }
 0xb84   :  { %v18977_v26 = vadd.f32 %v5462_v50, %v18679_v39 }
 0xb85   :  { %v4107_v62 = vpop.f32.mrf.mxu1 }
 0xb86   :  { %v4108_v0 = vadd.f32 %v4107_v62, %v3698_v54  ;;  %v3706_v56 = vpop.f32.mrf.mxu3 }
 0xb88   :  { %13450 = vmatmul.msk.f32.gmra.mxu2 %vm680_vm0, %v4108_v0 }
 0xb8b   :  { %v5465_v44 = vpop.f32.mrf.mxu2 }
 0xb8c   :  { %v18983_v59 = vadd.f32 %v5465_v44, %v5293_v10 }
 0xb8d   :  { %v4110_v5 = vpop.f32.mrf.mxu1 }
 0xb8e   :  { %v5570_v3 = vpack.c.bf16 %v18983_v59, %v18977_v26  ;;  %v4111_v60 = vadd.f32 %v4110_v5, %v3701_v25  ;;  %v3708_v0 = vpop.f32.mrf.mxu3 }
 0xb90   :  { %13451 = vmatmul.msk.f32.gmra.mxu2 %vm680_vm0, %v4111_v60 }
 0xb93   :  { %v5468_v39 = vpop.f32.mrf.mxu2 }
 0xb94   :  { %v5544_v19 = vadd.f32 %v5468_v39, %v5294_v42 }
 0xb95   :  { %v4112_v57 = vpop.f32.mrf.mxu1 }
 0xb96   :  { %v4113_v54 = vadd.f32 %v4112_v57, %v3703_v8  ;;  %v3711_v10 = vpop.f32.mrf.mxu3  ;;  %v5049_v57 = vadd.f32 %v18741_v43, %v18157_v33  ;;  %v5301_v33 = vadd.f32 %v18808_v30, %v5051_v6  ;;  %v5053_v30 = vadd.f32 %v20708_v32, %v20707_v41  ;;  %v20722_v41 = vld [vmem:[#allocation16_spill] sm:$0xff] }
 0xb98   :  { %13452 = vmatmul.msk.f32.gmra.mxu2 %vm680_vm0, %v4113_v54  ;;  %v5298_v54 = vadd.f32 %v18769_v11, %v5048_v40  ;;  %v20718_v40 = vld [vmem:[#allocation15_spill] sm:$0xff] }
 0xb9b   :  { %v5471_v38 = vpop.f32.mrf.mxu2 }
 0xb9c   :  { %v5545_v50 = vadd.f32 %v5471_v38, %v5295_v23 }
 0xb9d   :  { %v4115_v25 = vpop.f32.mrf.mxu1 }
 0xb9e   :  { %v5571_v26 = vpack.c.bf16 %v5545_v50, %v5544_v19  ;;  %v4116_v62 = vadd.f32 %v4115_v25, %v3706_v56  ;;  %v3713_v2 = vpop.f32.mrf.mxu3  ;;  %v5299_v56 = vadd.f32 %v18786_v63, %v5049_v57  ;;  %v20719_v57 = vld [vmem:[#allocation51_spill] sm:$0xff] }
 0xba0   :  { %13453 = vmatmul.msk.f32.gmra.mxu2 %vm680_vm0, %v4116_v62 }
 0xba3   :  { %v5474_v12 = vpop.f32.mrf.mxu2 }
 0xba4   :  { %v5546_v59 = vadd.f32 %v5474_v12, %v5296_v48 }
 0xba5   :  { %v4117_v9 = vpop.f32.mrf.mxu1 }
 0xba6   :  { %v4118_v14 = vadd.f32 %v4117_v9, %v3708_v0  ;;  %v20714_v0 = vld [vmem:[#allocation14_spill] sm:$0xff] }
 0xba8   :  { %13454 = vmatmul.msk.f32.gmra.mxu2 %vm680_vm0, %v4118_v14  ;;  %v5263_v14 = vpop.f32.mrf.mxu0 }
 0xbab   :  { %v5477_v44 = vpop.f32.mrf.mxu2 }
 0xbac   :  { %v5547_v8 = vadd.f32 %v5477_v44, %v5297_v49 }
 0xbad   :  { %v4120_v5 = vpop.f32.mrf.mxu1 }
 0xbae   :  { %v5572_v60 = vpack.c.bf16 %v5547_v8, %v5546_v59  ;;  %v4121_v39 = vadd.f32 %v4120_v5, %v3711_v10  ;;  %v20715_v59 = vld [vmem:[#allocation12_spill] sm:$0xff]  ;;  %v20716_v8 = vld [vmem:[#allocation62_spill] sm:$0xff] }
 0xbaf   :  { %v5059_v5 = vadd.f32 %v20716_v8, %v20715_v59 }
 0xbb0   :  { %13455 = vmatmul.msk.f32.gmra.mxu2 %vm680_vm0, %v4121_v39  ;;  %v5266_v44 = vpop.f32.mrf.mxu0 }
 0xbb3   :  { %v5480_v51 = vpop.f32.mrf.mxu2 }
 0xbb4   :  { %v5548_v52 = vadd.f32 %v5480_v51, %v5298_v54  ;;  %v20720_v54 = vld [vmem:[#allocation54_spill] sm:$0xff] }
 0xbb5   :  { %v4122_v24 = vpop.f32.mrf.mxu1 }
 0xbb6   :  { %v4123_v13 = vadd.f32 %v4122_v24, %v3713_v2 }
 0xbb8   :  { %13456 = vmatmul.msk.f32.gmra.mxu2 %vm680_vm0, %v4123_v13  ;;  %v5269_v2 = vpop.f32.mrf.mxu0  ;;  %v20717_v13 = vld [vmem:[#allocation39_spill] sm:$0xff] }
 0xbbb   :  { %v5483_v53 = vpop.f32.mrf.mxu2 }
 0xbbc   :  { %v5549_v42 = vadd.f32 %v5483_v53, %v5299_v56  ;;  %v5061_v56 = vadd.f32 %v20720_v54, %v20719_v57  ;;  %v13477_v57 = vld [vmem:[#allocation3 + $0x28] sm:$0xf0]  ;;  %v15336_v54 = vld [vmem:[#allocation3 + $0x54] sm:$0xf0] }
 0xbbe   :  { %v5573_v23 = vpack.c.bf16 %v5549_v42, %v5548_v52  ;;  %v5311_v42 = vadd.f32 %v5269_v2, %v5061_v56  ;;  %v13461_v2 = vld [vmem:[#allocation3 + $0x8] sm:$0xf0]  ;;  %v15331_v56 = vld [vmem:[#allocation3 + $0x34] sm:$0xf] }
 0xbc0   :  { %6542 = vmatpush.bf16.msra.mxu0 %v5573_v23  ;;  %v5272_v53 = vpop.f32.mrf.mxu0 }
 0xbc3   :  { %v5486_v38 = vpop.f32.mrf.mxu2 }
 0xbc4   :  { %v19018_v19 = vadd.f32 %v5486_v38, %v18797_v61  ;;  %6543 = vmatpush.bf16.msra.mxu0 %v5572_v60  ;;  %v5309_v60 = vadd.f32 %v5263_v14, %v5059_v5  ;;  %v13467_v5 = vld [vmem:[#allocation3 + $0x10] sm:$0xf] }
 0xbc8   :  { %6544 = vmatpush.bf16.msra.mxu0 %v5571_v26 }
 0xbcb   :  { %v5489_v34 = vpop.f32.mrf.mxu2 }
 0xbcc   :  { %v19023_v43 = vadd.f32 %v5489_v34, %v5301_v33  ;;  %6545 = vmatpush.bf16.msra.mxu0 %v5570_v3  ;;  %v20709_v3 = vld [vmem:[#allocation13_spill] sm:$0xff]  ;;  %v5275_v33 = vpop.f32.mrf.mxu0 }
 0xbcd   :  { %v5303_v50 = vadd.f32 %v20709_v3, %v5053_v30  ;;  %v20723_v30 = vld [vmem:[#allocation52_spill] sm:$0xff] }
 0xbce   :  { %v5574_v11 = vpack.c.bf16 %v19023_v43, %v19018_v19  ;;  %v20724_v3 = vld [vmem:[#allocation44_spill] sm:$0xff] }
 0xbd0   :  { %6546 = vmatpush.bf16.msra.mxu0 %v5569_v16 }
 0xbd3   :  { %v5492_v61 = vpop.f32.mrf.mxu2 }
 0xbd4   :  { %v19031_v63 = vadd.f32 %v5492_v61, %v18818_v29  ;;  %6547 = vmatpush.bf16.msra.mxu0 %v5568_v45  ;;  %v20710_v45 = vld [vmem:[#allocation58_spill] sm:$0xff] }
 0xbd5   :  { %v5055_v46 = vadd.f32 %v20711_v7, %v20710_v45  ;;  %v20721_v61 = vld [vmem:[#allocation42_spill] sm:$0xff] }
 0xbd6   :  { %v5062_v32 = vadd.f32 %v20722_v41, %v20721_v61  ;;  %v15340_v61 = vld [vmem:[#allocation3 + $0x74] sm:$0xf0]  ;;  %v15335_v41 = vld [vmem:[#allocation3 + $0x54] sm:$0xf] }
 0xbd8   :  { %6548 = vmatpush.bf16.msra.mxu0 %v5567_v27  ;;  %v5305_v27 = vadd.f32 %v20712_v15, %v5055_v46  ;;  %v5278_v15 = vpop.f32.mrf.mxu0 }
 0xbdb   :  { %v5495_v25 = vpop.f32.mrf.mxu2 }
 0xbdc   :  { %v19042_v36 = vadd.f32 %v5495_v25, %v5303_v50  ;;  %6549 = vmatpush.bf16.msra.mxu0 %v5566_v55  ;;  %v20713_v55 = vld [vmem:[#allocation59_spill] sm:$0xff]  ;;  %v5063_v50 = vadd.f32 %v20724_v3, %v20723_v30  ;;  %v5312_v25 = vadd.f32 %v5272_v53, %v5062_v32  ;;  %v13501_v32 = vld [vmem:[#allocation3 + $0x58] sm:$0xf0] }
 0xbdd   :  { %v5057_v12 = vadd.f32 %v20714_v0, %v20713_v55  ;;  %v20726_v0 = vld [vmem:[#allocation25_spill] sm:$0xff]  ;;  %v13504_v3 = vor.u32 %v15335_v41, %v13501_v32 }
 0xbde   :  { %v5575_v29 = vpack.c.bf16 %v19042_v36, %v19031_v63 }
 0xbdf   :  { %v5307_v9 = vadd.f32 %v18869_v17, %v5057_v12  ;;  %v5060_v17 = vadd.f32 %v20718_v40, %v20717_v13  ;;  %v5065_v12 = vadd.f32 %v18925_v18, %v20726_v0  ;;  %v13475_v18 = vld [vmem:[#allocation3 + $0x20] sm:$0xf]  ;;  %v15334_v40 = vld [vmem:[#allocation3 + $0x44] sm:$0xf0]  ;;  %v13531_v0 = vld [vmem:[#allocation3 + $0x90] sm:$0xf] }
 0xbe1   :  { %v5310_v52 = vadd.f32 %v5266_v44, %v5060_v17  ;;  %v15329_v17 = vld [vmem:[#allocation3 + $0x24] sm:$0xf] }
 0xbe2   :  { %v13480_v43 = vor.u32 %v15329_v17, %v13477_v57  ;;  %v13541_v17 = vld [vmem:[#allocation3 + $0xa8] sm:$0xf0] }
 0xbe3   :  { %v5498_v1 = vpop.f32.mrf.mxu2 }
 0xbe4   :  { %v19050_v22 = vadd.f32 %v5498_v1, %v18839_v20  ;;  %v5313_v1 = vadd.f32 %v5275_v33, %v5063_v50  ;;  %v13523_v50 = vld [vmem:[#allocation3 + $0x80] sm:$0xf] }
 0xbeb   :  { %v5501_v16 = vpop.f32.mrf.mxu2 }
 0xbec   :  { %v19055_v26 = vadd.f32 %v5501_v16, %v5305_v27 }
 0xbee   :  { %v5576_v62 = vpack.c.bf16 %v19055_v26, %v19050_v22  ;;  %v13483_v22 = vld [vmem:[#allocation3 + $0x30] sm:$0xf]  ;;  %v15332_v26 = vld [vmem:[#allocation3 + $0x34] sm:$0xf0] }
 0xbef   :  { %v13484_v63 = vor.u32 %v15332_v26, %v13483_v22 }
 0xbf3   :  { %v5504_v20 = vpop.f32.mrf.mxu2 }
 0xbf4   :  { %v5556_v58 = vadd.f32 %v5504_v20, %v18860_v31  ;;  %v5281_v20 = vpop.f32.mrf.mxu0 }
 0xbf5   :  { %v5315_v14 = vadd.f32 %v5281_v20, %v5065_v12  ;;  %v13517_v20 = vld [vmem:[#allocation3 + $0x78] sm:$0xf0]  ;;  %v15344_v12 = vld [vmem:[#allocation3 + $0x94] sm:$0xf0] }
 0xbfb   :  { %v5507_v21 = vpop.f32.mrf.mxu2 }
 0xbfc   :  { %v5557_v4 = vadd.f32 %v5507_v21, %v5307_v9  ;;  %v13459_v21 = vld [vmem:[#allocation3] sm:$0xf] }
 0xbfe   :  { %v5577_v48 = vpack.c.bf16 %v5557_v4, %v5556_v58  ;;  %v20725_v58 = vld [vmem:[#allocation24_spill] sm:$0xff]  ;;  %v15326_v4 = vld [vmem:[#allocation3 + $0x4] sm:$0xf0] }
 0xbff   :  { %v5064_v55 = vadd.f32 %v18922_v35, %v20725_v58  ;;  %v15330_v35 = vld [vmem:[#allocation3 + $0x24] sm:$0xf0] }
 0xc00   :  { %v7393_v58 = vld [vmem:[%s20501_s8 + $0x8] sm:$0xff] }
 0xc01   :  { %v5314_v9 = vadd.f32 %v5278_v15, %v5064_v55  ;;  %15683 = vmatpush.msra.mxu3 %v7393_v58 }
 0xc03   :  { %v5510_v49 = vpop.f32.mrf.mxu2 }
 0xc04   :  { %v5558_v10 = vadd.f32 %v5510_v49, %v18879_v28 }
 0xc0b   :  { %v5513_v39 = vpop.f32.mrf.mxu2 }
 0xc0c   :  { %v5559_v51 = vadd.f32 %v5513_v39, %v5309_v60  ;;  %v15328_v60 = vld [vmem:[#allocation3 + $0x14] sm:$0xf0] }
 0xc0d   :  { %v13468_v39 = vor.u32 %v15328_v60, %v13467_v5 }
 0xc0e   :  { %v5578_v31 = vpack.c.bf16 %v5559_v51, %v5558_v10  ;;  %v13460_v10 = vor.u32 %v15326_v4, %v13459_v21  ;;  %v15325_v51 = vld [vmem:[#allocation3 + $0x4] sm:$0xf]  ;;  %v13532_v21 = vor.u32 %v15344_v12, %v13531_v0  ;;  %v15351_v12 = vld [vmem:[#allocation3 + $0xd4] sm:$0xf] }
 0xc0f   :  { %v13464_v13 = vor.u32 %v15325_v51, %v13461_v2  ;;  %v15343_v51 = vld [vmem:[#allocation3 + $0x94] sm:$0xf]  ;;  %v13533_v2 = vld [vmem:[#allocation3 + $0x98] sm:$0xf0] }
 0xc10   :  { %6550 = vmatmul.bf16.vlgmr.msra.gmra.mxu0 %v13460_v10  ;;  %v13525_v10 = vld [vmem:[#allocation3 + $0x88] sm:$0xf0]  ;;  %v13536_v26 = vor.u32 %v15343_v51, %v13533_v2 }
 0xc13   :  { %v5516_v24 = vpop.f32.mrf.mxu2 }
 0xc14   :  { %v5560_v23 = vadd.f32 %v5516_v24, %v5310_v52  ;;  %v13476_v24 = vor.u32 %v15330_v35, %v13475_v18 }
 0xc1b   :  { %v5519_v28 = vpop.f32.mrf.mxu2 }
 0xc1c   :  { %v5561_v38 = vadd.f32 %v5519_v28, %v5311_v42  ;;  %v13507_v42 = vld [vmem:[#allocation3 + $0x60] sm:$0xf]  ;;  %v15338_v28 = vld [vmem:[#allocation3 + $0x64] sm:$0xf0] }
 0xc1e   :  { %v5579_v6 = vpack.c.bf16 %v5561_v38, %v5560_v23  ;;  %v15333_v23 = vld [vmem:[#allocation3 + $0x44] sm:$0xf]  ;;  %v13493_v38 = vld [vmem:[#allocation3 + $0x48] sm:$0xf0] }
 0xc1f   :  { %v13496_v33 = vor.u32 %v15333_v23, %v13493_v38  ;;  %v13549_v23 = vld [vmem:[#allocation3 + $0xb8] sm:$0xf0] }
 0xc20   :  { %6555 = vmatmul.bf16.gmra.mxu0 %v13468_v39 }
 0xc23   :  { %v5522_v34 = vpop.f32.mrf.mxu2 }
 0xc24   :  { %v5562_v7 = vadd.f32 %v5522_v34, %v5312_v25  ;;  %v13515_v34 = vld [vmem:[#allocation3 + $0x70] sm:$0xf]  ;;  %v15342_v25 = vld [vmem:[#allocation3 + $0x84] sm:$0xf0] }
 0xc25   :  { %v13516_v30 = vor.u32 %v15340_v61, %v13515_v34  ;;  %v15352_v34 = vld [vmem:[#allocation3 + $0xd4] sm:$0xf0] }
 0xc2b   :  { %v5525_v45 = vpop.f32.mrf.mxu2 }
 0xc2c   :  { %v5563_v46 = vadd.f32 %v5525_v45, %v5313_v1  ;;  %v15337_v1 = vld [vmem:[#allocation3 + $0x64] sm:$0xf]  ;;  %v13509_v45 = vld [vmem:[#allocation3 + $0x68] sm:$0xf0] }
 0xc2d   :  { %v13512_v15 = vor.u32 %v15337_v1, %v13509_v45  ;;  %v13557_v1 = vld [vmem:[#allocation3 + $0xc8] sm:$0xf0] }
 0xc2e   :  { %v5580_v27 = vpack.c.bf16 %v5563_v46, %v5562_v7  ;;  %v13524_v7 = vor.u32 %v15342_v25, %v13523_v50  ;;  %v15349_v25 = vld [vmem:[#allocation3 + $0xc4] sm:$0xf] }
 0xc30   :  { %6560 = vmatmul.bf16.gmra.mxu0 %v13476_v24 }
 0xc33   :  { %v5528_v16 = vpop.f32.mrf.mxu2 }
 0xc34   :  { %v5564_v44 = vadd.f32 %v5528_v16, %v5314_v9  ;;  %v15339_v16 = vld [vmem:[#allocation3 + $0x74] sm:$0xf] }
 0xc35   :  { %v13520_v9 = vor.u32 %v15339_v16, %v13517_v20  ;;  %v13560_v16 = vor.u32 %v15349_v25, %v13557_v1  ;;  %v13611_v1 = vld [vmem:[#allocation3 + $0x130] sm:$0xf] }
 0xc3b   :  { %v5531_v49 = vpop.f32.mrf.mxu2 }
 0xc3c   :  { %v5565_v59 = vadd.f32 %v5531_v49, %v5315_v14  ;;  %v7392_v14 = vld [vmem:[%s20501_s8] sm:$0xff] }
 0xc3d   :  { %15684 = vmatpush.msra.mxu3 %v7392_v14  ;;  %v15341_v49 = vld [vmem:[#allocation3 + $0x84] sm:$0xf] }
 0xc3e   :  { %v5581_v8 = vpack.c.bf16 %v5565_v59, %v5564_v44  ;;  %v13539_v59 = vld [vmem:[#allocation3 + $0xa0] sm:$0xf]  ;;  %v13528_v5 = vor.u32 %v15341_v49, %v13525_v10  ;;  %v15356_v49 = vld [vmem:[#allocation3 + $0xf4] sm:$0xf0] }
 0xc40   :  { %6951 = vmatpush.bf16.msrb.mxu2 %v5581_v8  ;;  %6565 = vmatmul.bf16.gmra.mxu0 %v13484_v63  ;;  %v15346_v8 = vld [vmem:[#allocation3 + $0xa4] sm:$0xf0] }
 0xc41   :  { %v13540_v60 = vor.u32 %v15346_v8, %v13539_v59 }
 0xc44   :  { %6952 = vmatpush.bf16.msrb.mxu2 %v5580_v27 }
 0xc48   :  { %6953 = vmatpush.bf16.msrb.mxu2 %v5579_v6  ;;  %v13508_v6 = vor.u32 %v15338_v28, %v13507_v42  ;;  %v15347_v28 = vld [vmem:[#allocation3 + $0xb4] sm:$0xf] }
 0xc49   :  { %v13552_v41 = vor.u32 %v15347_v28, %v13549_v23  ;;  %v13603_v23 = vld [vmem:[#allocation3 + $0x120] sm:$0xf] }
 0xc4c   :  { %6954 = vmatpush.bf16.msrb.mxu2 %v5578_v31  ;;  %v13469_v31 = vld [vmem:[#allocation3 + $0x18] sm:$0xf0] }
 0xc50   :  { %6955 = vmatpush.bf16.msrb.mxu2 %v5577_v48  ;;  %v20727_v48 = vld [vmem:[#allocation32_spill] sm:$0xff] }
 0xc54   :  { %6956 = vmatpush.bf16.msrb.mxu2 %v5576_v62  ;;  %v15327_v62 = vld [vmem:[#allocation3 + $0x14] sm:$0xf] }
 0xc55   :  { %v13472_v36 = vor.u32 %v15327_v62, %v13469_v31 }
 0xc58   :  { %6957 = vmatpush.bf16.msrb.mxu2 %v5575_v29  ;;  %v13491_v29 = vld [vmem:[#allocation3 + $0x40] sm:$0xf] }
 0xc59   :  { %v13492_v19 = vor.u32 %v15334_v40, %v13491_v29  ;;  %v14131_v29 = vld [vmem:[%s20501_s8 + $0x30] sm:$0xff]  ;;  %v15345_v40 = vld [vmem:[#allocation3 + $0xa4] sm:$0xf] }
 0xc5a   :  { %7912 = vmatpush.msrb.mxu1 %v14131_v29 }
 0xc5b   :  { %6570 = vmatmul.bf16.gmra.mxu0 %v13492_v19 }
 0xc5c   :  { %6958 = vmatpush.bf16.msrb.mxu2 %v5574_v11  ;;  %v13499_v11 = vld [vmem:[#allocation3 + $0x50] sm:$0xf] }
 0xc5d   :  { %v13500_v53 = vor.u32 %v15336_v54, %v13499_v11  ;;  %v15350_v11 = vld [vmem:[#allocation3 + $0xc4] sm:$0xf0] }
 0xc5f   :  { %6959 = vmatmul.bf16.vlgmr.msrb.gmra.mxu2 %v13464_v13  ;;  %v13547_v13 = vld [vmem:[#allocation3 + $0xb0] sm:$0xf] }
 0xc60   :  { %7505 = vmatpush.msra.mxu2 %v20727_v48  ;;  %v15348_v48 = vld [vmem:[#allocation3 + $0xb4] sm:$0xf0] }
 0xc61   :  { %v13548_v62 = vor.u32 %v15348_v48, %v13547_v13 }
 0xc62   :  { %7506 = vmatpush.msra.mxu2 %v19062_v37  ;;  %v13485_v37 = vld [vmem:[#allocation3 + $0x38] sm:$0xf0] }
 0xc63   :  { %v13488_v52 = vor.u32 %v15331_v56, %v13485_v37  ;;  %v13544_v56 = vor.u32 %v15345_v40, %v13541_v17  ;;  %v13595_v17 = vld [vmem:[#allocation3 + $0x110] sm:$0xf] }
 0xc64   :  { %7507 = vmatpush.msra.mxu2 %v7393_v58 }
 0xc66   :  { %7508 = vmatpush.msra.mxu2 %v7392_v14 }
 0xc68   :  { %15685 = vmatpush.msrb.mxu2 %v19007_v47 }
 0xc6a   :  { %15686 = vmatpush.msrb.mxu2 %v14131_v29 }
 0xc6b   :  { %6575 = vmatmul.bf16.gmra.mxu0 %v13500_v53 }
 0xc6f   :  { %6964 = vmatmul.bf16.gmra.mxu2 %v13472_v36 }
 0xc7b   :  { %6580 = vmatmul.bf16.gmra.mxu0 %v13508_v6 }
 0xc7f   :  { %6969 = vmatmul.bf16.gmra.mxu2 %v13480_v43  ;;  %v13555_v43 = vld [vmem:[#allocation3 + $0xc0] sm:$0xf] }
 0xc80   :  { %v13556_v37 = vor.u32 %v15350_v11, %v13555_v43 }
 0xc8b   :  { %6585 = vmatmul.bf16.gmra.mxu0 %v13516_v30 }
 0xc8d   :  { %v6551_v46 = vpop.f32.mrf.mxu0 }
 0xc8f   :  { %6974 = vmatmul.bf16.gmra.mxu2 %v13488_v52 }
 0xc95   :  { %v6553_v27 = vpop.f32.mrf.mxu0 }
 0xc9b   :  { %6590 = vmatmul.bf16.gmra.mxu0 %v13524_v7 }
 0xc9d   :  { %v6556_v55 = vpop.f32.mrf.mxu0 }
 0xc9f   :  { %6979 = vmatmul.bf16.gmra.mxu2 %v13496_v33  ;;  %v13563_v33 = vld [vmem:[#allocation3 + $0xd0] sm:$0xf] }
 0xca0   :  { %v13564_v32 = vor.u32 %v15352_v34, %v13563_v33 }
 0xca5   :  { %v6558_v4 = vpop.f32.mrf.mxu0 }
 0xcab   :  { %6595 = vmatmul.bf16.gmra.mxu0 %v13532_v21 }
 0xcad   :  { %v6561_v44 = vpop.f32.mrf.mxu0 }
 0xcaf   :  { %6984 = vmatmul.bf16.gmra.mxu2 %v13504_v3 }
 0xcb5   :  { %v6563_v18 = vpop.f32.mrf.mxu0 }
 0xcbb   :  { %6600 = vmatmul.bf16.gmra.mxu0 %v13540_v60 }
 0xcbd   :  { %v6566_v47 = vpop.f32.mrf.mxu0 }
 0xcbf   :  { %6989 = vmatmul.bf16.gmra.mxu2 %v13512_v15  ;;  %v15354_v15 = vld [vmem:[#allocation3 + $0xe4] sm:$0xf0] }
 0xcc5   :  { %v6568_v63 = vpop.f32.mrf.mxu0 }
 0xccb   :  { %6605 = vmatmul.bf16.gmra.mxu0 %v13548_v62 }
 0xccf   :  { %6994 = vmatmul.bf16.gmra.mxu2 %v13520_v9  ;;  %v13565_v9 = vld [vmem:[#allocation3 + $0xd8] sm:$0xf0] }
 0xcd8   :  { %v6571_v19 = vpop.f32.mrf.mxu0 }
 0xcdb   :  { %6610 = vmatmul.bf16.gmra.mxu0 %v13556_v37 }
 0xcdf   :  { %6999 = vmatmul.bf16.gmra.mxu2 %v13528_v5 }
 0xce0   :  { %v6573_v52 = vpop.f32.mrf.mxu0 }
 0xce2   :  { %v6960_v39 = vpop.f32.mrf.mxu2 }
 0xce3   :  { %v19102_v35 = vadd.f32 %v6960_v39, %v6551_v46  ;;  %v13571_v46 = vld [vmem:[#allocation3 + $0xe0] sm:$0xf]  ;;  %v15353_v39 = vld [vmem:[#allocation3 + $0xe4] sm:$0xf] }
 0xce4   :  { %v13572_v20 = vor.u32 %v15354_v15, %v13571_v46 }
 0xce8   :  { %v6576_v6 = vpop.f32.mrf.mxu0 }
 0xcea   :  { %v6962_v24 = vpop.f32.mrf.mxu2 }
 0xceb   :  { %v6963_v22 = vadd.f32 %v6962_v24, %v6553_v27  ;;  %6615 = vmatmul.bf16.gmra.mxu0 %v13564_v32  ;;  %v13587_v24 = vld [vmem:[#allocation3 + $0x100] sm:$0xf] }
 0xced   :  { %14098 = vmatmul.msk.f32.vlgmr.msra.gmra.mxu3 %vm7396_vm1, %v6963_v22 }
 0xcef   :  { %7004 = vmatmul.bf16.gmra.mxu2 %v13536_v26 }
 0xcf0   :  { %v6578_v3 = vpop.f32.mrf.mxu0 }
 0xcf2   :  { %v6965_v31 = vpop.f32.mrf.mxu2 }
 0xcf3   :  { %v6966_v36 = vadd.f32 %v6965_v31, %v6556_v55 }
 0xcf5   :  { %14099 = vmatmul.msk.f32.gmra.mxu3 %vm7396_vm1, %v6966_v36  ;;  %v13581_v36 = vld [vmem:[#allocation3 + $0xf8] sm:$0xf0] }
 0xcf8   :  { %v6581_v7 = vpop.f32.mrf.mxu0 }
 0xcfa   :  { %v6967_v57 = vpop.f32.mrf.mxu2 }
 0xcfb   :  { %v6968_v54 = vadd.f32 %v6967_v57, %v6558_v4  ;;  %6620 = vmatmul.bf16.gmra.mxu0 %v13572_v20  ;;  %v13579_v4 = vld [vmem:[#allocation3 + $0xf0] sm:$0xf]  ;;  %v15360_v57 = vld [vmem:[#allocation3 + $0x114] sm:$0xf0] }
 0xcfc   :  { %v13580_v59 = vor.u32 %v15356_v49, %v13579_v4  ;;  %v13596_v11 = vor.u32 %v15360_v57, %v13595_v17 }
 0xcfd   :  { %14100 = vmatmul.msk.f32.gmra.mxu3 %vm7396_vm1, %v6968_v54 }
 0xcff   :  { %7009 = vmatmul.bf16.gmra.mxu2 %v13544_v56 }
 0xd00   :  { %v6583_v55 = vpop.f32.mrf.mxu0 }
 0xd02   :  { %v6970_v53 = vpop.f32.mrf.mxu2 }
 0xd03   :  { %v6971_v42 = vadd.f32 %v6970_v53, %v6561_v44  ;;  %v13568_v44 = vor.u32 %v15351_v12, %v13565_v9  ;;  %v15357_v53 = vld [vmem:[#allocation3 + $0x104] sm:$0xf]  ;;  %v13619_v9 = vld [vmem:[#allocation3 + $0x140] sm:$0xf] }
 0xd05   :  { %14101 = vmatmul.msk.f32.gmra.mxu3 %vm7396_vm1, %v6971_v42 }
 0xd08   :  { %v6586_v21 = vpop.f32.mrf.mxu0 }
 0xd0a   :  { %v6972_v38 = vpop.f32.mrf.mxu2 }
 0xd0b   :  { %v6973_v61 = vadd.f32 %v6972_v38, %v6563_v18  ;;  %6625 = vmatmul.bf16.gmra.mxu0 %v13580_v59  ;;  %v13573_v18 = vld [vmem:[#allocation3 + $0xe8] sm:$0xf0]  ;;  %v15362_v38 = vld [vmem:[#allocation3 + $0x124] sm:$0xf0] }
 0xd0c   :  { %v13576_v48 = vor.u32 %v15353_v39, %v13573_v18  ;;  %v13604_v34 = vor.u32 %v15362_v38, %v13603_v23  ;;  %v13627_v18 = vld [vmem:[#allocation3 + $0x150] sm:$0xf] }
 0xd0d   :  { %14102 = vmatmul.msk.f32.gmra.mxu3 %vm7396_vm1, %v6973_v61 }
 0xd0f   :  { %7014 = vmatmul.bf16.gmra.mxu2 %v13552_v41 }
 0xd10   :  { %v6588_v5 = vpop.f32.mrf.mxu0 }
 0xd12   :  { %v6975_v30 = vpop.f32.mrf.mxu2 }
 0xd13   :  { %v6976_v50 = vadd.f32 %v6975_v30, %v6566_v47  ;;  %v15358_v47 = vld [vmem:[#allocation3 + $0x104] sm:$0xf0]  ;;  %v15359_v30 = vld [vmem:[#allocation3 + $0x114] sm:$0xf] }
 0xd14   :  { %v13588_v22 = vor.u32 %v15358_v47, %v13587_v24 }
 0xd15   :  { %14103 = vmatmul.msk.f32.gmra.mxu3 %vm7396_vm1, %v6976_v50 }
 0xd18   :  { %v6591_v2 = vpop.f32.mrf.mxu0 }
 0xd1a   :  { %v6977_v45 = vpop.f32.mrf.mxu2 }
 0xd1b   :  { %v6978_v27 = vadd.f32 %v6977_v45, %v6568_v63  ;;  %6630 = vmatmul.bf16.gmra.mxu0 %v13588_v22  ;;  %v15355_v63 = vld [vmem:[#allocation3 + $0xf4] sm:$0xf]  ;;  %v15364_v45 = vld [vmem:[#allocation3 + $0x134] sm:$0xf0] }
 0xd1c   :  { %v13584_v43 = vor.u32 %v15355_v63, %v13581_v36  ;;  %v13612_v15 = vor.u32 %v15364_v45, %v13611_v1  ;;  %v13635_v36 = vld [vmem:[#allocation3 + $0x160] sm:$0xf]  ;;  %v15374_v45 = vld [vmem:[#allocation3 + $0x184] sm:$0xf0] }
 0xd1d   :  { %14104 = vmatmul.msk.f32.gmra.mxu3 %vm7396_vm1, %v6978_v27  ;;  %v13651_v1 = vld [vmem:[#allocation3 + $0x180] sm:$0xf] }
 0xd1f   :  { %7019 = vmatmul.bf16.gmra.mxu2 %v13560_v16 }
 0xd20   :  { %v6593_v62 = vpop.f32.mrf.mxu0 }
 0xd22   :  { %v6980_v58 = vpop.f32.mrf.mxu2 }
 0xd23   :  { %v6981_v0 = vadd.f32 %v6980_v58, %v6571_v19  ;;  %v15361_v58 = vld [vmem:[#allocation3 + $0x124] sm:$0xf] }
 0xd25   :  { %14105 = vmatmul.msk.f32.gmra.mxu3 %vm7396_vm1, %v6981_v0 }
 0xd28   :  { %v6596_v40 = vpop.f32.mrf.mxu0 }
 0xd2a   :  { %v6982_v14 = vpop.f32.mrf.mxu2 }
 0xd2b   :  { %v6983_v10 = vadd.f32 %v6982_v14, %v6573_v52  ;;  %6635 = vmatmul.bf16.gmra.mxu0 %v13596_v11  ;;  %v13589_v52 = vld [vmem:[#allocation3 + $0x108] sm:$0xf0]  ;;  %v15366_v14 = vld [vmem:[#allocation3 + $0x144] sm:$0xf0] }
 0xd2c   :  { %v13592_v33 = vor.u32 %v15357_v53, %v13589_v52  ;;  %v13620_v49 = vor.u32 %v15366_v14, %v13619_v9  ;;  %v13645_v9 = vld [vmem:[#allocation3 + $0x178] sm:$0xf0] }
 0xd2d   :  { %14106 = vmatmul.msk.f32.gmra.mxu3 %vm7396_vm1, %v6983_v10 }
 0xd2f   :  { %7024 = vmatmul.bf16.gmra.mxu2 %v13568_v44 }
 0xd30   :  { %v6598_v56 = vpop.f32.mrf.mxu0 }
 0xd32   :  { %v6985_v8 = vpop.f32.mrf.mxu2 }
 0xd33   :  { %v6986_v60 = vadd.f32 %v6985_v8, %v6576_v6  ;;  %v15363_v8 = vld [vmem:[#allocation3 + $0x134] sm:$0xf] }
 0xd35   :  { %14107 = vmatmul.msk.f32.gmra.mxu3 %vm7396_vm1, %v6986_v60 }
 0xd38   :  { %v6601_v28 = vpop.f32.mrf.mxu0 }
 0xd3a   :  { %v6987_v51 = vpop.f32.mrf.mxu2 }
 0xd3b   :  { %v6988_v13 = vadd.f32 %v6987_v51, %v6578_v3  ;;  %6640 = vmatmul.bf16.gmra.mxu0 %v13604_v34  ;;  %v13597_v3 = vld [vmem:[#allocation3 + $0x118] sm:$0xf0]  ;;  %v15368_v51 = vld [vmem:[#allocation3 + $0x154] sm:$0xf0] }
 0xd3c   :  { %v13600_v46 = vor.u32 %v15359_v30, %v13597_v3  ;;  %v13628_v47 = vor.u32 %v15368_v51, %v13627_v18  ;;  %v15369_v30 = vld [vmem:[#allocation3 + $0x164] sm:$0xf]  ;;  %v13637_v3 = vld [vmem:[#allocation3 + $0x168] sm:$0xf0] }
 0xd3d   :  { %14108 = vmatmul.msk.f32.gmra.mxu3 %vm7396_vm1, %v6988_v13  ;;  %v15373_v51 = vld [vmem:[#allocation3 + $0x184] sm:$0xf] }
 0xd3f   :  { %7029 = vmatmul.bf16.gmra.mxu2 %v13576_v48 }
 0xd40   :  { %v6603_v41 = vpop.f32.mrf.mxu0 }
 0xd42   :  { %v6990_v26 = vpop.f32.mrf.mxu2 }
 0xd43   :  { %v6991_v31 = vadd.f32 %v6990_v26, %v6581_v7  ;;  %v15365_v26 = vld [vmem:[#allocation3 + $0x144] sm:$0xf] }
 0xd45   :  { %14109 = vmatmul.msk.f32.gmra.mxu3 %vm7396_vm1, %v6991_v31 }
 0xd48   :  { %v6606_v25 = vpop.f32.mrf.mxu0 }
 0xd4a   :  { %v6992_v29 = vpop.f32.mrf.mxu2 }
 0xd4b   :  { %v6993_v19 = vadd.f32 %v6992_v29, %v6583_v55  ;;  %6645 = vmatmul.bf16.gmra.mxu0 %v13612_v15  ;;  %v13605_v55 = vld [vmem:[#allocation3 + $0x128] sm:$0xf0]  ;;  %v15370_v29 = vld [vmem:[#allocation3 + $0x164] sm:$0xf0]  ;;  %v13652_v15 = vor.u32 %v15374_v45, %v13651_v1 }
 0xd4c   :  { %v13608_v4 = vor.u32 %v15361_v58, %v13605_v55  ;;  %v13636_v57 = vor.u32 %v15370_v29, %v13635_v36 }
 0xd4d   :  { %14110 = vmatmul.msk.f32.gmra.mxu3 %vm7396_vm1, %v6993_v19 }
 0xd4f   :  { %7034 = vmatmul.bf16.gmra.mxu2 %v13584_v43 }
 0xd50   :  { %v6608_v16 = vpop.f32.mrf.mxu0 }
 0xd52   :  { %v6995_v54 = vpop.f32.mrf.mxu2 }
 0xd53   :  { %v6996_v37 = vadd.f32 %v6995_v54, %v6586_v21 }
 0xd55   :  { %14111 = vmatmul.msk.f32.gmra.mxu3 %vm7396_vm1, %v6996_v37  ;;  %v13629_v37 = vld [vmem:[#allocation3 + $0x158] sm:$0xf0] }
 0xd58   :  { %v6611_v12 = vpop.f32.mrf.mxu0 }
 0xd5a   :  { %v6997_v42 = vpop.f32.mrf.mxu2 }
 0xd5b   :  { %v6998_v6 = vadd.f32 %v6997_v42, %v6588_v5  ;;  %6650 = vmatmul.bf16.gmra.mxu0 %v13620_v49  ;;  %v13613_v5 = vld [vmem:[#allocation3 + $0x138] sm:$0xf0]  ;;  %v13643_v42 = vld [vmem:[#allocation3 + $0x170] sm:$0xf] }
 0xd5c   :  { %v13616_v24 = vor.u32 %v15363_v8, %v13613_v5  ;;  %v13659_v49 = vld [vmem:[#allocation3 + $0x190] sm:$0xf] }
 0xd5d   :  { %14112 = vmatmul.msk.f32.gmra.mxu3 %vm7396_vm1, %v6998_v6 }
 0xd5f   :  { %7039 = vmatmul.bf16.gmra.mxu2 %v13592_v33 }
 0xd60   :  { %v6613_v44 = vpop.f32.mrf.mxu0 }
 0xd62   :  { %v7000_v61 = vpop.f32.mrf.mxu2 }
 0xd63   :  { %v7001_v32 = vadd.f32 %v7000_v61, %v6591_v2 }
 0xd65   :  { %14113 = vmatmul.msk.f32.gmra.mxu3 %vm7396_vm1, %v7001_v32 }
 0xd68   :  { %v6616_v39 = vpop.f32.mrf.mxu0 }
 0xd6a   :  { %v7002_v50 = vpop.f32.mrf.mxu2 }
 0xd6b   :  { %v7003_v7 = vadd.f32 %v7002_v50, %v6593_v62  ;;  %6655 = vmatmul.bf16.gmra.mxu0 %v13628_v47  ;;  %v13621_v62 = vld [vmem:[#allocation3 + $0x148] sm:$0xf0] }
 0xd6c   :  { %v13624_v17 = vor.u32 %v15365_v26, %v13621_v62 }
 0xd6d   :  { %14114 = vmatmul.msk.f32.gmra.mxu3 %vm7396_vm1, %v7003_v7 }
 0xd6f   :  { %7044 = vmatmul.bf16.gmra.mxu2 %v13600_v46  ;;  %v13640_v46 = vor.u32 %v15369_v30, %v13637_v3 }
 0xd70   :  { %v6618_v48 = vpop.f32.mrf.mxu0  ;;  %v19130_v19 = vpop.f32.mrf.mxu3 }
 0xd72   :  { %v7005_v27 = vpop.f32.mrf.mxu2 }
 0xd73   :  { %v7006_v20 = vadd.f32 %v7005_v27, %v6596_v40 }
 0xd75   :  { %14115 = vmatmul.msk.f32.gmra.mxu3 %vm7396_vm1, %v7006_v20 }
 0xd78   :  { %v6621_v63 = vpop.f32.mrf.mxu0  ;;  %v19133_v23 = vpop.f32.mrf.mxu3 }
 0xd7a   :  { %v7007_v0 = vpop.f32.mrf.mxu2 }
 0xd7b   :  { %v7008_v21 = vadd.f32 %v7007_v0, %v6598_v56  ;;  %6660 = vmatmul.bf16.gmra.mxu0 %v13636_v57  ;;  %v15367_v56 = vld [vmem:[#allocation3 + $0x154] sm:$0xf]  ;;  %v14129_v0 = vld [vmem:[%s20501_s8 + $0x20] sm:$0xff] }
 0xd7c   :  { %v13632_v6 = vor.u32 %v15367_v56, %v13629_v37 }
 0xd7d   :  { %14116 = vmatmul.msk.f32.gmra.mxu3 %vm7396_vm1, %v7008_v21 }
 0xd7f   :  { %7049 = vmatmul.bf16.gmra.mxu2 %v13608_v4 }
 0xd80   :  { %v6623_v11 = vpop.f32.mrf.mxu0  ;;  %v19136_v32 = vpop.f32.mrf.mxu3 }
 0xd82   :  { %v7010_v10 = vpop.f32.mrf.mxu2 }
 0xd83   :  { %v7011_v59 = vadd.f32 %v7010_v10, %v6601_v28  ;;  %v15372_v28 = vld [vmem:[#allocation3 + $0x174] sm:$0xf0] }
 0xd84   :  { %v13644_v33 = vor.u32 %v15372_v28, %v13643_v42  ;;  %v15376_v10 = vld [vmem:[#allocation3 + $0x194] sm:$0xf0] }
 0xd85   :  { %14117 = vmatmul.msk.f32.gmra.mxu3 %vm7396_vm1, %v7011_v59  ;;  %v13660_v8 = vor.u32 %v15376_v10, %v13659_v49  ;;  %v15381_v49 = vld [vmem:[#allocation3 + $0x1c4] sm:$0xf]  ;;  %v13685_v10 = vld [vmem:[#allocation3 + $0x1c8] sm:$0xf0] }
 0xd88   :  { %v6626_v52 = vpop.f32.mrf.mxu0  ;;  %v19140_v27 = vpop.f32.mrf.mxu3 }
 0xd8a   :  { %v7012_v60 = vpop.f32.mrf.mxu2 }
 0xd8b   :  { %v7013_v2 = vadd.f32 %v7012_v60, %v6603_v41  ;;  %6665 = vmatmul.bf16.gmra.mxu0 %v13644_v33 }
 0xd8d   :  { %14118 = vmatmul.msk.f32.gmra.mxu3 %vm7396_vm1, %v7013_v2  ;;  %v13653_v2 = vld [vmem:[#allocation3 + $0x188] sm:$0xf0] }
 0xd8e   :  { %v13656_v26 = vor.u32 %v15373_v51, %v13653_v2 }
 0xd8f   :  { %7054 = vmatmul.bf16.gmra.mxu2 %v13616_v24 }
 0xd90   :  { %v6628_v61 = vpop.f32.mrf.mxu0  ;;  %v19149_v14 = vpop.f32.mrf.mxu3 }
 0xd92   :  { %v7015_v13 = vpop.f32.mrf.mxu2 }
 0xd93   :  { %v7016_v22 = vadd.f32 %v7015_v13, %v6606_v25  ;;  %v13667_v13 = vld [vmem:[#allocation3 + $0x1a0] sm:$0xf] }
 0xd95   :  { %14119 = vmatmul.msk.f32.gmra.mxu3 %vm7396_vm1, %v7016_v22 }
 0xd98   :  { %v6631_v25 = vpop.f32.mrf.mxu0 }
 0xd9a   :  { %v7017_v31 = vpop.f32.mrf.mxu2 }
 0xd9b   :  { %v7018_v40 = vadd.f32 %v7017_v31, %v6608_v16  ;;  %6670 = vmatmul.bf16.gmra.mxu0 %v13652_v15  ;;  %v14130_v16 = vld [vmem:[%s20501_s8 + $0x28] sm:$0xff] }
 0xd9c   :  { %7913 = vmatpush.msrb.mxu1 %v14130_v16  ;;  %15687 = vmatpush.msrb.mxu2 %v14130_v16 }
 0xd9d   :  { %14120 = vmatmul.msk.f32.gmra.mxu3 %vm7396_vm1, %v7018_v40  ;;  %v15375_v40 = vld [vmem:[#allocation3 + $0x194] sm:$0xf] }
 0xd9e   :  { %7914 = vmatpush.msrb.mxu1 %v14129_v0  ;;  %15688 = vmatpush.msrb.mxu2 %v14129_v0 }
 0xd9f   :  { %7059 = vmatmul.bf16.gmra.mxu2 %v13624_v17  ;;  %v13661_v17 = vld [vmem:[#allocation3 + $0x198] sm:$0xf0] }
 0xda0   :  { %v6633_v58 = vpop.f32.mrf.mxu0  ;;  %v13664_v37 = vor.u32 %v15375_v40, %v13661_v17 }
 0xda2   :  { %v7020_v43 = vpop.f32.mrf.mxu2 }
 0xda3   :  { %v7021_v54 = vadd.f32 %v7020_v43, %v6611_v12  ;;  %v15371_v12 = vld [vmem:[#allocation3 + $0x174] sm:$0xf] }
 0xda4   :  { %v13648_v59 = vor.u32 %v15371_v12, %v13645_v9 }
 0xda5   :  { %14121 = vmatmul.msk.f32.gmra.mxu3 %vm7396_vm1, %v7021_v54  ;;  %v15380_v54 = vld [vmem:[#allocation3 + $0x1b4] sm:$0xf0] }
 0xda8   :  { %v6636_v4 = vpop.f32.mrf.mxu0 }
 0xdaa   :  { %v7022_v53 = vpop.f32.mrf.mxu2 }
 0xdab   :  { %v7023_v38 = vadd.f32 %v7022_v53, %v6613_v44  ;;  %6675 = vmatmul.bf16.gmra.mxu0 %v13660_v8  ;;  %v13699_v8 = vld [vmem:[#allocation3 + $0x1e0] sm:$0xf] }
 0xdad   :  { %14122 = vmatmul.msk.f32.gmra.mxu3 %vm7396_vm1, %v7023_v38  ;;  %v15377_v38 = vld [vmem:[#allocation3 + $0x1a4] sm:$0xf] }
 0xdaf   :  { %7064 = vmatmul.bf16.gmra.mxu2 %v13632_v6  ;;  %v13669_v6 = vld [vmem:[#allocation3 + $0x1a8] sm:$0xf0] }
 0xdb0   :  { %v6638_v60 = vpop.f32.mrf.mxu0  ;;  %v13672_v3 = vor.u32 %v15377_v38, %v13669_v6 }
 0xdb2   :  { %v7025_v34 = vpop.f32.mrf.mxu2 }
 0xdb3   :  { %v7026_v41 = vadd.f32 %v7025_v34, %v6616_v39  ;;  %v19152_v39 = vpop.f32.mrf.mxu3 }
 0xdb5   :  { %14123 = vmatmul.msk.f32.gmra.mxu3 %vm7396_vm1, %v7026_v41  ;;  %v15382_v41 = vld [vmem:[#allocation3 + $0x1c4] sm:$0xf0] }
 0xdb8   :  { %v6641_v47 = vpop.f32.mrf.mxu0 }
 0xdba   :  { %v7027_v50 = vpop.f32.mrf.mxu2 }
 0xdbb   :  { %v7028_v7 = vadd.f32 %v7027_v50, %v6618_v48  ;;  %v15378_v48 = vld [vmem:[#allocation3 + $0x1a4] sm:$0xf0]  ;;  %v19155_v31 = vpop.f32.mrf.mxu3 }
 0xdbc   :  { %v13668_v62 = vor.u32 %v15378_v48, %v13667_v13  ;;  %v15383_v13 = vld [vmem:[#allocation3 + $0x1d4] sm:$0xf]  ;;  %v13693_v48 = vld [vmem:[#allocation3 + $0x1d8] sm:$0xf0] }
 0xdbd   :  { %14124 = vmatmul.msk.f32.gmra.mxu3 %vm7396_vm1, %v7028_v7  ;;  %v15379_v7 = vld [vmem:[#allocation3 + $0x1b4] sm:$0xf] }
 0xdbe   :  { %6680 = vmatmul.bf16.gmra.mxu0 %v13668_v62  ;;  %v13707_v62 = vld [vmem:[#allocation3 + $0x1f0] sm:$0xf] }
 0xdbf   :  { %7069 = vmatmul.bf16.gmra.mxu2 %v13640_v46  ;;  %v13677_v46 = vld [vmem:[#allocation3 + $0x1b8] sm:$0xf0] }
 0xdc0   :  { %v6643_v36 = vpop.f32.mrf.mxu0  ;;  %v13680_v0 = vor.u32 %v15379_v7, %v13677_v46 }
 0xdc2   :  { %v7030_v20 = vpop.f32.mrf.mxu2 }
 0xdc3   :  { %v7031_v55 = vadd.f32 %v7030_v20, %v6621_v63  ;;  %v13691_v20 = vld [vmem:[#allocation3 + $0x1d0] sm:$0xf] }
 0xdc5   :  { %14125 = vmatmul.msk.f32.gmra.mxu3 %vm7396_vm1, %v7031_v55 }
 0xdc8   :  { %v6646_v43 = vpop.f32.mrf.mxu0 }
 0xdca   :  { %v7032_v21 = vpop.f32.mrf.mxu2 }
 0xdcb   :  { %v7033_v44 = vadd.f32 %v7032_v21, %v6623_v11  ;;  %v13675_v11 = vld [vmem:[#allocation3 + $0x1b0] sm:$0xf] }
 0xdcc   :  { %v13676_v53 = vor.u32 %v15380_v54, %v13675_v11  ;;  %v15385_v11 = vld [vmem:[#allocation3 + $0x1e4] sm:$0xf]  ;;  %v13701_v54 = vld [vmem:[#allocation3 + $0x1e8] sm:$0xf0] }
 0xdcd   :  { %14126 = vmatmul.msk.f32.gmra.mxu3 %vm7396_vm1, %v7033_v44 }
 0xdce   :  { %6685 = vmatmul.bf16.gmra.mxu0 %v13676_v53  ;;  %v13715_v53 = vld [vmem:[#allocation3 + $0x200] sm:$0xf] }
 0xdcf   :  { %7074 = vmatmul.bf16.gmra.mxu2 %v13648_v59 }
 0xdd0   :  { %v6648_v42 = vpop.f32.mrf.mxu0 }
 0xdd2   :  { %v7035_v5 = vpop.f32.mrf.mxu2 }
 0xdd3   :  { %v7036_v18 = vadd.f32 %v7035_v5, %v6626_v52  ;;  %v15386_v5 = vld [vmem:[#allocation3 + $0x1e4] sm:$0xf0] }
 0xdd4   :  { %v13700_v51 = vor.u32 %v15386_v5, %v13699_v8  ;;  %v15391_v8 = vld [vmem:[#allocation3 + $0x214] sm:$0xf]  ;;  %v13725_v5 = vld [vmem:[#allocation3 + $0x218] sm:$0xf0] }
 0xdd5   :  { %14127 = vmatmul.msk.f32.gmra.mxu3 %vm7396_vm1, %v7036_v18  ;;  %v13688_v18 = vor.u32 %v15381_v49, %v13685_v10 }
 0xdd8   :  { %v6651_v34 = vpop.f32.mrf.mxu0 }
 0xdda   :  { %v7037_v24 = vpop.f32.mrf.mxu2 }
 0xddb   :  { %v7038_v22 = vadd.f32 %v7037_v24, %v6628_v61  ;;  %v13683_v61 = vld [vmem:[#allocation3 + $0x1c0] sm:$0xf] }
 0xddc   :  { %v13684_v50 = vor.u32 %v15382_v41, %v13683_v61  ;;  %v15387_v61 = vld [vmem:[#allocation3 + $0x1f4] sm:$0xf]  ;;  %v13709_v41 = vld [vmem:[#allocation3 + $0x1f8] sm:$0xf0] }
 0xddd   :  { %14128 = vmatmul.msk.f32.gmra.mxu3 %vm7396_vm1, %v7038_v22 }
 0xdde   :  { %6690 = vmatmul.bf16.gmra.mxu0 %v13684_v50  ;;  %v13723_v50 = vld [vmem:[#allocation3 + $0x210] sm:$0xf] }
 0xddf   :  { %7079 = vmatmul.bf16.gmra.mxu2 %v13656_v26 }
 0xde0   :  { %v6653_v1 = vpop.f32.mrf.mxu0 }
 0xde2   :  { %v7040_v63 = vpop.f32.mrf.mxu2 }
 0xde3   :  { %v7041_v29 = vadd.f32 %v7040_v63, %v6631_v25  ;;  %v15388_v63 = vld [vmem:[#allocation3 + $0x1f4] sm:$0xf0] }
 0xde4   :  { %v13708_v40 = vor.u32 %v15388_v63, %v13707_v62  ;;  %v15393_v62 = vld [vmem:[#allocation3 + $0x224] sm:$0xf]  ;;  %v13733_v63 = vld [vmem:[#allocation3 + $0x228] sm:$0xf0] }
 0xde5   :  { %14133 = vmatmul.msk.f32.vlgmr.msrb.gmra.mxu1 %vm7396_vm1, %v7041_v29  ;;  %v13696_v29 = vor.u32 %v15383_v13, %v13693_v48 }
 0xde8   :  { %v6656_v16 = vpop.f32.mrf.mxu0 }
 0xdea   :  { %v7042_v57 = vpop.f32.mrf.mxu2 }
 0xdeb   :  { %v7043_v56 = vadd.f32 %v7042_v57, %v6633_v58  ;;  %v15384_v58 = vld [vmem:[#allocation3 + $0x1d4] sm:$0xf0] }
 0xdec   :  { %v13692_v12 = vor.u32 %v15384_v58, %v13691_v20  ;;  %v15389_v20 = vld [vmem:[#allocation3 + $0x204] sm:$0xf]  ;;  %v13717_v58 = vld [vmem:[#allocation3 + $0x208] sm:$0xf0] }
 0xded   :  { %14134 = vmatmul.msk.f32.gmra.mxu1 %vm7396_vm1, %v7043_v56 }
 0xdee   :  { %6695 = vmatmul.bf16.gmra.mxu0 %v13692_v12  ;;  %v13731_v12 = vld [vmem:[#allocation3 + $0x220] sm:$0xf] }
 0xdef   :  { %7084 = vmatmul.bf16.gmra.mxu2 %v13664_v37 }
 0xdf0   :  { %v6658_v21 = vpop.f32.mrf.mxu0 }
 0xdf2   :  { %v7045_v52 = vpop.f32.mrf.mxu2 }
 0xdf3   :  { %v7046_v28 = vadd.f32 %v7045_v52, %v6636_v4  ;;  %v15390_v52 = vld [vmem:[#allocation3 + $0x204] sm:$0xf0] }
 0xdf4   :  { %v13716_v38 = vor.u32 %v15390_v52, %v13715_v53 }
 0xdf5   :  { %14135 = vmatmul.msk.f32.gmra.mxu1 %vm7396_vm1, %v7046_v28  ;;  %v13704_v28 = vor.u32 %v15385_v11, %v13701_v54 }
 0xdf8   :  { %v6661_v59 = vpop.f32.mrf.mxu0 }
 0xdfa   :  { %v7047_v33 = vpop.f32.mrf.mxu2 }
 0xdfb   :  { %v7048_v30 = vadd.f32 %v7047_v33, %v6638_v60 }
 0xdfd   :  { %14136 = vmatmul.msk.f32.gmra.mxu1 %vm7396_vm1, %v7048_v30 }
 0xdfe   :  { %6700 = vmatmul.bf16.gmra.mxu0 %v13700_v51  ;;  %v15396_v51 = vld [vmem:[#allocation3 + $0x234] sm:$0xf0] }
 0xdff   :  { %7089 = vmatmul.bf16.gmra.mxu2 %v13672_v3 }
 0xe00   :  { %v6663_v24 = vpop.f32.mrf.mxu0 }
 0xe02   :  { %v7050_v25 = vpop.f32.mrf.mxu2 }
 0xe03   :  { %v7051_v45 = vadd.f32 %v7050_v25, %v6641_v47  ;;  %v15392_v25 = vld [vmem:[#allocation3 + $0x214] sm:$0xf0] }
 0xe04   :  { %v13724_v7 = vor.u32 %v15392_v25, %v13723_v50 }
 0xe05   :  { %14137 = vmatmul.msk.f32.gmra.mxu1 %vm7396_vm1, %v7051_v45  ;;  %v13712_v45 = vor.u32 %v15387_v61, %v13709_v41 }
 0xe08   :  { %v6666_v26 = vpop.f32.mrf.mxu0 }
 0xe0a   :  { %v7052_v15 = vpop.f32.mrf.mxu2 }
 0xe0b   :  { %v7053_v55 = vadd.f32 %v7052_v15, %v6643_v36 }
 0xe0d   :  { %14138 = vmatmul.msk.f32.gmra.mxu1 %vm7396_vm1, %v7053_v55 }
 0xe0e   :  { %6705 = vmatmul.bf16.gmra.mxu0 %v13708_v40  ;;  %v13747_v40 = vld [vmem:[#allocation3 + $0x240] sm:$0xf] }
 0xe0f   :  { %7094 = vmatmul.bf16.gmra.mxu2 %v13680_v0 }
 0xe10   :  { %v6668_v57 = vpop.f32.mrf.mxu0 }
 0xe12   :  { %v7055_v9 = vpop.f32.mrf.mxu2 }
 0xe13   :  { %v7056_v4 = vadd.f32 %v7055_v9, %v6646_v43  ;;  %v15394_v9 = vld [vmem:[#allocation3 + $0x224] sm:$0xf0] }
 0xe14   :  { %v13732_v49 = vor.u32 %v15394_v9, %v13731_v12 }
 0xe15   :  { %14139 = vmatmul.msk.f32.gmra.mxu1 %vm7396_vm1, %v7056_v4  ;;  %v13720_v4 = vor.u32 %v15389_v20, %v13717_v58  ;;  %v13763_v20 = vld [vmem:[#allocation3 + $0x260] sm:$0xf]  ;;  %v15402_v58 = vld [vmem:[#allocation3 + $0x264] sm:$0xf0] }
 0xe16   :  { %v13764_v9 = vor.u32 %v15402_v58, %v13763_v20 }
 0xe18   :  { %v6671_v37 = vpop.f32.mrf.mxu0 }
 0xe1a   :  { %v7057_v44 = vpop.f32.mrf.mxu2 }
 0xe1b   :  { %v7058_v60 = vadd.f32 %v7057_v44, %v6648_v42 }
 0xe1d   :  { %14140 = vmatmul.msk.f32.gmra.mxu1 %vm7396_vm1, %v7058_v60 }
 0xe1e   :  { %6710 = vmatmul.bf16.gmra.mxu0 %v13716_v38 }
 0xe1f   :  { %7099 = vmatmul.bf16.gmra.mxu2 %v13688_v18  ;;  %v13739_v18 = vld [vmem:[#allocation3 + $0x230] sm:$0xf] }
 0xe20   :  { %v6673_v33 = vpop.f32.mrf.mxu0  ;;  %v13740_v13 = vor.u32 %v15396_v51, %v13739_v18  ;;  %v15404_v18 = vld [vmem:[#allocation3 + $0x274] sm:$0xf0] }
 0xe22   :  { %v7060_v2 = vpop.f32.mrf.mxu2 }
 0xe23   :  { %v7061_v47 = vadd.f32 %v7060_v2, %v6651_v34 }
 0xe25   :  { %14141 = vmatmul.msk.f32.gmra.mxu1 %vm7396_vm1, %v7061_v47 }
 0xe28   :  { %v6676_v3 = vpop.f32.mrf.mxu0 }
 0xe2a   :  { %v7062_v22 = vpop.f32.mrf.mxu2 }
 0xe2b   :  { %v7063_v36 = vadd.f32 %v7062_v22, %v6653_v1 }
 0xe2d   :  { %14142 = vmatmul.msk.f32.gmra.mxu1 %vm7396_vm1, %v7063_v36  ;;  %v19177_v36 = vpop.f32.mrf.mxu3 }
 0xe2e   :  { %6715 = vmatmul.bf16.gmra.mxu0 %v13724_v7  ;;  %v15397_v7 = vld [vmem:[#allocation3 + $0x244] sm:$0xf] }
 0xe2f   :  { %7104 = vmatmul.bf16.gmra.mxu2 %v13696_v29 }
 0xe30   :  { %v6678_v15 = vpop.f32.mrf.mxu0 }
 0xe32   :  { %v7065_v17 = vpop.f32.mrf.mxu2 }
 0xe33   :  { %v7066_v43 = vadd.f32 %v7065_v17, %v6656_v16  ;;  %v15398_v17 = vld [vmem:[#allocation3 + $0x244] sm:$0xf0] }
 0xe34   :  { %v13748_v54 = vor.u32 %v15398_v17, %v13747_v40  ;;  %v15401_v40 = vld [vmem:[#allocation3 + $0x264] sm:$0xf]  ;;  %v13765_v17 = vld [vmem:[#allocation3 + $0x268] sm:$0xf0] }
 0xe35   :  { %14143 = vmatmul.msk.f32.gmra.mxu1 %vm7396_vm1, %v7066_v43  ;;  %v13736_v43 = vor.u32 %v15393_v62, %v13733_v63  ;;  %v19180_v52 = vpop.f32.mrf.mxu3 }
 0xe36   :  { %20728 = vst [vmem:[#allocation65_spill] sm:$0xff] %v19180_v52  ;;  %v15471_v52 = vld [vmem:[#allocation3 + $0x494] sm:$0xf] }
 0xe3a   :  { %v7067_v56 = vpop.f32.mrf.mxu2 }
 0xe3b   :  { %v7068_v42 = vadd.f32 %v7067_v56, %v6658_v21  ;;  %v6681_v0 = vpop.f32.mrf.mxu0 }
 0xe3d   :  { %14144 = vmatmul.msk.f32.gmra.mxu1 %vm7396_vm1, %v7068_v42  ;;  %v15395_v42 = vld [vmem:[#allocation3 + $0x234] sm:$0xf] }
 0xe3e   :  { %6720 = vmatmul.bf16.gmra.mxu0 %v13732_v49 }
 0xe3f   :  { %7109 = vmatmul.bf16.gmra.mxu2 %v13704_v28  ;;  %v13741_v28 = vld [vmem:[#allocation3 + $0x238] sm:$0xf0] }
 0xe40   :  { %v13744_v61 = vor.u32 %v15395_v42, %v13741_v28  ;;  %v14168_v42 = vld [vmem:[%s20501_s8 + $0x58] sm:$0xff]  ;;  %v14167_v28 = vld [vmem:[%s20501_s8 + $0x50] sm:$0xff] }
 0xe41   :  { %8157 = vmatpush.msrb.mxu3 %v14168_v42 }
 0xe42   :  { %v7070_v6 = vpop.f32.mrf.mxu2 }
 0xe43   :  { %v7071_v34 = vadd.f32 %v7070_v6, %v6661_v59  ;;  %v6683_v59 = vpop.f32.mrf.mxu0  ;;  %v13755_v6 = vld [vmem:[#allocation3 + $0x250] sm:$0xf]  ;;  %8158 = vmatpush.msrb.mxu3 %v14167_v28 }
 0xe45   :  { %14145 = vmatmul.msk.f32.gmra.mxu1 %vm7396_vm1, %v7071_v34 }
 0xe4a   :  { %v7072_v30 = vpop.f32.mrf.mxu2 }
 0xe4b   :  { %v7073_v1 = vadd.f32 %v7072_v30, %v6663_v24  ;;  %v13728_v24 = vor.u32 %v15391_v8, %v13725_v5  ;;  %v6686_v47 = vpop.f32.mrf.mxu0  ;;  %v13757_v8 = vld [vmem:[#allocation3 + $0x258] sm:$0xf0] }
 0xe4d   :  { %14146 = vmatmul.msk.f32.gmra.mxu1 %vm7396_vm1, %v7073_v1 }
 0xe4e   :  { %6725 = vmatmul.bf16.gmra.mxu0 %v13740_v13 }
 0xe4f   :  { %7114 = vmatmul.bf16.gmra.mxu2 %v13712_v45 }
 0xe52   :  { %v7075_v46 = vpop.f32.mrf.mxu2 }
 0xe53   :  { %v7076_v16 = vadd.f32 %v7075_v46, %v6666_v26  ;;  %v6688_v26 = vpop.f32.mrf.mxu0  ;;  %v13749_v46 = vld [vmem:[#allocation3 + $0x248] sm:$0xf0] }
 0xe55   :  { %14147 = vmatmul.msk.f32.gmra.mxu1 %vm7396_vm1, %v7076_v16 }
 0xe5a   :  { %v7077_v55 = vpop.f32.mrf.mxu2 }
 0xe5b   :  { %v7078_v21 = vadd.f32 %v7077_v55, %v6668_v57  ;;  %v6691_v11 = vpop.f32.mrf.mxu0 }
 0xe5d   :  { %14148 = vmatmul.msk.f32.gmra.mxu1 %vm7396_vm1, %v7078_v21 }
 0xe5e   :  { %6730 = vmatmul.bf16.gmra.mxu0 %v13748_v54 }
 0xe5f   :  { %7119 = vmatmul.bf16.gmra.mxu2 %v13720_v4 }
 0xe62   :  { %v7080_v10 = vpop.f32.mrf.mxu2 }
 0xe63   :  { %v7081_v44 = vadd.f32 %v7080_v10, %v6671_v37  ;;  %v6693_v53 = vpop.f32.mrf.mxu0 }
 0xe65   :  { %14149 = vmatmul.msk.f32.gmra.mxu1 %vm7396_vm1, %v7081_v44 }
 0xe6a   :  { %v7082_v60 = vpop.f32.mrf.mxu2 }
 0xe6b   :  { %v7083_v2 = vadd.f32 %v7082_v60, %v6673_v33  ;;  %v15400_v33 = vld [vmem:[#allocation3 + $0x254] sm:$0xf0]  ;;  %v6696_v41 = vpop.f32.mrf.mxu0  ;;  %v13771_v60 = vld [vmem:[#allocation3 + $0x270] sm:$0xf] }
 0xe6c   :  { %v13756_v30 = vor.u32 %v15400_v33, %v13755_v6  ;;  %v14166_v33 = vld [vmem:[%s20501_s8 + $0x48] sm:$0xff] }
 0xe6d   :  { %14150 = vmatmul.msk.f32.gmra.mxu1 %vm7396_vm1, %v7083_v2  ;;  %8159 = vmatpush.msrb.mxu3 %v14166_v33 }
 0xe6e   :  { %6735 = vmatmul.bf16.gmra.mxu0 %v13756_v30  ;;  %v14165_v30 = vld [vmem:[%s20501_s8 + $0x40] sm:$0xff] }
 0xe6f   :  { %7124 = vmatmul.bf16.gmra.mxu2 %v13728_v24  ;;  %8160 = vmatpush.msrb.mxu3 %v14165_v30 }
 0xe72   :  { %v7085_v48 = vpop.f32.mrf.mxu2 }
 0xe73   :  { %v7086_v22 = vadd.f32 %v7085_v48, %v6676_v3  ;;  %v19184_v3 = vpop.f32.mrf.mxu3  ;;  %v6698_v1 = vpop.f32.mrf.mxu0 }
 0xe75   :  { %14151 = vmatmul.msk.f32.gmra.mxu1 %vm7396_vm1, %v7086_v22 }
 0xe7a   :  { %v7087_v29 = vpop.f32.mrf.mxu2 }
 0xe7b   :  { %v7088_v57 = vadd.f32 %v7087_v29, %v6678_v15  ;;  %v19187_v45 = vpop.f32.mrf.mxu3  ;;  %v19189_v15 = vpop.f32.mrf.mxu1 }
 0xe7c   :  { %20729 = vst [vmem:[#allocation17_spill] sm:$0xff] %v19189_v15  ;;  %v6701_v12 = vpop.f32.mrf.mxu0  ;;  %v15465_v15 = vld [vmem:[#allocation3 + $0x464] sm:$0xf] }
 0xe7d   :  { %14152 = vmatmul.msk.f32.gmra.mxu1 %vm7396_vm1, %v7088_v57 }
 0xe7e   :  { %6740 = vmatmul.bf16.gmra.mxu0 %v13764_v9 }
 0xe7f   :  { %7129 = vmatmul.bf16.gmra.mxu2 %v13736_v43  ;;  %v13779_v43 = vld [vmem:[#allocation3 + $0x280] sm:$0xf] }
 0xe82   :  { %v7090_v56 = vpop.f32.mrf.mxu2 }
 0xe83   :  { %v7091_v37 = vadd.f32 %v7090_v56, %v6681_v0  ;;  %v13752_v0 = vor.u32 %v15397_v7, %v13749_v46  ;;  %v19192_v21 = vpop.f32.mrf.mxu3  ;;  %v19194_v49 = vpop.f32.mrf.mxu1  ;;  %v13768_v56 = vor.u32 %v15401_v40, %v13765_v17  ;;  %v13787_v46 = vld [vmem:[#allocation3 + $0x290] sm:$0xf] }
 0xe84   :  { %v6703_v44 = vpop.f32.mrf.mxu0 }
 0xe85   :  { %14153 = vmatmul.msk.f32.gmra.mxu1 %vm7396_vm1, %v7091_v37 }
 0xe8a   :  { %v7092_v38 = vpop.f32.mrf.mxu2 }
 0xe8b   :  { %v7093_v34 = vadd.f32 %v7092_v38, %v6683_v59  ;;  %v15399_v59 = vld [vmem:[#allocation3 + $0x254] sm:$0xf]  ;;  %v19197_v13 = vpop.f32.mrf.mxu3  ;;  %v19199_v48 = vpop.f32.mrf.mxu1 }
 0xe8c   :  { %v13760_v2 = vor.u32 %v15399_v59, %v13757_v8  ;;  %v6706_v24 = vpop.f32.mrf.mxu0 }
 0xe8d   :  { %14154 = vmatmul.msk.f32.gmra.mxu1 %vm7396_vm1, %v7093_v34 }
 0xe8f   :  { %7134 = vmatmul.bf16.gmra.mxu2 %v13744_v61 }
 0xe92   :  { %v7095_v50 = vpop.f32.mrf.mxu2 }
 0xe93   :  { %v7096_v25 = vadd.f32 %v7095_v50, %v6686_v47  ;;  %v13772_v47 = vor.u32 %v15404_v18, %v13771_v60  ;;  %v19203_v63 = vpop.f32.mrf.mxu3  ;;  %v19205_v29 = vpop.f32.mrf.mxu1  ;;  %v15403_v50 = vld [vmem:[#allocation3 + $0x274] sm:$0xf]  ;;  %v13781_v60 = vld [vmem:[#allocation3 + $0x288] sm:$0xf0] }
 0xe94   :  { %v6708_v62 = vpop.f32.mrf.mxu0 }
 0xe95   :  { %14155 = vmatmul.msk.f32.gmra.mxu1 %vm7396_vm1, %v7096_v25  ;;  %6745 = vmatmul.bf16.gmra.mxu0 %v13772_v47  ;;  %v13773_v25 = vld [vmem:[#allocation3 + $0x278] sm:$0xf0] }
 0xe9a   :  { %v7097_v16 = vpop.f32.mrf.mxu2 }
 0xe9b   :  { %v7098_v55 = vadd.f32 %v7097_v16, %v6688_v26  ;;  %v19214_v38 = vpop.f32.mrf.mxu3  ;;  %v19216_v6 = vpop.f32.mrf.mxu1  ;;  %v15408_v16 = vld [vmem:[#allocation3 + $0x294] sm:$0xf0] }
 0xe9c   :  { %v6711_v37 = vpop.f32.mrf.mxu0 }
 0xe9d   :  { %14156 = vmatmul.msk.f32.gmra.mxu1 %vm7396_vm1, %v7098_v55  ;;  %v13776_v55 = vor.u32 %v15403_v50, %v13773_v25  ;;  %v15409_v25 = vld [vmem:[#allocation3 + $0x2a4] sm:$0xf] }
 0xe9f   :  { %7139 = vmatmul.bf16.gmra.mxu2 %v13752_v0 }
 0xea2   :  { %v7100_v4 = vpop.f32.mrf.mxu2 }
 0xea3   :  { %v7101_v10 = vadd.f32 %v7100_v4, %v6691_v11  ;;  %v15406_v11 = vld [vmem:[#allocation3 + $0x284] sm:$0xf0]  ;;  %v19227_v20 = vpop.f32.mrf.mxu1 }
 0xea5   :  { %14157 = vmatmul.msk.f32.gmra.mxu1 %vm7396_vm1, %v7101_v10 }
 0xeaa   :  { %v7102_v5 = vpop.f32.mrf.mxu2 }
 0xeab   :  { %v7103_v51 = vadd.f32 %v7102_v5, %v6693_v53  ;;  %v13780_v53 = vor.u32 %v15406_v11, %v13779_v43  ;;  %v19232_v8 = vpop.f32.mrf.mxu1  ;;  %v15405_v5 = vld [vmem:[#allocation3 + $0x284] sm:$0xf]  ;;  %v15407_v11 = vld [vmem:[#allocation3 + $0x294] sm:$0xf] }
 0xeac   :  { %v13784_v47 = vor.u32 %v15405_v5, %v13781_v60 }
 0xead   :  { %14158 = vmatmul.msk.f32.gmra.mxu1 %vm7396_vm1, %v7103_v51  ;;  %6750 = vmatmul.bf16.gmra.mxu0 %v13780_v53  ;;  %v15410_v51 = vld [vmem:[#allocation3 + $0x2a4] sm:$0xf0]  ;;  %v13803_v53 = vld [vmem:[#allocation3 + $0x2b0] sm:$0xf] }
 0xeaf   :  { %7144 = vmatmul.bf16.gmra.mxu2 %v13760_v2 }
 0xeb2   :  { %v7105_v22 = vpop.f32.mrf.mxu2 }
 0xeb3   :  { %v7106_v26 = vadd.f32 %v7105_v22, %v6696_v41  ;;  %v6713_v41 = vpop.f32.mrf.mxu0 }
 0xeb5   :  { %14159 = vmatmul.msk.f32.gmra.mxu1 %vm7396_vm1, %v7106_v26 }
 0xeba   :  { %v7107_v57 = vpop.f32.mrf.mxu2 }
 0xebb   :  { %v7108_v54 = vadd.f32 %v7107_v57, %v6698_v1  ;;  %v19225_v1 = vpop.f32.mrf.mxu3  ;;  %v6716_v0 = vpop.f32.mrf.mxu0 }
 0xebd   :  { %14160 = vmatmul.msk.f32.gmra.mxu1 %vm7396_vm1, %v7108_v54  ;;  %v13789_v54 = vld [vmem:[#allocation3 + $0x298] sm:$0xf0] }
 0xebe   :  { %v13792_v28 = vor.u32 %v15407_v11, %v13789_v54 }
 0xebf   :  { %7149 = vmatmul.bf16.gmra.mxu2 %v13768_v56 }
 0xec2   :  { %v7110_v34 = vpop.f32.mrf.mxu2 }
 0xec3   :  { %v7111_v61 = vadd.f32 %v7110_v34, %v6701_v12  ;;  %v13788_v12 = vor.u32 %v15408_v16, %v13787_v46  ;;  %v6718_v10 = vpop.f32.mrf.mxu0  ;;  %v19230_v59 = vpop.f32.mrf.mxu3  ;;  %v13811_v16 = vld [vmem:[#allocation3 + $0x2c0] sm:$0xf] }
 0xec4   :  { %20730 = vst [vmem:[#allocation68_spill] sm:$0xff] %v19230_v59 }
 0xec5   :  { %14161 = vmatmul.msk.f32.gmra.mxu1 %vm7396_vm1, %v7111_v61  ;;  %6755 = vmatmul.bf16.gmra.mxu0 %v13788_v12 }
 0xeca   :  { %v7112_v7 = vpop.f32.mrf.mxu2 }
 0xecb   :  { %v7113_v58 = vadd.f32 %v7112_v7, %v6703_v44  ;;  %v13795_v44 = vld [vmem:[#allocation3 + $0x2a0] sm:$0xf]  ;;  %v6721_v22 = vpop.f32.mrf.mxu0  ;;  %v19237_v40 = vpop.f32.mrf.mxu3  ;;  %v13797_v7 = vld [vmem:[#allocation3 + $0x2a8] sm:$0xf0] }
 0xecc   :  { %v13796_v26 = vor.u32 %v15410_v51, %v13795_v44  ;;  %20731 = vst [vmem:[#allocation18_spill] sm:$0xff] %v19237_v40  ;;  %v19252_v44 = vpop.permute.xlu2 %7763  ;;  %v15411_v51 = vld [vmem:[#allocation3 + $0x2b4] sm:$0xf] }
 0xecd   :  { %14162 = vmatmul.msk.f32.gmra.mxu1 %vm7396_vm1, %v7113_v58  ;;  %v15414_v58 = vld [vmem:[#allocation3 + $0x2c4] sm:$0xf0]  ;;  %20736 = vst [vmem:[#allocation60_spill] sm:$0xff] %v19252_v44 }
 0xecf   :  { %7154 = vmatmul.bf16.gmra.mxu2 %v13776_v55  ;;  %v13800_v55 = vor.u32 %v15409_v25, %v13797_v7  ;;  %v13827_v25 = vld [vmem:[#allocation3 + $0x2e0] sm:$0xf]  ;;  %v15418_v7 = vld [vmem:[#allocation3 + $0x2e4] sm:$0xf0] }
 0xed2   :  { %v7115_v9 = vpop.f32.mrf.mxu2 }
 0xed3   :  { %v7116_v4 = vadd.f32 %v7115_v9, %v6706_v24  ;;  %v6723_v57 = vpop.f32.mrf.mxu0  ;;  %v19240_v43 = vpop.f32.mrf.mxu3  ;;  %v13812_v9 = vor.u32 %v15414_v58, %v13811_v16 }
 0xed4   :  { %20732 = vst [vmem:[#allocation53_spill] sm:$0xff] %v19240_v43 }
 0xed5   :  { %14163 = vmatmul.msk.f32.gmra.mxu1 %vm7396_vm1, %v7116_v4  ;;  %6760 = vmatmul.bf16.gmra.mxu0 %v13796_v26  ;;  %v13819_v26 = vld [vmem:[#allocation3 + $0x2d0] sm:$0xf] }
 0xeda   :  { %v7117_v18 = vpop.f32.mrf.mxu2 }
 0xedb   :  { %v19235_v2 = vadd.f32 %v7117_v18, %v6708_v62  ;;  %v15412_v62 = vld [vmem:[#allocation3 + $0x2b4] sm:$0xf0]  ;;  %v6726_v33 = vpop.f32.mrf.mxu0  ;;  %v19243_v61 = vpop.f32.mrf.mxu3 }
 0xedc   :  { %v13804_v34 = vor.u32 %v15412_v62, %v13803_v53  ;;  %20733 = vst [vmem:[#allocation70_spill] sm:$0xff] %v19243_v61  ;;  %v19257_v53 = vpop.permute.xlu2 %7678  ;;  %v15452_v61 = vld [vmem:[#allocation3 + $0x3f4] sm:$0xf0] }
 0xedf   :  { %7159 = vmatmul.bf16.gmra.mxu2 %v13784_v47 }
 0xee2   :  { %v7120_v24 = vpop.f32.mrf.mxu2 }
 0xee3   :  { %v7121_v17 = vadd.f32 %v7120_v24, %v6711_v37  ;;  %v6728_v50 = vpop.f32.mrf.mxu0  ;;  %v19246_v4 = vpop.f32.mrf.mxu3  ;;  %v15416_v24 = vld [vmem:[#allocation3 + $0x2d4] sm:$0xf0] }
 0xee4   :  { %20734 = vst [vmem:[#allocation73_spill] sm:$0xff] %v19246_v4 }
 0xee5   :  { %14169 = vmatmul.msk.f32.vlgmr.msrb.gmra.mxu3 %vm7396_vm1, %v7121_v17  ;;  %6765 = vmatmul.bf16.gmra.mxu0 %v13804_v34  ;;  %v15413_v34 = vld [vmem:[#allocation3 + $0x2c4] sm:$0xf] }
 0xeea   :  { %v7122_v56 = vpop.f32.mrf.mxu2 }
 0xeeb   :  { %v7123_v42 = vadd.f32 %v7122_v56, %v6713_v41  ;;  %v6731_v12 = vpop.f32.mrf.mxu0  ;;  %v19250_v18 = vpop.f32.mrf.mxu3  ;;  %v13820_v56 = vor.u32 %v15416_v24, %v13819_v26  ;;  %v13835_v24 = vld [vmem:[#allocation3 + $0x2f0] sm:$0xf] }
 0xeec   :  { %20735 = vst [vmem:[#allocation19_spill] sm:$0xff] %v19250_v18  ;;  %v15448_v18 = vld [vmem:[#allocation3 + $0x3d4] sm:$0xf0] }
 0xeed   :  { %14170 = vmatmul.msk.f32.gmra.mxu3 %vm7396_vm1, %v7123_v42 }
 0xeef   :  { %7164 = vmatmul.bf16.gmra.mxu2 %v13792_v28 }
 0xef2   :  { %v7125_v37 = vpop.f32.mrf.mxu2 }
 0xef3   :  { %v7126_v30 = vadd.f32 %v7125_v37, %v6716_v0  ;;  %v6733_v60 = vpop.f32.mrf.mxu0  ;;  %v13813_v37 = vld [vmem:[#allocation3 + $0x2c8] sm:$0xf0] }
 0xef4   :  { %v13816_v16 = vor.u32 %v15413_v34, %v13813_v37 }
 0xef5   :  { %14171 = vmatmul.msk.f32.gmra.mxu3 %vm7396_vm1, %v7126_v30  ;;  %6770 = vmatmul.bf16.gmra.mxu0 %v13812_v9 }
 0xefa   :  { %v7127_v46 = vpop.f32.mrf.mxu2 }
 0xefb   :  { %v7128_v41 = vadd.f32 %v7127_v46, %v6718_v10  ;;  %v13805_v10 = vld [vmem:[#allocation3 + $0x2b8] sm:$0xf0]  ;;  %v6736_v54 = vpop.f32.mrf.mxu0 }
 0xefc   :  { %v13808_v11 = vor.u32 %v15411_v51, %v13805_v10 }
 0xefd   :  { %14172 = vmatmul.msk.f32.gmra.mxu3 %vm7396_vm1, %v7128_v41  ;;  %v13828_v41 = vor.u32 %v15418_v7, %v13827_v25 }
 0xeff   :  { %7169 = vmatmul.bf16.gmra.mxu2 %v13800_v55  ;;  %v19262_v55 = vpop.permute.xlu2 %7743 }
 0xf00   :  { %20739 = vst [vmem:[#allocation75_spill] sm:$0xff] %v19262_v55 }
 0xf02   :  { %v7130_v5 = vpop.f32.mrf.mxu2 }
 0xf03   :  { %v7131_v0 = vadd.f32 %v7130_v5, %v6721_v22  ;;  %v19255_v22 = vpop.f32.mrf.mxu3  ;;  %v6738_v28 = vpop.f32.mrf.mxu0 }
 0xf04   :  { %20737 = vst [vmem:[#allocation20_spill] sm:$0xff] %v19255_v22 }
 0xf05   :  { %14173 = vmatmul.msk.f32.gmra.mxu3 %vm7396_vm1, %v7131_v0  ;;  %6775 = vmatmul.bf16.gmra.mxu0 %v13820_v56 }
 0xf07   :  { %v19270_v10 = vpop.permute.xlu2 %7728 }
 0xf08   :  { %20742 = vst [vmem:[#allocation57_spill] sm:$0xff] %v19270_v10 }
 0xf0a   :  { %v7132_v47 = vpop.f32.mrf.mxu2 }
 0xf0b   :  { %v7133_v17 = vadd.f32 %v7132_v47, %v6723_v57  ;;  %v19260_v30 = vpop.f32.mrf.mxu3  ;;  %v6741_v58 = vpop.f32.mrf.mxu0  ;;  %v13821_v47 = vld [vmem:[#allocation3 + $0x2d8] sm:$0xf0] }
 0xf0c   :  { %20738 = vst [vmem:[#allocation63_spill] sm:$0xff] %v19260_v30 }
 0xf0d   :  { %14174 = vmatmul.msk.f32.gmra.mxu3 %vm7396_vm1, %v7133_v17  ;;  %v15420_v17 = vld [vmem:[#allocation3 + $0x2f4] sm:$0xf0] }
 0xf0f   :  { %7174 = vmatmul.bf16.gmra.mxu2 %v13808_v11  ;;  %v19277_v37 = vpop.permute.xlu2 %7663 }
 0xf12   :  { %v7135_v62 = vpop.f32.mrf.mxu2 }
 0xf13   :  { %v7136_v42 = vadd.f32 %v7135_v62, %v6726_v33  ;;  %v19265_v33 = vpop.permute.xlu0 %7748  ;;  %v6743_v0 = vpop.f32.mrf.mxu0 }
 0xf14   :  { %20740 = vst [vmem:[#allocation77_spill] sm:$0xff] %v19265_v33  ;;  %v19267_v51 = vpop.f32.mrf.mxu3 }
 0xf15   :  { %14175 = vmatmul.msk.f32.gmra.mxu3 %vm7396_vm1, %v7136_v42  ;;  %6780 = vmatmul.bf16.gmra.mxu0 %v13828_v41  ;;  %20741 = vst [vmem:[#allocation50_spill] sm:$0xff] %v19267_v51  ;;  %v13836_v42 = vor.u32 %v15420_v17, %v13835_v24  ;;  %v15417_v41 = vld [vmem:[#allocation3 + $0x2e4] sm:$0xf] }
 0xf1a   :  { %v7137_v57 = vpop.f32.mrf.mxu2 }
 0xf1b   :  { %v7138_v46 = vadd.f32 %v7137_v57, %v6728_v50  ;;  %v15415_v50 = vld [vmem:[#allocation3 + $0x2d4] sm:$0xf]  ;;  %v6746_v62 = vpop.f32.mrf.mxu0  ;;  %v19272_v34 = vpop.permute.xlu0 %7683 }
 0xf1c   :  { %v13824_v56 = vor.u32 %v15415_v50, %v13821_v47  ;;  %v13843_v47 = vld [vmem:[#allocation3 + $0x300] sm:$0xf] }
 0xf1d   :  { %14176 = vmatmul.msk.f32.gmra.mxu3 %vm7396_vm1, %v7138_v46  ;;  %v19279_v46 = vpop.permute.xlu1 %7758 }
 0xf1e   :  { %20744 = vst [vmem:[#allocation49_spill] sm:$0xff] %v19279_v46 }
 0xf1f   :  { %7179 = vmatmul.bf16.gmra.mxu2 %v13816_v16 }
 0xf22   :  { %v7140_v9 = vpop.f32.mrf.mxu2 }
 0xf23   :  { %v7141_v5 = vadd.f32 %v7140_v9, %v6731_v12  ;;  %v19275_v12 = vpop.f32.mrf.mxu3  ;;  %v6748_v7 = vpop.f32.mrf.mxu0  ;;  %v13829_v9 = vld [vmem:[#allocation3 + $0x2e8] sm:$0xf0] }
 0xf24   :  { %20743 = vst [vmem:[#allocation45_spill] sm:$0xff] %v19275_v12  ;;  %v13832_v17 = vor.u32 %v15417_v41, %v13829_v9  ;;  %v15419_v41 = vld [vmem:[#allocation3 + $0x2f4] sm:$0xf]  ;;  %v13837_v9 = vld [vmem:[#allocation3 + $0x2f8] sm:$0xf0] }
 0xf25   :  { %14177 = vmatmul.msk.f32.gmra.mxu3 %vm7396_vm1, %v7141_v5  ;;  %6785 = vmatmul.bf16.gmra.mxu0 %v13836_v42  ;;  %v19286_v5 = vpop.permute.xlu2 %7648 }
 0xf2a   :  { %v7142_v26 = vpop.f32.mrf.mxu2 }
 0xf2b   :  { %v7143_v11 = vadd.f32 %v7142_v26, %v6733_v60  ;;  %v19282_v60 = vpop.permute.xlu0 %7668  ;;  %v19284_v16 = vpop.f32.mrf.mxu3  ;;  %v15422_v26 = vld [vmem:[#allocation3 + $0x304] sm:$0xf0] }
 0xf2c   :  { %20745 = vst [vmem:[#allocation66_spill] sm:$0xff] %v19284_v16 }
 0xf2d   :  { %14178 = vmatmul.msk.f32.gmra.mxu3 %vm7396_vm1, %v7143_v11  ;;  %v6751_v11 = vpop.f32.mrf.mxu0  ;;  %v19295_v4 = vpop.permute.xlu2 %7713 }
 0xf2e   :  { %20749 = vst [vmem:[#allocation48_spill] sm:$0xff] %v19295_v4 }
 0xf2f   :  { %7184 = vmatmul.bf16.gmra.mxu2 %v13824_v56  ;;  %v19289_v56 = vpop.permute.xlu1 %7753 }
 0xf30   :  { %20746 = vst [vmem:[#allocation47_spill] sm:$0xff] %v19289_v56 }
 0xf32   :  { %v7145_v57 = vpop.f32.mrf.mxu2 }
 0xf33   :  { %v7146_v25 = vadd.f32 %v7145_v57, %v6736_v54  ;;  %v13844_v54 = vor.u32 %v15422_v26, %v13843_v47  ;;  %v19291_v42 = vpop.permute.xlu0 %7733  ;;  %v19293_v57 = vpop.f32.mrf.mxu3  ;;  %v13851_v26 = vld [vmem:[#allocation3 + $0x310] sm:$0xf] }
 0xf34   :  { %20747 = vst [vmem:[#allocation41_spill] sm:$0xff] %v19291_v42 }
 0xf35   :  { %14179 = vmatmul.msk.f32.gmra.mxu3 %vm7396_vm1, %v7146_v25  ;;  %6790 = vmatmul.bf16.gmra.mxu0 %v13844_v54  ;;  %20748 = vst [vmem:[#allocation79_spill] sm:$0xff] %v19293_v57  ;;  %v6753_v43 = vpop.f32.mrf.mxu0  ;;  %v13840_v54 = vor.u32 %v15419_v41, %v13837_v9  ;;  %v15421_v9 = vld [vmem:[#allocation3 + $0x304] sm:$0xf] }
 0xf3a   :  { %v7147_v50 = vpop.f32.mrf.mxu2 }
 0xf3b   :  { %v7148_v24 = vadd.f32 %v7147_v50, %v6738_v28  ;;  %v19298_v28 = vpop.permute.xlu1 %7738  ;;  %v19300_v50 = vpop.permute.xlu0 %7718 }
 0xf3c   :  { %20750 = vst [vmem:[#allocation43_spill] sm:$0xff] %v19298_v28  ;;  %v19302_v51 = vpop.f32.mrf.mxu3 }
 0xf3d   :  { %14180 = vmatmul.msk.f32.gmra.mxu3 %vm7396_vm1, %v7148_v24  ;;  %20751 = vst [vmem:[#allocation37_spill] sm:$0xff] %v19300_v50  ;;  %v15424_v24 = vld [vmem:[#allocation3 + $0x314] sm:$0xf0] }
 0xf3e   :  { %v13852_v42 = vor.u32 %v15424_v24, %v13851_v26  ;;  %20752 = vst [vmem:[#allocation76_spill] sm:$0xff] %v19302_v51  ;;  %v15426_v24 = vld [vmem:[#allocation3 + $0x324] sm:$0xf0] }
 0xf3f   :  { %7189 = vmatmul.bf16.gmra.mxu2 %v13832_v17 }
 0xf42   :  { %v7150_v25 = vpop.f32.mrf.mxu2  ;;  %v6756_v22 = vpop.f32.mrf.mxu0 }
 0xf43   :  { %v7151_v59 = vadd.f32 %v7150_v25, %v6741_v58  ;;  %v19305_v58 = vpop.permute.xlu2 %7698  ;;  %v19309_v12 = vpop.permute.xlu0 %7653 }
 0xf44   :  { %20753 = vst [vmem:[#allocation78_spill] sm:$0xff] %v19305_v58 }
 0xf45   :  { %14181 = vmatmul.msk.f32.gmra.mxu3 %vm7396_vm1, %v7151_v59  ;;  %6795 = vmatmul.bf16.gmra.mxu0 %v13852_v42  ;;  %v19307_v59 = vpop.permute.xlu1 %7673  ;;  %20754 = vst [vmem:[#allocation46_spill] sm:$0xff] %v19309_v12  ;;  %v13859_v42 = vld [vmem:[#allocation3 + $0x320] sm:$0xf] }
 0xf46   :  { %v13860_v16 = vor.u32 %v15426_v24, %v13859_v42  ;;  %v13867_v24 = vld [vmem:[#allocation3 + $0x330] sm:$0xf] }
 0xf4a   :  { %v7152_v47 = vpop.f32.mrf.mxu2  ;;  %v6758_v28 = vpop.f32.mrf.mxu0 }
 0xf4b   :  { %v7153_v17 = vadd.f32 %v7152_v47, %v6743_v0  ;;  %v19312_v0 = vpop.f32.mrf.mxu3  ;;  %v19314_v41 = vpop.permute.xlu2 %7633  ;;  %v13845_v47 = vld [vmem:[#allocation3 + $0x308] sm:$0xf0] }
 0xf4c   :  { %20755 = vst [vmem:[#allocation40_spill] sm:$0xff] %v19312_v0 }
 0xf4d   :  { %14182 = vmatmul.msk.f32.gmra.mxu3 %vm7396_vm1, %v7153_v17  ;;  %v19316_v33 = vpop.permute.xlu1 %7658 }
 0xf4f   :  { %7194 = vmatmul.bf16.gmra.mxu2 %v13840_v54  ;;  %v13848_v54 = vor.u32 %v15421_v9, %v13845_v47 }
 0xf52   :  { %v7155_v25 = vpop.f32.mrf.mxu2  ;;  %v6761_v55 = vpop.f32.mrf.mxu0 }
 0xf53   :  { %v7156_v4 = vadd.f32 %v7155_v25, %v6746_v62  ;;  %v19319_v62 = vpop.permute.xlu0 %7638  ;;  %v7619_v25 = vpop.permute.xlu2 %7618 }
 0xf55   :  { %14183 = vmatmul.msk.f32.gmra.mxu3 %vm7396_vm1, %v7156_v4  ;;  %6800 = vmatmul.bf16.gmra.mxu0 %v13860_v16  ;;  %v19321_v4 = vpop.f32.mrf.mxu3  ;;  %v13853_v16 = vld [vmem:[#allocation3 + $0x318] sm:$0xf0] }
 0xf56   :  { %20756 = vst [vmem:[#allocation33_spill] sm:$0xff] %v19321_v4 }
 0xf5a   :  { %v7157_v26 = vpop.f32.mrf.mxu2  ;;  %v19323_v51 = vpop.f32.mrf.mxu0 }
 0xf5b   :  { %v7158_v17 = vadd.f32 %v7157_v26, %v6748_v7  ;;  %v19326_v7 = vpop.permute.xlu1 %7723  ;;  %v19328_v9 = vpop.permute.xlu0 %7703  ;;  %v15423_v26 = vld [vmem:[#allocation3 + $0x314] sm:$0xf] }
 0xf5c   :  { %20757 = vst [vmem:[#allocation72_spill] sm:$0xff] %v19326_v7  ;;  %v13856_v46 = vor.u32 %v15423_v26, %v13853_v16 }
 0xf5d   :  { %14184 = vmatmul.msk.f32.gmra.mxu3 %vm7396_vm1, %v7158_v17  ;;  %20758 = vst [vmem:[#allocation74_spill] sm:$0xff] %v19328_v9  ;;  %v15428_v17 = vld [vmem:[#allocation3 + $0x334] sm:$0xf0] }
 0xf5f   :  { %7199 = vmatmul.bf16.gmra.mxu2 %v13848_v54 }
 0xf62   :  { %v7160_v57 = vpop.f32.mrf.mxu2  ;;  %v19332_v0 = vpop.f32.mrf.mxu0 }
 0xf63   :  { %v7161_v56 = vadd.f32 %v7160_v57, %v6751_v11  ;;  %v13868_v11 = vor.u32 %v15428_v17, %v13867_v24  ;;  %v7614_v57 = vpop.permute.xlu2 %7613  ;;  %v19337_v9 = vpop.permute.xlu1 %7708  ;;  %v15425_v17 = vld [vmem:[#allocation3 + $0x324] sm:$0xf] }
 0xf64   :  { %v7767_v44 = vadd.f32 %v7614_v57, %v19130_v19  ;;  %20760 = vst [vmem:[#allocation69_spill] sm:$0xff] %v19337_v9  ;;  %v19341_v10 = vpop.permute.xlu0 %7688  ;;  %v13963_v9 = vld [vmem:[#allocation3 + $0x3f0] sm:$0xf] }
 0xf65   :  { %14185 = vmatmul.msk.f32.gmra.mxu3 %vm7396_vm1, %v7161_v56  ;;  %6805 = vmatmul.bf16.gmra.mxu0 %v13868_v11  ;;  %20761 = vst [vmem:[#allocation71_spill] sm:$0xff] %v19341_v10  ;;  %v15430_v11 = vld [vmem:[#allocation3 + $0x344] sm:$0xf0] }
 0xf66   :  { %v8013_v56 = vadd.f32 %v19194_v49, %v7767_v44  ;;  %v13861_v49 = vld [vmem:[#allocation3 + $0x328] sm:$0xf0]  ;;  %v15478_v10 = vld [vmem:[#allocation3 + $0x4c4] sm:$0xf0] }
 0xf68   :  { %v19330_v47 = vpop.f32.mrf.mxu3 }
 0xf69   :  { %20759 = vst [vmem:[#allocation36_spill] sm:$0xff] %v19330_v47 }
 0xf6a   :  { %v7162_v42 = vpop.f32.mrf.mxu2  ;;  %v6768_v16 = vpop.f32.mrf.mxu0 }
 0xf6b   :  { %v7163_v54 = vadd.f32 %v7162_v42, %v6753_v43  ;;  %v7768_v42 = vadd.f32 %v7619_v25, %v19133_v23 }
 0xf6d   :  { %14186 = vmatmul.msk.f32.gmra.mxu3 %vm7396_vm1, %v7163_v54  ;;  %v8014_v19 = vadd.f32 %v19199_v48, %v7768_v42 }
 0xf6f   :  { %7204 = vmatmul.bf16.gmra.mxu2 %v13856_v46  ;;  %v7644_v46 = vpop.permute.xlu1 %7643 }
 0xf70   :  { %v8165_v7 = vpop.f32.mrf.mxu3 }
 0xf71   :  { %v19339_v4 = vadd.f32 %v8165_v7, %v8013_v56  ;;  %v13875_v7 = vld [vmem:[#allocation3 + $0x340] sm:$0xf]  ;;  %v13864_v56 = vor.u32 %v15425_v17, %v13861_v49  ;;  %v15427_v49 = vld [vmem:[#allocation3 + $0x334] sm:$0xf] }
 0xf72   :  { %v7165_v43 = vpop.f32.mrf.mxu2  ;;  %v6771_v30 = vpop.f32.mrf.mxu0 }
 0xf73   :  { %v7166_v26 = vadd.f32 %v7165_v43, %v6756_v22  ;;  %v13876_v22 = vor.u32 %v15430_v11, %v13875_v7  ;;  %v7624_v43 = vpop.permute.xlu0 %7623  ;;  %v13883_v11 = vld [vmem:[#allocation3 + $0x350] sm:$0xf] }
 0xf74   :  { %v7769_v23 = vadd.f32 %v7624_v43, %v19136_v32 }
 0xf75   :  { %14187 = vmatmul.msk.f32.gmra.mxu3 %vm7396_vm1, %v7166_v26  ;;  %6810 = vmatmul.bf16.gmra.mxu0 %v13876_v22 }
 0xf76   :  { %v8015_v48 = vadd.f32 %v19205_v29, %v7769_v23 }
 0xf77   :  { %v7629_v50 = vpop.permute.xlu1 %7628 }
 0xf78   :  { %v8168_v24 = vpop.f32.mrf.mxu3 }
 0xf79   :  { %v19346_v44 = vadd.f32 %v8168_v24, %v8014_v19 }
 0xf7a   :  { %v7167_v54 = vpop.f32.mrf.mxu2  ;;  %v6773_v24 = vpop.f32.mrf.mxu0 }
 0xf7b   :  { %v7168_v57 = vadd.f32 %v7167_v54, %v6758_v28  ;;  %v7770_v28 = vadd.f32 %v7629_v50, %v19140_v27  ;;  %v13869_v54 = vld [vmem:[#allocation3 + $0x338] sm:$0xf0]  ;;  %v7771_v27 = vadd.f32 %v19314_v41, %v19149_v14 }
 0xf7c   :  { %v13872_v22 = vor.u32 %v15427_v49, %v13869_v54  ;;  %v15434_v49 = vld [vmem:[#allocation3 + $0x364] sm:$0xf0] }
 0xf7d   :  { %14188 = vmatmul.msk.f32.gmra.mxu3 %vm7396_vm1, %v7168_v57  ;;  %v8016_v17 = vadd.f32 %v19216_v6, %v7770_v28  ;;  %v15432_v57 = vld [vmem:[#allocation3 + $0x354] sm:$0xf0]  ;;  %v8017_v6 = vadd.f32 %v19227_v20, %v7771_v27  ;;  %v13877_v28 = vld [vmem:[#allocation3 + $0x348] sm:$0xf0] }
 0xf7e   :  { %v13884_v43 = vor.u32 %v15432_v57, %v13883_v11  ;;  %v7937_v57 = vpop.f32.mrf.mxu1 }
 0xf7f   :  { %7209 = vmatmul.bf16.gmra.mxu2 %v13864_v56 }
 0xf80   :  { %v8171_v25 = vpop.f32.mrf.mxu3 }
 0xf81   :  { %v19351_v26 = vadd.f32 %v8171_v25, %v8015_v48 }
 0xf82   :  { %v7170_v42 = vpop.f32.mrf.mxu2 }
 0xf83   :  { %v7171_v19 = vadd.f32 %v7170_v42, %v6761_v55  ;;  %v6776_v55 = vpop.f32.mrf.mxu0 }
 0xf85   :  { %14189 = vmatmul.msk.f32.gmra.mxu3 %vm7396_vm1, %v7171_v19  ;;  %6815 = vmatmul.bf16.gmra.mxu0 %v13884_v43  ;;  %v15429_v19 = vld [vmem:[#allocation3 + $0x344] sm:$0xf] }
 0xf88   :  { %v8174_v32 = vpop.f32.mrf.mxu3 }
 0xf89   :  { %v19356_v7 = vadd.f32 %v8174_v32, %v8016_v17  ;;  %v13891_v32 = vld [vmem:[#allocation3 + $0x360] sm:$0xf] }
 0xf8a   :  { %v7172_v29 = vpop.f32.mrf.mxu2 }
 0xf8b   :  { %v7173_v56 = vadd.f32 %v7172_v29, %v19323_v51  ;;  %v6778_v42 = vpop.f32.mrf.mxu0  ;;  %v7772_v51 = vadd.f32 %v19319_v62, %v19152_v39  ;;  %v13880_v29 = vor.u32 %v15429_v19, %v13877_v28  ;;  %v19378_v19 = vpop.f32.mrf.mxu1 }
 0xf8d   :  { %14190 = vmatmul.msk.f32.gmra.mxu3 %vm7396_vm1, %v7173_v56  ;;  %v8018_v14 = vadd.f32 %v19232_v8, %v7772_v51  ;;  %v7773_v56 = vadd.f32 %v7644_v46, %v19155_v31 }
 0xf8f   :  { %7214 = vmatmul.bf16.gmra.mxu2 %v13872_v22  ;;  %v8019_v39 = vadd.f32 %v7937_v57, %v7773_v56 }
 0xf90   :  { %v8177_v50 = vpop.f32.mrf.mxu3 }
 0xf91   :  { %v19363_v23 = vadd.f32 %v8177_v50, %v8017_v6  ;;  %v13885_v6 = vld [vmem:[#allocation3 + $0x358] sm:$0xf0] }
 0xf92   :  { %v7175_v48 = vpop.f32.mrf.mxu2 }
 0xf93   :  { %v7176_v25 = vadd.f32 %v7175_v48, %v19332_v0  ;;  %v6781_v11 = vpop.f32.mrf.mxu0  ;;  %v13892_v0 = vor.u32 %v15434_v49, %v13891_v32  ;;  %v13899_v48 = vld [vmem:[#allocation3 + $0x370] sm:$0xf]  ;;  %v13893_v32 = vld [vmem:[#allocation3 + $0x368] sm:$0xf0] }
 0xf95   :  { %14191 = vmatmul.msk.f32.gmra.mxu3 %vm7396_vm1, %v7176_v25  ;;  %6820 = vmatmul.bf16.gmra.mxu0 %v13892_v0  ;;  %v15436_v25 = vld [vmem:[#allocation3 + $0x374] sm:$0xf0] }
 0xf98   :  { %v8180_v41 = vpop.f32.mrf.mxu3 }
 0xf99   :  { %v19370_v17 = vadd.f32 %v8180_v41, %v8018_v14  ;;  %v13900_v14 = vor.u32 %v15436_v25, %v13899_v48  ;;  %v15435_v48 = vld [vmem:[#allocation3 + $0x374] sm:$0xf]  ;;  %v13901_v25 = vld [vmem:[#allocation3 + $0x378] sm:$0xf0] }
 0xf9a   :  { %v7177_v20 = vpop.f32.mrf.mxu2 }
 0xf9b   :  { %v7178_v54 = vadd.f32 %v7177_v20, %v6768_v16  ;;  %v6783_v27 = vpop.f32.mrf.mxu0  ;;  %v15431_v16 = vld [vmem:[#allocation3 + $0x354] sm:$0xf]  ;;  %v15433_v20 = vld [vmem:[#allocation3 + $0x364] sm:$0xf] }
 0xf9c   :  { %v13888_v31 = vor.u32 %v15431_v16, %v13885_v6  ;;  %v13896_v0 = vor.u32 %v15433_v20, %v13893_v32  ;;  %v14201_v6 = vld [vmem:[%s20501_s8 + $0x60] sm:$0xff] }
 0xf9d   :  { %14192 = vmatmul.msk.f32.gmra.mxu3 %vm7396_vm1, %v7178_v54  ;;  %v13907_v54 = vld [vmem:[#allocation3 + $0x380] sm:$0xf] }
 0xf9f   :  { %7219 = vmatmul.bf16.gmra.mxu2 %v13880_v29  ;;  %v15438_v29 = vld [vmem:[#allocation3 + $0x384] sm:$0xf0] }
 0xfa0   :  { %v8183_v8 = vpop.f32.mrf.mxu3  ;;  %v13908_v56 = vor.u32 %v15438_v29, %v13907_v54 }
 0xfa1   :  { %v19374_v62 = vadd.f32 %v8183_v8, %v8019_v39  ;;  %v19381_v39 = vpop.f32.mrf.mxu1  ;;  %v14203_v8 = vld [vmem:[%s20501_s8 + $0x70] sm:$0xff] }
 0xfa2   :  { %v7180_v22 = vpop.f32.mrf.mxu2  ;;  %20762 = vst [vmem:[#allocation67_spill] sm:$0xff] %v19381_v39 }
 0xfa3   :  { %v7181_v43 = vadd.f32 %v7180_v22, %v6771_v30  ;;  %v6786_v46 = vpop.f32.mrf.mxu0 }
 0xfa5   :  { %14193 = vmatmul.msk.f32.gmra.mxu3 %vm7396_vm1, %v7181_v43  ;;  %6825 = vmatmul.bf16.gmra.mxu0 %v13900_v14  ;;  %v15440_v14 = vld [vmem:[#allocation3 + $0x394] sm:$0xf0] }
 0xfaa   :  { %v7182_v50 = vpop.f32.mrf.mxu2 }
 0xfab   :  { %v7183_v51 = vadd.f32 %v7182_v50, %v6773_v24  ;;  %v6788_v28 = vpop.f32.mrf.mxu0  ;;  %v19397_v50 = vpop.f32.mrf.mxu1 }
 0xfac   :  { %20763 = vst [vmem:[#allocation10_spill] sm:$0xff] %v19397_v50 }
 0xfad   :  { %14194 = vmatmul.msk.f32.gmra.mxu3 %vm7396_vm1, %v7183_v51 }
 0xfaf   :  { %7224 = vmatmul.bf16.gmra.mxu2 %v13888_v31  ;;  %v13915_v31 = vld [vmem:[#allocation3 + $0x390] sm:$0xf] }
 0xfb0   :  { %v13916_v32 = vor.u32 %v15440_v14, %v13915_v31  ;;  %v15439_v31 = vld [vmem:[#allocation3 + $0x394] sm:$0xf]  ;;  %v13917_v14 = vld [vmem:[#allocation3 + $0x398] sm:$0xf0] }
 0xfb2   :  { %v7185_v41 = vpop.f32.mrf.mxu2 }
 0xfb3   :  { %v7186_v30 = vadd.f32 %v7185_v41, %v6776_v55  ;;  %v6791_v57 = vpop.f32.mrf.mxu0  ;;  %v14204_v55 = vld [vmem:[%s20501_s8 + $0x78] sm:$0xff] }
 0xfb4   :  { %8403 = vmatpush.msra.mxu1 %v14204_v55  ;;  %v13923_v55 = vld [vmem:[#allocation3 + $0x3a0] sm:$0xf] }
 0xfb5   :  { %14195 = vmatmul.msk.f32.gmra.mxu3 %vm7396_vm1, %v7186_v30  ;;  %6830 = vmatmul.bf16.gmra.mxu0 %v13908_v56  ;;  %v13904_v30 = vor.u32 %v15435_v48, %v13901_v25 }
 0xfb6   :  { %8404 = vmatpush.msra.mxu1 %v14203_v8  ;;  %v15442_v8 = vld [vmem:[#allocation3 + $0x3a4] sm:$0xf0] }
 0xfba   :  { %v7187_v49 = vpop.f32.mrf.mxu2 }
 0xfbb   :  { %v7188_v24 = vadd.f32 %v7187_v49, %v6778_v42  ;;  %v14202_v42 = vld [vmem:[%s20501_s8 + $0x68] sm:$0xff]  ;;  %v6793_v16 = vpop.f32.mrf.mxu0 }
 0xfbc   :  { %8405 = vmatpush.msra.mxu1 %v14202_v42 }
 0xfbd   :  { %14196 = vmatmul.msk.f32.gmra.mxu3 %vm7396_vm1, %v7188_v24  ;;  %v15437_v24 = vld [vmem:[#allocation3 + $0x384] sm:$0xf] }
 0xfbe   :  { %8406 = vmatpush.msra.mxu1 %v14201_v6  ;;  %v13924_v6 = vor.u32 %v15442_v8, %v13923_v55  ;;  %v15441_v8 = vld [vmem:[#allocation3 + $0x3a4] sm:$0xf] }
 0xfbf   :  { %7229 = vmatmul.bf16.gmra.mxu2 %v13896_v0  ;;  %v13909_v0 = vld [vmem:[#allocation3 + $0x388] sm:$0xf0] }
 0xfc2   :  { %v7190_v22 = vpop.f32.mrf.mxu2 }
 0xfc3   :  { %v7191_v43 = vadd.f32 %v7190_v22, %v6781_v11  ;;  %v6796_v20 = vpop.f32.mrf.mxu0  ;;  %v19400_v11 = vpop.f32.mrf.mxu1  ;;  %v13912_v22 = vor.u32 %v15437_v24, %v13909_v0 }
 0xfc4   :  { %20764 = vst [vmem:[#allocation38_spill] sm:$0xff] %v19400_v11  ;;  %v14067_v11 = vld [vmem:[#allocation3 + $0x4c0] sm:$0xf] }
 0xfc5   :  { %14197 = vmatmul.msk.f32.gmra.mxu3 %vm7396_vm1, %v7191_v43  ;;  %6835 = vmatmul.bf16.gmra.mxu0 %v13916_v32  ;;  %v15444_v32 = vld [vmem:[#allocation3 + $0x3b4] sm:$0xf0] }
 0xfca   :  { %v7192_v51 = vpop.f32.mrf.mxu2 }
 0xfcb   :  { %v7193_v41 = vadd.f32 %v7192_v51, %v6783_v27  ;;  %v6798_v29 = vpop.f32.mrf.mxu0  ;;  %v19403_v27 = vpop.f32.mrf.mxu1 }
 0xfcd   :  { %14198 = vmatmul.msk.f32.gmra.mxu3 %vm7396_vm1, %v7193_v41 }
 0xfcf   :  { %7234 = vmatmul.bf16.gmra.mxu2 %v13904_v30  ;;  %v13931_v30 = vld [vmem:[#allocation3 + $0x3b0] sm:$0xf] }
 0xfd0   :  { %v13932_v24 = vor.u32 %v15444_v32, %v13931_v30 }
 0xfd2   :  { %v7195_v49 = vpop.f32.mrf.mxu2 }
 0xfd3   :  { %v7196_v54 = vadd.f32 %v7195_v49, %v6786_v46  ;;  %v6801_v43 = vpop.f32.mrf.mxu0  ;;  %v19406_v51 = vpop.f32.mrf.mxu1  ;;  %v13920_v49 = vor.u32 %v15439_v31, %v13917_v14 }
 0xfd5   :  { %14199 = vmatmul.msk.f32.gmra.mxu3 %vm7396_vm1, %v7196_v54  ;;  %6840 = vmatmul.bf16.gmra.mxu0 %v13924_v6 }
 0xfda   :  { %v7197_v56 = vpop.f32.mrf.mxu2 }
 0xfdb   :  { %v7198_v42 = vadd.f32 %v7197_v56, %v6788_v28  ;;  %v6803_v25 = vpop.f32.mrf.mxu0  ;;  %v19410_v0 = vpop.f32.mrf.mxu1 }
 0xfdd   :  { %14200 = vmatmul.msk.f32.gmra.mxu3 %vm7396_vm1, %v7198_v42  ;;  %v13925_v42 = vld [vmem:[#allocation3 + $0x3a8] sm:$0xf0] }
 0xfde   :  { %v13928_v31 = vor.u32 %v15441_v8, %v13925_v42 }
 0xfdf   :  { %7239 = vmatmul.bf16.gmra.mxu2 %v13912_v22 }
 0xfe2   :  { %v7200_v48 = vpop.f32.mrf.mxu2 }
 0xfe3   :  { %v7201_v46 = vadd.f32 %v7200_v48, %v6791_v57  ;;  %v6806_v54 = vpop.f32.mrf.mxu0  ;;  %v19413_v22 = vpop.f32.mrf.mxu1  ;;  %v15446_v48 = vld [vmem:[#allocation3 + $0x3c4] sm:$0xf0] }
 0xfe5   :  { %14205 = vmatmul.msk.f32.vlgmr.msra.gmra.mxu1 %vm7396_vm1, %v7201_v46  ;;  %6845 = vmatmul.bf16.gmra.mxu0 %v13932_v24  ;;  %v13933_v24 = vld [vmem:[#allocation3 + $0x3b8] sm:$0xf0] }
 0xfea   :  { %v7202_v41 = vpop.f32.mrf.mxu2 }
 0xfeb   :  { %v7203_v28 = vadd.f32 %v7202_v41, %v6793_v16  ;;  %v6808_v55 = vpop.f32.mrf.mxu0  ;;  %v13939_v16 = vld [vmem:[#allocation3 + $0x3c0] sm:$0xf] }
 0xfec   :  { %v13940_v41 = vor.u32 %v15446_v48, %v13939_v16 }
 0xfed   :  { %14206 = vmatmul.msk.f32.gmra.mxu1 %vm7396_vm1, %v7203_v28 }
 0xfef   :  { %7244 = vmatmul.bf16.gmra.mxu2 %v13920_v49  ;;  %v15443_v49 = vld [vmem:[#allocation3 + $0x3b4] sm:$0xf] }
 0xff0   :  { %v13936_v8 = vor.u32 %v15443_v49, %v13933_v24  ;;  %v15450_v49 = vld [vmem:[#allocation3 + $0x3e4] sm:$0xf0] }
 0xff2   :  { %v7205_v57 = vpop.f32.mrf.mxu2 }
 0xff3   :  { %v7206_v56 = vadd.f32 %v7205_v57, %v6796_v20  ;;  %v6811_v14 = vpop.f32.mrf.mxu0  ;;  %v19416_v20 = vpop.f32.mrf.mxu1 }
 0xff4   :  { %20765 = vst [vmem:[#allocation35_spill] sm:$0xff] %v19416_v20 }
 0xff5   :  { %14207 = vmatmul.msk.f32.gmra.mxu1 %vm7396_vm1, %v7206_v56  ;;  %6850 = vmatmul.bf16.gmra.mxu0 %v13940_v41  ;;  %v13947_v56 = vld [vmem:[#allocation3 + $0x3d0] sm:$0xf]  ;;  %v15445_v41 = vld [vmem:[#allocation3 + $0x3c4] sm:$0xf] }
 0xffa   :  { %v7207_v6 = vpop.f32.mrf.mxu2 }
 0xffb   :  { %v7208_v46 = vadd.f32 %v7207_v6, %v6798_v29  ;;  %v6813_v28 = vpop.f32.mrf.mxu0  ;;  %v13948_v6 = vor.u32 %v15448_v18, %v13947_v56  ;;  %v19419_v16 = vpop.f32.mrf.mxu1 }
 0xffc   :  { %20766 = vst [vmem:[#allocation9_spill] sm:$0xff] %v19419_v16 }
 0xffd   :  { %14208 = vmatmul.msk.f32.gmra.mxu1 %vm7396_vm1, %v7208_v46 }
 0xfff   :  { %7249 = vmatmul.bf16.gmra.mxu2 %v13928_v31 }
0x1002   :  { %v7210_v30 = vpop.f32.mrf.mxu2 }
0x1003   :  { %v7211_v32 = vadd.f32 %v7210_v30, %v6801_v43  ;;  %v6816_v42 = vpop.f32.mrf.mxu0  ;;  %v19423_v31 = vpop.f32.mrf.mxu1  ;;  %v13941_v30 = vld [vmem:[#allocation3 + $0x3c8] sm:$0xf0] }
0x1004   :  { %20767 = vst [vmem:[#allocation26_spill] sm:$0xff] %v19423_v31  ;;  %v13944_v18 = vor.u32 %v15445_v41, %v13941_v30 }
0x1005   :  { %14209 = vmatmul.msk.f32.gmra.mxu1 %vm7396_vm1, %v7211_v32  ;;  %6855 = vmatmul.bf16.gmra.mxu0 %v13948_v6 }
0x100a   :  { %v7212_v57 = vpop.f32.mrf.mxu2 }
0x100b   :  { %v7213_v29 = vadd.f32 %v7212_v57, %v6803_v25  ;;  %v6818_v46 = vpop.f32.mrf.mxu0  ;;  %v13955_v25 = vld [vmem:[#allocation3 + $0x3e0] sm:$0xf] }
0x100c   :  { %v13956_v56 = vor.u32 %v15450_v49, %v13955_v25  ;;  %v13964_v25 = vor.u32 %v15452_v61, %v13963_v9 }
0x100d   :  { %14210 = vmatmul.msk.f32.gmra.mxu1 %vm7396_vm1, %v7213_v29  ;;  %v19426_v29 = vpop.f32.mrf.mxu1 }
0x100e   :  { %20768 = vst [vmem:[#allocation55_spill] sm:$0xff] %v19426_v29  ;;  %v13971_v29 = vld [vmem:[#allocation3 + $0x400] sm:$0xf] }
0x100f   :  { %7254 = vmatmul.bf16.gmra.mxu2 %v13936_v8 }
0x1012   :  { %v7215_v48 = vpop.f32.mrf.mxu2 }
0x1013   :  { %v7216_v43 = vadd.f32 %v7215_v48, %v6806_v54  ;;  %v6821_v57 = vpop.f32.mrf.mxu0  ;;  %v15447_v48 = vld [vmem:[#allocation3 + $0x3d4] sm:$0xf] }
0x1015   :  { %14211 = vmatmul.msk.f32.gmra.mxu1 %vm7396_vm1, %v7216_v43  ;;  %6860 = vmatmul.bf16.gmra.mxu0 %v13956_v56  ;;  %v13949_v43 = vld [vmem:[#allocation3 + $0x3d8] sm:$0xf0]  ;;  %v15449_v56 = vld [vmem:[#allocation3 + $0x3e4] sm:$0xf] }
0x1016   :  { %v13952_v30 = vor.u32 %v15447_v48, %v13949_v43 }
0x101a   :  { %v7217_v32 = vpop.f32.mrf.mxu2 }
0x101b   :  { %v7218_v24 = vadd.f32 %v7217_v32, %v6808_v55  ;;  %v6823_v6 = vpop.f32.mrf.mxu0  ;;  %v19429_v55 = vpop.f32.mrf.mxu1 }
0x101c   :  { %20769 = vst [vmem:[#allocation27_spill] sm:$0xff] %v19429_v55  ;;  %v15454_v55 = vld [vmem:[#allocation3 + $0x404] sm:$0xf0] }
0x101d   :  { %14212 = vmatmul.msk.f32.gmra.mxu1 %vm7396_vm1, %v7218_v24  ;;  %v13972_v61 = vor.u32 %v15454_v55, %v13971_v29 }
0x101f   :  { %7259 = vmatmul.bf16.gmra.mxu2 %v13944_v18 }
0x1022   :  { %v7220_v54 = vpop.f32.mrf.mxu2 }
0x1023   :  { %v7221_v8 = vadd.f32 %v7220_v54, %v6811_v14  ;;  %v6826_v32 = vpop.f32.mrf.mxu0  ;;  %v19432_v18 = vpop.f32.mrf.mxu1  ;;  %v13957_v54 = vld [vmem:[#allocation3 + $0x3e8] sm:$0xf0] }
0x1024   :  { %20770 = vst [vmem:[#allocation56_spill] sm:$0xff] %v19432_v18 }
0x1025   :  { %14213 = vmatmul.msk.f32.gmra.mxu1 %vm7396_vm1, %v7221_v8  ;;  %6865 = vmatmul.bf16.gmra.mxu0 %v13964_v25  ;;  %v13965_v25 = vld [vmem:[#allocation3 + $0x3f8] sm:$0xf0] }
0x102a   :  { %v7222_v16 = vpop.f32.mrf.mxu2 }
0x102b   :  { %v7223_v41 = vadd.f32 %v7222_v16, %v6813_v28  ;;  %v6828_v24 = vpop.f32.mrf.mxu0  ;;  %v13960_v16 = vor.u32 %v15449_v56, %v13957_v54  ;;  %v19436_v9 = vpop.f32.mrf.mxu1  ;;  %v15456_v56 = vld [vmem:[#allocation3 + $0x414] sm:$0xf0] }
0x102c   :  { %20771 = vst [vmem:[#allocation22_spill] sm:$0xff] %v19436_v9  ;;  %v15458_v9 = vld [vmem:[#allocation3 + $0x424] sm:$0xf0] }
0x102d   :  { %14214 = vmatmul.msk.f32.gmra.mxu1 %vm7396_vm1, %v7223_v41 }
0x102f   :  { %7264 = vmatmul.bf16.gmra.mxu2 %v13952_v30  ;;  %v15451_v30 = vld [vmem:[#allocation3 + $0x3f4] sm:$0xf] }
0x1030   :  { %v13968_v29 = vor.u32 %v15451_v30, %v13965_v25 }
0x1032   :  { %v7225_v49 = vpop.f32.mrf.mxu2 }
0x1033   :  { %v7226_v14 = vadd.f32 %v7225_v49, %v6816_v42  ;;  %v6831_v48 = vpop.f32.mrf.mxu0  ;;  %v19439_v49 = vpop.f32.mrf.mxu1 }
0x1034   :  { %20772 = vst [vmem:[#allocation29_spill] sm:$0xff] %v19439_v49  ;;  %v13987_v49 = vld [vmem:[#allocation3 + $0x420] sm:$0xf] }
0x1035   :  { %14215 = vmatmul.msk.f32.gmra.mxu1 %vm7396_vm1, %v7226_v14  ;;  %6870 = vmatmul.bf16.gmra.mxu0 %v13972_v61 }
0x103a   :  { %v7227_v8 = vpop.f32.mrf.mxu2 }
0x103b   :  { %v7228_v28 = vadd.f32 %v7227_v8, %v6818_v46  ;;  %v6833_v41 = vpop.f32.mrf.mxu0  ;;  %v13979_v46 = vld [vmem:[#allocation3 + $0x410] sm:$0xf] }
0x103c   :  { %v13980_v8 = vor.u32 %v15456_v56, %v13979_v46 }
0x103d   :  { %14216 = vmatmul.msk.f32.gmra.mxu1 %vm7396_vm1, %v7228_v28 }
0x103f   :  { %7269 = vmatmul.bf16.gmra.mxu2 %v13960_v16 }
0x1042   :  { %v7230_v42 = vpop.f32.mrf.mxu2 }
0x1043   :  { %v7231_v43 = vadd.f32 %v7230_v42, %v6821_v57  ;;  %v6836_v55 = vpop.f32.mrf.mxu0  ;;  %v19442_v57 = vpop.f32.mrf.mxu1  ;;  %v15453_v42 = vld [vmem:[#allocation3 + $0x404] sm:$0xf] }
0x1044   :  { %20773 = vst [vmem:[#allocation23_spill] sm:$0xff] %v19442_v57  ;;  %v13997_v57 = vld [vmem:[#allocation3 + $0x438] sm:$0xf0] }
0x1045   :  { %14217 = vmatmul.msk.f32.gmra.mxu1 %vm7396_vm1, %v7231_v43  ;;  %6875 = vmatmul.bf16.gmra.mxu0 %v13980_v8  ;;  %v13973_v43 = vld [vmem:[#allocation3 + $0x408] sm:$0xf0]  ;;  %v15455_v8 = vld [vmem:[#allocation3 + $0x414] sm:$0xf] }
0x1046   :  { %v13976_v30 = vor.u32 %v15453_v42, %v13973_v43 }
0x104a   :  { %v7232_v14 = vpop.f32.mrf.mxu2 }
0x104b   :  { %v7233_v54 = vadd.f32 %v7232_v14, %v6823_v6  ;;  %v6838_v61 = vpop.f32.mrf.mxu0  ;;  %v13988_v14 = vor.u32 %v15458_v9, %v13987_v49  ;;  %v19445_v46 = vpop.f32.mrf.mxu1 }
0x104c   :  { %20774 = vst [vmem:[#allocation21_spill] sm:$0xff] %v19445_v46  ;;  %v19455_v46 = vpop.f32.mrf.mxu3 }
0x104d   :  { %14218 = vmatmul.msk.f32.gmra.mxu1 %vm7396_vm1, %v7233_v54 }
0x104f   :  { %7274 = vmatmul.bf16.gmra.mxu2 %v13968_v29 }
0x1052   :  { %v7235_v28 = vpop.f32.mrf.mxu2 }
0x1053   :  { %v7236_v16 = vadd.f32 %v7235_v28, %v6826_v32  ;;  %v6841_v25 = vpop.f32.mrf.mxu0  ;;  %v19449_v29 = vpop.f32.mrf.mxu1  ;;  %v13981_v28 = vld [vmem:[#allocation3 + $0x418] sm:$0xf0] }
0x1054   :  { %20775 = vst [vmem:[#allocation30_spill] sm:$0xff] %v19449_v29  ;;  %v13984_v9 = vor.u32 %v15455_v8, %v13981_v28  ;;  %v15462_v8 = vld [vmem:[#allocation3 + $0x444] sm:$0xf0] }
0x1055   :  { %14219 = vmatmul.msk.f32.gmra.mxu1 %vm7396_vm1, %v7236_v16  ;;  %6880 = vmatmul.bf16.gmra.mxu0 %v13988_v14 }
0x105a   :  { %v7237_v18 = vpop.f32.mrf.mxu2 }
0x105b   :  { %v7238_v6 = vadd.f32 %v7237_v18, %v6828_v24  ;;  %v6843_v54 = vpop.f32.mrf.mxu0  ;;  %v13995_v24 = vld [vmem:[#allocation3 + $0x430] sm:$0xf]  ;;  %v15460_v18 = vld [vmem:[#allocation3 + $0x434] sm:$0xf0] }
0x105c   :  { %v13996_v43 = vor.u32 %v15460_v18, %v13995_v24 }
0x105d   :  { %14220 = vmatmul.msk.f32.gmra.mxu1 %vm7396_vm1, %v7238_v6  ;;  %v19452_v6 = vpop.f32.mrf.mxu1 }
0x105e   :  { %20776 = vst [vmem:[#allocation28_spill] sm:$0xff] %v19452_v6  ;;  %v15459_v6 = vld [vmem:[#allocation3 + $0x434] sm:$0xf] }
0x105f   :  { %7279 = vmatmul.bf16.gmra.mxu2 %v13976_v30 }
0x1062   :  { %v7240_v56 = vpop.f32.mrf.mxu2 }
0x1063   :  { %v7241_v32 = vadd.f32 %v7240_v56, %v6831_v48  ;;  %v6846_v49 = vpop.f32.mrf.mxu0  ;;  %v15457_v56 = vld [vmem:[#allocation3 + $0x424] sm:$0xf] }
0x1065   :  { %14221 = vmatmul.msk.f32.gmra.mxu1 %vm7396_vm1, %v7241_v32  ;;  %6885 = vmatmul.bf16.gmra.mxu0 %v13996_v43  ;;  %v13989_v32 = vld [vmem:[#allocation3 + $0x428] sm:$0xf0]  ;;  %v19457_v28 = vpop.f32.mrf.mxu1 }
0x1066   :  { %20777 = vst [vmem:[#allocation31_spill] sm:$0xff] %v19457_v28  ;;  %v13992_v24 = vor.u32 %v15457_v56, %v13989_v32  ;;  %v14000_v32 = vor.u32 %v15459_v6, %v13997_v57  ;;  %v15461_v57 = vld [vmem:[#allocation3 + $0x444] sm:$0xf] }
0x106a   :  { %v7242_v16 = vpop.f32.mrf.mxu2 }
0x106b   :  { %v7243_v42 = vadd.f32 %v7242_v16, %v6833_v41  ;;  %v6848_v14 = vpop.f32.mrf.mxu0  ;;  %v14003_v41 = vld [vmem:[#allocation3 + $0x440] sm:$0xf] }
0x106d   :  { %14222 = vmatmul.msk.f32.gmra.mxu1 %vm7396_vm1, %v7243_v42  ;;  %v14004_v42 = vor.u32 %v15462_v8, %v14003_v41 }
0x106f   :  { %7284 = vmatmul.bf16.gmra.mxu2 %v13984_v9 }
0x1072   :  { %v7245_v48 = vpop.f32.mrf.mxu2 }
0x1073   :  { %v7246_v30 = vadd.f32 %v7245_v48, %v6836_v55  ;;  %v6851_v18 = vpop.f32.mrf.mxu0  ;;  %v19460_v48 = vpop.f32.mrf.mxu3 }
0x1074   :  { %20778 = vst [vmem:[#allocation11_spill] sm:$0xff] %v19460_v48 }
0x1075   :  { %14223 = vmatmul.msk.f32.gmra.mxu1 %vm7396_vm1, %v7246_v30  ;;  %6890 = vmatmul.bf16.gmra.mxu0 %v14004_v42  ;;  %v19462_v30 = vpop.f32.mrf.mxu1 }
0x1076   :  { %20779 = vst [vmem:[#allocation34_spill] sm:$0xff] %v19462_v30 }
0x107a   :  { %v7247_v29 = vpop.f32.mrf.mxu2 }
0x107b   :  { %v7248_v16 = vadd.f32 %v7247_v29, %v6838_v61  ;;  %v6853_v43 = vpop.f32.mrf.mxu0  ;;  %v14011_v61 = vld [vmem:[#allocation3 + $0x450] sm:$0xf]  ;;  %v15464_v29 = vld [vmem:[#allocation3 + $0x454] sm:$0xf0] }
0x107c   :  { %v14012_v8 = vor.u32 %v15464_v29, %v14011_v61  ;;  %v15466_v61 = vld [vmem:[#allocation3 + $0x464] sm:$0xf0] }
0x107d   :  { %14224 = vmatmul.msk.f32.gmra.mxu1 %vm7396_vm1, %v7248_v16  ;;  %v19468_v16 = vpop.f32.mrf.mxu1 }
0x107e   :  { %20781 = vst [vmem:[#allocation58_spill] sm:$0xff] %v19468_v16 }
0x107f   :  { %7289 = vmatmul.bf16.gmra.mxu2 %v13992_v24 }
0x1082   :  { %v7250_v55 = vpop.f32.mrf.mxu2 }
0x1083   :  { %v7251_v9 = vadd.f32 %v7250_v55, %v6841_v25  ;;  %v6856_v41 = vpop.f32.mrf.mxu0  ;;  %v19466_v25 = vpop.f32.mrf.mxu3 }
0x1084   :  { %20780 = vst [vmem:[#allocation13_spill] sm:$0xff] %v19466_v25 }
0x1085   :  { %14225 = vmatmul.msk.f32.gmra.mxu1 %vm7396_vm1, %v7251_v9  ;;  %6895 = vmatmul.bf16.gmra.mxu0 %v14012_v8  ;;  %v19471_v9 = vpop.f32.mrf.mxu1 }
0x1086   :  { %20782 = vst [vmem:[#allocation61_spill] sm:$0xff] %v19471_v9 }
0x108a   :  { %v7252_v28 = vpop.f32.mrf.mxu2 }
0x108b   :  { %v7253_v56 = vadd.f32 %v7252_v28, %v6843_v54  ;;  %v6858_v55 = vpop.f32.mrf.mxu0  ;;  %v19473_v30 = vpop.f32.mrf.mxu3  ;;  %v14005_v54 = vld [vmem:[#allocation3 + $0x448] sm:$0xf0]  ;;  %v14019_v28 = vld [vmem:[#allocation3 + $0x460] sm:$0xf] }
0x108c   :  { %20783 = vst [vmem:[#allocation64_spill] sm:$0xff] %v19473_v30  ;;  %v14020_v47 = vor.u32 %v15466_v61, %v14019_v28  ;;  %v14027_v28 = vld [vmem:[#allocation3 + $0x470] sm:$0xf] }
0x108d   :  { %14226 = vmatmul.msk.f32.gmra.mxu1 %vm7396_vm1, %v7253_v56  ;;  %v14008_v56 = vor.u32 %v15461_v57, %v14005_v54  ;;  %v15463_v57 = vld [vmem:[#allocation3 + $0x454] sm:$0xf]  ;;  %v14013_v54 = vld [vmem:[#allocation3 + $0x458] sm:$0xf0] }
0x108f   :  { %7294 = vmatmul.bf16.gmra.mxu2 %v14000_v32 }
0x1092   :  { %v7255_v24 = vpop.f32.mrf.mxu2 }
0x1093   :  { %v7256_v42 = vadd.f32 %v7255_v24, %v6846_v49  ;;  %v6861_v8 = vpop.f32.mrf.mxu0  ;;  %v19476_v49 = vpop.f32.mrf.mxu1 }
0x1094   :  { %v19478_v32 = vpop.f32.mrf.mxu3 }
0x1095   :  { %14227 = vmatmul.msk.f32.gmra.mxu1 %vm7396_vm1, %v7256_v42  ;;  %6900 = vmatmul.bf16.gmra.mxu0 %v14020_v47  ;;  %20784 = vst [vmem:[#allocation59_spill] sm:$0xff] %v19478_v32  ;;  %v15468_v47 = vld [vmem:[#allocation3 + $0x474] sm:$0xf0] }
0x1096   :  { %v14028_v31 = vor.u32 %v15468_v47, %v14027_v28 }
0x109a   :  { %v7257_v6 = vpop.f32.mrf.mxu2 }
0x109b   :  { %v7258_v29 = vadd.f32 %v7257_v6, %v6848_v14  ;;  %v6863_v16 = vpop.f32.mrf.mxu0  ;;  %v14240_v14 = vld [vmem:[%s20501_s8 + $0x98] sm:$0xff]  ;;  %v19484_v61 = vpop.f32.mrf.mxu1 }
0x109c   :  { %8649 = vmatpush.msra.mxu3 %v14240_v14 }
0x109d   :  { %14228 = vmatmul.msk.f32.gmra.mxu1 %vm7396_vm1, %v7258_v29 }
0x109f   :  { %7299 = vmatmul.bf16.gmra.mxu2 %v14008_v56  ;;  %v14016_v56 = vor.u32 %v15463_v57, %v14013_v54  ;;  %v14035_v54 = vld [vmem:[#allocation3 + $0x480] sm:$0xf] }
0x10a2   :  { %v7260_v24 = vpop.f32.mrf.mxu2 }
0x10a3   :  { %v7261_v42 = vadd.f32 %v7260_v24, %v6851_v18  ;;  %v6866_v9 = vpop.f32.mrf.mxu0  ;;  %v19486_v18 = vpop.f32.mrf.mxu3 }
0x10a4   :  { %v19489_v58 = vpop.f32.mrf.mxu1 }
0x10a5   :  { %14229 = vmatmul.msk.f32.gmra.mxu1 %vm7396_vm1, %v7261_v42  ;;  %6905 = vmatmul.bf16.gmra.mxu0 %v14028_v31 }
0x10aa   :  { %v7262_v6 = vpop.f32.mrf.mxu2 }
0x10ab   :  { %v7263_v29 = vadd.f32 %v7262_v6, %v6853_v43  ;;  %v6868_v14 = vpop.f32.mrf.mxu0  ;;  %v19492_v40 = vpop.f32.mrf.mxu3  ;;  %v14021_v43 = vld [vmem:[#allocation3 + $0x468] sm:$0xf0]  ;;  %v15470_v6 = vld [vmem:[#allocation3 + $0x484] sm:$0xf0] }
0x10ac   :  { %v14024_v47 = vor.u32 %v15465_v15, %v14021_v43  ;;  %v19495_v31 = vpop.f32.mrf.mxu1  ;;  %v14237_v43 = vld [vmem:[%s20501_s8 + $0x80] sm:$0xff] }
0x10ad   :  { %14230 = vmatmul.msk.f32.gmra.mxu1 %vm7396_vm1, %v7263_v29  ;;  %v14036_v29 = vor.u32 %v15470_v6, %v14035_v54  ;;  %v14029_v54 = vld [vmem:[#allocation3 + $0x478] sm:$0xf0] }
0x10af   :  { %7304 = vmatmul.bf16.gmra.mxu2 %v14016_v56 }
0x10b2   :  { %v7265_v24 = vpop.f32.mrf.mxu2 }
0x10b3   :  { %v7266_v42 = vadd.f32 %v7265_v24, %v6856_v41  ;;  %v6871_v48 = vpop.f32.mrf.mxu0  ;;  %v14239_v41 = vld [vmem:[%s20501_s8 + $0x90] sm:$0xff]  ;;  %v19500_v56 = vpop.f32.mrf.mxu3 }
0x10b4   :  { %8650 = vmatpush.msra.mxu3 %v14239_v41  ;;  %v19509_v6 = vpop.f32.mrf.mxu1  ;;  %v15472_v41 = vld [vmem:[#allocation3 + $0x494] sm:$0xf0] }
0x10b5   :  { %14231 = vmatmul.msk.f32.gmra.mxu1 %vm7396_vm1, %v7266_v42  ;;  %6910 = vmatmul.bf16.gmra.mxu0 %v14036_v29  ;;  %v14043_v29 = vld [vmem:[#allocation3 + $0x490] sm:$0xf] }
0x10ba   :  { %v7267_v57 = vpop.f32.mrf.mxu2 }
0x10bb   :  { %v7268_v28 = vadd.f32 %v7267_v57, %v6858_v55  ;;  %v14238_v55 = vld [vmem:[%s20501_s8 + $0x88] sm:$0xff]  ;;  %v6873_v42 = vpop.f32.mrf.mxu0  ;;  %v15467_v57 = vld [vmem:[#allocation3 + $0x474] sm:$0xf] }
0x10bc   :  { %8651 = vmatpush.msra.mxu3 %v14238_v55  ;;  %v14032_v55 = vor.u32 %v15467_v57, %v14029_v54  ;;  %v19514_v39 = vpop.f32.mrf.mxu1  ;;  %v14051_v54 = vld [vmem:[#allocation3 + $0x4a0] sm:$0xf] }
0x10bd   :  { %14232 = vmatmul.msk.f32.gmra.mxu1 %vm7396_vm1, %v7268_v28  ;;  %v19511_v28 = vpop.f32.mrf.mxu3 }
0x10be   :  { %8652 = vmatpush.msra.mxu3 %v14237_v43  ;;  %20785 = vst [vmem:[#allocation14_spill] sm:$0xff] %v19511_v28  ;;  %v19519_v28 = vld [vmem:[%s20504_s11 + $0x8] sm:$0xff] }
0x10bf   :  { %7309 = vmatmul.bf16.gmra.mxu2 %v14024_v47  ;;  %10721 = vmatpush.msrb.mxu0 %v19519_v28 }
0x10c2   :  { %v7270_v15 = vpop.f32.mrf.mxu2 }
0x10c3   :  { %v7271_v24 = vadd.f32 %v7270_v15, %v6861_v8  ;;  %v6876_v8 = vpop.f32.mrf.mxu0  ;;  %v14044_v15 = vor.u32 %v15472_v41, %v14043_v29 }
0x10c5   :  { %14233 = vmatmul.msk.f32.gmra.mxu1 %vm7396_vm1, %v7271_v24  ;;  %6915 = vmatmul.bf16.gmra.mxu0 %v14044_v15  ;;  %v19521_v20 = vpop.f32.mrf.mxu3  ;;  %v19525_v15 = vpop.f32.mrf.mxu1 }
0x10c6   :  { %20786 = vst [vmem:[#allocation12_spill] sm:$0xff] %v19521_v20 }
0x10ca   :  { %v7272_v47 = vpop.f32.mrf.mxu2 }
0x10cb   :  { %v7273_v25 = vadd.f32 %v7272_v47, %v6863_v16  ;;  %v6878_v30 = vpop.f32.mrf.mxu0  ;;  %v15469_v16 = vld [vmem:[#allocation3 + $0x484] sm:$0xf]  ;;  %v15474_v47 = vld [vmem:[#allocation3 + $0x4a4] sm:$0xf0] }
0x10cd   :  { %14234 = vmatmul.msk.f32.gmra.mxu1 %vm7396_vm1, %v7273_v25  ;;  %v14037_v25 = vld [vmem:[#allocation3 + $0x488] sm:$0xf0] }
0x10ce   :  { %v14040_v41 = vor.u32 %v15469_v16, %v14037_v25  ;;  %v14059_v25 = vld [vmem:[#allocation3 + $0x4b0] sm:$0xf] }
0x10cf   :  { %7314 = vmatmul.bf16.gmra.mxu2 %v14032_v55  ;;  %v14052_v55 = vor.u32 %v15474_v47, %v14051_v54 }
0x10d2   :  { %v7275_v43 = vpop.f32.mrf.mxu2 }
0x10d3   :  { %v7276_v24 = vadd.f32 %v7275_v43, %v6866_v9  ;;  %v6881_v9 = vpop.f32.mrf.mxu0  ;;  %v19528_v43 = vpop.f32.mrf.mxu3 }
0x10d4   :  { %20787 = vst [vmem:[#allocation62_spill] sm:$0xff] %v19528_v43 }
0x10d5   :  { %14235 = vmatmul.msk.f32.gmra.mxu1 %vm7396_vm1, %v7276_v24  ;;  %6920 = vmatmul.bf16.gmra.mxu0 %v14052_v55  ;;  %v15473_v55 = vld [vmem:[#allocation3 + $0x4a4] sm:$0xf] }
0x10da   :  { %v7277_v57 = vpop.f32.mrf.mxu2 }
0x10db   :  { %v7278_v29 = vadd.f32 %v7277_v57, %v6868_v14  ;;  %v6883_v24 = vpop.f32.mrf.mxu0  ;;  %v19531_v12 = vpop.f32.mrf.mxu3  ;;  %v14045_v14 = vld [vmem:[#allocation3 + $0x498] sm:$0xf0]  ;;  %v15476_v57 = vld [vmem:[#allocation3 + $0x4b4] sm:$0xf0] }
0x10dc   :  { %20788 = vst [vmem:[#allocation39_spill] sm:$0xff] %v19531_v12  ;;  %v14048_v47 = vor.u32 %v15471_v52, %v14045_v14  ;;  %v14053_v12 = vld [vmem:[#allocation3 + $0x4a8] sm:$0xf0] }
0x10dd   :  { %14236 = vmatmul.msk.f32.gmra.mxu1 %vm7396_vm1, %v7278_v29  ;;  %v14060_v29 = vor.u32 %v15476_v57, %v14059_v25  ;;  %v14056_v52 = vor.u32 %v15473_v55, %v14053_v12  ;;  %v15480_v12 = vld [vmem:[#allocation3 + $0x4d4] sm:$0xf0] }
0x10df   :  { %7319 = vmatmul.bf16.gmra.mxu2 %v14040_v41 }
0x10e2   :  { %v7280_v20 = vpop.f32.mrf.mxu2 }
0x10e3   :  { %v7281_v50 = vadd.f32 %v7280_v20, %v6871_v48  ;;  %v6886_v32 = vpop.f32.mrf.mxu0  ;;  %v19534_v41 = vpop.f32.mrf.mxu3 }
0x10e4   :  { %20789 = vst [vmem:[#allocation15_spill] sm:$0xff] %v19534_v41  ;;  %v15484_v41 = vld [vmem:[#allocation3 + $0x4f4] sm:$0xf0] }
0x10e5   :  { %14241 = vmatmul.msk.f32.vlgmr.msra.gmra.mxu3 %vm7396_vm1, %v7281_v50  ;;  %6925 = vmatmul.bf16.gmra.mxu0 %v14060_v29  ;;  %v15475_v29 = vld [vmem:[#allocation3 + $0x4b4] sm:$0xf] }
0x10ea   :  { %v7282_v16 = vpop.f32.mrf.mxu2 }
0x10eb   :  { %v7283_v54 = vadd.f32 %v7282_v16, %v6873_v42  ;;  %v6888_v50 = vpop.f32.mrf.mxu0  ;;  %v14068_v16 = vor.u32 %v15478_v10, %v14067_v11  ;;  %v19537_v25 = vpop.f32.mrf.mxu3 }
0x10ec   :  { %20790 = vst [vmem:[#allocation51_spill] sm:$0xff] %v19537_v25 }
0x10ed   :  { %14242 = vmatmul.msk.f32.gmra.mxu3 %vm7396_vm1, %v7283_v54 }
0x10ef   :  { %7324 = vmatmul.bf16.gmra.mxu2 %v14048_v47 }
0x10f2   :  { %v7285_v20 = vpop.f32.mrf.mxu2 }
0x10f3   :  { %v7286_v48 = vadd.f32 %v7285_v20, %v6876_v8  ;;  %v6891_v14 = vpop.f32.mrf.mxu0  ;;  %v19541_v47 = vpop.f32.mrf.mxu3  ;;  %v14061_v20 = vld [vmem:[#allocation3 + $0x4b8] sm:$0xf0] }
0x10f4   :  { %20791 = vst [vmem:[#allocation54_spill] sm:$0xff] %v19541_v47  ;;  %v14064_v10 = vor.u32 %v15475_v29, %v14061_v20  ;;  %v15482_v29 = vld [vmem:[#allocation3 + $0x4e4] sm:$0xf0] }
0x10f5   :  { %14243 = vmatmul.msk.f32.gmra.mxu3 %vm7396_vm1, %v7286_v48  ;;  %6930 = vmatmul.bf16.gmra.mxu0 %v14068_v16 }
0x10fa   :  { %v7287_v43 = vpop.f32.mrf.mxu2 }
0x10fb   :  { %v7288_v42 = vadd.f32 %v7287_v43, %v6878_v30  ;;  %v6893_v54 = vpop.f32.mrf.mxu0  ;;  %v14075_v30 = vld [vmem:[#allocation3 + $0x4d0] sm:$0xf] }
0x10fc   :  { %v14076_v55 = vor.u32 %v15480_v12, %v14075_v30 }
0x10fd   :  { %14244 = vmatmul.msk.f32.gmra.mxu3 %vm7396_vm1, %v7288_v42  ;;  %v19544_v42 = vpop.f32.mrf.mxu3 }
0x10fe   :  { %20792 = vst [vmem:[#allocation42_spill] sm:$0xff] %v19544_v42 }
0x10ff   :  { %7329 = vmatmul.bf16.gmra.mxu2 %v14056_v52 }
0x1102   :  { %v7290_v57 = vpop.f32.mrf.mxu2 }
0x1103   :  { %v7291_v8 = vadd.f32 %v7290_v57, %v6881_v9  ;;  %v6896_v11 = vpop.f32.mrf.mxu0  ;;  %v15477_v57 = vld [vmem:[#allocation3 + $0x4c4] sm:$0xf] }
0x1105   :  { %14245 = vmatmul.msk.f32.gmra.mxu3 %vm7396_vm1, %v7291_v8  ;;  %6935 = vmatmul.bf16.gmra.mxu0 %v14076_v55  ;;  %v14069_v8 = vld [vmem:[#allocation3 + $0x4c8] sm:$0xf0]  ;;  %v19547_v25 = vpop.f32.mrf.mxu3 }
0x1106   :  { %20793 = vst [vmem:[#allocation16_spill] sm:$0xff] %v19547_v25  ;;  %v14091_v25 = vld [vmem:[#allocation3 + $0x4f0] sm:$0xf] }
0x110a   :  { %v7292_v48 = vpop.f32.mrf.mxu2 }
0x110b   :  { %v7293_v43 = vadd.f32 %v7292_v48, %v6883_v24  ;;  %v6898_v16 = vpop.f32.mrf.mxu0  ;;  %v14083_v24 = vld [vmem:[#allocation3 + $0x4e0] sm:$0xf]  ;;  %v14072_v48 = vor.u32 %v15477_v57, %v14069_v8  ;;  %v14092_v57 = vor.u32 %v15484_v41, %v14091_v25 }
0x110c   :  { %v14084_v30 = vor.u32 %v15482_v29, %v14083_v24 }
0x110d   :  { %14246 = vmatmul.msk.f32.gmra.mxu3 %vm7396_vm1, %v7293_v43 }
0x110f   :  { %7334 = vmatmul.bf16.gmra.mxu2 %v14064_v10  ;;  %v19550_v10 = vpop.f32.mrf.mxu3 }
0x1112   :  { %v7295_v9 = vpop.f32.mrf.mxu2 }
0x1113   :  { %v7296_v52 = vadd.f32 %v7295_v9, %v6886_v32  ;;  %v6901_v12 = vpop.f32.mrf.mxu0  ;;  %v15479_v9 = vld [vmem:[#allocation3 + $0x4d4] sm:$0xf] }
0x1115   :  { %14247 = vmatmul.msk.f32.gmra.mxu3 %vm7396_vm1, %v7296_v52  ;;  %6940 = vmatmul.bf16.gmra.mxu0 %v14084_v30  ;;  %v14077_v52 = vld [vmem:[#allocation3 + $0x4d8] sm:$0xf0]  ;;  %v14085_v30 = vld [vmem:[#allocation3 + $0x4e8] sm:$0xf0] }
0x1117   :  { %v19554_v8 = vpop.f32.mrf.mxu3 }
0x111a   :  { %v7297_v47 = vpop.f32.mrf.mxu2 }
0x111b   :  { %v7298_v20 = vadd.f32 %v7297_v47, %v6888_v50  ;;  %v6903_v55 = vpop.f32.mrf.mxu0  ;;  %v14080_v47 = vor.u32 %v15479_v9, %v14077_v52 }
0x111d   :  { %14248 = vmatmul.msk.f32.gmra.mxu3 %vm7396_vm1, %v7298_v20 }
0x111f   :  { %7339 = vmatmul.bf16.gmra.mxu2 %v14072_v48  ;;  %v19557_v20 = vpop.f32.mrf.mxu3  ;;  %v15481_v48 = vld [vmem:[#allocation3 + $0x4e4] sm:$0xf] }
0x1122   :  { %v7300_v43 = vpop.f32.mrf.mxu2 }
0x1123   :  { %v7301_v32 = vadd.f32 %v7300_v43, %v6891_v14  ;;  %v6906_v14 = vpop.f32.mrf.mxu0 }
0x1125   :  { %14249 = vmatmul.msk.f32.gmra.mxu3 %vm7396_vm1, %v7301_v32  ;;  %6945 = vmatmul.bf16.gmra.mxu0 %v14092_v57 }
0x1127   :  { %v19560_v41 = vpop.f32.mrf.mxu3 }
0x112a   :  { %v7302_v42 = vpop.f32.mrf.mxu2 }
0x112b   :  { %v7303_v50 = vadd.f32 %v7302_v42, %v6893_v54  ;;  %v6908_v32 = vpop.f32.mrf.mxu0  ;;  %v14088_v42 = vor.u32 %v15481_v48, %v14085_v30 }
0x112d   :  { %14250 = vmatmul.msk.f32.gmra.mxu3 %vm7396_vm1, %v7303_v50  ;;  %v14093_v50 = vld [vmem:[#allocation3 + $0x4f8] sm:$0xf0] }
0x112f   :  { %7344 = vmatmul.bf16.gmra.mxu2 %v14080_v47 }
0x1132   :  { %v7305_v24 = vpop.f32.mrf.mxu2 }
0x1133   :  { %v7306_v29 = vadd.f32 %v7305_v24, %v6896_v11  ;;  %v6911_v52 = vpop.f32.mrf.mxu0  ;;  %v15483_v11 = vld [vmem:[#allocation3 + $0x4f4] sm:$0xf] }
0x1134   :  { %v14096_v24 = vor.u32 %v15483_v11, %v14093_v50 }
0x1135   :  { %14251 = vmatmul.msk.f32.gmra.mxu3 %vm7396_vm1, %v7306_v29  ;;  %v19563_v29 = vpop.f32.mrf.mxu3 }
0x113a   :  { %v7307_v43 = vpop.f32.mrf.mxu2 }
0x113b   :  { %v7308_v54 = vadd.f32 %v7307_v43, %v6898_v16  ;;  %v6913_v16 = vpop.f32.mrf.mxu0 }
0x113d   :  { %14252 = vmatmul.msk.f32.gmra.mxu3 %vm7396_vm1, %v7308_v54  ;;  %v19567_v43 = vpop.f32.mrf.mxu3 }
0x113f   :  { %7349 = vmatmul.bf16.gmra.mxu2 %v14088_v42 }
0x1142   :  { %v7310_v25 = vpop.f32.mrf.mxu2 }
0x1143   :  { %v7311_v9 = vadd.f32 %v7310_v25, %v6901_v12  ;;  %v6916_v12 = vpop.f32.mrf.mxu0 }
0x1145   :  { %14253 = vmatmul.msk.f32.gmra.mxu3 %vm7396_vm1, %v7311_v9 }
0x114a   :  { %v7312_v47 = vpop.f32.mrf.mxu2 }
0x114b   :  { %v7313_v57 = vadd.f32 %v7312_v47, %v6903_v55  ;;  %v19572_v55 = vpop.f32.mrf.mxu3  ;;  %v6918_v9 = vpop.f32.mrf.mxu0 }
0x114d   :  { %14254 = vmatmul.msk.f32.gmra.mxu3 %vm7396_vm1, %v7313_v57 }
0x114f   :  { %7354 = vmatmul.bf16.gmra.mxu2 %v14096_v24 }
0x1152   :  { %v7315_v48 = vpop.f32.mrf.mxu2 }
0x1153   :  { %v7316_v30 = vadd.f32 %v7315_v48, %v6906_v14  ;;  %v6921_v47 = vpop.f32.mrf.mxu0 }
0x1155   :  { %14255 = vmatmul.msk.f32.gmra.mxu3 %vm7396_vm1, %v7316_v30  ;;  %v8432_v30 = vpop.f32.mrf.mxu1 }
0x115a   :  { %v7317_v54 = vpop.f32.mrf.mxu2 }
0x115b   :  { %v7318_v42 = vadd.f32 %v7317_v54, %v6908_v32  ;;  %v6923_v48 = vpop.f32.mrf.mxu0 }
0x115d   :  { %14256 = vmatmul.msk.f32.gmra.mxu3 %vm7396_vm1, %v7318_v42 }
0x115f   :  { %14097 = vmatmul.msk.f32.vlgmr.msra.gmra.mxu2 %vm7396_vm1, %v19102_v35  ;;  %v8505_v35 = vadd.f32 %v19476_v49, %v19339_v4  ;;  %v8507_v4 = vadd.f32 %v19489_v58, %v19351_v26 }
0x1160   :  { %15689 = vmatpush.msra.mxu2 %v19519_v28 }
0x1162   :  { %v7320_v25 = vpop.f32.mrf.mxu2 }
0x1163   :  { %v7321_v11 = vadd.f32 %v7320_v25, %v6911_v52 }
0x1165   :  { %14257 = vmatmul.msk.f32.gmra.mxu3 %vm7396_vm1, %v7321_v11  ;;  %v6926_v11 = vpop.f32.mrf.mxu0 }
0x1167   :  { %14164 = vmatmul.msk.f32.vlgmr.msrb.gmra.mxu2 %vm7396_vm1, %v19235_v2  ;;  %v8506_v2 = vadd.f32 %v19484_v61, %v19346_v44 }
0x1168   :  { %v19578_v14 = vpop.f32.mrf.mxu3 }
0x116a   :  { %v7322_v32 = vpop.f32.mrf.mxu2 }
0x116b   :  { %v7323_v50 = vadd.f32 %v7322_v32, %v6913_v16  ;;  %v19595_v32 = vpop.f32.mrf.mxu1 }
0x116d   :  { %14258 = vmatmul.msk.f32.gmra.mxu3 %vm7396_vm1, %v7323_v50  ;;  %v6928_v26 = vpop.f32.mrf.mxu0 }
0x1170   :  { %v8657_v57 = vpop.f32.mrf.mxu3 }
0x1171   :  { %v19583_v28 = vadd.f32 %v8657_v57, %v8505_v35 }
0x1172   :  { %v7325_v24 = vpop.f32.mrf.mxu2 }
0x1173   :  { %v7326_v52 = vadd.f32 %v7325_v24, %v6916_v12 }
0x1175   :  { %14259 = vmatmul.msk.f32.gmra.mxu3 %vm7396_vm1, %v7326_v52  ;;  %v19604_v52 = vpop.f32.mrf.mxu1 }
0x1178   :  { %v8660_v54 = vpop.f32.mrf.mxu3 }
0x1179   :  { %v19588_v16 = vadd.f32 %v8660_v54, %v8506_v2  ;;  %v8509_v2 = vadd.f32 %v19509_v6, %v19363_v23 }
0x117a   :  { %v7327_v42 = vpop.f32.mrf.mxu2 }
0x117b   :  { %v7328_v25 = vadd.f32 %v7327_v42, %v6918_v9  ;;  %v8508_v9 = vadd.f32 %v19495_v31, %v19356_v7 }
0x117d   :  { %14260 = vmatmul.msk.f32.gmra.mxu3 %vm7396_vm1, %v7328_v25  ;;  %v6931_v25 = vpop.f32.mrf.mxu0 }
0x1180   :  { %v8663_v49 = vpop.f32.mrf.mxu3 }
0x1181   :  { %v19593_v12 = vadd.f32 %v8663_v49, %v8507_v4  ;;  %v19614_v4 = vpop.f32.mrf.mxu1 }
0x1182   :  { %v7330_v50 = vpop.f32.mrf.mxu2 }
0x1183   :  { %v7331_v61 = vadd.f32 %v7330_v50, %v6921_v47 }
0x1185   :  { %14261 = vmatmul.msk.f32.gmra.mxu3 %vm7396_vm1, %v7331_v61  ;;  %v6933_v61 = vpop.f32.mrf.mxu0 }
0x1188   :  { %v8666_v35 = vpop.f32.mrf.mxu3 }
0x1189   :  { %v19602_v57 = vadd.f32 %v8666_v35, %v8508_v9  ;;  %v8511_v9 = vadd.f32 %v19525_v15, %v19374_v62 }
0x118a   :  { %v7332_v58 = vpop.f32.mrf.mxu2 }
0x118b   :  { %v7333_v24 = vadd.f32 %v7332_v58, %v6923_v48  ;;  %v8510_v48 = vadd.f32 %v19514_v39, %v19370_v17  ;;  %v7774_v58 = vadd.f32 %v19286_v5, %v19177_v36 }
0x118d   :  { %14262 = vmatmul.msk.f32.gmra.mxu3 %vm7396_vm1, %v7333_v24  ;;  %v8020_v39 = vadd.f32 %v19378_v19, %v7774_v58 }
0x1190   :  { %v8669_v54 = vpop.f32.mrf.mxu3 }
0x1191   :  { %v19609_v47 = vadd.f32 %v8669_v54, %v8509_v2  ;;  %v8266_v54 = vadd.f32 %v19455_v46, %v8020_v39 }
0x1192   :  { %v7335_v42 = vpop.f32.mrf.mxu2 }
0x1193   :  { %v8784_v7 = vpack.c.bf16 %v19609_v47, %v19602_v57  ;;  %v7336_v31 = vadd.f32 %v7335_v42, %v6926_v11  ;;  %v19623_v11 = vpop.f32.mrf.mxu1  ;;  %v8512_v62 = vadd.f32 %v8432_v30, %v8266_v54  ;;  %v6936_v42 = vpop.f32.mrf.mxu0  ;;  %v20817_v47 = vld [vmem:[#allocation15_spill] sm:$0xff] }
0x1195   :  { %14263 = vmatmul.msk.f32.gmra.mxu3 %vm7396_vm1, %v7336_v31 }
0x1198   :  { %v8672_v49 = vpop.f32.mrf.mxu3 }
0x1199   :  { %v19618_v50 = vadd.f32 %v8672_v49, %v8510_v48 }
0x119a   :  { %v7337_v23 = vpop.f32.mrf.mxu2 }
0x119b   :  { %v7338_v6 = vadd.f32 %v7337_v23, %v6928_v26  ;;  %v8447_v48 = vpop.f32.mrf.mxu1  ;;  %v6938_v19 = vpop.f32.mrf.mxu0 }
0x119d   :  { %14264 = vmatmul.msk.f32.gmra.mxu3 %vm7396_vm1, %v7338_v6 }
0x11a0   :  { %v8675_v35 = vpop.f32.mrf.mxu3 }
0x11a1   :  { %v19627_v24 = vadd.f32 %v8675_v35, %v8511_v9 }
0x11a2   :  { %v7340_v17 = vpop.f32.mrf.mxu2 }
0x11a3   :  { %v8785_v26 = vpack.c.bf16 %v19627_v24, %v19618_v50  ;;  %v7341_v2 = vadd.f32 %v7340_v17, %v6931_v25  ;;  %v8450_v25 = vpop.f32.mrf.mxu1  ;;  %v6941_v35 = vpop.f32.mrf.mxu0 }
0x11a5   :  { %14265 = vmatmul.msk.f32.gmra.mxu3 %vm7396_vm1, %v7341_v2 }
0x11a8   :  { %v8678_v15 = vpop.f32.mrf.mxu3 }
0x11a9   :  { %v19634_v31 = vadd.f32 %v8678_v15, %v8512_v62 }
0x11aa   :  { %v7342_v36 = vpop.f32.mrf.mxu2 }
0x11ab   :  { %v7343_v5 = vadd.f32 %v7342_v36, %v6933_v61  ;;  %v8453_v58 = vpop.f32.mrf.mxu1  ;;  %v6943_v2 = vpop.f32.mrf.mxu0 }
0x11ad   :  { %14266 = vmatmul.msk.f32.gmra.mxu3 %vm7396_vm1, %v7343_v5 }
0x11b0   :  { %v19637_v49 = vpop.f32.mrf.mxu3 }
0x11b2   :  { %v7345_v23 = vpop.f32.mrf.mxu2 }
0x11b3   :  { %v7346_v6 = vadd.f32 %v7345_v23, %v6936_v42  ;;  %v8456_v54 = vpop.f32.mrf.mxu1  ;;  %v6946_v36 = vpop.f32.mrf.mxu0 }
0x11b5   :  { %14267 = vmatmul.msk.f32.gmra.mxu3 %vm7396_vm1, %v7346_v6 }
0x11b8   :  { %v19640_v46 = vpop.f32.mrf.mxu3 }
0x11ba   :  { %v7347_v30 = vpop.f32.mrf.mxu2 }
0x11bb   :  { %v7348_v9 = vadd.f32 %v7347_v30, %v6938_v19  ;;  %v19645_v23 = vpop.f32.mrf.mxu1 }
0x11bd   :  { %14268 = vmatmul.msk.f32.gmra.mxu3 %vm7396_vm1, %v7348_v9  ;;  %v7780_v9 = vadd.f32 %v19257_v53, %v19203_v63 }
0x11c0   :  { %v8687_v17 = vpop.f32.mrf.mxu3 }
0x11c2   :  { %v7350_v61 = vpop.f32.mrf.mxu2 }
0x11c3   :  { %v7351_v39 = vadd.f32 %v7350_v61, %v6941_v35  ;;  %v7781_v35 = vadd.f32 %v19272_v34, %v19214_v38  ;;  %v6948_v61 = vpop.f32.mrf.mxu0 }
0x11c5   :  { %14269 = vmatmul.msk.f32.gmra.mxu3 %vm7396_vm1, %v7351_v39 }
0x11c8   :  { %v8690_v62 = vpop.f32.mrf.mxu3 }
0x11ca   :  { %v7352_v15 = vpop.f32.mrf.mxu2 }
0x11cb   :  { %v7353_v42 = vadd.f32 %v7352_v15, %v6943_v2  ;;  %v7779_v2 = vadd.f32 %v19307_v59, %v19197_v13  ;;  %v8026_v15 = vadd.f32 %v19410_v0, %v7780_v9  ;;  %v7777_v13 = vadd.f32 %v19277_v37, %v19187_v45  ;;  %v20796_v9 = vld [vmem:[#allocation59_spill] sm:$0xff] }
0x11cd   :  { %14270 = vmatmul.msk.f32.gmra.mxu3 %vm7396_vm1, %v7353_v42  ;;  %v8027_v42 = vadd.f32 %v19413_v22, %v7781_v35  ;;  %v8272_v63 = vadd.f32 %v19492_v40, %v8026_v15  ;;  %v19666_v22 = vpop.permute.xlu1 %7693  ;;  %v20794_v40 = vld [vmem:[#allocation71_spill] sm:$0xff] }
0x11cf   :  { %v8273_v38 = vadd.f32 %v19500_v56, %v8027_v42  ;;  %v8518_v59 = vadd.f32 %v8450_v25, %v8272_v63  ;;  %v20801_v42 = vld [vmem:[#allocation64_spill] sm:$0xff] }
0x11d0   :  { %v8693_v5 = vpop.f32.mrf.mxu3 }
0x11d1   :  { %v8519_v0 = vadd.f32 %v8453_v58, %v8273_v38  ;;  %v20799_v58 = vld [vmem:[#allocation10_spill] sm:$0xff]  ;;  %v20803_v38 = vld [vmem:[#allocation13_spill] sm:$0xff] }
0x11d2   :  { %v7355_v19 = vpop.f32.mrf.mxu2 }
0x11d3   :  { %v7356_v6 = vadd.f32 %v7355_v19, %v6946_v36  ;;  %v8462_v36 = vpop.f32.mrf.mxu1  ;;  %v7778_v19 = vadd.f32 %v19282_v60, %v19192_v21  ;;  %v7776_v21 = vadd.f32 %v19316_v33, %v19184_v3  ;;  %v7782_v60 = vadd.f32 %v20794_v40, %v19225_v1 }
0x11d5   :  { %14271 = vmatmul.msk.f32.gmra.mxu3 %vm7396_vm1, %v7356_v6  ;;  %v8025_v6 = vadd.f32 %v19406_v51, %v7779_v2  ;;  %v8024_v53 = vadd.f32 %v19403_v27, %v7778_v19  ;;  %v20795_v51 = vld [vmem:[#allocation38_spill] sm:$0xff]  ;;  %v20800_v2 = vld [vmem:[#allocation35_spill] sm:$0xff] }
0x11d6   :  { %v8023_v56 = vadd.f32 %v20795_v51, %v7777_v13  ;;  %v8028_v15 = vadd.f32 %v20800_v2, %v7782_v60 }
0x11d7   :  { %v8271_v34 = vadd.f32 %v19486_v18, %v8025_v6  ;;  %v8270_v35 = vadd.f32 %v20796_v9, %v8024_v53  ;;  %v20798_v18 = vld [vmem:[#allocation46_spill] sm:$0xff]  ;;  %v20802_v6 = vld [vmem:[#allocation67_spill] sm:$0xff] }
0x11d8   :  { %v8696_v30 = vpop.f32.mrf.mxu3  ;;  %v8269_v3 = vadd.f32 %v20801_v42, %v8023_v56  ;;  %v20812_v42 = vld [vmem:[#allocation61_spill] sm:$0xff] }
0x11d9   :  { %v8517_v45 = vadd.f32 %v8447_v48, %v8271_v34  ;;  %v8764_v37 = vadd.f32 %v8696_v30, %v8518_v59  ;;  %v8516_v33 = vadd.f32 %v19623_v11, %v8270_v35  ;;  %v20804_v48 = vld [vmem:[#allocation14_spill] sm:$0xff]  ;;  %v20805_v59 = vld [vmem:[#allocation11_spill] sm:$0xff] }
0x11da   :  { %v7357_v39 = vpop.f32.mrf.mxu2  ;;  %v8274_v30 = vadd.f32 %v20804_v48, %v8028_v15  ;;  %v8515_v53 = vadd.f32 %v19614_v4, %v8269_v3  ;;  %v7609_v4 = vpop.permute.xlu1 %7608  ;;  %v20811_v15 = vld [vmem:[#allocation62_spill] sm:$0xff] }
0x11db   :  { %v7358_v44 = vadd.f32 %v7357_v39, %v6948_v61  ;;  %v20797_v61 = vld [vmem:[#allocation65_spill] sm:$0xff]  ;;  %v8022_v39 = vadd.f32 %v20799_v58, %v7776_v21  ;;  %v8763_v1 = vadd.f32 %v8693_v5, %v8517_v45  ;;  %v8762_v34 = vadd.f32 %v8690_v62, %v8516_v33  ;;  %v19685_v21 = vpop.f32.mrf.mxu1 }
0x11dc   :  { %v7775_v25 = vadd.f32 %v20798_v18, %v20797_v61  ;;  %v8520_v60 = vadd.f32 %v8456_v54, %v8274_v30  ;;  %v8761_v11 = vadd.f32 %v8687_v17, %v8515_v53  ;;  %v20806_v54 = vld [vmem:[#allocation17_spill] sm:$0xff]  ;;  %v20807_v18 = vld [vmem:[#allocation18_spill] sm:$0xff] }
0x11dd   :  { %14272 = vmatmul.msk.f32.gmra.mxu3 %vm7396_vm1, %v7358_v44  ;;  %v8268_v13 = vadd.f32 %v20803_v38, %v8022_v39  ;;  %v8788_v5 = vpack.c.bf16 %v8763_v1, %v8762_v34  ;;  %v20810_v39 = vld [vmem:[#allocation36_spill] sm:$0xff] }
0x11de   :  { %v8021_v63 = vadd.f32 %v20802_v6, %v7775_v25 }
0x11df   :  { %v8514_v40 = vadd.f32 %v19604_v52, %v8268_v13  ;;  %v20816_v13 = vld [vmem:[#allocation27_spill] sm:$0xff] }
0x11e0   :  { %v8699_v44 = vpop.f32.mrf.mxu3 }
0x11e1   :  { %v8765_v27 = vadd.f32 %v8699_v44, %v8519_v0  ;;  %v8267_v0 = vadd.f32 %v20805_v59, %v8021_v63  ;;  %v8760_v9 = vadd.f32 %v19640_v46, %v8514_v40  ;;  %v20809_v46 = vld [vmem:[#allocation26_spill] sm:$0xff]  ;;  %v20813_v63 = vpack.c.bf16 %v19593_v12, %v19588_v16  ;;  %v20819_v12 = vld [vmem:[#allocation37_spill] sm:$0xff] }
0x11e2   :  { %v7510_v51 = vpop.f32.mrf.mxu2 }
0x11e3   :  { %v8789_v19 = vpack.c.bf16 %v8765_v27, %v8764_v37  ;;  %v8513_v44 = vadd.f32 %v19595_v32, %v8267_v0  ;;  %v8787_v45 = vpack.c.bf16 %v8761_v11, %v8760_v9  ;;  %v7766_v37 = vadd.f32 %v7609_v4, %v7510_v51  ;;  %v8468_v27 = vpop.f32.mrf.mxu1  ;;  %v20808_v32 = vld [vmem:[#allocation78_spill] sm:$0xff]  ;;  %v20822_v4 = vld [vmem:[#allocation63_spill] sm:$0xff] }
0x11e4   :  { %v7784_v25 = vadd.f32 %v20808_v32, %v20807_v18  ;;  %v20820_v0 = vld [vmem:[#allocation22_spill] sm:$0xff] }
0x11e5   :  { %9758 = vmatpush.bf16.msrb.mxu1 %v8789_v19  ;;  %v8759_v62 = vadd.f32 %v19637_v49, %v8513_v44  ;;  %v8012_v17 = vadd.f32 %v20806_v54, %v7766_v37 }
0x11e6   :  { %v8030_v58 = vadd.f32 %v20809_v46, %v7784_v25 }
0x11e7   :  { %v8786_v52 = vpack.c.bf16 %v8759_v62, %v19634_v31  ;;  %v8258_v2 = vadd.f32 %v20810_v39, %v8012_v17  ;;  %v20823_v62 = vld [vmem:[#allocation57_spill] sm:$0xff]  ;;  %v20825_v17 = vld [vmem:[#allocation16_spill] sm:$0xff] }
0x11e8   :  { %v8702_v56 = vpop.f32.mrf.mxu3  ;;  %v8276_v49 = vadd.f32 %v20811_v15, %v8030_v58 }
0x11e9   :  { %v19690_v35 = vadd.f32 %v8702_v56, %v8520_v60  ;;  %9759 = vmatpush.bf16.msrb.mxu1 %v8788_v5  ;;  %v8504_v3 = vadd.f32 %v20812_v42, %v8258_v2  ;;  %v20821_v60 = vld [vmem:[#allocation54_spill] sm:$0xff] }
0x11ea   :  { %v8522_v31 = vadd.f32 %v8462_v36, %v8276_v49  ;;  %v20815_v36 = vld [vmem:[#allocation69_spill] sm:$0xff] }
0x11eb   :  { %v19711_v19 = vpop.f32.mrf.mxu1  ;;  %v8750_v6 = vadd.f32 %v19578_v14, %v8504_v3 }
0x11ed   :  { %9760 = vmatpush.bf16.msrb.mxu1 %v8787_v45  ;;  %v8782_v50 = vpack.c.bf16 %v19583_v28, %v8750_v6  ;;  %v20818_v28 = vld [vmem:[#allocation19_spill] sm:$0xff]  ;;  %v7790_v45 = vadd.f32 %v20823_v62, %v20822_v4  ;;  %v8009_v6 = vpop.f32.mrf.mxu2 }
0x11ee   :  { %v7788_v59 = vadd.f32 %v20819_v12, %v20818_v28 }
0x11f0   :  { %v19695_v61 = vpop.f32.mrf.mxu3  ;;  %v8034_v40 = vadd.f32 %v20820_v0, %v7788_v59  ;;  %v20833_v59 = vld [vmem:[#allocation79_spill] sm:$0xff]  ;;  %v20834_v0 = vld [vmem:[#allocation77_spill] sm:$0xff] }
0x11f1   :  { %9761 = vmatpush.bf16.msrb.mxu1 %v8786_v52  ;;  %v20824_v52 = vld [vmem:[#allocation23_spill] sm:$0xff] }
0x11f2   :  { %v8280_v11 = vadd.f32 %v20821_v60, %v8034_v40  ;;  %v8036_v54 = vadd.f32 %v20824_v52, %v7790_v45  ;;  %v7794_v40 = vadd.f32 %v20834_v0, %v20833_v59  ;;  %v20835_v60 = vld [vmem:[#allocation34_spill] sm:$0xff]  ;;  %v20838_v45 = vld [vmem:[#allocation31_spill] sm:$0xff] }
0x11f3   :  { %v8474_v57 = vpop.f32.mrf.mxu1 }
0x11f4   :  { %v8526_v5 = vadd.f32 %v8474_v57, %v8280_v11  ;;  %v8040_v52 = vadd.f32 %v20838_v45, %v7794_v40  ;;  %v20845_v40 = vld [vmem:[#allocation21_spill] sm:$0xff] }
0x11f5   :  { %9762 = vmatpush.bf16.msrb.mxu1 %v8785_v26  ;;  %v20814_v26 = vld [vmem:[#allocation70_spill] sm:$0xff] }
0x11f6   :  { %v7786_v38 = vadd.f32 %v20815_v36, %v20814_v26 }
0x11f8   :  { %v8708_v33 = vpop.f32.mrf.mxu3  ;;  %v8032_v48 = vadd.f32 %v20816_v13, %v7786_v38  ;;  %v20828_v13 = vld [vmem:[#allocation40_spill] sm:$0xff] }
0x11f9   :  { %v19706_v1 = vadd.f32 %v8708_v33, %v8522_v31  ;;  %9763 = vmatpush.bf16.msrb.mxu1 %v8784_v7 }
0x11fa   :  { %v8278_v7 = vadd.f32 %v20817_v47, %v8032_v48  ;;  %v20829_v48 = vld [vmem:[#allocation49_spill] sm:$0xff]  ;;  %v20830_v47 = vld [vmem:[#allocation76_spill] sm:$0xff] }
0x11fb   :  { %v19726_v34 = vpop.f32.mrf.mxu1  ;;  %v7796_v57 = vadd.f32 %v20829_v48, %v20828_v13 }
0x11fc   :  { %v8524_v30 = vadd.f32 %v8468_v27, %v8278_v7  ;;  %v8282_v27 = vadd.f32 %v20825_v17, %v8036_v54  ;;  %v20831_v7 = vld [vmem:[#allocation47_spill] sm:$0xff] }
0x11fd   :  { %9764 = vmatpush.bf16.msrb.mxu1 %v20813_v63  ;;  %v20826_v63 = vld [vmem:[#allocation33_spill] sm:$0xff] }
0x1200   :  { %v19718_v24 = vpop.f32.mrf.mxu3 }
0x1201   :  { %9765 = vmatpush.bf16.msrb.mxu1 %v8782_v50  ;;  %v20827_v50 = vld [vmem:[#allocation60_spill] sm:$0xff] }
0x1202   :  { %v7797_v26 = vadd.f32 %v20827_v50, %v20826_v63  ;;  %v20841_v50 = vld [vmem:[#allocation28_spill] sm:$0xff] }
0x1203   :  { %v8480_v51 = vpop.f32.mrf.mxu1 }
0x1204   :  { %v8528_v18 = vadd.f32 %v8480_v51, %v8282_v27  ;;  %v8043_v36 = vadd.f32 %v8009_v6, %v7797_v26  ;;  %v20836_v51 = vld [vmem:[#allocation66_spill] sm:$0xff]  ;;  %v20840_v6 = vld [vmem:[#allocation43_spill] sm:$0xff] }
0x1206   :  { %v8289_v12 = vadd.f32 %v19572_v55, %v8043_v36  ;;  %v20839_v55 = vld [vmem:[#allocation45_spill] sm:$0xff] }
0x1207   :  { %v7792_v63 = vadd.f32 %v20840_v6, %v20839_v55 }
0x1208   :  { %v8714_v53 = vpop.f32.mrf.mxu3 }
0x1209   :  { %v19724_v14 = vadd.f32 %v8714_v53, %v8524_v30  ;;  %v7795_v30 = vadd.f32 %v20831_v7, %v20830_v47  ;;  %v20832_v53 = vld [vmem:[#allocation58_spill] sm:$0xff] }
0x120a   :  { %v8042_v28 = vadd.f32 %v20832_v53, %v7796_v57  ;;  %v20842_v7 = vld [vmem:[#allocation50_spill] sm:$0xff] }
0x120b   :  { %v8483_v37 = vpop.f32.mrf.mxu1  ;;  %v8041_v11 = vadd.f32 %v20835_v60, %v7795_v30  ;;  %v20843_v30 = vld [vmem:[#allocation41_spill] sm:$0xff] }
0x120c   :  { %v7791_v53 = vadd.f32 %v20843_v30, %v20842_v7 }
0x120d   :  { %v8287_v54 = vadd.f32 %v19563_v29, %v8041_v11  ;;  %v20844_v29 = vld [vmem:[#allocation30_spill] sm:$0xff] }
0x120e   :  { %v8037_v60 = vadd.f32 %v20845_v40, %v7791_v53  ;;  %v20859_v53 = vld [vmem:[#allocation9_spill] sm:$0xff] }
0x1210   :  { %v19728_v16 = vpop.f32.mrf.mxu3 }
0x1213   :  { %v8486_v46 = vpop.f32.mrf.mxu1 }
0x1218   :  { %v8720_v56 = vpop.f32.mrf.mxu3 }
0x1219   :  { %v19734_v44 = vadd.f32 %v8720_v56, %v8526_v5  ;;  %v8288_v5 = vadd.f32 %v19567_v43, %v8042_v28  ;;  %v20837_v56 = vld [vmem:[#allocation75_spill] sm:$0xff]  ;;  %v8286_v43 = vadd.f32 %v19560_v41, %v8040_v52  ;;  %v20848_v52 = vld [vmem:[#allocation29_spill] sm:$0xff] }
0x121a   :  { %v7793_v4 = vadd.f32 %v20837_v56, %v20836_v51  ;;  %v8283_v56 = vadd.f32 %v19550_v10, %v8037_v60  ;;  %v20853_v10 = vld [vmem:[#allocation53_spill] sm:$0xff]  ;;  %v15490_v60 = vld [vmem:[#allocation5 + $0x24] sm:$0xf0] }
0x121b   :  { %v8489_v39 = vpop.f32.mrf.mxu1 }
0x121c   :  { %v8039_v26 = vadd.f32 %v20841_v50, %v7793_v4 }
0x121e   :  { %v8285_v28 = vadd.f32 %v19557_v20, %v8039_v26  ;;  %v14283_v26 = vld [vmem:[#allocation5 + $0x10] sm:$0xf] }
0x1220   :  { %v19736_v9 = vpop.f32.mrf.mxu3 }
0x1223   :  { %v8492_v15 = vpop.f32.mrf.mxu1 }
0x1228   :  { %v8726_v32 = vpop.f32.mrf.mxu3 }
0x1229   :  { %v19742_v25 = vadd.f32 %v8726_v32, %v8528_v18  ;;  %v14275_v18 = vld [vmem:[#allocation5] sm:$0xf]  ;;  %v15486_v32 = vld [vmem:[#allocation5 + $0x4] sm:$0xf0] }
0x122a   :  { %v14276_v13 = vor.u32 %v15486_v32, %v14275_v18  ;;  %v20852_v32 = vld [vmem:[#allocation56_spill] sm:$0xff] }
0x122b   :  { %v8495_v42 = vpop.f32.mrf.mxu1 }
0x122c   :  { %v8533_v48 = vadd.f32 %v8495_v42, %v8287_v54  ;;  %9766 = vmatmul.bf16.vlgmr.msrb.gmra.mxu1 %v14276_v13  ;;  %v20846_v42 = vld [vmem:[#allocation20_spill] sm:$0xff]  ;;  %v20849_v54 = vld [vmem:[#allocation73_spill] sm:$0xff] }
0x1230   :  { %v8729_v58 = vpop.f32.mrf.mxu3 }
0x1233   :  { %v8498_v33 = vpop.f32.mrf.mxu1 }
0x1234   :  { %v8534_v17 = vadd.f32 %v8498_v33, %v8288_v5  ;;  %v8038_v33 = vadd.f32 %v20844_v29, %v7792_v63  ;;  %v8531_v5 = vadd.f32 %v8489_v39, %v8285_v28  ;;  %v20855_v63 = vld [vmem:[#allocation51_spill] sm:$0xff] }
0x1236   :  { %v8284_v11 = vadd.f32 %v19554_v8, %v8038_v33  ;;  %v20851_v8 = vld [vmem:[#allocation42_spill] sm:$0xff]  ;;  %v20860_v33 = vld [vmem:[#allocation12_spill] sm:$0xff] }
0x1238   :  { %v8732_v2 = vpop.f32.mrf.mxu3  ;;  %v8530_v4 = vadd.f32 %v8486_v46, %v8284_v11  ;;  %v20854_v46 = vld [vmem:[#allocation74_spill] sm:$0xff] }
0x123b   :  { %v8501_v62 = vpop.f32.mrf.mxu1 }
0x123c   :  { %v8535_v27 = vadd.f32 %v8501_v62, %v8289_v12  ;;  %v8532_v12 = vadd.f32 %v8492_v15, %v8286_v43  ;;  %v8529_v15 = vadd.f32 %v8483_v37, %v8283_v56  ;;  %v20856_v43 = vld [vmem:[#allocation55_spill] sm:$0xff]  ;;  %v15494_v56 = vld [vmem:[#allocation5 + $0x44] sm:$0xf0] }
0x1240   :  { %v8735_v49 = vpop.f32.mrf.mxu3 }
0x1241   :  { %v8777_v62 = vadd.f32 %v8735_v49, %v8531_v5  ;;  %v7785_v49 = vadd.f32 %v20854_v46, %v20853_v10 }
0x1248   :  { %v8738_v31 = vpop.f32.mrf.mxu3 }
0x1249   :  { %v8778_v41 = vadd.f32 %v8738_v31, %v8532_v12  ;;  %v8775_v31 = vadd.f32 %v8729_v58, %v8529_v15  ;;  %v8031_v58 = vadd.f32 %v20856_v43, %v7785_v49  ;;  %v15497_v49 = vld [vmem:[#allocation5 + $0x64] sm:$0xf] }
0x124a   :  { %v10608_v43 = vld [vmem:[%s20504_s11] sm:$0xff] }
0x124b   :  { %10722 = vmatpush.msrb.mxu0 %v10608_v43  ;;  %15690 = vmatpush.msra.mxu2 %v10608_v43 }
0x1250   :  { %v8741_v3 = vpop.f32.mrf.mxu3 }
0x1251   :  { %v8779_v59 = vadd.f32 %v8741_v3, %v8533_v48  ;;  %v8776_v3 = vadd.f32 %v8732_v2, %v8530_v4  ;;  %v8794_v2 = vpack.c.bf16 %v8775_v31, %v19742_v25 }
0x1253   :  { %v8796_v45 = vpack.c.bf16 %v8779_v59, %v8778_v41  ;;  %v8795_v18 = vpack.c.bf16 %v8777_v62, %v8776_v3  ;;  %v15492_v41 = vld [vmem:[#allocation5 + $0x34] sm:$0xf0]  ;;  %v15491_v62 = vld [vmem:[#allocation5 + $0x34] sm:$0xf] }
0x1258   :  { %v8744_v38 = vpop.f32.mrf.mxu3 }
0x1259   :  { %v8780_v57 = vadd.f32 %v8744_v38, %v8534_v17  ;;  %v20847_v38 = vld [vmem:[#allocation72_spill] sm:$0xff] }
0x125a   :  { %v7789_v51 = vadd.f32 %v20847_v38, %v20846_v42  ;;  %v20850_v17 = vld [vmem:[#allocation48_spill] sm:$0xff]  ;;  %v14293_v38 = vld [vmem:[#allocation5 + $0x28] sm:$0xf0] }
0x125c   :  { %v8035_v20 = vadd.f32 %v20848_v52, %v7789_v51  ;;  %v14307_v51 = vld [vmem:[#allocation5 + $0x40] sm:$0xf]  ;;  %v14315_v52 = vld [vmem:[#allocation5 + $0x50] sm:$0xf] }
0x125d   :  { %v14308_v4 = vor.u32 %v15494_v56, %v14307_v51  ;;  %v14371_v56 = vld [vmem:[#allocation5 + $0xc0] sm:$0xf] }
0x125e   :  { %v8281_v39 = vadd.f32 %v20851_v8, %v8035_v20  ;;  %v15496_v20 = vld [vmem:[#allocation5 + $0x54] sm:$0xf0]  ;;  %v15498_v8 = vld [vmem:[#allocation5 + $0x64] sm:$0xf0] }
0x125f   :  { %v14316_v3 = vor.u32 %v15496_v20, %v14315_v52 }
0x1260   :  { %v8747_v36 = vpop.f32.mrf.mxu3  ;;  %v8527_v6 = vadd.f32 %v19726_v34, %v8281_v39  ;;  %v20857_v34 = vld [vmem:[#allocation68_spill] sm:$0xff] }
0x1261   :  { %v8781_v47 = vadd.f32 %v8747_v36, %v8535_v27  ;;  %v7787_v27 = vadd.f32 %v20850_v17, %v20849_v54  ;;  %v15488_v36 = vld [vmem:[#allocation5 + $0x14] sm:$0xf0]  ;;  %v15493_v54 = vld [vmem:[#allocation5 + $0x44] sm:$0xf]  ;;  %v14309_v17 = vld [vmem:[#allocation5 + $0x48] sm:$0xf0] }
0x1262   :  { %v8773_v37 = vadd.f32 %v19736_v9, %v8527_v6  ;;  %v14284_v13 = vor.u32 %v15488_v36, %v14283_v26  ;;  %v14312_v39 = vor.u32 %v15493_v54, %v14309_v17  ;;  %v15500_v6 = vld [vmem:[#allocation5 + $0x74] sm:$0xf0]  ;;  %v14365_v54 = vld [vmem:[#allocation5 + $0xb8] sm:$0xf0] }
0x1263   :  { %v8797_v0 = vpack.c.bf16 %v8781_v47, %v8780_v57  ;;  %v8033_v55 = vadd.f32 %v20852_v32, %v7787_v27  ;;  %v7783_v57 = vadd.f32 %v19666_v22, %v20857_v34  ;;  %v20858_v47 = vld [vmem:[#allocation39_spill] sm:$0xff]  ;;  %v14323_v27 = vld [vmem:[#allocation5 + $0x60] sm:$0xf]  ;;  %v14317_v32 = vld [vmem:[#allocation5 + $0x58] sm:$0xf0] }
0x1264   :  { %9771 = vmatmul.bf16.gmra.mxu1 %v14284_v13  ;;  %v8277_v7 = vadd.f32 %v20858_v47, %v8031_v58  ;;  %v8793_v9 = vpack.c.bf16 %v8773_v37, %v19734_v44  ;;  %v15485_v44 = vld [vmem:[#allocation5 + $0x4] sm:$0xf]  ;;  %v14324_v31 = vor.u32 %v15498_v8, %v14323_v27  ;;  %v14339_v37 = vld [vmem:[#allocation5 + $0x80] sm:$0xf]  ;;  %v15499_v58 = vld [vmem:[#allocation5 + $0x74] sm:$0xf] }
0x1265   :  { %10167 = vmatpush.bf16.msrb.mxu3 %v8797_v0  ;;  %v8279_v50 = vadd.f32 %v20855_v63, %v8033_v55  ;;  %v8029_v25 = vadd.f32 %v20859_v53, %v7783_v57  ;;  %v14277_v0 = vld [vmem:[#allocation5 + $0x8] sm:$0xf0]  ;;  %v14331_v55 = vld [vmem:[#allocation5 + $0x70] sm:$0xf]  ;;  %v15504_v47 = vld [vmem:[#allocation5 + $0x94] sm:$0xf0] }
0x1266   :  { %v8523_v29 = vadd.f32 %v19685_v21, %v8277_v7  ;;  %v14291_v21 = vld [vmem:[#allocation5 + $0x20] sm:$0xf]  ;;  %v14280_v11 = vor.u32 %v15485_v44, %v14277_v0  ;;  %v14332_v46 = vor.u32 %v15500_v6, %v14331_v55  ;;  %v14325_v63 = vld [vmem:[#allocation5 + $0x68] sm:$0xf0]  ;;  %v14347_v57 = vld [vmem:[#allocation5 + $0x90] sm:$0xf] }
0x1267   :  { %v8525_v48 = vadd.f32 %v19711_v19, %v8279_v50  ;;  %v8275_v28 = vadd.f32 %v20860_v33, %v8029_v25  ;;  %v14292_v5 = vor.u32 %v15490_v60, %v14291_v21  ;;  %v14328_v26 = vor.u32 %v15497_v49, %v14325_v63  ;;  %v15501_v53 = vld [vmem:[#allocation5 + $0x84] sm:$0xf]  ;;  %v14341_v25 = vld [vmem:[#allocation5 + $0x88] sm:$0xf0]  ;;  %v14355_v33 = vld [vmem:[#allocation5 + $0xa0] sm:$0xf] }
0x1268   :  { %v8769_v19 = vadd.f32 %v19718_v24, %v8523_v29  ;;  %v15487_v24 = vld [vmem:[#allocation5 + $0x14] sm:$0xf]  ;;  %v14349_v0 = vld [vmem:[#allocation5 + $0x98] sm:$0xf0]  ;;  %v14363_v60 = vld [vmem:[#allocation5 + $0xb0] sm:$0xf] }
0x1269   :  { %10168 = vmatpush.bf16.msrb.mxu3 %v8796_v45  ;;  %v8771_v30 = vadd.f32 %v19728_v16, %v8525_v48  ;;  %v8521_v59 = vadd.f32 %v19645_v23, %v8275_v28  ;;  %v14299_v23 = vld [vmem:[#allocation5 + $0x30] sm:$0xf]  ;;  %v14301_v45 = vld [vmem:[#allocation5 + $0x38] sm:$0xf0]  ;;  %v15506_v28 = vld [vmem:[#allocation5 + $0xa4] sm:$0xf0] }
0x126a   :  { %v8791_v16 = vpack.c.bf16 %v8769_v19, %v19706_v1  ;;  %v15489_v1 = vld [vmem:[#allocation5 + $0x24] sm:$0xf]  ;;  %v14304_v15 = vor.u32 %v15491_v62, %v14301_v45  ;;  %v14333_v48 = vld [vmem:[#allocation5 + $0x78] sm:$0xf0]  ;;  %v14344_v19 = vor.u32 %v15501_v53, %v14341_v25  ;;  %v15503_v44 = vld [vmem:[#allocation5 + $0x94] sm:$0xf] }
0x126b   :  { %v8792_v12 = vpack.c.bf16 %v8771_v30, %v19724_v14  ;;  %v8767_v22 = vadd.f32 %v19695_v61, %v8521_v59  ;;  %v14285_v14 = vld [vmem:[#allocation5 + $0x18] sm:$0xf0]  ;;  %v14300_v61 = vor.u32 %v15492_v41, %v14299_v23  ;;  %v14336_v7 = vor.u32 %v15499_v58, %v14333_v48  ;;  %v14379_v8 = vld [vmem:[#allocation5 + $0xd0] sm:$0xf]  ;;  %v14373_v49 = vld [vmem:[#allocation5 + $0xc8] sm:$0xf0] }
0x126c   :  { %v14288_v42 = vor.u32 %v15487_v24, %v14285_v14  ;;  %v14348_v30 = vor.u32 %v15504_v47, %v14347_v57  ;;  %v14352_v24 = vor.u32 %v15503_v44, %v14349_v0  ;;  %v14381_v57 = vld [vmem:[#allocation5 + $0xd8] sm:$0xf0]  ;;  %v14403_v44 = vld [vmem:[#allocation5 + $0x100] sm:$0xf]  ;;  %v15518_v0 = vld [vmem:[#allocation5 + $0x104] sm:$0xf0] }
0x126d   :  { %10169 = vmatpush.bf16.msrb.mxu3 %v8795_v18  ;;  %v8790_v40 = vpack.c.bf16 %v8767_v22, %v19690_v35  ;;  %v14296_v35 = vor.u32 %v15489_v1, %v14293_v38  ;;  %v15495_v18 = vld [vmem:[#allocation5 + $0x54] sm:$0xf]  ;;  %v14357_v1 = vld [vmem:[#allocation5 + $0xa8] sm:$0xf0] }
0x126e   :  { %v14320_v10 = vor.u32 %v15495_v18, %v14317_v32 }
0x1271   :  { %10170 = vmatpush.bf16.msrb.mxu3 %v8794_v2  ;;  %v15502_v2 = vld [vmem:[#allocation5 + $0x84] sm:$0xf0] }
0x1272   :  { %v14340_v36 = vor.u32 %v15502_v2, %v14339_v37  ;;  %v14387_v37 = vld [vmem:[#allocation5 + $0xe0] sm:$0xf]  ;;  %v15514_v2 = vld [vmem:[#allocation5 + $0xe4] sm:$0xf0] }
0x1274   :  { %9776 = vmatmul.bf16.gmra.mxu1 %v14292_v5 }
0x1275   :  { %10171 = vmatpush.bf16.msrb.mxu3 %v8793_v9 }
0x1279   :  { %10172 = vmatpush.bf16.msrb.mxu3 %v8792_v12  ;;  %v14356_v12 = vor.u32 %v15506_v28, %v14355_v33 }
0x127d   :  { %10173 = vmatpush.bf16.msrb.mxu3 %v8791_v16 }
0x1281   :  { %10174 = vmatpush.bf16.msrb.mxu3 %v8790_v40 }
0x1284   :  { %10175 = vmatmul.bf16.vlgmr.msrb.gmra.mxu3 %v14280_v11  ;;  %9781 = vmatmul.bf16.gmra.mxu1 %v14300_v61  ;;  %v15508_v11 = vld [vmem:[#allocation5 + $0xb4] sm:$0xf0]  ;;  %v15505_v61 = vld [vmem:[#allocation5 + $0xa4] sm:$0xf] }
0x1285   :  { %v14364_v14 = vor.u32 %v15508_v11, %v14363_v60  ;;  %v14360_v62 = vor.u32 %v15505_v61, %v14357_v1  ;;  %v14404_v60 = vor.u32 %v15518_v0, %v14403_v44  ;;  %v14411_v61 = vld [vmem:[#allocation5 + $0x110] sm:$0xf]  ;;  %v15520_v1 = vld [vmem:[#allocation5 + $0x114] sm:$0xf0] }
0x1294   :  { %10180 = vmatmul.bf16.gmra.mxu3 %v14288_v42  ;;  %9786 = vmatmul.bf16.gmra.mxu1 %v14308_v4 }
0x12a4   :  { %10185 = vmatmul.bf16.gmra.mxu3 %v14296_v35  ;;  %9791 = vmatmul.bf16.gmra.mxu1 %v14316_v3  ;;  %v15510_v35 = vld [vmem:[#allocation5 + $0xc4] sm:$0xf0]  ;;  %v15507_v3 = vld [vmem:[#allocation5 + $0xb4] sm:$0xf] }
0x12a5   :  { %v14372_v45 = vor.u32 %v15510_v35, %v14371_v56  ;;  %v14368_v18 = vor.u32 %v15507_v3, %v14365_v54  ;;  %v14412_v56 = vor.u32 %v15520_v1, %v14411_v61  ;;  %v14419_v3 = vld [vmem:[#allocation5 + $0x120] sm:$0xf]  ;;  %v15522_v54 = vld [vmem:[#allocation5 + $0x124] sm:$0xf0] }
0x12a9   :  { %v9767_v50 = vpop.f32.mrf.mxu1 }
0x12b1   :  { %v9769_v13 = vpop.f32.mrf.mxu1 }
0x12b4   :  { %10190 = vmatmul.bf16.gmra.mxu3 %v14304_v15  ;;  %9796 = vmatmul.bf16.gmra.mxu1 %v14324_v31 }
0x12c4   :  { %10195 = vmatmul.bf16.gmra.mxu3 %v14312_v39  ;;  %9801 = vmatmul.bf16.gmra.mxu1 %v14332_v46  ;;  %v15512_v39 = vld [vmem:[#allocation5 + $0xd4] sm:$0xf0]  ;;  %v15509_v46 = vld [vmem:[#allocation5 + $0xc4] sm:$0xf] }
0x12c5   :  { %v14380_v32 = vor.u32 %v15512_v39, %v14379_v8  ;;  %v14420_v8 = vor.u32 %v15522_v54, %v14419_v3 }
0x12d4   :  { %10200 = vmatmul.bf16.gmra.mxu3 %v14320_v10  ;;  %9806 = vmatmul.bf16.gmra.mxu1 %v14340_v36  ;;  %v14376_v36 = vor.u32 %v15509_v46, %v14373_v49  ;;  %v15524_v46 = vld [vmem:[#allocation5 + $0x134] sm:$0xf0] }
0x12e1   :  { %v9772_v34 = vpop.f32.mrf.mxu1 }
0x12e4   :  { %10205 = vmatmul.bf16.gmra.mxu3 %v14328_v26  ;;  %9811 = vmatmul.bf16.gmra.mxu1 %v14348_v30  ;;  %v14395_v30 = vld [vmem:[#allocation5 + $0xf0] sm:$0xf] }
0x12e9   :  { %v9774_v9 = vpop.f32.mrf.mxu1 }
0x12f1   :  { %v9777_v29 = vpop.f32.mrf.mxu1 }
0x12f4   :  { %10210 = vmatmul.bf16.gmra.mxu3 %v14336_v7  ;;  %9816 = vmatmul.bf16.gmra.mxu1 %v14356_v12  ;;  %v15513_v12 = vld [vmem:[#allocation5 + $0xe4] sm:$0xf] }
0x12f9   :  { %v9779_v22 = vpop.f32.mrf.mxu1 }
0x1301   :  { %v9782_v21 = vpop.f32.mrf.mxu1 }
0x1304   :  { %10215 = vmatmul.bf16.gmra.mxu3 %v14344_v19  ;;  %9821 = vmatmul.bf16.gmra.mxu1 %v14364_v14  ;;  %v15515_v14 = vld [vmem:[#allocation5 + $0xf4] sm:$0xf] }
0x1307   :  { %v10176_v59 = vpop.f32.mrf.mxu3 }
0x1308   :  { %v10177_v16 = vadd.f32 %v10176_v59, %v9767_v50  ;;  %v14389_v59 = vld [vmem:[#allocation5 + $0xe8] sm:$0xf0] }
0x1309   :  { %v9784_v41 = vpop.f32.mrf.mxu1 }
0x130a   :  { %14913 = vmatmul.msk.f32.vlgmr.msrb.gmra.mxu0 %vm10610_vm2, %v10177_v16 }
0x130f   :  { %v10178_v40 = vpop.f32.mrf.mxu3 }
0x1310   :  { %v10179_v5 = vadd.f32 %v10178_v40, %v9769_v13  ;;  %v14388_v13 = vor.u32 %v15514_v2, %v14387_v37 }
0x1311   :  { %v9787_v51 = vpop.f32.mrf.mxu1 }
0x1312   :  { %14914 = vmatmul.msk.f32.gmra.mxu0 %vm10610_vm2, %v10179_v5 }
0x1314   :  { %10220 = vmatmul.bf16.gmra.mxu3 %v14352_v24  ;;  %9826 = vmatmul.bf16.gmra.mxu1 %v14372_v45  ;;  %v15517_v45 = vld [vmem:[#allocation5 + $0x104] sm:$0xf] }
0x1317   :  { %v10181_v23 = vpop.f32.mrf.mxu3 }
0x1318   :  { %v10182_v42 = vadd.f32 %v10181_v23, %v9772_v34  ;;  %v15511_v34 = vld [vmem:[#allocation5 + $0xd4] sm:$0xf]  ;;  %v14397_v23 = vld [vmem:[#allocation5 + $0xf8] sm:$0xf0] }
0x1319   :  { %v9789_v20 = vpop.f32.mrf.mxu1  ;;  %v14384_v25 = vor.u32 %v15511_v34, %v14381_v57  ;;  %v15526_v34 = vld [vmem:[#allocation5 + $0x144] sm:$0xf0] }
0x131a   :  { %14915 = vmatmul.msk.f32.gmra.mxu0 %vm10610_vm2, %v10182_v42 }
0x131f   :  { %v10183_v38 = vpop.f32.mrf.mxu3 }
0x1320   :  { %v10184_v4 = vadd.f32 %v10183_v38, %v9774_v9  ;;  %v15516_v9 = vld [vmem:[#allocation5 + $0xf4] sm:$0xf0] }
0x1321   :  { %v9792_v27 = vpop.f32.mrf.mxu1 }
0x1322   :  { %14916 = vmatmul.msk.f32.gmra.mxu0 %vm10610_vm2, %v10184_v4 }
0x1324   :  { %10225 = vmatmul.bf16.gmra.mxu3 %v14360_v62  ;;  %9831 = vmatmul.bf16.gmra.mxu1 %v14380_v32  ;;  %v15519_v32 = vld [vmem:[#allocation5 + $0x114] sm:$0xf] }
0x1327   :  { %v10186_v52 = vpop.f32.mrf.mxu3 }
0x1328   :  { %v10187_v15 = vadd.f32 %v10186_v52, %v9777_v29  ;;  %v14396_v29 = vor.u32 %v15516_v9, %v14395_v30  ;;  %v14405_v52 = vld [vmem:[#allocation5 + $0x108] sm:$0xf0] }
0x1329   :  { %v9794_v6 = vpop.f32.mrf.mxu1 }
0x132a   :  { %14917 = vmatmul.msk.f32.gmra.mxu0 %vm10610_vm2, %v10187_v15 }
0x132f   :  { %v10188_v17 = vpop.f32.mrf.mxu3 }
0x1330   :  { %v10189_v31 = vadd.f32 %v10188_v17, %v9779_v22 }
0x1331   :  { %v9797_v50 = vpop.f32.mrf.mxu1 }
0x1332   :  { %14918 = vmatmul.msk.f32.gmra.mxu0 %vm10610_vm2, %v10189_v31 }
0x1334   :  { %10230 = vmatmul.bf16.gmra.mxu3 %v14368_v18  ;;  %9836 = vmatmul.bf16.gmra.mxu1 %v14388_v13  ;;  %v15521_v13 = vld [vmem:[#allocation5 + $0x124] sm:$0xf] }
0x1337   :  { %v10191_v55 = vpop.f32.mrf.mxu3 }
0x1338   :  { %v10192_v10 = vadd.f32 %v10191_v55, %v9782_v21  ;;  %v14392_v21 = vor.u32 %v15513_v12, %v14389_v59  ;;  %v14413_v55 = vld [vmem:[#allocation5 + $0x118] sm:$0xf0]  ;;  %v15528_v12 = vld [vmem:[#allocation5 + $0x154] sm:$0xf0] }
0x1339   :  { %v9799_v58 = vpop.f32.mrf.mxu1 }
0x133a   :  { %14919 = vmatmul.msk.f32.gmra.mxu0 %vm10610_vm2, %v10192_v10  ;;  %v14427_v10 = vld [vmem:[#allocation5 + $0x130] sm:$0xf] }
0x133b   :  { %v14428_v37 = vor.u32 %v15524_v46, %v14427_v10  ;;  %v14467_v10 = vld [vmem:[#allocation5 + $0x180] sm:$0xf]  ;;  %v15534_v46 = vld [vmem:[#allocation5 + $0x184] sm:$0xf0] }
0x133f   :  { %v10193_v63 = vpop.f32.mrf.mxu3 }
0x1340   :  { %v10194_v26 = vadd.f32 %v10193_v63, %v9784_v41  ;;  %v14416_v63 = vor.u32 %v15519_v32, %v14413_v55  ;;  %v15529_v32 = vld [vmem:[#allocation5 + $0x164] sm:$0xf]  ;;  %v14453_v55 = vld [vmem:[#allocation5 + $0x168] sm:$0xf0] }
0x1341   :  { %v9802_v7 = vpop.f32.mrf.mxu1 }
0x1342   :  { %14920 = vmatmul.msk.f32.gmra.mxu0 %vm10610_vm2, %v10194_v26 }
0x1344   :  { %10235 = vmatmul.bf16.gmra.mxu3 %v14376_v36  ;;  %9841 = vmatmul.bf16.gmra.mxu1 %v14396_v29  ;;  %v15523_v29 = vld [vmem:[#allocation5 + $0x134] sm:$0xf] }
0x1347   :  { %v10196_v43 = vpop.f32.mrf.mxu3 }
0x1348   :  { %v10197_v48 = vadd.f32 %v10196_v43, %v9787_v51  ;;  %v14400_v51 = vor.u32 %v15515_v14, %v14397_v23  ;;  %v14421_v43 = vld [vmem:[#allocation5 + $0x128] sm:$0xf0]  ;;  %v14451_v14 = vld [vmem:[#allocation5 + $0x160] sm:$0xf]  ;;  %v15530_v23 = vld [vmem:[#allocation5 + $0x164] sm:$0xf0] }
0x1349   :  { %v9804_v28 = vpop.f32.mrf.mxu1  ;;  %v14452_v1 = vor.u32 %v15530_v23, %v14451_v14 }
0x134a   :  { %14921 = vmatmul.msk.f32.gmra.mxu0 %vm10610_vm2, %v10197_v48  ;;  %v14435_v48 = vld [vmem:[#allocation5 + $0x140] sm:$0xf] }
0x134b   :  { %v14436_v30 = vor.u32 %v15526_v34, %v14435_v48  ;;  %v15531_v48 = vld [vmem:[#allocation5 + $0x174] sm:$0xf]  ;;  %v14461_v34 = vld [vmem:[#allocation5 + $0x178] sm:$0xf0] }
0x134f   :  { %v10198_v47 = vpop.f32.mrf.mxu3 }
0x1350   :  { %v10199_v53 = vadd.f32 %v10198_v47, %v9789_v20  ;;  %v14424_v47 = vor.u32 %v15521_v13, %v14421_v43  ;;  %v14945_v43 = vld [vmem:[%s20504_s11 + $0x10] sm:$0xff] }
0x1351   :  { %v9807_v16 = vpop.f32.mrf.mxu1 }
0x1352   :  { %14922 = vmatmul.msk.f32.gmra.mxu0 %vm10610_vm2, %v10199_v53 }
0x1354   :  { %10240 = vmatmul.bf16.gmra.mxu3 %v14384_v25  ;;  %9846 = vmatmul.bf16.gmra.mxu1 %v14404_v60  ;;  %v15525_v60 = vld [vmem:[#allocation5 + $0x144] sm:$0xf] }
0x1357   :  { %v10201_v33 = vpop.f32.mrf.mxu3 }
0x1358   :  { %v10202_v19 = vadd.f32 %v10201_v33, %v9792_v27  ;;  %v14408_v27 = vor.u32 %v15517_v45, %v14405_v52  ;;  %v14429_v33 = vld [vmem:[#allocation5 + $0x138] sm:$0xf0]  ;;  %v14459_v52 = vld [vmem:[#allocation5 + $0x170] sm:$0xf] }
0x1359   :  { %v9809_v5 = vpop.f32.mrf.mxu1 }
0x135a   :  { %14923 = vmatmul.msk.f32.gmra.mxu0 %vm10610_vm2, %v10202_v19  ;;  %v14443_v19 = vld [vmem:[#allocation5 + $0x150] sm:$0xf] }
0x135b   :  { %v14444_v44 = vor.u32 %v15528_v12, %v14443_v19 }
0x135f   :  { %v10203_v22 = vpop.f32.mrf.mxu3 }
0x1360   :  { %v10204_v40 = vadd.f32 %v10203_v22, %v9794_v6  ;;  %v14432_v22 = vor.u32 %v15523_v29, %v14429_v33 }
0x1361   :  { %v9812_v42 = vpop.f32.mrf.mxu1 }
0x1362   :  { %14924 = vmatmul.msk.f32.gmra.mxu0 %vm10610_vm2, %v10204_v40 }
0x1364   :  { %10245 = vmatmul.bf16.gmra.mxu3 %v14392_v21  ;;  %9851 = vmatmul.bf16.gmra.mxu1 %v14412_v56 }
0x1367   :  { %v10206_v11 = vpop.f32.mrf.mxu3 }
0x1368   :  { %v10207_v24 = vadd.f32 %v10206_v11, %v9797_v50  ;;  %v14437_v11 = vld [vmem:[#allocation5 + $0x148] sm:$0xf0] }
0x1369   :  { %v9814_v4 = vpop.f32.mrf.mxu1 }
0x136a   :  { %14925 = vmatmul.msk.f32.gmra.mxu0 %vm10610_vm2, %v10207_v24 }
0x136f   :  { %v10208_v41 = vpop.f32.mrf.mxu3 }
0x1370   :  { %v10209_v38 = vadd.f32 %v10208_v41, %v9799_v58 }
0x1371   :  { %v9817_v15 = vpop.f32.mrf.mxu1 }
0x1372   :  { %14926 = vmatmul.msk.f32.gmra.mxu0 %vm10610_vm2, %v10209_v38 }
0x1374   :  { %10250 = vmatmul.bf16.gmra.mxu3 %v14400_v51  ;;  %9856 = vmatmul.bf16.gmra.mxu1 %v14420_v8 }
0x1377   :  { %v10211_v35 = vpop.f32.mrf.mxu3 }
0x1378   :  { %v10212_v62 = vadd.f32 %v10211_v35, %v9802_v7 }
0x1379   :  { %v9819_v18 = vpop.f32.mrf.mxu1 }
0x137a   :  { %14927 = vmatmul.msk.f32.gmra.mxu0 %vm10610_vm2, %v10212_v62  ;;  %v14445_v62 = vld [vmem:[#allocation5 + $0x158] sm:$0xf0] }
0x137f   :  { %v10213_v20 = vpop.f32.mrf.mxu3 }
0x1380   :  { %v10214_v17 = vadd.f32 %v10213_v20, %v9804_v28  ;;  %v15532_v20 = vld [vmem:[#allocation5 + $0x174] sm:$0xf0] }
0x1381   :  { %v9822_v50 = vpop.f32.mrf.mxu1 }
0x1382   :  { %14928 = vmatmul.msk.f32.gmra.mxu0 %vm10610_vm2, %v10214_v17  ;;  %v14460_v17 = vor.u32 %v15532_v20, %v14459_v52 }
0x1384   :  { %10255 = vmatmul.bf16.gmra.mxu3 %v14408_v27  ;;  %9861 = vmatmul.bf16.gmra.mxu1 %v14428_v37  ;;  %v14468_v37 = vor.u32 %v15534_v46, %v14467_v10 }
0x1387   :  { %v10216_v39 = vpop.f32.mrf.mxu3 }
0x1388   :  { %v10217_v31 = vadd.f32 %v10216_v39, %v9807_v16 }
0x1389   :  { %v9824_v36 = vpop.f32.mrf.mxu1 }
0x138a   :  { %14929 = vmatmul.msk.f32.gmra.mxu0 %vm10610_vm2, %v10217_v31 }
0x138f   :  { %v10218_v6 = vpop.f32.mrf.mxu3 }
0x1390   :  { %v10219_v49 = vadd.f32 %v10218_v6, %v9809_v5  ;;  %v19826_v5 = vpop.f32.mrf.mxu0 }
0x1391   :  { %v9827_v7 = vpop.f32.mrf.mxu1 }
0x1392   :  { %14930 = vmatmul.msk.f32.gmra.mxu0 %vm10610_vm2, %v10219_v49 }
0x1394   :  { %10260 = vmatmul.bf16.gmra.mxu3 %v14416_v63  ;;  %9866 = vmatmul.bf16.gmra.mxu1 %v14436_v30  ;;  %v14456_v63 = vor.u32 %v15529_v32, %v14453_v55 }
0x1397   :  { %v10221_v2 = vpop.f32.mrf.mxu3 }
0x1398   :  { %v10222_v26 = vadd.f32 %v10221_v2, %v9812_v42  ;;  %v14440_v42 = vor.u32 %v15525_v60, %v14437_v11  ;;  %v19829_v51 = vpop.f32.mrf.mxu0 }
0x1399   :  { %v9829_v25 = vpop.f32.mrf.mxu1 }
0x139a   :  { %14931 = vmatmul.msk.f32.gmra.mxu0 %vm10610_vm2, %v10222_v26  ;;  %v14946_v26 = vld [vmem:[%s20504_s11 + $0x18] sm:$0xff] }
0x139b   :  { %11125 = vmatpush.msrb.mxu2 %v14946_v26  ;;  %v15544_v26 = vld [vmem:[#allocation5 + $0x1d4] sm:$0xf0] }
0x139d   :  { %11126 = vmatpush.msrb.mxu2 %v14945_v43 }
0x139f   :  { %v10223_v58 = vpop.f32.mrf.mxu3 }
0x13a0   :  { %v10224_v57 = vadd.f32 %v10223_v58, %v9814_v4  ;;  %v15527_v4 = vld [vmem:[#allocation5 + $0x154] sm:$0xf]  ;;  %v19832_v27 = vpop.f32.mrf.mxu0 }
0x13a1   :  { %v9832_v16 = vpop.f32.mrf.mxu1  ;;  %v14448_v3 = vor.u32 %v15527_v4, %v14445_v62 }
0x13a2   :  { %14932 = vmatmul.msk.f32.gmra.mxu0 %vm10610_vm2, %v10224_v57 }
0x13a4   :  { %10265 = vmatmul.bf16.gmra.mxu3 %v14424_v47  ;;  %9871 = vmatmul.bf16.gmra.mxu1 %v14444_v44  ;;  %v14475_v47 = vld [vmem:[#allocation5 + $0x190] sm:$0xf]  ;;  %v14483_v44 = vld [vmem:[#allocation5 + $0x1a0] sm:$0xf] }
0x13a7   :  { %v10226_v9 = vpop.f32.mrf.mxu3 }
0x13a8   :  { %v10227_v53 = vadd.f32 %v10226_v9, %v9817_v15 }
0x13a9   :  { %v9834_v21 = vpop.f32.mrf.mxu1 }
0x13aa   :  { %14933 = vmatmul.msk.f32.gmra.mxu0 %vm10610_vm2, %v10227_v53  ;;  %v14464_v53 = vor.u32 %v15531_v48, %v14461_v34 }
0x13af   :  { %v10228_v28 = vpop.f32.mrf.mxu3 }
0x13b0   :  { %v10229_v59 = vadd.f32 %v10228_v28, %v9819_v18  ;;  %v19836_v18 = vpop.f32.mrf.mxu0 }
0x13b1   :  { %v9837_v61 = vpop.f32.mrf.mxu1 }
0x13b2   :  { %14934 = vmatmul.msk.f32.gmra.mxu0 %vm10610_vm2, %v10229_v59  ;;  %v15533_v59 = vld [vmem:[#allocation5 + $0x184] sm:$0xf] }
0x13b4   :  { %10270 = vmatmul.bf16.gmra.mxu3 %v14432_v22  ;;  %9876 = vmatmul.bf16.gmra.mxu1 %v14452_v1  ;;  %v14469_v22 = vld [vmem:[#allocation5 + $0x188] sm:$0xf0]  ;;  %v14491_v1 = vld [vmem:[#allocation5 + $0x1b0] sm:$0xf] }
0x13b7   :  { %v10231_v0 = vpop.f32.mrf.mxu3 }
0x13b8   :  { %v10232_v40 = vadd.f32 %v10231_v0, %v9822_v50  ;;  %v19839_v2 = vpop.f32.mrf.mxu0  ;;  %v15538_v0 = vld [vmem:[#allocation5 + $0x1a4] sm:$0xf0] }
0x13b9   :  { %v9839_v35 = vpop.f32.mrf.mxu1  ;;  %v14484_v11 = vor.u32 %v15538_v0, %v14483_v44  ;;  %v15543_v44 = vld [vmem:[#allocation5 + $0x1d4] sm:$0xf]  ;;  %v14509_v0 = vld [vmem:[#allocation5 + $0x1d8] sm:$0xf0] }
0x13ba   :  { %14935 = vmatmul.msk.f32.gmra.mxu0 %vm10610_vm2, %v10232_v40 }
0x13bf   :  { %v10233_v24 = vpop.f32.mrf.mxu3 }
0x13c0   :  { %v10234_v41 = vadd.f32 %v10233_v24, %v9824_v36  ;;  %v19848_v30 = vpop.f32.mrf.mxu0 }
0x13c1   :  { %v9842_v54 = vpop.f32.mrf.mxu1 }
0x13c2   :  { %14936 = vmatmul.msk.f32.gmra.mxu0 %vm10610_vm2, %v10234_v41  ;;  %v15535_v41 = vld [vmem:[#allocation5 + $0x194] sm:$0xf] }
0x13c4   :  { %10275 = vmatmul.bf16.gmra.mxu3 %v14440_v42  ;;  %9881 = vmatmul.bf16.gmra.mxu1 %v14460_v17  ;;  %v14477_v42 = vld [vmem:[#allocation5 + $0x198] sm:$0xf0]  ;;  %v14499_v17 = vld [vmem:[#allocation5 + $0x1c0] sm:$0xf] }
0x13c7   :  { %v10236_v38 = vpop.f32.mrf.mxu3 }
0x13c8   :  { %v10237_v56 = vadd.f32 %v10236_v38, %v9827_v7  ;;  %v15536_v7 = vld [vmem:[#allocation5 + $0x194] sm:$0xf0]  ;;  %v19851_v12 = vpop.f32.mrf.mxu0 }
0x13c9   :  { %v9844_v31 = vpop.f32.mrf.mxu1  ;;  %v14476_v29 = vor.u32 %v15536_v7, %v14475_v47  ;;  %v15540_v38 = vld [vmem:[#allocation5 + $0x1b4] sm:$0xf0]  ;;  %v15541_v47 = vld [vmem:[#allocation5 + $0x1c4] sm:$0xf]  ;;  %v14501_v7 = vld [vmem:[#allocation5 + $0x1c8] sm:$0xf0] }
0x13ca   :  { %14937 = vmatmul.msk.f32.gmra.mxu0 %vm10610_vm2, %v10237_v56  ;;  %v14492_v62 = vor.u32 %v15540_v38, %v14491_v1  ;;  %v15545_v1 = vld [vmem:[#allocation5 + $0x1e4] sm:$0xf]  ;;  %v14517_v38 = vld [vmem:[#allocation5 + $0x1e8] sm:$0xf0] }
0x13cf   :  { %v10238_v45 = vpop.f32.mrf.mxu3 }
0x13d0   :  { %v10239_v15 = vadd.f32 %v10238_v45, %v9829_v25 }
0x13d1   :  { %v9847_v50 = vpop.f32.mrf.mxu1 }
0x13d2   :  { %14938 = vmatmul.msk.f32.gmra.mxu0 %vm10610_vm2, %v10239_v15  ;;  %v15537_v15 = vld [vmem:[#allocation5 + $0x1a4] sm:$0xf] }
0x13d4   :  { %10280 = vmatmul.bf16.gmra.mxu3 %v14448_v3  ;;  %9886 = vmatmul.bf16.gmra.mxu1 %v14468_v37  ;;  %v14485_v3 = vld [vmem:[#allocation5 + $0x1a8] sm:$0xf0]  ;;  %v14507_v37 = vld [vmem:[#allocation5 + $0x1d0] sm:$0xf] }
0x13d7   :  { %v10241_v8 = vpop.f32.mrf.mxu3 }
0x13d8   :  { %v10242_v39 = vadd.f32 %v10241_v8, %v9832_v16  ;;  %v15542_v8 = vld [vmem:[#allocation5 + $0x1c4] sm:$0xf0] }
0x13d9   :  { %v9849_v58 = vpop.f32.mrf.mxu1  ;;  %v14500_v55 = vor.u32 %v15542_v8, %v14499_v17  ;;  %v15547_v17 = vld [vmem:[#allocation5 + $0x1f4] sm:$0xf]  ;;  %v14525_v8 = vld [vmem:[#allocation5 + $0x1f8] sm:$0xf0] }
0x13da   :  { %14939 = vmatmul.msk.f32.gmra.mxu0 %vm10610_vm2, %v10242_v39 }
0x13df   :  { %v10243_v6 = vpop.f32.mrf.mxu3 }
0x13e0   :  { %v10244_v49 = vadd.f32 %v10243_v6, %v9834_v21  ;;  %v14472_v21 = vor.u32 %v15533_v59, %v14469_v22 }
0x13e1   :  { %v9852_v25 = vpop.f32.mrf.mxu1 }
0x13e2   :  { %14940 = vmatmul.msk.f32.gmra.mxu0 %vm10610_vm2, %v10244_v49  ;;  %v15539_v49 = vld [vmem:[#allocation5 + $0x1b4] sm:$0xf] }
0x13e4   :  { %10285 = vmatmul.bf16.gmra.mxu3 %v14456_v63  ;;  %9891 = vmatmul.bf16.gmra.mxu1 %v14476_v29  ;;  %v14493_v63 = vld [vmem:[#allocation5 + $0x1b8] sm:$0xf0] }
0x13e7   :  { %v10246_v36 = vpop.f32.mrf.mxu3 }
0x13e8   :  { %v10247_v13 = vadd.f32 %v10246_v36, %v9837_v61 }
0x13e9   :  { %v9854_v19 = vpop.f32.mrf.mxu1 }
0x13ea   :  { %14941 = vmatmul.msk.f32.gmra.mxu0 %vm10610_vm2, %v10247_v13  ;;  %v14496_v13 = vor.u32 %v15539_v49, %v14493_v63 }
0x13ef   :  { %v10248_v57 = vpop.f32.mrf.mxu3 }
0x13f0   :  { %v10249_v9 = vadd.f32 %v10248_v57, %v9839_v35  ;;  %v14480_v35 = vor.u32 %v15535_v41, %v14477_v42 }
0x13f1   :  { %v9857_v60 = vpop.f32.mrf.mxu1 }
0x13f2   :  { %14942 = vmatmul.msk.f32.gmra.mxu0 %vm10610_vm2, %v10249_v9 }
0x13f4   :  { %10290 = vmatmul.bf16.gmra.mxu3 %v14464_v53  ;;  %9896 = vmatmul.bf16.gmra.mxu1 %v14484_v11  ;;  %v14515_v53 = vld [vmem:[#allocation5 + $0x1e0] sm:$0xf] }
0x13f7   :  { %v10251_v33 = vpop.f32.mrf.mxu3 }
0x13f8   :  { %v10252_v28 = vadd.f32 %v10251_v33, %v9842_v54  ;;  %v14504_v33 = vor.u32 %v15541_v47, %v14501_v7 }
0x13f9   :  { %v9859_v23 = vpop.f32.mrf.mxu1 }
0x13fa   :  { %14943 = vmatmul.msk.f32.gmra.mxu0 %vm10610_vm2, %v10252_v28 }
0x13ff   :  { %v10253_v16 = vpop.f32.mrf.mxu3 }
0x1400   :  { %v10254_v40 = vadd.f32 %v10253_v16, %v9844_v31  ;;  %v14488_v31 = vor.u32 %v15537_v15, %v14485_v3 }
0x1401   :  { %v9862_v4 = vpop.f32.mrf.mxu1 }
0x1402   :  { %14944 = vmatmul.msk.f32.vlgmr.msra.gmra.mxu2 %vm10610_vm2, %v10254_v40 }
0x1404   :  { %10295 = vmatmul.bf16.gmra.mxu3 %v14472_v21  ;;  %9901 = vmatmul.bf16.gmra.mxu1 %v14492_v62  ;;  %v14523_v21 = vld [vmem:[#allocation5 + $0x1f0] sm:$0xf] }
0x1407   :  { %v10256_v24 = vpop.f32.mrf.mxu3 }
0x1408   :  { %v10257_v14 = vadd.f32 %v10256_v24, %v9847_v50  ;;  %v14512_v24 = vor.u32 %v15543_v44, %v14509_v0 }
0x1409   :  { %v9864_v20 = vpop.f32.mrf.mxu1 }
0x140a   :  { %14947 = vmatmul.msk.f32.vlgmr.msrb.gmra.mxu2 %vm10610_vm2, %v10257_v14 }
0x140f   :  { %v10258_v61 = vpop.f32.mrf.mxu3 }
0x1410   :  { %v10259_v56 = vadd.f32 %v10258_v61, %v9849_v58  ;;  %v14508_v58 = vor.u32 %v15544_v26, %v14507_v37  ;;  %v15549_v37 = vld [vmem:[#allocation5 + $0x204] sm:$0xf]  ;;  %v14533_v26 = vld [vmem:[#allocation5 + $0x208] sm:$0xf0] }
0x1411   :  { %v9867_v32 = vpop.f32.mrf.mxu1 }
0x1412   :  { %14948 = vmatmul.msk.f32.gmra.mxu2 %vm10610_vm2, %v10259_v56 }
0x1414   :  { %10300 = vmatmul.bf16.gmra.mxu3 %v14480_v35  ;;  %9906 = vmatmul.bf16.gmra.mxu1 %v14500_v55  ;;  %v14531_v35 = vld [vmem:[#allocation5 + $0x200] sm:$0xf] }
0x1417   :  { %v10261_v45 = vpop.f32.mrf.mxu3 }
0x1418   :  { %v10262_v52 = vadd.f32 %v10261_v45, %v9852_v25  ;;  %v15546_v25 = vld [vmem:[#allocation5 + $0x1e4] sm:$0xf0]  ;;  %v14520_v45 = vor.u32 %v15545_v1, %v14517_v38 }
0x1419   :  { %v9869_v46 = vpop.f32.mrf.mxu1 }
0x141a   :  { %14949 = vmatmul.msk.f32.gmra.mxu2 %vm10610_vm2, %v10262_v52 }
0x141f   :  { %v10263_v54 = vpop.f32.mrf.mxu3 }
0x1420   :  { %v10264_v39 = vadd.f32 %v10263_v54, %v9854_v19  ;;  %v14516_v19 = vor.u32 %v15546_v25, %v14515_v53  ;;  %v15551_v53 = vld [vmem:[#allocation5 + $0x214] sm:$0xf]  ;;  %v14541_v25 = vld [vmem:[#allocation5 + $0x218] sm:$0xf0] }
0x1421   :  { %v9872_v43 = vpop.f32.mrf.mxu1 }
0x1422   :  { %14950 = vmatmul.msk.f32.gmra.mxu2 %vm10610_vm2, %v10264_v39 }
0x1424   :  { %10305 = vmatmul.bf16.gmra.mxu3 %v14488_v31  ;;  %9911 = vmatmul.bf16.gmra.mxu1 %v14508_v58  ;;  %v14539_v31 = vld [vmem:[#allocation5 + $0x210] sm:$0xf] }
0x1427   :  { %v10266_v6 = vpop.f32.mrf.mxu3 }
0x1428   :  { %v10267_v10 = vadd.f32 %v10266_v6, %v9857_v60  ;;  %v15548_v60 = vld [vmem:[#allocation5 + $0x1f4] sm:$0xf0]  ;;  %v14528_v6 = vor.u32 %v15547_v17, %v14525_v8 }
0x1429   :  { %v9874_v57 = vpop.f32.mrf.mxu1 }
0x142a   :  { %14951 = vmatmul.msk.f32.gmra.mxu2 %vm10610_vm2, %v10267_v10 }
0x142f   :  { %v10268_v50 = vpop.f32.mrf.mxu3 }
0x1430   :  { %v10269_v36 = vadd.f32 %v10268_v50, %v9859_v23  ;;  %v14524_v23 = vor.u32 %v15548_v60, %v14523_v21  ;;  %v15553_v21 = vld [vmem:[#allocation5 + $0x224] sm:$0xf]  ;;  %v14549_v60 = vld [vmem:[#allocation5 + $0x228] sm:$0xf0] }
0x1431   :  { %v9877_v28 = vpop.f32.mrf.mxu1 }
0x1432   :  { %14952 = vmatmul.msk.f32.gmra.mxu2 %vm10610_vm2, %v10269_v36 }
0x1434   :  { %10310 = vmatmul.bf16.gmra.mxu3 %v14496_v13  ;;  %9916 = vmatmul.bf16.gmra.mxu1 %v14516_v19  ;;  %v14547_v13 = vld [vmem:[#allocation5 + $0x220] sm:$0xf] }
0x1437   :  { %v10271_v48 = vpop.f32.mrf.mxu3 }
0x1438   :  { %v10272_v34 = vadd.f32 %v10271_v48, %v9862_v4  ;;  %v15550_v4 = vld [vmem:[#allocation5 + $0x204] sm:$0xf0]  ;;  %v14536_v48 = vor.u32 %v15549_v37, %v14533_v26 }
0x1439   :  { %v9879_v16 = vpop.f32.mrf.mxu1 }
0x143a   :  { %14953 = vmatmul.msk.f32.gmra.mxu2 %vm10610_vm2, %v10272_v34 }
0x143f   :  { %v10273_v9 = vpop.f32.mrf.mxu3 }
0x1440   :  { %v10274_v29 = vadd.f32 %v10273_v9, %v9864_v20  ;;  %v14532_v20 = vor.u32 %v15550_v4, %v14531_v35  ;;  %v15555_v35 = vld [vmem:[#allocation5 + $0x234] sm:$0xf]  ;;  %v14557_v4 = vld [vmem:[#allocation5 + $0x238] sm:$0xf0] }
0x1441   :  { %v9882_v14 = vpop.f32.mrf.mxu1 }
0x1442   :  { %14954 = vmatmul.msk.f32.gmra.mxu2 %vm10610_vm2, %v10274_v29 }
0x1444   :  { %10315 = vmatmul.bf16.gmra.mxu3 %v14504_v33  ;;  %9921 = vmatmul.bf16.gmra.mxu1 %v14524_v23  ;;  %v14555_v33 = vld [vmem:[#allocation5 + $0x230] sm:$0xf] }
0x1447   :  { %v10276_v59 = vpop.f32.mrf.mxu3 }
0x1448   :  { %v10277_v22 = vadd.f32 %v10276_v59, %v9867_v32  ;;  %v15552_v32 = vld [vmem:[#allocation5 + $0x214] sm:$0xf0]  ;;  %v14544_v59 = vor.u32 %v15551_v53, %v14541_v25 }
0x1449   :  { %v9884_v61 = vpop.f32.mrf.mxu1 }
0x144a   :  { %14955 = vmatmul.msk.f32.gmra.mxu2 %vm10610_vm2, %v10277_v22 }
0x144f   :  { %v10278_v40 = vpop.f32.mrf.mxu3 }
0x1450   :  { %v10279_v11 = vadd.f32 %v10278_v40, %v9869_v46  ;;  %v14540_v46 = vor.u32 %v15552_v32, %v14539_v31 }
0x1451   :  { %v9887_v52 = vpop.f32.mrf.mxu1 }
0x1452   :  { %14956 = vmatmul.msk.f32.gmra.mxu2 %vm10610_vm2, %v10279_v11 }
0x1454   :  { %10320 = vmatmul.bf16.gmra.mxu3 %v14512_v24  ;;  %9926 = vmatmul.bf16.gmra.mxu1 %v14532_v20  ;;  %v14563_v24 = vld [vmem:[#allocation5 + $0x240] sm:$0xf] }
0x1457   :  { %v10281_v41 = vpop.f32.mrf.mxu3 }
0x1458   :  { %v10282_v42 = vadd.f32 %v10281_v41, %v9872_v43  ;;  %v15554_v43 = vld [vmem:[#allocation5 + $0x224] sm:$0xf0]  ;;  %v14552_v41 = vor.u32 %v15553_v21, %v14549_v60  ;;  %v14595_v60 = vld [vmem:[#allocation5 + $0x280] sm:$0xf] }
0x1459   :  { %v9889_v54 = vpop.f32.mrf.mxu1 }
0x145a   :  { %14957 = vmatmul.msk.f32.gmra.mxu2 %vm10610_vm2, %v10282_v42 }
0x145f   :  { %v10283_v56 = vpop.f32.mrf.mxu3 }
0x1460   :  { %v10284_v62 = vadd.f32 %v10283_v56, %v9874_v57  ;;  %v14548_v57 = vor.u32 %v15554_v43, %v14547_v13 }
0x1461   :  { %v9892_v10 = vpop.f32.mrf.mxu1 }
0x1462   :  { %14958 = vmatmul.msk.f32.gmra.mxu2 %vm10610_vm2, %v10284_v62 }
0x1464   :  { %10325 = vmatmul.bf16.gmra.mxu3 %v14520_v45  ;;  %9931 = vmatmul.bf16.gmra.mxu1 %v14540_v46  ;;  %v14571_v45 = vld [vmem:[#allocation5 + $0x250] sm:$0xf]  ;;  %v14579_v46 = vld [vmem:[#allocation5 + $0x260] sm:$0xf] }
0x1467   :  { %v10286_v15 = vpop.f32.mrf.mxu3 }
0x1468   :  { %v10287_v3 = vadd.f32 %v10286_v15, %v9877_v28  ;;  %v15556_v28 = vld [vmem:[#allocation5 + $0x234] sm:$0xf0]  ;;  %v14560_v15 = vor.u32 %v15555_v35, %v14557_v4  ;;  %v14979_v35 = vld [vmem:[%s20504_s11 + $0x20] sm:$0xff] }
0x1469   :  { %v9894_v50 = vpop.f32.mrf.mxu1 }
0x146a   :  { %14959 = vmatmul.msk.f32.gmra.mxu2 %vm10610_vm2, %v10287_v3 }
0x146f   :  { %v10288_v39 = vpop.f32.mrf.mxu3 }
0x1470   :  { %v10289_v55 = vadd.f32 %v10288_v39, %v9879_v16  ;;  %v14556_v16 = vor.u32 %v15556_v28, %v14555_v33 }
0x1471   :  { %v9897_v34 = vpop.f32.mrf.mxu1 }
0x1472   :  { %14960 = vmatmul.msk.f32.gmra.mxu2 %vm10610_vm2, %v10289_v55  ;;  %v15557_v55 = vld [vmem:[#allocation5 + $0x244] sm:$0xf] }
0x1474   :  { %10330 = vmatmul.bf16.gmra.mxu3 %v14528_v6  ;;  %9936 = vmatmul.bf16.gmra.mxu1 %v14548_v57  ;;  %v14565_v6 = vld [vmem:[#allocation5 + $0x248] sm:$0xf0]  ;;  %v19886_v57 = vpop.f32.mrf.mxu0 }
0x1477   :  { %v10291_v49 = vpop.f32.mrf.mxu3 }
0x1478   :  { %v10292_v63 = vadd.f32 %v10291_v49, %v9882_v14  ;;  %v15558_v14 = vld [vmem:[#allocation5 + $0x244] sm:$0xf0] }
0x1479   :  { %v9899_v9 = vpop.f32.mrf.mxu1  ;;  %v15562_v49 = vld [vmem:[#allocation5 + $0x264] sm:$0xf0] }
0x147a   :  { %14961 = vmatmul.msk.f32.gmra.mxu2 %vm10610_vm2, %v10292_v63  ;;  %v14580_v26 = vor.u32 %v15562_v49, %v14579_v46 }
0x147f   :  { %v10293_v36 = vpop.f32.mrf.mxu3 }
0x1480   :  { %v10294_v58 = vadd.f32 %v10293_v36, %v9884_v61  ;;  %v14564_v61 = vor.u32 %v15558_v14, %v14563_v24 }
0x1481   :  { %v9902_v22 = vpop.f32.mrf.mxu1 }
0x1482   :  { %14962 = vmatmul.msk.f32.gmra.mxu2 %vm10610_vm2, %v10294_v58 }
0x1484   :  { %10335 = vmatmul.bf16.gmra.mxu3 %v14536_v48  ;;  %9941 = vmatmul.bf16.gmra.mxu1 %v14556_v16  ;;  %v15559_v48 = vld [vmem:[#allocation5 + $0x254] sm:$0xf] }
0x1485   :  { %v19876_v17 = vpop.f32.mrf.mxu2 }
0x1486   :  { %20861 = vst [vmem:[#allocation52_spill] sm:$0xff] %v19876_v17  ;;  %v15591_v17 = vld [vmem:[#allocation5 + $0x354] sm:$0xf] }
0x1487   :  { %v10296_v47 = vpop.f32.mrf.mxu3 }
0x1488   :  { %v10297_v7 = vadd.f32 %v10296_v47, %v9887_v52  ;;  %v15560_v52 = vld [vmem:[#allocation5 + $0x254] sm:$0xf0] }
0x1489   :  { %v9904_v40 = vpop.f32.mrf.mxu1 }
0x148a   :  { %14963 = vmatmul.msk.f32.gmra.mxu2 %vm10610_vm2, %v10297_v7  ;;  %v14587_v7 = vld [vmem:[#allocation5 + $0x270] sm:$0xf] }
0x148d   :  { %v19880_v32 = vpop.f32.mrf.mxu2 }
0x148f   :  { %v10298_v29 = vpop.f32.mrf.mxu3 }
0x1490   :  { %v10299_v19 = vadd.f32 %v10298_v29, %v9889_v54  ;;  %v14572_v54 = vor.u32 %v15560_v52, %v14571_v45  ;;  %v15563_v45 = vld [vmem:[#allocation5 + $0x274] sm:$0xf]  ;;  %v14589_v52 = vld [vmem:[#allocation5 + $0x278] sm:$0xf0] }
0x1491   :  { %v9907_v42 = vpop.f32.mrf.mxu1 }
0x1492   :  { %14964 = vmatmul.msk.f32.gmra.mxu2 %vm10610_vm2, %v10299_v19 }
0x1494   :  { %10340 = vmatmul.bf16.gmra.mxu3 %v14544_v59  ;;  %9946 = vmatmul.bf16.gmra.mxu1 %v14564_v61  ;;  %v19891_v59 = vpop.f32.mrf.mxu0 }
0x1495   :  { %v19883_v36 = vpop.f32.mrf.mxu2 }
0x1497   :  { %v10301_v44 = vpop.f32.mrf.mxu3 }
0x1498   :  { %v10302_v0 = vadd.f32 %v10301_v44, %v9892_v10 }
0x1499   :  { %v9909_v56 = vpop.f32.mrf.mxu1 }
0x149a   :  { %14965 = vmatmul.msk.f32.gmra.mxu2 %vm10610_vm2, %v10302_v0  ;;  %v15561_v0 = vld [vmem:[#allocation5 + $0x264] sm:$0xf] }
0x149d   :  { %v19888_v53 = vpop.f32.mrf.mxu2 }
0x149f   :  { %v10303_v11 = vpop.f32.mrf.mxu3 }
0x14a0   :  { %v10304_v23 = vadd.f32 %v10303_v11, %v9894_v50  ;;  %v14568_v50 = vor.u32 %v15557_v55, %v14565_v6  ;;  %v15566_v11 = vld [vmem:[#allocation5 + $0x284] sm:$0xf0] }
0x14a1   :  { %v9912_v3 = vpop.f32.mrf.mxu1 }
0x14a2   :  { %14966 = vmatmul.msk.f32.gmra.mxu2 %vm10610_vm2, %v10304_v23 }
0x14a4   :  { %10345 = vmatmul.bf16.gmra.mxu3 %v14552_v41  ;;  %9951 = vmatmul.bf16.gmra.mxu1 %v14572_v54  ;;  %v14596_v41 = vor.u32 %v15566_v11, %v14595_v60  ;;  %v15568_v54 = vld [vmem:[#allocation5 + $0x294] sm:$0xf0] }
0x14a5   :  { %v19893_v44 = vpop.f32.mrf.mxu2 }
0x14a7   :  { %v10306_v1 = vpop.f32.mrf.mxu3 }
0x14a8   :  { %v10307_v38 = vadd.f32 %v10306_v1, %v9897_v34  ;;  %v14573_v34 = vld [vmem:[#allocation5 + $0x258] sm:$0xf0]  ;;  %v14980_v1 = vld [vmem:[%s20504_s11 + $0x28] sm:$0xff] }
0x14a9   :  { %v9914_v31 = vpop.f32.mrf.mxu1  ;;  %v14576_v29 = vor.u32 %v15559_v48, %v14573_v34  ;;  %11369 = vmatpush.msra.mxu0 %v14980_v1 }
0x14aa   :  { %14967 = vmatmul.msk.f32.gmra.mxu2 %vm10610_vm2, %v10307_v38 }
0x14ab   :  { %11370 = vmatpush.msra.mxu0 %v14979_v35 }
0x14ad   :  { %v19899_v61 = vpop.f32.mrf.mxu2 }
0x14af   :  { %v10308_v62 = vpop.f32.mrf.mxu3 }
0x14b0   :  { %v10309_v20 = vadd.f32 %v10308_v62, %v9899_v9  ;;  %v15564_v9 = vld [vmem:[#allocation5 + $0x274] sm:$0xf0] }
0x14b1   :  { %v9917_v37 = vpop.f32.mrf.mxu1  ;;  %v14588_v28 = vor.u32 %v15564_v9, %v14587_v7 }
0x14b2   :  { %14968 = vmatmul.msk.f32.gmra.mxu2 %vm10610_vm2, %v10309_v20 }
0x14b4   :  { %10350 = vmatmul.bf16.gmra.mxu3 %v14560_v15  ;;  %9956 = vmatmul.bf16.gmra.mxu1 %v14580_v26 }
0x14b5   :  { %v19910_v20 = vpop.f32.mrf.mxu2 }
0x14b7   :  { %v10311_v8 = vpop.f32.mrf.mxu3 }
0x14b8   :  { %v10312_v39 = vadd.f32 %v10311_v8, %v9902_v22 }
0x14b9   :  { %v9919_v58 = vpop.f32.mrf.mxu1 }
0x14ba   :  { %14969 = vmatmul.msk.f32.gmra.mxu2 %vm10610_vm2, %v10312_v39  ;;  %v14592_v39 = vor.u32 %v15563_v45, %v14589_v52  ;;  %v15574_v52 = vld [vmem:[#allocation5 + $0x2c4] sm:$0xf0] }
0x14bd   :  { %v19915_v46 = vpop.f32.mrf.mxu2 }
0x14bf   :  { %v10313_v10 = vpop.f32.mrf.mxu3 }
0x14c0   :  { %v10314_v63 = vadd.f32 %v10313_v10, %v9904_v40  ;;  %v14581_v40 = vld [vmem:[#allocation5 + $0x268] sm:$0xf0] }
0x14c1   :  { %v9922_v33 = vpop.f32.mrf.mxu1  ;;  %v14584_v14 = vor.u32 %v15561_v0, %v14581_v40  ;;  %v15572_v40 = vld [vmem:[#allocation5 + $0x2b4] sm:$0xf0] }
0x14c2   :  { %14970 = vmatmul.msk.f32.gmra.mxu2 %vm10610_vm2, %v10314_v63 }
0x14c4   :  { %10355 = vmatmul.bf16.gmra.mxu3 %v14568_v50  ;;  %9961 = vmatmul.bf16.gmra.mxu1 %v14588_v28  ;;  %v15565_v50 = vld [vmem:[#allocation5 + $0x284] sm:$0xf] }
0x14c5   :  { %v19920_v9 = vpop.f32.mrf.mxu2 }
0x14c7   :  { %v10316_v13 = vpop.f32.mrf.mxu3 }
0x14c8   :  { %v10317_v43 = vadd.f32 %v10316_v13, %v9907_v42  ;;  %v19896_v42 = vpop.f32.mrf.mxu0  ;;  %v14611_v13 = vld [vmem:[#allocation5 + $0x2a0] sm:$0xf] }
0x14c9   :  { %v9924_v16 = vpop.f32.mrf.mxu1 }
0x14ca   :  { %14971 = vmatmul.msk.f32.gmra.mxu2 %vm10610_vm2, %v10317_v43  ;;  %v15570_v43 = vld [vmem:[#allocation5 + $0x2a4] sm:$0xf0] }
0x14cb   :  { %v14612_v7 = vor.u32 %v15570_v43, %v14611_v13  ;;  %v15576_v13 = vld [vmem:[#allocation5 + $0x2d4] sm:$0xf0] }
0x14cf   :  { %v10318_v47 = vpop.f32.mrf.mxu3 }
0x14d0   :  { %v10319_v25 = vadd.f32 %v10318_v47, %v9909_v56  ;;  %v19908_v62 = vpop.f32.mrf.mxu0 }
0x14d1   :  { %v9927_v23 = vpop.f32.mrf.mxu1 }
0x14d2   :  { %14972 = vmatmul.msk.f32.gmra.mxu2 %vm10610_vm2, %v10319_v25 }
0x14d4   :  { %10360 = vmatmul.bf16.gmra.mxu3 %v14576_v29  ;;  %9966 = vmatmul.bf16.gmra.mxu1 %v14596_v41 }
0x14d7   :  { %v10321_v19 = vpop.f32.mrf.mxu3 }
0x14d8   :  { %v10322_v22 = vadd.f32 %v10321_v19, %v9912_v3  ;;  %v14603_v3 = vld [vmem:[#allocation5 + $0x290] sm:$0xf]  ;;  %v19913_v6 = vpop.f32.mrf.mxu0  ;;  %v15567_v19 = vld [vmem:[#allocation5 + $0x294] sm:$0xf] }
0x14d9   :  { %v9929_v4 = vpop.f32.mrf.mxu1  ;;  %v14604_v55 = vor.u32 %v15568_v54, %v14603_v3 }
0x14da   :  { %14973 = vmatmul.msk.f32.gmra.mxu2 %vm10610_vm2, %v10322_v22  ;;  %v14605_v22 = vld [vmem:[#allocation5 + $0x298] sm:$0xf0] }
0x14db   :  { %v14608_v60 = vor.u32 %v15567_v19, %v14605_v22  ;;  %v15573_v22 = vld [vmem:[#allocation5 + $0x2c4] sm:$0xf] }
0x14df   :  { %v10323_v21 = vpop.f32.mrf.mxu3 }
0x14e0   :  { %v10324_v24 = vadd.f32 %v10323_v21, %v9914_v31 }
0x14e1   :  { %v9932_v31 = vpop.f32.mrf.mxu1 }
0x14e2   :  { %14974 = vmatmul.msk.f32.gmra.mxu2 %vm10610_vm2, %v10324_v24 }
0x14e4   :  { %10365 = vmatmul.bf16.gmra.mxu3 %v14584_v14  ;;  %9971 = vmatmul.bf16.gmra.mxu1 %v14604_v55 }
0x14e7   :  { %v10326_v38 = vpop.f32.mrf.mxu3 }
0x14e8   :  { %v10327_v56 = vadd.f32 %v10326_v38, %v9917_v37  ;;  %v14597_v37 = vld [vmem:[#allocation5 + $0x288] sm:$0xf0]  ;;  %v15569_v38 = vld [vmem:[#allocation5 + $0x2a4] sm:$0xf] }
0x14e9   :  { %v9934_v63 = vpop.f32.mrf.mxu1  ;;  %v14600_v34 = vor.u32 %v15565_v50, %v14597_v37  ;;  %v14621_v50 = vld [vmem:[#allocation5 + $0x2b8] sm:$0xf0] }
0x14ea   :  { %14975 = vmatmul.msk.f32.gmra.mxu2 %vm10610_vm2, %v10327_v56  ;;  %v14613_v56 = vld [vmem:[#allocation5 + $0x2a8] sm:$0xf0] }
0x14eb   :  { %v14616_v3 = vor.u32 %v15569_v38, %v14613_v56 }
0x14ef   :  { %v10328_v15 = vpop.f32.mrf.mxu3 }
0x14f0   :  { %v10329_v8 = vadd.f32 %v10328_v15, %v9919_v58  ;;  %v19918_v58 = vpop.f32.mrf.mxu0 }
0x14f1   :  { %v9937_v47 = vpop.f32.mrf.mxu1 }
0x14f2   :  { %14976 = vmatmul.msk.f32.gmra.mxu2 %vm10610_vm2, %v10329_v8 }
0x14f4   :  { %10370 = vmatmul.bf16.gmra.mxu3 %v14592_v39  ;;  %9976 = vmatmul.bf16.gmra.mxu1 %v14612_v7 }
0x14f7   :  { %v10331_v10 = vpop.f32.mrf.mxu3 }
0x14f8   :  { %v10332_v49 = vadd.f32 %v10331_v10, %v9922_v33  ;;  %v19923_v28 = vpop.f32.mrf.mxu0 }
0x14f9   :  { %v9939_v33 = vpop.f32.mrf.mxu1 }
0x14fa   :  { %14977 = vmatmul.msk.f32.gmra.mxu2 %vm10610_vm2, %v10332_v49  ;;  %v15571_v49 = vld [vmem:[#allocation5 + $0x2b4] sm:$0xf] }
0x14fb   :  { %v14624_v43 = vor.u32 %v15571_v49, %v14621_v50 }
0x14ff   :  { %v10333_v26 = vpop.f32.mrf.mxu3 }
0x1500   :  { %v10334_v48 = vadd.f32 %v10333_v26, %v9924_v16  ;;  %v14619_v16 = vld [vmem:[#allocation5 + $0x2b0] sm:$0xf]  ;;  %v19927_v14 = vpop.f32.mrf.mxu0 }
0x1501   :  { %v9942_v11 = vpop.f32.mrf.mxu1  ;;  %v14620_v24 = vor.u32 %v15572_v40, %v14619_v16  ;;  %v14635_v26 = vld [vmem:[#allocation5 + $0x2d0] sm:$0xf]  ;;  %v15578_v40 = vld [vmem:[#allocation5 + $0x2e4] sm:$0xf0] }
0x1502   :  { %14978 = vmatmul.msk.f32.gmra.mxu2 %vm10610_vm2, %v10334_v48 }
0x1504   :  { %10375 = vmatmul.bf16.gmra.mxu3 %v14600_v34  ;;  %9981 = vmatmul.bf16.gmra.mxu1 %v14620_v24  ;;  %v14636_v34 = vor.u32 %v15576_v13, %v14635_v26  ;;  %v15577_v13 = vld [vmem:[#allocation5 + $0x2e4] sm:$0xf] }
0x1507   :  { %v10336_v25 = vpop.f32.mrf.mxu3 }
0x1508   :  { %v10337_v29 = vadd.f32 %v10336_v25, %v9927_v23  ;;  %v19930_v35 = vpop.f32.mrf.mxu0 }
0x1509   :  { %v9944_v1 = vpop.f32.mrf.mxu1 }
0x150a   :  { %14981 = vmatmul.msk.f32.vlgmr.msra.gmra.mxu0 %vm10610_vm2, %v10337_v29 }
0x150f   :  { %v10338_v0 = vpop.f32.mrf.mxu3 }
0x1510   :  { %v10339_v21 = vadd.f32 %v10338_v0, %v9929_v4  ;;  %v14627_v4 = vld [vmem:[#allocation5 + $0x2c0] sm:$0xf]  ;;  %v14629_v0 = vld [vmem:[#allocation5 + $0x2c8] sm:$0xf0] }
0x1511   :  { %v9947_v54 = vpop.f32.mrf.mxu1  ;;  %v14628_v8 = vor.u32 %v15574_v52, %v14627_v4  ;;  %v14637_v4 = vld [vmem:[#allocation5 + $0x2d8] sm:$0xf0] }
0x1512   :  { %14982 = vmatmul.msk.f32.gmra.mxu0 %vm10610_vm2, %v10339_v21 }
0x1514   :  { %10380 = vmatmul.bf16.gmra.mxu3 %v14608_v60  ;;  %9986 = vmatmul.bf16.gmra.mxu1 %v14628_v8  ;;  %v14632_v60 = vor.u32 %v15573_v22, %v14629_v0 }
0x1517   :  { %v10341_v23 = vpop.f32.mrf.mxu3 }
0x1518   :  { %v10342_v41 = vadd.f32 %v10341_v23, %v9932_v31  ;;  %v19933_v31 = vpop.f32.mrf.mxu0 }
0x1519   :  { %v9949_v10 = vpop.f32.mrf.mxu1 }
0x151a   :  { %14983 = vmatmul.msk.f32.gmra.mxu0 %vm10610_vm2, %v10342_v41 }
0x151f   :  { %v10343_v45 = vpop.f32.mrf.mxu3 }
0x1520   :  { %v10344_v15 = vadd.f32 %v10343_v45, %v9934_v63  ;;  %v19936_v7 = vpop.f32.mrf.mxu0  ;;  %v15575_v45 = vld [vmem:[#allocation5 + $0x2d4] sm:$0xf] }
0x1521   :  { %v9952_v48 = vpop.f32.mrf.mxu1  ;;  %20862 = vst [vmem:[#allocation44_spill] sm:$0xff] %v19936_v7  ;;  %v14755_v7 = vld [vmem:[#allocation5 + $0x3c0] sm:$0xf] }
0x1522   :  { %14984 = vmatmul.msk.f32.gmra.mxu0 %vm10610_vm2, %v10344_v15  ;;  %v14651_v15 = vld [vmem:[#allocation5 + $0x2f0] sm:$0xf] }
0x1524   :  { %10385 = vmatmul.bf16.gmra.mxu3 %v14616_v3  ;;  %9991 = vmatmul.bf16.gmra.mxu1 %v14636_v34  ;;  %v15580_v3 = vld [vmem:[#allocation5 + $0x2f4] sm:$0xf0]  ;;  %v14659_v34 = vld [vmem:[#allocation5 + $0x300] sm:$0xf] }
0x1525   :  { %v14652_v49 = vor.u32 %v15580_v3, %v14651_v15 }
0x1527   :  { %v10346_v39 = vpop.f32.mrf.mxu3 }
0x1528   :  { %v10347_v55 = vadd.f32 %v10346_v39, %v9937_v47  ;;  %v19940_v19 = vpop.f32.mrf.mxu0  ;;  %v14640_v39 = vor.u32 %v15575_v45, %v14637_v4 }
0x1529   :  { %v9954_v29 = vpop.f32.mrf.mxu1  ;;  %20863 = vst [vmem:[#allocation24_spill] sm:$0xff] %v19940_v19  ;;  %v15599_v19 = vld [vmem:[#allocation5 + $0x394] sm:$0xf] }
0x152a   :  { %14985 = vmatmul.msk.f32.gmra.mxu0 %vm10610_vm2, %v10347_v55 }
0x152f   :  { %v10348_v37 = vpop.f32.mrf.mxu3 }
0x1530   :  { %v10349_v63 = vadd.f32 %v10348_v37, %v9939_v33  ;;  %v14643_v33 = vld [vmem:[#allocation5 + $0x2e0] sm:$0xf]  ;;  %v19943_v41 = vpop.f32.mrf.mxu0 }
0x1531   :  { %v9957_v24 = vpop.f32.mrf.mxu1  ;;  %v14644_v23 = vor.u32 %v15578_v40, %v14643_v33  ;;  %20864 = vst [vmem:[#allocation25_spill] sm:$0xff] %v19943_v41 }
0x1532   :  { %14986 = vmatmul.msk.f32.gmra.mxu0 %vm10610_vm2, %v10349_v63  ;;  %v14645_v63 = vld [vmem:[#allocation5 + $0x2e8] sm:$0xf0] }
0x1534   :  { %10390 = vmatmul.bf16.gmra.mxu3 %v14624_v43  ;;  %9996 = vmatmul.bf16.gmra.mxu1 %v14644_v23 }
0x1537   :  { %v10351_v25 = vpop.f32.mrf.mxu3 }
0x1538   :  { %v10352_v47 = vadd.f32 %v10351_v25, %v9942_v11  ;;  %v15582_v25 = vld [vmem:[#allocation5 + $0x304] sm:$0xf0] }
0x1539   :  { %v9959_v56 = vpop.f32.mrf.mxu1  ;;  %v14660_v0 = vor.u32 %v15582_v25, %v14659_v34 }
0x153a   :  { %14987 = vmatmul.msk.f32.gmra.mxu0 %vm10610_vm2, %v10352_v47  ;;  %v14648_v47 = vor.u32 %v15577_v13, %v14645_v63  ;;  %v14675_v13 = vld [vmem:[#allocation5 + $0x320] sm:$0xf]  ;;  %v15586_v63 = vld [vmem:[#allocation5 + $0x324] sm:$0xf0] }
0x153b   :  { %v14676_v25 = vor.u32 %v15586_v63, %v14675_v13  ;;  %v15590_v63 = vld [vmem:[#allocation5 + $0x344] sm:$0xf0] }
0x153f   :  { %v10353_v16 = vpop.f32.mrf.mxu3 }
0x1540   :  { %v10354_v21 = vadd.f32 %v10353_v16, %v9944_v1  ;;  %v19946_v1 = vpop.f32.mrf.mxu0 }
0x1541   :  { %20865 = vst [vmem:[#allocation32_spill] sm:$0xff] %v19946_v1  ;;  %v9962_v55 = vpop.f32.mrf.mxu1  ;;  %v14725_v1 = vld [vmem:[#allocation5 + $0x388] sm:$0xf0] }
0x1542   :  { %14988 = vmatmul.msk.f32.gmra.mxu0 %vm10610_vm2, %v10354_v21  ;;  %v15579_v21 = vld [vmem:[#allocation5 + $0x2f4] sm:$0xf] }
0x1544   :  { %10395 = vmatmul.bf16.gmra.mxu3 %v14632_v60  ;;  %10001 = vmatmul.bf16.gmra.mxu1 %v14652_v49  ;;  %v14653_v60 = vld [vmem:[#allocation5 + $0x2f8] sm:$0xf0]  ;;  %v15581_v49 = vld [vmem:[#allocation5 + $0x304] sm:$0xf] }
0x1545   :  { %v14656_v4 = vor.u32 %v15579_v21, %v14653_v60  ;;  %v14669_v21 = vld [vmem:[#allocation5 + $0x318] sm:$0xf0] }
0x1547   :  { %v10356_v11 = vpop.f32.mrf.mxu3 }
0x1548   :  { %v10357_v38 = vadd.f32 %v10356_v11, %v9947_v54  ;;  %v19949_v26 = vpop.f32.mrf.mxu0 }
0x1549   :  { %v9964_v37 = vpop.f32.mrf.mxu1  ;;  %20866 = vst [vmem:[#allocation71_spill] sm:$0xff] %v19949_v26  ;;  %v15597_v26 = vld [vmem:[#allocation5 + $0x384] sm:$0xf] }
0x154a   :  { %14989 = vmatmul.msk.f32.gmra.mxu0 %vm10610_vm2, %v10357_v38  ;;  %v15584_v38 = vld [vmem:[#allocation5 + $0x314] sm:$0xf0] }
0x154f   :  { %v10358_v52 = vpop.f32.mrf.mxu3 }
0x1550   :  { %v10359_v8 = vadd.f32 %v10358_v52, %v9949_v10  ;;  %v19953_v16 = vpop.f32.mrf.mxu0 }
0x1551   :  { %v9967_v22 = vpop.f32.mrf.mxu1  ;;  %20867 = vst [vmem:[#allocation38_spill] sm:$0xff] %v19953_v16 }
0x1552   :  { %14990 = vmatmul.msk.f32.gmra.mxu0 %vm10610_vm2, %v10359_v8 }
0x1554   :  { %10400 = vmatmul.bf16.gmra.mxu3 %v14640_v39  ;;  %10006 = vmatmul.bf16.gmra.mxu1 %v14660_v0 }
0x1557   :  { %v10361_v50 = vpop.f32.mrf.mxu3 }
0x1558   :  { %v10362_v54 = vadd.f32 %v10361_v50, %v9952_v48  ;;  %v19956_v23 = vpop.f32.mrf.mxu0  ;;  %v14661_v50 = vld [vmem:[#allocation5 + $0x308] sm:$0xf0] }
0x1559   :  { %v9969_v40 = vpop.f32.mrf.mxu1  ;;  %20868 = vst [vmem:[#allocation59_spill] sm:$0xff] %v19956_v23 }
0x155a   :  { %14991 = vmatmul.msk.f32.gmra.mxu0 %vm10610_vm2, %v10362_v54 }
0x155f   :  { %v10363_v43 = vpop.f32.mrf.mxu3 }
0x1560   :  { %v10364_v10 = vadd.f32 %v10363_v43, %v9954_v29  ;;  %v14667_v29 = vld [vmem:[#allocation5 + $0x310] sm:$0xf]  ;;  %v14664_v43 = vor.u32 %v15581_v49, %v14661_v50  ;;  %v15585_v49 = vld [vmem:[#allocation5 + $0x324] sm:$0xf]  ;;  %v14677_v50 = vld [vmem:[#allocation5 + $0x328] sm:$0xf0] }
0x1561   :  { %v9972_v52 = vpop.f32.mrf.mxu1  ;;  %v14668_v15 = vor.u32 %v15584_v38, %v14667_v29 }
0x1562   :  { %14992 = vmatmul.msk.f32.gmra.mxu0 %vm10610_vm2, %v10364_v10 }
0x1564   :  { %10405 = vmatmul.bf16.gmra.mxu3 %v14648_v47  ;;  %10011 = vmatmul.bf16.gmra.mxu1 %v14668_v15 }
0x1567   :  { %v10366_v48 = vpop.f32.mrf.mxu3 }
0x1568   :  { %v10367_v33 = vadd.f32 %v10366_v48, %v9957_v24  ;;  %v19959_v24 = vpop.f32.mrf.mxu0 }
0x1569   :  { %20869 = vst [vmem:[#allocation65_spill] sm:$0xff] %v19959_v24  ;;  %v9974_v39 = vpop.f32.mrf.mxu1 }
0x156a   :  { %14993 = vmatmul.msk.f32.gmra.mxu0 %vm10610_vm2, %v10367_v33  ;;  %v15583_v33 = vld [vmem:[#allocation5 + $0x314] sm:$0xf] }
0x156b   :  { %v14672_v38 = vor.u32 %v15583_v33, %v14669_v21 }
0x156f   :  { %v10368_v11 = vpop.f32.mrf.mxu3 }
0x1570   :  { %v10369_v45 = vadd.f32 %v10368_v11, %v9959_v56  ;;  %v19962_v10 = vpop.f32.mrf.mxu0  ;;  %v15588_v11 = vld [vmem:[#allocation5 + $0x334] sm:$0xf0] }
0x1571   :  { %v9977_v34 = vpop.f32.mrf.mxu1  ;;  %20870 = vst [vmem:[#allocation46_spill] sm:$0xff] %v19962_v10 }
0x1572   :  { %14994 = vmatmul.msk.f32.gmra.mxu0 %vm10610_vm2, %v10369_v45 }
0x1574   :  { %10410 = vmatmul.bf16.gmra.mxu3 %v14656_v4  ;;  %10016 = vmatmul.bf16.gmra.mxu1 %v14676_v25  ;;  %v14680_v25 = vor.u32 %v15585_v49, %v14677_v50 }
0x1577   :  { %v10371_v3 = vpop.f32.mrf.mxu3 }
0x1578   :  { %v10372_v8 = vadd.f32 %v10371_v3, %v9962_v55  ;;  %v19966_v48 = vpop.f32.mrf.mxu0 }
0x1579   :  { %v9979_v0 = vpop.f32.mrf.mxu1  ;;  %20871 = vst [vmem:[#allocation10_spill] sm:$0xff] %v19966_v48 }
0x157a   :  { %14995 = vmatmul.msk.f32.gmra.mxu0 %vm10610_vm2, %v10372_v8 }
0x157f   :  { %v10373_v54 = vpop.f32.mrf.mxu3 }
0x1580   :  { %v10374_v56 = vadd.f32 %v10373_v54, %v9964_v37  ;;  %v14683_v37 = vld [vmem:[#allocation5 + $0x330] sm:$0xf]  ;;  %v19969_v15 = vpop.f32.mrf.mxu0  ;;  %v19972_v54 = vpop.f32.mrf.mxu2 }
0x1581   :  { %v9982_v45 = vpop.f32.mrf.mxu1  ;;  %v14684_v4 = vor.u32 %v15588_v11, %v14683_v37  ;;  %20872 = vst [vmem:[#allocation35_spill] sm:$0xff] %v19969_v15  ;;  %v15587_v11 = vld [vmem:[#allocation5 + $0x334] sm:$0xf]  ;;  %v15593_v15 = vld [vmem:[#allocation5 + $0x364] sm:$0xf] }
0x1582   :  { %14996 = vmatmul.msk.f32.gmra.mxu0 %vm10610_vm2, %v10374_v56 }
0x1584   :  { %10415 = vmatmul.bf16.gmra.mxu3 %v14664_v43  ;;  %10021 = vmatmul.bf16.gmra.mxu1 %v14684_v4  ;;  %v15592_v4 = vld [vmem:[#allocation5 + $0x354] sm:$0xf0] }
0x1587   :  { %v10376_v47 = vpop.f32.mrf.mxu3 }
0x1588   :  { %v10377_v55 = vadd.f32 %v10376_v47, %v9967_v22  ;;  %v19974_v56 = vpop.f32.mrf.mxu0 }
0x1589   :  { %v9984_v8 = vpop.f32.mrf.mxu1  ;;  %20873 = vst [vmem:[#allocation64_spill] sm:$0xff] %v19974_v56 }
0x158a   :  { %14997 = vmatmul.msk.f32.gmra.mxu0 %vm10610_vm2, %v10377_v55 }
0x158f   :  { %v10378_v60 = vpop.f32.mrf.mxu3 }
0x1590   :  { %v10379_v29 = vadd.f32 %v10378_v60, %v9969_v40  ;;  %v14691_v40 = vld [vmem:[#allocation5 + $0x340] sm:$0xf]  ;;  %v19977_v60 = vpop.f32.mrf.mxu2  ;;  %v19979_v37 = vpop.f32.mrf.mxu0 }
0x1591   :  { %v9987_v47 = vpop.f32.mrf.mxu1  ;;  %v14692_v55 = vor.u32 %v15590_v63, %v14691_v40  ;;  %20874 = vst [vmem:[#allocation67_spill] sm:$0xff] %v19979_v37 }
0x1592   :  { %14998 = vmatmul.msk.f32.gmra.mxu0 %vm10610_vm2, %v10379_v29  ;;  %v14685_v29 = vld [vmem:[#allocation5 + $0x338] sm:$0xf0] }
0x1594   :  { %10420 = vmatmul.bf16.gmra.mxu3 %v14672_v38  ;;  %10026 = vmatmul.bf16.gmra.mxu1 %v14692_v55 }
0x1597   :  { %v10381_v22 = vpop.f32.mrf.mxu3 }
0x1598   :  { %v10382_v3 = vadd.f32 %v10381_v22, %v9972_v52 }
0x1599   :  { %v9989_v21 = vpop.f32.mrf.mxu1 }
0x159a   :  { %14999 = vmatmul.msk.f32.gmra.mxu0 %vm10610_vm2, %v10382_v3  ;;  %v14688_v3 = vor.u32 %v15587_v11, %v14685_v29  ;;  %v14707_v11 = vld [vmem:[#allocation5 + $0x360] sm:$0xf]  ;;  %v15594_v29 = vld [vmem:[#allocation5 + $0x364] sm:$0xf0] }
0x159f   :  { %v10383_v13 = vpop.f32.mrf.mxu3 }
0x15a0   :  { %v10384_v43 = vadd.f32 %v10383_v13, %v9974_v39  ;;  %v14699_v39 = vld [vmem:[#allocation5 + $0x350] sm:$0xf]  ;;  %v19985_v13 = vpop.f32.mrf.mxu0 }
0x15a1   :  { %v9992_v49 = vpop.f32.mrf.mxu1  ;;  %v14700_v50 = vor.u32 %v15592_v4, %v14699_v39  ;;  %20875 = vst [vmem:[#allocation13_spill] sm:$0xff] %v19985_v13  ;;  %v14701_v13 = vld [vmem:[#allocation5 + $0x358] sm:$0xf0] }
0x15a2   :  { %15000 = vmatmul.msk.f32.gmra.mxu0 %vm10610_vm2, %v10384_v43 }
0x15a4   :  { %10425 = vmatmul.bf16.gmra.mxu3 %v14680_v25  ;;  %10031 = vmatmul.bf16.gmra.mxu1 %v14700_v50 }
0x15a7   :  { %v10386_v52 = vpop.f32.mrf.mxu3 }
0x15a8   :  { %v10387_v33 = vadd.f32 %v10386_v52, %v9977_v34  ;;  %v19983_v34 = vpop.f32.mrf.mxu2  ;;  %v19988_v25 = vpop.f32.mrf.mxu0  ;;  %v14693_v52 = vld [vmem:[#allocation5 + $0x348] sm:$0xf0] }
0x15a9   :  { %v9994_v43 = vpop.f32.mrf.mxu1 }
0x15aa   :  { %15001 = vmatmul.msk.f32.gmra.mxu0 %vm10610_vm2, %v10387_v33 }
0x15af   :  { %v10388_v38 = vpop.f32.mrf.mxu3 }
0x15b0   :  { %v10389_v22 = vadd.f32 %v10388_v38, %v9979_v0  ;;  %v19990_v55 = vpop.f32.mrf.mxu2  ;;  %v15589_v0 = vld [vmem:[#allocation5 + $0x344] sm:$0xf] }
0x15b1   :  { %v14696_v39 = vor.u32 %v15589_v0, %v14693_v52  ;;  %v9997_v4 = vpop.f32.mrf.mxu1  ;;  %v15596_v0 = vld [vmem:[#allocation5 + $0x374] sm:$0xf0] }
0x15b2   :  { %15002 = vmatmul.msk.f32.gmra.mxu0 %vm10610_vm2, %v10389_v22  ;;  %v14708_v22 = vor.u32 %v15594_v29, %v14707_v11  ;;  %v14704_v11 = vor.u32 %v15591_v17, %v14701_v13  ;;  %v15598_v13 = vld [vmem:[#allocation5 + $0x384] sm:$0xf0] }
0x15b4   :  { %10430 = vmatmul.bf16.gmra.mxu3 %v14688_v3  ;;  %10036 = vmatmul.bf16.gmra.mxu1 %v14708_v22 }
0x15b7   :  { %v10391_v40 = vpop.f32.mrf.mxu3 }
0x15b8   :  { %v10392_v63 = vadd.f32 %v10391_v40, %v9982_v45  ;;  %v19993_v45 = vpop.f32.mrf.mxu0  ;;  %v19995_v3 = vpop.f32.mrf.mxu2 }
0x15ba   :  { %15003 = vmatmul.msk.f32.gmra.mxu0 %vm10610_vm2, %v10392_v63  ;;  %v9999_v63 = vpop.f32.mrf.mxu1 }
0x15bf   :  { %v10393_v33 = vpop.f32.mrf.mxu3 }
0x15c0   :  { %v10394_v38 = vadd.f32 %v10393_v33, %v9984_v8  ;;  %v14715_v8 = vld [vmem:[#allocation5 + $0x370] sm:$0xf]  ;;  %v19998_v52 = vpop.f32.mrf.mxu0 }
0x15c2   :  { %15004 = vmatmul.msk.f32.gmra.mxu0 %vm10610_vm2, %v10394_v38  ;;  %v10002_v29 = vpop.f32.mrf.mxu1  ;;  %v14716_v38 = vor.u32 %v15596_v0, %v14715_v8 }
0x15c4   :  { %10435 = vmatmul.bf16.gmra.mxu3 %v14696_v39  ;;  %v20000_v39 = vpop.f32.mrf.mxu2  ;;  %10041 = vmatmul.bf16.gmra.mxu1 %v14716_v38  ;;  %v15014_v38 = vld [vmem:[%s20504_s11 + $0x38] sm:$0xff] }
0x15c5   :  { %11613 = vmatpush.msra.mxu2 %v15014_v38 }
0x15c7   :  { %v10396_v50 = vpop.f32.mrf.mxu3 }
0x15c8   :  { %v10397_v40 = vadd.f32 %v10396_v50, %v9987_v47 }
0x15ca   :  { %15005 = vmatmul.msk.f32.gmra.mxu0 %vm10610_vm2, %v10397_v40  ;;  %v10004_v50 = vpop.f32.mrf.mxu1  ;;  %v20003_v40 = vpop.f32.mrf.mxu0 }
0x15cc   :  { %v20006_v56 = vpop.f32.mrf.mxu2 }
0x15cf   :  { %v10398_v37 = vpop.f32.mrf.mxu3 }
0x15d0   :  { %v10399_v33 = vadd.f32 %v10398_v37, %v9989_v21  ;;  %v14709_v21 = vld [vmem:[#allocation5 + $0x368] sm:$0xf0]  ;;  %v14723_v37 = vld [vmem:[#allocation5 + $0x380] sm:$0xf] }
0x15d1   :  { %v14712_v0 = vor.u32 %v15593_v15, %v14709_v21  ;;  %v15013_v15 = vld [vmem:[%s20504_s11 + $0x30] sm:$0xff] }
0x15d2   :  { %15006 = vmatmul.msk.f32.gmra.mxu0 %vm10610_vm2, %v10399_v33  ;;  %v10007_v48 = vpop.f32.mrf.mxu1  ;;  %v14724_v33 = vor.u32 %v15598_v13, %v14723_v37  ;;  %11614 = vmatpush.msra.mxu2 %v15013_v15  ;;  %v15595_v21 = vld [vmem:[#allocation5 + $0x374] sm:$0xf] }
0x15d4   :  { %10440 = vmatmul.bf16.gmra.mxu3 %v14704_v11  ;;  %10046 = vmatmul.bf16.gmra.mxu1 %v14724_v33  ;;  %v20011_v11 = vpop.f32.mrf.mxu2  ;;  %v15600_v33 = vld [vmem:[#allocation5 + $0x394] sm:$0xf0] }
0x15d7   :  { %v10401_v47 = vpop.f32.mrf.mxu3 }
0x15d8   :  { %v10402_v22 = vadd.f32 %v10401_v47, %v9992_v49  ;;  %v20009_v49 = vpop.f32.mrf.mxu0 }
0x15da   :  { %15007 = vmatmul.msk.f32.gmra.mxu0 %vm10610_vm2, %v10402_v22 }
0x15dc   :  { %v20022_v13 = vpop.f32.mrf.mxu2 }
0x15dd   :  { %20876 = vst [vmem:[#allocation14_spill] sm:$0xff] %v20022_v13  ;;  %v15606_v13 = vld [vmem:[#allocation5 + $0x3c4] sm:$0xf0] }
0x15df   :  { %v10403_v17 = vpop.f32.mrf.mxu3 }
0x15e0   :  { %v10404_v8 = vadd.f32 %v10403_v17, %v9994_v43  ;;  %v10009_v43 = vpop.f32.mrf.mxu1  ;;  %v14717_v17 = vld [vmem:[#allocation5 + $0x378] sm:$0xf0]  ;;  %v20020_v37 = vpop.f32.mrf.mxu0 }
0x15e1   :  { %v14720_v38 = vor.u32 %v15595_v21, %v14717_v17  ;;  %v15602_v21 = vld [vmem:[#allocation5 + $0x3a4] sm:$0xf0] }
0x15e2   :  { %15008 = vmatmul.msk.f32.gmra.mxu0 %vm10610_vm2, %v10404_v8 }
0x15e4   :  { %10445 = vmatmul.bf16.gmra.mxu3 %v14712_v0  ;;  %v14731_v0 = vld [vmem:[#allocation5 + $0x390] sm:$0xf]  ;;  %v20027_v16 = vpop.f32.mrf.mxu2 }
0x15e5   :  { %20877 = vst [vmem:[#allocation11_spill] sm:$0xff] %v20027_v16 }
0x15e7   :  { %v10406_v47 = vpop.f32.mrf.mxu3 }
0x15e8   :  { %v10407_v22 = vadd.f32 %v10406_v47, %v9997_v4  ;;  %v10012_v4 = vpop.f32.mrf.mxu1  ;;  %v14732_v47 = vor.u32 %v15600_v33, %v14731_v0  ;;  %v20025_v24 = vpop.f32.mrf.mxu0 }
0x15ea   :  { %15009 = vmatmul.msk.f32.gmra.mxu0 %vm10610_vm2, %v10407_v22  ;;  %10051 = vmatmul.bf16.gmra.mxu1 %v14732_v47 }
0x15ef   :  { %v10408_v8 = vpop.f32.mrf.mxu3 }
0x15f0   :  { %v10409_v10 = vadd.f32 %v10408_v8, %v9999_v63  ;;  %v10014_v23 = vpop.f32.mrf.mxu1  ;;  %v14739_v63 = vld [vmem:[#allocation5 + $0x3a0] sm:$0xf]  ;;  %v14728_v8 = vor.u32 %v15597_v26, %v14725_v1  ;;  %v20030_v33 = vpop.f32.mrf.mxu0  ;;  %v14747_v26 = vld [vmem:[#allocation5 + $0x3b0] sm:$0xf] }
0x15f2   :  { %15010 = vmatmul.msk.f32.gmra.mxu0 %vm10610_vm2, %v10409_v10  ;;  %v14740_v10 = vor.u32 %v15602_v21, %v14739_v63 }
0x15f4   :  { %10450 = vmatmul.bf16.gmra.mxu3 %v14720_v38 }
0x15f7   :  { %v10411_v15 = vpop.f32.mrf.mxu3 }
0x15f8   :  { %v10412_v22 = vadd.f32 %v10411_v15, %v10002_v29  ;;  %v10017_v0 = vpop.f32.mrf.mxu1  ;;  %v20033_v29 = vpop.f32.mrf.mxu2 }
0x15f9   :  { %20878 = vst [vmem:[#allocation17_spill] sm:$0xff] %v20033_v29 }
0x15fa   :  { %15011 = vmatmul.msk.f32.gmra.mxu0 %vm10610_vm2, %v10412_v22  ;;  %10056 = vmatmul.bf16.gmra.mxu1 %v14740_v10 }
0x15ff   :  { %v10413_v41 = vpop.f32.mrf.mxu3 }
0x1600   :  { %v10414_v17 = vadd.f32 %v10413_v41, %v10004_v50  ;;  %v10019_v15 = vpop.f32.mrf.mxu1  ;;  %v20036_v22 = vpop.f32.mrf.mxu2  ;;  %v14733_v41 = vld [vmem:[#allocation5 + $0x398] sm:$0xf0]  ;;  %v15604_v50 = vld [vmem:[#allocation5 + $0x3b4] sm:$0xf0] }
0x1601   :  { %20879 = vst [vmem:[#allocation18_spill] sm:$0xff] %v20036_v22  ;;  %v14736_v21 = vor.u32 %v15599_v19, %v14733_v41  ;;  %v14741_v22 = vld [vmem:[#allocation5 + $0x3a8] sm:$0xf0] }
0x1602   :  { %15012 = vmatmul.msk.f32.gmra.mxu0 %vm10610_vm2, %v10414_v17  ;;  %v14748_v17 = vor.u32 %v15604_v50, %v14747_v26 }
0x1604   :  { %10455 = vmatmul.bf16.gmra.mxu3 %v14728_v8 }
0x1607   :  { %v10416_v38 = vpop.f32.mrf.mxu3 }
0x1608   :  { %v10417_v47 = vadd.f32 %v10416_v38, %v10007_v48  ;;  %v10022_v16 = vpop.f32.mrf.mxu1  ;;  %v20039_v8 = vpop.f32.mrf.mxu2 }
0x1609   :  { %20880 = vst [vmem:[#allocation78_spill] sm:$0xff] %v20039_v8  ;;  %v15612_v8 = vld [vmem:[#allocation5 + $0x3f4] sm:$0xf0] }
0x160a   :  { %15015 = vmatmul.msk.f32.vlgmr.msra.gmra.mxu2 %vm10610_vm2, %v10417_v47  ;;  %10061 = vmatmul.bf16.gmra.mxu1 %v14748_v17  ;;  %v15601_v47 = vld [vmem:[#allocation5 + $0x3a4] sm:$0xf]  ;;  %v15603_v17 = vld [vmem:[#allocation5 + $0x3b4] sm:$0xf] }
0x160b   :  { %v14744_v19 = vor.u32 %v15601_v47, %v14741_v22 }
0x160f   :  { %v10418_v1 = vpop.f32.mrf.mxu3 }
0x1610   :  { %v10419_v63 = vadd.f32 %v10418_v1, %v10009_v43  ;;  %v10024_v38 = vpop.f32.mrf.mxu1  ;;  %v14756_v1 = vor.u32 %v15606_v13, %v14755_v7  ;;  %v20042_v26 = vpop.f32.mrf.mxu2 }
0x1611   :  { %20881 = vst [vmem:[#allocation26_spill] sm:$0xff] %v20042_v26 }
0x1612   :  { %15016 = vmatmul.msk.f32.gmra.mxu2 %vm10610_vm2, %v10419_v63 }
0x1614   :  { %10460 = vmatmul.bf16.gmra.mxu3 %v14736_v21 }
0x1617   :  { %v10421_v48 = vpop.f32.mrf.mxu3 }
0x1618   :  { %v10422_v10 = vadd.f32 %v10421_v48, %v10012_v4  ;;  %v10027_v41 = vpop.f32.mrf.mxu1  ;;  %v20046_v21 = vpop.f32.mrf.mxu2  ;;  %v14749_v48 = vld [vmem:[#allocation5 + $0x3b8] sm:$0xf0] }
0x1619   :  { %20882 = vst [vmem:[#allocation36_spill] sm:$0xff] %v20046_v21  ;;  %v14752_v7 = vor.u32 %v15603_v17, %v14749_v48  ;;  %v15610_v17 = vld [vmem:[#allocation5 + $0x3e4] sm:$0xf0] }
0x161a   :  { %15017 = vmatmul.msk.f32.gmra.mxu2 %vm10610_vm2, %v10422_v10  ;;  %10066 = vmatmul.bf16.gmra.mxu1 %v14756_v1 }
0x161f   :  { %v10423_v29 = vpop.f32.mrf.mxu3 }
0x1620   :  { %v10424_v43 = vadd.f32 %v10423_v29, %v10014_v23  ;;  %v10029_v63 = vpop.f32.mrf.mxu1  ;;  %v14763_v23 = vld [vmem:[#allocation5 + $0x3d0] sm:$0xf]  ;;  %v15608_v29 = vld [vmem:[#allocation5 + $0x3d4] sm:$0xf0] }
0x1621   :  { %v14764_v47 = vor.u32 %v15608_v29, %v14763_v23 }
0x1622   :  { %15018 = vmatmul.msk.f32.gmra.mxu2 %vm10610_vm2, %v10424_v43  ;;  %v20049_v43 = vpop.f32.mrf.mxu2 }
0x1623   :  { %20883 = vst [vmem:[#allocation62_spill] sm:$0xff] %v20049_v43  ;;  %v14779_v43 = vld [vmem:[#allocation5 + $0x3f0] sm:$0xf] }
0x1624   :  { %10465 = vmatmul.bf16.gmra.mxu3 %v14744_v19 }
0x1627   :  { %v10426_v50 = vpop.f32.mrf.mxu3 }
0x1628   :  { %v10427_v4 = vadd.f32 %v10426_v50, %v10017_v0  ;;  %v10032_v13 = vpop.f32.mrf.mxu1  ;;  %v15605_v50 = vld [vmem:[#allocation5 + $0x3c4] sm:$0xf] }
0x162a   :  { %15019 = vmatmul.msk.f32.gmra.mxu2 %vm10610_vm2, %v10427_v4  ;;  %10071 = vmatmul.bf16.gmra.mxu1 %v14764_v47  ;;  %v14757_v4 = vld [vmem:[#allocation5 + $0x3c8] sm:$0xf0]  ;;  %v20052_v21 = vpop.f32.mrf.mxu2 }
0x162b   :  { %20884 = vst [vmem:[#allocation61_spill] sm:$0xff] %v20052_v21 }
0x162f   :  { %v10428_v10 = vpop.f32.mrf.mxu3 }
0x1630   :  { %v10429_v22 = vadd.f32 %v10428_v10, %v10019_v15  ;;  %v10034_v1 = vpop.f32.mrf.mxu1  ;;  %v14771_v15 = vld [vmem:[#allocation5 + $0x3e0] sm:$0xf]  ;;  %v14760_v10 = vor.u32 %v15605_v50, %v14757_v4  ;;  %v14780_v4 = vor.u32 %v15612_v8, %v14779_v43 }
0x1631   :  { %v14772_v29 = vor.u32 %v15610_v17, %v14771_v15 }
0x1632   :  { %15020 = vmatmul.msk.f32.gmra.mxu2 %vm10610_vm2, %v10429_v22  ;;  %v20055_v47 = vpop.f32.mrf.mxu2 }
0x1633   :  { %20885 = vst [vmem:[#allocation70_spill] sm:$0xff] %v20055_v47  ;;  %v15616_v47 = vld [vmem:[#allocation5 + $0x414] sm:$0xf0] }
0x1634   :  { %10470 = vmatmul.bf16.gmra.mxu3 %v14752_v7 }
0x1637   :  { %v10431_v0 = vpop.f32.mrf.mxu3 }
0x1638   :  { %v10432_v19 = vadd.f32 %v10431_v0, %v10022_v16  ;;  %v10037_v23 = vpop.f32.mrf.mxu1  ;;  %v15607_v0 = vld [vmem:[#allocation5 + $0x3d4] sm:$0xf] }
0x163a   :  { %15021 = vmatmul.msk.f32.gmra.mxu2 %vm10610_vm2, %v10432_v19  ;;  %10076 = vmatmul.bf16.gmra.mxu1 %v14772_v29  ;;  %v14765_v19 = vld [vmem:[#allocation5 + $0x3d8] sm:$0xf0]  ;;  %v20059_v15 = vpop.f32.mrf.mxu2  ;;  %v15609_v29 = vld [vmem:[#allocation5 + $0x3e4] sm:$0xf] }
0x163b   :  { %20886 = vst [vmem:[#allocation69_spill] sm:$0xff] %v20059_v15  ;;  %v14795_v15 = vld [vmem:[#allocation5 + $0x410] sm:$0xf] }
0x163f   :  { %v10433_v26 = vpop.f32.mrf.mxu3 }
0x1640   :  { %v10434_v48 = vadd.f32 %v10433_v26, %v10024_v38  ;;  %v10039_v7 = vpop.f32.mrf.mxu1  ;;  %v14768_v26 = vor.u32 %v15607_v0, %v14765_v19 }
0x1642   :  { %15022 = vmatmul.msk.f32.gmra.mxu2 %vm10610_vm2, %v10434_v48 }
0x1644   :  { %10475 = vmatmul.bf16.gmra.mxu3 %v14760_v10  ;;  %v20062_v10 = vpop.f32.mrf.mxu2 }
0x1645   :  { %20887 = vst [vmem:[#allocation27_spill] sm:$0xff] %v20062_v10 }
0x1647   :  { %v10436_v22 = vpop.f32.mrf.mxu3 }
0x1648   :  { %v10437_v16 = vadd.f32 %v10436_v22, %v10027_v41  ;;  %v10042_v50 = vpop.f32.mrf.mxu1  ;;  %v14773_v22 = vld [vmem:[#allocation5 + $0x3e8] sm:$0xf0] }
0x1649   :  { %v14776_v8 = vor.u32 %v15609_v29, %v14773_v22 }
0x164a   :  { %15023 = vmatmul.msk.f32.gmra.mxu2 %vm10610_vm2, %v10437_v16  ;;  %10081 = vmatmul.bf16.gmra.mxu1 %v14780_v4 }
0x164f   :  { %v10438_v21 = vpop.f32.mrf.mxu3 }
0x1650   :  { %v10439_v38 = vadd.f32 %v10438_v21, %v10029_v63  ;;  %v10044_v48 = vpop.f32.mrf.mxu1  ;;  %v14787_v63 = vld [vmem:[#allocation5 + $0x400] sm:$0xf]  ;;  %v15614_v21 = vld [vmem:[#allocation5 + $0x404] sm:$0xf0] }
0x1651   :  { %v14788_v19 = vor.u32 %v15614_v21, %v14787_v63 }
0x1652   :  { %15024 = vmatmul.msk.f32.gmra.mxu2 %vm10610_vm2, %v10439_v38  ;;  %v20065_v38 = vpop.f32.mrf.mxu2 }
0x1653   :  { %20888 = vst [vmem:[#allocation15_spill] sm:$0xff] %v20065_v38  ;;  %v15642_v38 = vld [vmem:[#allocation5 + $0x4e4] sm:$0xf0] }
0x1654   :  { %10480 = vmatmul.bf16.gmra.mxu3 %v14768_v26 }
0x1657   :  { %v10441_v41 = vpop.f32.mrf.mxu3 }
0x1658   :  { %v10442_v17 = vadd.f32 %v10441_v41, %v10032_v13  ;;  %v10047_v43 = vpop.f32.mrf.mxu1  ;;  %v15611_v41 = vld [vmem:[#allocation5 + $0x3f4] sm:$0xf] }
0x165a   :  { %15025 = vmatmul.msk.f32.gmra.mxu2 %vm10610_vm2, %v10442_v17  ;;  %10086 = vmatmul.bf16.gmra.mxu1 %v14788_v19  ;;  %v14781_v17 = vld [vmem:[#allocation5 + $0x3f8] sm:$0xf0]  ;;  %v20068_v63 = vpop.f32.mrf.mxu2  ;;  %v15613_v19 = vld [vmem:[#allocation5 + $0x404] sm:$0xf] }
0x165b   :  { %v14784_v29 = vor.u32 %v15611_v41, %v14781_v17  ;;  %20889 = vst [vmem:[#allocation19_spill] sm:$0xff] %v20068_v63  ;;  %v14899_v63 = vld [vmem:[#allocation5 + $0x4e0] sm:$0xf] }
0x165f   :  { %v10443_v16 = vpop.f32.mrf.mxu3 }
0x1660   :  { %v10444_v0 = vadd.f32 %v10443_v16, %v10034_v1  ;;  %v10049_v4 = vpop.f32.mrf.mxu1  ;;  %v14796_v16 = vor.u32 %v15616_v47, %v14795_v15 }
0x1662   :  { %15026 = vmatmul.msk.f32.gmra.mxu2 %vm10610_vm2, %v10444_v0 }
0x1664   :  { %10485 = vmatmul.bf16.gmra.mxu3 %v14776_v8  ;;  %v20072_v8 = vpop.f32.mrf.mxu2 }
0x1665   :  { %20890 = vst [vmem:[#allocation37_spill] sm:$0xff] %v20072_v8 }
0x1667   :  { %v10446_v13 = vpop.f32.mrf.mxu3 }
0x1668   :  { %v10447_v26 = vadd.f32 %v10446_v13, %v10037_v23  ;;  %v10052_v22 = vpop.f32.mrf.mxu1  ;;  %v14789_v13 = vld [vmem:[#allocation5 + $0x408] sm:$0xf0] }
0x1669   :  { %v14792_v47 = vor.u32 %v15613_v19, %v14789_v13  ;;  %v15615_v13 = vld [vmem:[#allocation5 + $0x414] sm:$0xf] }
0x166a   :  { %15027 = vmatmul.msk.f32.gmra.mxu2 %vm10610_vm2, %v10447_v26  ;;  %10091 = vmatmul.bf16.gmra.mxu1 %v14796_v16 }
0x166f   :  { %v10448_v10 = vpop.f32.mrf.mxu3 }
0x1670   :  { %v10449_v1 = vadd.f32 %v10448_v10, %v10039_v7  ;;  %v10054_v0 = vpop.f32.mrf.mxu1  ;;  %v14803_v7 = vld [vmem:[#allocation5 + $0x420] sm:$0xf]  ;;  %v15618_v10 = vld [vmem:[#allocation5 + $0x424] sm:$0xf0] }
0x1671   :  { %v14804_v17 = vor.u32 %v15618_v10, %v14803_v7  ;;  %v10828_v10 = vpop.permute.xlu1 %10827 }
0x1672   :  { %15028 = vmatmul.msk.f32.gmra.mxu2 %vm10610_vm2, %v10449_v1  ;;  %v10823_v1 = vpop.permute.xlu0 %10822 }
0x1673   :  { %v10980_v16 = vadd.f32 %v10823_v1, %v19826_v5  ;;  %v10981_v5 = vadd.f32 %v10828_v10, %v19829_v51 }
0x1674   :  { %10490 = vmatmul.bf16.gmra.mxu3 %v14784_v29 }
0x1675   :  { %v11224_v8 = vadd.f32 %v19880_v32, %v10980_v16  ;;  %v11225_v16 = vadd.f32 %v19883_v36, %v10981_v5 }
0x1677   :  { %v10451_v21 = vpop.f32.mrf.mxu3 }
0x1678   :  { %v10452_v23 = vadd.f32 %v10451_v21, %v10042_v50  ;;  %v20074_v15 = vpop.f32.mrf.mxu1  ;;  %v20077_v50 = vpop.f32.mrf.mxu2 }
0x1679   :  { %20891 = vst [vmem:[#allocation22_spill] sm:$0xff] %v20077_v50 }
0x167a   :  { %15029 = vmatmul.msk.f32.gmra.mxu2 %vm10610_vm2, %v10452_v23  ;;  %10096 = vmatmul.bf16.gmra.mxu1 %v14804_v17  ;;  %v15620_v17 = vld [vmem:[#allocation5 + $0x434] sm:$0xf0]  ;;  %v10838_v5 = vpop.permute.xlu0 %10837 }
0x167f   :  { %v10453_v26 = vpop.f32.mrf.mxu3 }
0x1680   :  { %v10454_v41 = vadd.f32 %v10453_v26, %v10044_v48  ;;  %v20080_v23 = vpop.f32.mrf.mxu1  ;;  %v11468_v48 = vadd.f32 %v19988_v25, %v11224_v8  ;;  %v14797_v26 = vld [vmem:[#allocation5 + $0x418] sm:$0xf0]  ;;  %v11469_v25 = vadd.f32 %v19993_v45, %v11225_v16 }
0x1681   :  { %v14800_v1 = vor.u32 %v15615_v13, %v14797_v26  ;;  %v20098_v26 = vpop.f32.mrf.mxu0 }
0x1682   :  { %15030 = vmatmul.msk.f32.gmra.mxu2 %vm10610_vm2, %v10454_v41 }
0x1684   :  { %10495 = vmatmul.bf16.gmra.mxu3 %v14792_v47  ;;  %v14811_v47 = vld [vmem:[#allocation5 + $0x430] sm:$0xf] }
0x1685   :  { %v14812_v32 = vor.u32 %v15620_v17, %v14811_v47  ;;  %v14805_v47 = vld [vmem:[#allocation5 + $0x428] sm:$0xf0] }
0x1687   :  { %v10456_v29 = vpop.f32.mrf.mxu3 }
0x1688   :  { %v10457_v21 = vadd.f32 %v10456_v29, %v10047_v43  ;;  %v20088_v29 = vpop.f32.mrf.mxu1 }
0x168a   :  { %15031 = vmatmul.msk.f32.gmra.mxu2 %vm10610_vm2, %v10457_v21  ;;  %10101 = vmatmul.bf16.gmra.mxu1 %v14812_v32 }
0x168d   :  { %v11616_v19 = vpop.f32.mrf.mxu2 }
0x168e   :  { %v20085_v7 = vadd.f32 %v11616_v19, %v11468_v48  ;;  %v10833_v48 = vpop.permute.xlu2 %10832 }
0x168f   :  { %v10458_v41 = vpop.f32.mrf.mxu3  ;;  %v10982_v51 = vadd.f32 %v10833_v48, %v19832_v27  ;;  %v15622_v27 = vld [vmem:[#allocation5 + $0x444] sm:$0xf0] }
0x1690   :  { %v10459_v43 = vadd.f32 %v10458_v41, %v10049_v4  ;;  %v20096_v13 = vpop.f32.mrf.mxu1  ;;  %v15617_v41 = vld [vmem:[#allocation5 + $0x424] sm:$0xf] }
0x1691   :  { %v11226_v36 = vadd.f32 %v19888_v53, %v10982_v51  ;;  %v14808_v16 = vor.u32 %v15617_v41, %v14805_v47  ;;  %v15619_v47 = vld [vmem:[#allocation5 + $0x434] sm:$0xf] }
0x1692   :  { %15032 = vmatmul.msk.f32.gmra.mxu2 %vm10610_vm2, %v10459_v43 }
0x1693   :  { %v11470_v10 = vadd.f32 %v19998_v52, %v11226_v36  ;;  %v20110_v52 = vpop.f32.mrf.mxu0 }
0x1694   :  { %10500 = vmatmul.bf16.gmra.mxu3 %v14800_v1  ;;  %v14819_v1 = vld [vmem:[#allocation5 + $0x440] sm:$0xf] }
0x1695   :  { %v11619_v8 = vpop.f32.mrf.mxu2  ;;  %v14820_v53 = vor.u32 %v15622_v27, %v14819_v1 }
0x1696   :  { %v20093_v21 = vadd.f32 %v11619_v8, %v11469_v25  ;;  %v10848_v1 = vpop.permute.xlu2 %10847 }
0x1697   :  { %v10461_v19 = vpop.f32.mrf.mxu3 }
0x1698   :  { %v10462_v4 = vadd.f32 %v10461_v19, %v10052_v22  ;;  %v10983_v22 = vadd.f32 %v10838_v5, %v19836_v18  ;;  %v20106_v25 = vpop.f32.mrf.mxu1  ;;  %v14813_v5 = vld [vmem:[#allocation5 + $0x438] sm:$0xf0] }
0x169a   :  { %15033 = vmatmul.msk.f32.gmra.mxu2 %vm10610_vm2, %v10462_v4  ;;  %v11227_v8 = vadd.f32 %v19893_v44, %v10983_v22  ;;  %10106 = vmatmul.bf16.gmra.mxu1 %v14820_v53  ;;  %v10843_v4 = vpop.permute.xlu1 %10842  ;;  %v15624_v22 = vld [vmem:[#allocation5 + $0x454] sm:$0xf0] }
0x169b   :  { %v20122_v41 = vpop.f32.mrf.mxu0 }
0x169c   :  { %v11471_v48 = vadd.f32 %v20003_v40, %v11227_v8 }
0x169d   :  { %v11622_v45 = vpop.f32.mrf.mxu2 }
0x169e   :  { %v20103_v17 = vadd.f32 %v11622_v45, %v11470_v10 }
0x169f   :  { %v10463_v43 = vpop.f32.mrf.mxu3 }
0x16a0   :  { %v10464_v32 = vadd.f32 %v10463_v43, %v10054_v0  ;;  %v10984_v0 = vadd.f32 %v10843_v4, %v19839_v2  ;;  %v20117_v10 = vpop.f32.mrf.mxu1  ;;  %v14827_v2 = vld [vmem:[#allocation5 + $0x450] sm:$0xf] }
0x16a1   :  { %v14828_v53 = vor.u32 %v15624_v22, %v14827_v2  ;;  %v15626_v2 = vld [vmem:[#allocation5 + $0x464] sm:$0xf0] }
0x16a2   :  { %15034 = vmatmul.msk.f32.gmra.mxu2 %vm10610_vm2, %v10464_v32  ;;  %v11228_v44 = vadd.f32 %v19899_v61, %v10984_v0  ;;  %v14816_v61 = vor.u32 %v15619_v47, %v14813_v5  ;;  %v10858_v5 = vpop.permute.xlu1 %10857 }
0x16a4   :  { %10505 = vmatmul.bf16.gmra.mxu3 %v14808_v16  ;;  %v11472_v45 = vadd.f32 %v20009_v49, %v11228_v44 }
0x16a5   :  { %v11625_v19 = vpop.f32.mrf.mxu2 }
0x16a6   :  { %v20113_v51 = vadd.f32 %v11625_v19, %v11471_v48  ;;  %v10853_v19 = vpop.permute.xlu0 %10852 }
0x16a7   :  { %v10466_v18 = vpop.f32.mrf.mxu3 }
0x16a8   :  { %v10467_v36 = vadd.f32 %v10466_v18, %v20074_v15  ;;  %v10985_v15 = vadd.f32 %v10848_v1, %v19848_v30  ;;  %v10072_v16 = vpop.f32.mrf.mxu1  ;;  %v20133_v18 = vpop.f32.mrf.mxu0 }
0x16aa   :  { %15035 = vmatmul.msk.f32.gmra.mxu2 %vm10610_vm2, %v10467_v36  ;;  %v11229_v49 = vadd.f32 %v19910_v20, %v10985_v15  ;;  %10111 = vmatmul.bf16.gmra.mxu1 %v14828_v53 }
0x16ac   :  { %v11473_v8 = vadd.f32 %v20020_v37, %v11229_v49 }
0x16ad   :  { %v11628_v40 = vpop.f32.mrf.mxu2 }
0x16ae   :  { %v20124_v43 = vadd.f32 %v11628_v40, %v11472_v45  ;;  %v15621_v45 = vld [vmem:[#allocation5 + $0x444] sm:$0xf]  ;;  %v14821_v40 = vld [vmem:[#allocation5 + $0x448] sm:$0xf0] }
0x16af   :  { %v10468_v27 = vpop.f32.mrf.mxu3  ;;  %v14824_v22 = vor.u32 %v15621_v45, %v14821_v40 }
0x16b0   :  { %v10469_v32 = vadd.f32 %v10468_v27, %v20080_v23  ;;  %v10986_v23 = vadd.f32 %v10853_v19, %v19851_v12  ;;  %v10074_v36 = vpop.f32.mrf.mxu1  ;;  %v14835_v27 = vld [vmem:[#allocation5 + $0x460] sm:$0xf]  ;;  %v10987_v12 = vadd.f32 %v10858_v5, %v19886_v57  ;;  %v15623_v19 = vld [vmem:[#allocation5 + $0x454] sm:$0xf] }
0x16b2   :  { %15036 = vmatmul.msk.f32.gmra.mxu2 %vm10610_vm2, %v10469_v32  ;;  %v11230_v20 = vadd.f32 %v19915_v46, %v10986_v23  ;;  %v14836_v46 = vor.u32 %v15626_v2, %v14835_v27  ;;  %v20144_v32 = vpop.f32.mrf.mxu0  ;;  %v14843_v23 = vld [vmem:[#allocation5 + $0x470] sm:$0xf]  ;;  %v15625_v27 = vld [vmem:[#allocation5 + $0x464] sm:$0xf]  ;;  %v14837_v2 = vld [vmem:[#allocation5 + $0x468] sm:$0xf0] }
0x16b4   :  { %10510 = vmatmul.bf16.gmra.mxu3 %v14816_v61  ;;  %v11474_v44 = vadd.f32 %v20025_v24, %v11230_v20  ;;  %v11231_v24 = vadd.f32 %v19920_v9, %v10987_v12 }
0x16b5   :  { %v11631_v48 = vpop.f32.mrf.mxu2 }
0x16b6   :  { %v20131_v4 = vadd.f32 %v11631_v48, %v11473_v8  ;;  %v11475_v61 = vadd.f32 %v20030_v33, %v11231_v24  ;;  %v15048_v48 = vld [vmem:[%s20504_s11 + $0x48] sm:$0xff]  ;;  %v14840_v24 = vor.u32 %v15625_v27, %v14837_v2 }
0x16b7   :  { %v10471_v30 = vpop.f32.mrf.mxu3  ;;  %11857 = vmatpush.msrb.mxu0 %v15048_v48 }
0x16b8   :  { %v10472_v0 = vadd.f32 %v10471_v30, %v20088_v29  ;;  %v10077_v15 = vpop.f32.mrf.mxu1  ;;  %v14829_v30 = vld [vmem:[#allocation5 + $0x458] sm:$0xf0] }
0x16ba   :  { %15037 = vmatmul.msk.f32.gmra.mxu2 %vm10610_vm2, %v10472_v0  ;;  %10116 = vmatmul.bf16.gmra.mxu1 %v14836_v46  ;;  %v20156_v9 = vpop.f32.mrf.mxu0  ;;  %v15628_v0 = vld [vmem:[#allocation5 + $0x474] sm:$0xf0] }
0x16bd   :  { %v11634_v37 = vpop.f32.mrf.mxu2 }
0x16be   :  { %v20140_v47 = vadd.f32 %v11634_v37, %v11474_v44  ;;  %v14832_v44 = vor.u32 %v15623_v19, %v14829_v30  ;;  %v14845_v30 = vld [vmem:[#allocation5 + $0x478] sm:$0xf0] }
0x16bf   :  { %v10473_v1 = vpop.f32.mrf.mxu3 }
0x16c0   :  { %v10474_v29 = vadd.f32 %v10473_v1, %v20096_v13  ;;  %v10079_v13 = vpop.f32.mrf.mxu1 }
0x16c2   :  { %15038 = vmatmul.msk.f32.gmra.mxu2 %vm10610_vm2, %v10474_v29  ;;  %v20160_v45 = vpop.f32.mrf.mxu0 }
0x16c4   :  { %10515 = vmatmul.bf16.gmra.mxu3 %v14824_v22  ;;  %v15630_v22 = vld [vmem:[#allocation5 + $0x484] sm:$0xf0] }
0x16c5   :  { %v11637_v53 = vpop.f32.mrf.mxu2 }
0x16c6   :  { %v20149_v49 = vadd.f32 %v11637_v53, %v11475_v61 }
0x16c7   :  { %v10476_v8 = vpop.f32.mrf.mxu3 }
0x16c8   :  { %v10477_v57 = vadd.f32 %v10476_v8, %v20106_v25  ;;  %v10082_v37 = vpop.f32.mrf.mxu1  ;;  %v14844_v25 = vor.u32 %v15628_v0, %v14843_v23  ;;  %v14859_v23 = vld [vmem:[#allocation5 + $0x490] sm:$0xf]  ;;  %v15632_v0 = vld [vmem:[#allocation5 + $0x494] sm:$0xf0] }
0x16ca   :  { %15039 = vmatmul.msk.f32.gmra.mxu2 %vm10610_vm2, %v10477_v57  ;;  %10121 = vmatmul.bf16.gmra.mxu1 %v14844_v25  ;;  %v20163_v12 = vpop.f32.mrf.mxu0  ;;  %v15047_v57 = vld [vmem:[%s20504_s11 + $0x40] sm:$0xff] }
0x16cb   :  { %11858 = vmatpush.msrb.mxu0 %v15047_v57 }
0x16cf   :  { %v10478_v33 = vpop.f32.mrf.mxu3 }
0x16d0   :  { %v10479_v20 = vadd.f32 %v10478_v33, %v20117_v10  ;;  %v10084_v1 = vpop.f32.mrf.mxu1  ;;  %v14851_v10 = vld [vmem:[#allocation5 + $0x480] sm:$0xf] }
0x16d1   :  { %v14852_v53 = vor.u32 %v15630_v22, %v14851_v10  ;;  %v15629_v10 = vld [vmem:[#allocation5 + $0x484] sm:$0xf]  ;;  %v14853_v22 = vld [vmem:[#allocation5 + $0x488] sm:$0xf0] }
0x16d2   :  { %15040 = vmatmul.msk.f32.gmra.mxu2 %vm10610_vm2, %v10479_v20  ;;  %v20169_v19 = vpop.f32.mrf.mxu0 }
0x16d4   :  { %10520 = vmatmul.bf16.gmra.mxu3 %v14832_v44 }
0x16d7   :  { %v10481_v40 = vpop.f32.mrf.mxu3 }
0x16d8   :  { %v10482_v5 = vadd.f32 %v10481_v40, %v10072_v16  ;;  %v10087_v61 = vpop.f32.mrf.mxu1  ;;  %v14860_v40 = vor.u32 %v15632_v0, %v14859_v23  ;;  %v15631_v23 = vld [vmem:[#allocation5 + $0x494] sm:$0xf]  ;;  %v14861_v0 = vld [vmem:[#allocation5 + $0x498] sm:$0xf0] }
0x16da   :  { %15041 = vmatmul.msk.f32.gmra.mxu2 %vm10610_vm2, %v10482_v5  ;;  %10126 = vmatmul.bf16.gmra.mxu1 %v14852_v53 }
0x16df   :  { %v10483_v29 = vpop.f32.mrf.mxu3 }
0x16e0   :  { %v10484_v46 = vadd.f32 %v10483_v29, %v10074_v36  ;;  %v10089_v48 = vpop.f32.mrf.mxu1  ;;  %v15627_v36 = vld [vmem:[#allocation5 + $0x474] sm:$0xf] }
0x16e1   :  { %v14848_v44 = vor.u32 %v15627_v36, %v14845_v30 }
0x16e2   :  { %15042 = vmatmul.msk.f32.gmra.mxu2 %vm10610_vm2, %v10484_v46 }
0x16e4   :  { %10525 = vmatmul.bf16.gmra.mxu3 %v14840_v24  ;;  %v15634_v24 = vld [vmem:[#allocation5 + $0x4a4] sm:$0xf0] }
0x16e7   :  { %v10486_v8 = vpop.f32.mrf.mxu3 }
0x16e8   :  { %v10487_v16 = vadd.f32 %v10486_v8, %v10077_v15  ;;  %v10092_v25 = vpop.f32.mrf.mxu1  ;;  %v20173_v15 = vpop.f32.mrf.mxu0  ;;  %v14856_v8 = vor.u32 %v15629_v10, %v14853_v22 }
0x16ea   :  { %15043 = vmatmul.msk.f32.gmra.mxu2 %vm10610_vm2, %v10487_v16  ;;  %10131 = vmatmul.bf16.gmra.mxu1 %v14860_v40  ;;  %v15636_v40 = vld [vmem:[#allocation5 + $0x4b4] sm:$0xf0] }
0x16ef   :  { %v10488_v33 = vpop.f32.mrf.mxu3 }
0x16f0   :  { %v10489_v20 = vadd.f32 %v10488_v33, %v10079_v13  ;;  %v10094_v2 = vpop.f32.mrf.mxu1  ;;  %v20176_v29 = vpop.f32.mrf.mxu0  ;;  %v14867_v13 = vld [vmem:[#allocation5 + $0x4a0] sm:$0xf] }
0x16f1   :  { %v14868_v57 = vor.u32 %v15634_v24, %v14867_v13 }
0x16f2   :  { %15044 = vmatmul.msk.f32.gmra.mxu2 %vm10610_vm2, %v10489_v20 }
0x16f4   :  { %10530 = vmatmul.bf16.gmra.mxu3 %v14848_v44  ;;  %v14875_v44 = vld [vmem:[#allocation5 + $0x4b0] sm:$0xf] }
0x16f5   :  { %v14876_v10 = vor.u32 %v15636_v40, %v14875_v44 }
0x16f7   :  { %v10491_v5 = vpop.f32.mrf.mxu3 }
0x16f8   :  { %v10492_v27 = vadd.f32 %v10491_v5, %v10082_v37  ;;  %v10097_v16 = vpop.f32.mrf.mxu1  ;;  %v20179_v36 = vpop.f32.mrf.mxu0  ;;  %v14864_v5 = vor.u32 %v15631_v23, %v14861_v0 }
0x16fa   :  { %15045 = vmatmul.msk.f32.gmra.mxu2 %vm10610_vm2, %v10492_v27  ;;  %10136 = vmatmul.bf16.gmra.mxu1 %v14868_v57 }
0x16ff   :  { %v10493_v46 = vpop.f32.mrf.mxu3 }
0x1700   :  { %v10494_v53 = vadd.f32 %v10493_v46, %v10084_v1  ;;  %v10099_v33 = vpop.f32.mrf.mxu1  ;;  %v20182_v22 = vpop.f32.mrf.mxu0 }
0x1702   :  { %15046 = vmatmul.msk.f32.gmra.mxu2 %vm10610_vm2, %v10494_v53  ;;  %v15633_v53 = vld [vmem:[#allocation5 + $0x4a4] sm:$0xf] }
0x1704   :  { %10535 = vmatmul.bf16.gmra.mxu3 %v14856_v8  ;;  %v14869_v8 = vld [vmem:[#allocation5 + $0x4a8] sm:$0xf0] }
0x1705   :  { %v14872_v23 = vor.u32 %v15633_v53, %v14869_v8  ;;  %v15640_v53 = vld [vmem:[#allocation5 + $0x4d4] sm:$0xf0] }
0x1707   :  { %v10496_v37 = vpop.f32.mrf.mxu3 }
0x1708   :  { %v10497_v30 = vadd.f32 %v10496_v37, %v10087_v61  ;;  %v10102_v27 = vpop.f32.mrf.mxu1  ;;  %v20186_v24 = vpop.f32.mrf.mxu0  ;;  %v15638_v37 = vld [vmem:[#allocation5 + $0x4c4] sm:$0xf0] }
0x170a   :  { %15049 = vmatmul.msk.f32.vlgmr.msrb.gmra.mxu0 %vm10610_vm2, %v10497_v30  ;;  %10141 = vmatmul.bf16.gmra.mxu1 %v14876_v10  ;;  %v14877_v10 = vld [vmem:[#allocation5 + $0x4b8] sm:$0xf0] }
0x170f   :  { %v10498_v20 = vpop.f32.mrf.mxu3 }
0x1710   :  { %v10499_v1 = vadd.f32 %v10498_v20, %v10089_v48  ;;  %v10104_v13 = vpop.f32.mrf.mxu1  ;;  %v14883_v48 = vld [vmem:[#allocation5 + $0x4c0] sm:$0xf]  ;;  %v20189_v44 = vpop.f32.mrf.mxu0 }
0x1711   :  { %v14884_v20 = vor.u32 %v15638_v37, %v14883_v48 }
0x1712   :  { %15050 = vmatmul.msk.f32.gmra.mxu0 %vm10610_vm2, %v10499_v1 }
0x1714   :  { %10540 = vmatmul.bf16.gmra.mxu3 %v14864_v5  ;;  %v15635_v5 = vld [vmem:[#allocation5 + $0x4b4] sm:$0xf] }
0x1717   :  { %v10501_v46 = vpop.f32.mrf.mxu3 }
0x1718   :  { %v10502_v61 = vadd.f32 %v10501_v46, %v10092_v25  ;;  %v10107_v0 = vpop.f32.mrf.mxu1  ;;  %v20192_v46 = vpop.f32.mrf.mxu0 }
0x171a   :  { %15051 = vmatmul.msk.f32.gmra.mxu0 %vm10610_vm2, %v10502_v61  ;;  %10146 = vmatmul.bf16.gmra.mxu1 %v14884_v20 }
0x171f   :  { %v10503_v57 = vpop.f32.mrf.mxu3 }
0x1720   :  { %v10504_v30 = vadd.f32 %v10503_v57, %v10094_v2  ;;  %v10109_v1 = vpop.f32.mrf.mxu1  ;;  %v14891_v2 = vld [vmem:[#allocation5 + $0x4d0] sm:$0xf]  ;;  %v14880_v57 = vor.u32 %v15635_v5, %v14877_v10  ;;  %v20195_v20 = vpop.f32.mrf.mxu0 }
0x1721   :  { %v14892_v37 = vor.u32 %v15640_v53, %v14891_v2  ;;  %20892 = vst [vmem:[#allocation54_spill] sm:$0xff] %v20195_v20 }
0x1722   :  { %15052 = vmatmul.msk.f32.gmra.mxu0 %vm10610_vm2, %v10504_v30 }
0x1724   :  { %10545 = vmatmul.bf16.gmra.mxu3 %v14872_v23 }
0x1727   :  { %v10506_v25 = vpop.f32.mrf.mxu3 }
0x1728   :  { %v10507_v40 = vadd.f32 %v10506_v25, %v10097_v16  ;;  %v10112_v48 = vpop.f32.mrf.mxu1  ;;  %v15637_v25 = vld [vmem:[#allocation5 + $0x4c4] sm:$0xf]  ;;  %v20199_v2 = vpop.f32.mrf.mxu0 }
0x1729   :  { %20893 = vst [vmem:[#allocation63_spill] sm:$0xff] %v20199_v2 }
0x172a   :  { %15053 = vmatmul.msk.f32.gmra.mxu0 %vm10610_vm2, %v10507_v40  ;;  %10151 = vmatmul.bf16.gmra.mxu1 %v14892_v37  ;;  %v14885_v40 = vld [vmem:[#allocation5 + $0x4c8] sm:$0xf0]  ;;  %v15639_v37 = vld [vmem:[#allocation5 + $0x4d4] sm:$0xf] }
0x172b   :  { %v14888_v5 = vor.u32 %v15637_v25, %v14885_v40 }
0x172f   :  { %v10508_v61 = vpop.f32.mrf.mxu3 }
0x1730   :  { %v10509_v8 = vadd.f32 %v10508_v61, %v10099_v33  ;;  %v10114_v23 = vpop.f32.mrf.mxu1  ;;  %v14900_v61 = vor.u32 %v15642_v38, %v14899_v63 }
0x1732   :  { %15054 = vmatmul.msk.f32.gmra.mxu0 %vm10610_vm2, %v10509_v8 }
0x1734   :  { %10550 = vmatmul.bf16.gmra.mxu3 %v14880_v57  ;;  %v20202_v57 = vpop.f32.mrf.mxu0 }
0x1735   :  { %20894 = vst [vmem:[#allocation57_spill] sm:$0xff] %v20202_v57 }
0x1737   :  { %v10511_v30 = vpop.f32.mrf.mxu3 }
0x1738   :  { %v10512_v16 = vadd.f32 %v10511_v30, %v10102_v27  ;;  %v10117_v10 = vpop.f32.mrf.mxu1  ;;  %v14893_v30 = vld [vmem:[#allocation5 + $0x4d8] sm:$0xf0] }
0x1739   :  { %v14896_v38 = vor.u32 %v15639_v37, %v14893_v30 }
0x173a   :  { %15055 = vmatmul.msk.f32.gmra.mxu0 %vm10610_vm2, %v10512_v16  ;;  %10156 = vmatmul.bf16.gmra.mxu1 %v14900_v61  ;;  %v15641_v61 = vld [vmem:[#allocation5 + $0x4e4] sm:$0xf] }
0x173f   :  { %v10513_v50 = vpop.f32.mrf.mxu3 }
0x1740   :  { %v10514_v33 = vadd.f32 %v10513_v50, %v10104_v13  ;;  %v10119_v8 = vpop.f32.mrf.mxu1  ;;  %v14907_v50 = vld [vmem:[#allocation5 + $0x4f0] sm:$0xf]  ;;  %v15644_v13 = vld [vmem:[#allocation5 + $0x4f4] sm:$0xf0] }
0x1741   :  { %v14908_v63 = vor.u32 %v15644_v13, %v14907_v50  ;;  %v14909_v13 = vld [vmem:[#allocation5 + $0x4f8] sm:$0xf0] }
0x1742   :  { %15056 = vmatmul.msk.f32.gmra.mxu0 %vm10610_vm2, %v10514_v33  ;;  %v20205_v33 = vpop.f32.mrf.mxu0 }
0x1744   :  { %10555 = vmatmul.bf16.gmra.mxu3 %v14888_v5 }
0x1747   :  { %v10516_v27 = vpop.f32.mrf.mxu3 }
0x1748   :  { %v10517_v53 = vadd.f32 %v10516_v27, %v10107_v0  ;;  %v10122_v40 = vpop.f32.mrf.mxu1  ;;  %v14901_v27 = vld [vmem:[#allocation5 + $0x4e8] sm:$0xf0] }
0x1749   :  { %v14904_v20 = vor.u32 %v15641_v61, %v14901_v27 }
0x174a   :  { %15057 = vmatmul.msk.f32.gmra.mxu0 %vm10610_vm2, %v10517_v53  ;;  %10161 = vmatmul.bf16.gmra.mxu1 %v14908_v63 }
0x174f   :  { %v10518_v16 = vpop.f32.mrf.mxu3 }
0x1750   :  { %v10519_v25 = vadd.f32 %v10518_v16, %v10109_v1  ;;  %v10124_v53 = vpop.f32.mrf.mxu1  ;;  %v20208_v1 = vpop.f32.mrf.mxu0 }
0x1752   :  { %15058 = vmatmul.msk.f32.gmra.mxu0 %vm10610_vm2, %v10519_v25 }
0x1754   :  { %10560 = vmatmul.bf16.gmra.mxu3 %v14896_v38 }
0x1757   :  { %v10521_v0 = vpop.f32.mrf.mxu3 }
0x1758   :  { %v10522_v5 = vadd.f32 %v10521_v0, %v10112_v48  ;;  %v10127_v16 = vpop.f32.mrf.mxu1  ;;  %v20212_v50 = vpop.f32.mrf.mxu0  ;;  %v15643_v48 = vld [vmem:[#allocation5 + $0x4f4] sm:$0xf] }
0x1759   :  { %v14912_v63 = vor.u32 %v15643_v48, %v14909_v13 }
0x175a   :  { %15059 = vmatmul.msk.f32.gmra.mxu0 %vm10610_vm2, %v10522_v5 }
0x175f   :  { %v10523_v57 = vpop.f32.mrf.mxu3 }
0x1760   :  { %v10524_v2 = vadd.f32 %v10523_v57, %v10114_v23  ;;  %v10129_v23 = vpop.f32.mrf.mxu1  ;;  %v20215_v57 = vpop.f32.mrf.mxu0 }
0x1762   :  { %15060 = vmatmul.msk.f32.gmra.mxu0 %vm10610_vm2, %v10524_v2 }
0x1764   :  { %10565 = vmatmul.bf16.gmra.mxu3 %v14904_v20 }
0x1767   :  { %v10526_v37 = vpop.f32.mrf.mxu3 }
0x1768   :  { %v10527_v30 = vadd.f32 %v10526_v37, %v10117_v10  ;;  %v10132_v10 = vpop.f32.mrf.mxu1  ;;  %v20218_v0 = vpop.f32.mrf.mxu0 }
0x176a   :  { %15061 = vmatmul.msk.f32.gmra.mxu0 %vm10610_vm2, %v10527_v30 }
0x176f   :  { %v10528_v25 = vpop.f32.mrf.mxu3 }
0x1770   :  { %v10529_v38 = vadd.f32 %v10528_v25, %v10119_v8  ;;  %v10134_v27 = vpop.f32.mrf.mxu1 }
0x1772   :  { %15062 = vmatmul.msk.f32.gmra.mxu0 %vm10610_vm2, %v10529_v38 }
0x1774   :  { %10570 = vmatmul.bf16.gmra.mxu3 %v14912_v63 }
0x1777   :  { %v10531_v2 = vpop.f32.mrf.mxu3 }
0x1778   :  { %v10532_v20 = vadd.f32 %v10531_v2, %v10122_v40  ;;  %v11988_v40 = vld [vmem:[%s20506_s13] sm:$0xff] }
0x177a   :  { %15063 = vmatmul.msk.f32.gmra.mxu0 %vm10610_vm2, %v10532_v20  ;;  %v10137_v20 = vpop.f32.mrf.mxu1 }
0x177f   :  { %v10533_v5 = vpop.f32.mrf.mxu3 }
0x1780   :  { %v10534_v61 = vadd.f32 %v10533_v5, %v10124_v53  ;;  %v11989_v53 = vld [vmem:[%s20506_s13 + $0x8] sm:$0xff] }
0x1782   :  { %15064 = vmatmul.msk.f32.gmra.mxu0 %vm10610_vm2, %v10534_v61 }
0x1787   :  { %v10536_v8 = vpop.f32.mrf.mxu3  ;;  %v11860_v37 = vpop.f32.mrf.mxu0 }
0x1788   :  { %v10537_v30 = vadd.f32 %v10536_v8, %v10127_v16  ;;  %v11956_v48 = vadd.f32 %v11860_v37, %v20085_v7  ;;  %v20231_v7 = vpop.f32.mrf.mxu2 }
0x178a   :  { %15065 = vmatmul.msk.f32.gmra.mxu0 %vm10610_vm2, %v10537_v30  ;;  %v12020_v38 = vmul.f32 %v11988_v40, %v11956_v48 }
0x178c   :  { %v12053_v5 = vsel %vm12052_vm3, %v12020_v38, 0.0 }
0x178f   :  { %v10538_v13 = vpop.f32.mrf.mxu3  ;;  %v11863_v25 = vpop.f32.mrf.mxu0 }
0x1790   :  { %v10539_v63 = vadd.f32 %v10538_v13, %v10129_v23  ;;  %v11957_v2 = vadd.f32 %v11863_v25, %v20093_v21  ;;  %v11990_v23 = vld [vmem:[%s20506_s13 + $0x10] sm:$0xff]  ;;  %v10139_v13 = vpop.f32.mrf.mxu1  ;;  %v20241_v38 = vpop.f32.mrf.mxu2 }
0x1792   :  { %v12021_v16 = vmul.f32 %v11989_v53, %v11957_v2  ;;  %15066 = vmatmul.msk.f32.gmra.mxu0 %vm10610_vm2, %v10539_v63 }
0x1794   :  { %v12054_v61 = vsel %vm12052_vm3, %v12021_v16, 0.0  ;;  %v11991_v16 = vld [vmem:[%s20506_s13 + $0x18] sm:$0xff] }
0x1795   :  { %v12055_v8 = vadd.f32 %v12054_v61, %v12053_v5 }
0x1797   :  { %v10541_v37 = vpop.f32.mrf.mxu3  ;;  %v11866_v30 = vpop.f32.mrf.mxu0 }
0x1798   :  { %v10542_v48 = vadd.f32 %v10541_v37, %v10132_v10  ;;  %v11958_v21 = vadd.f32 %v11866_v30, %v20103_v17  ;;  %v10142_v37 = vpop.f32.mrf.mxu1 }
0x179a   :  { %v12022_v40 = vmul.f32 %v11990_v23, %v11958_v21  ;;  %15067 = vmatmul.msk.f32.gmra.mxu0 %vm10610_vm2, %v10542_v48  ;;  %v11992_v48 = vld [vmem:[%s20506_s13 + $0x20] sm:$0xff]  ;;  %v20252_v21 = vpop.f32.mrf.mxu2 }
0x179c   :  { %v12056_v25 = vsel %vm12052_vm3, %v12022_v40, 0.0 }
0x179d   :  { %v12057_v53 = vadd.f32 %v12056_v25, %v12055_v8 }
0x179f   :  { %v10543_v63 = vpop.f32.mrf.mxu3  ;;  %v11869_v2 = vpop.f32.mrf.mxu0 }
0x17a0   :  { %v10544_v5 = vadd.f32 %v10543_v63, %v10134_v27  ;;  %v11959_v10 = vadd.f32 %v11869_v2, %v20113_v51  ;;  %v10144_v2 = vpop.f32.mrf.mxu1 }
0x17a2   :  { %v12023_v61 = vmul.f32 %v11991_v16, %v11959_v10  ;;  %15068 = vmatmul.msk.f32.gmra.mxu0 %vm10610_vm2, %v10544_v5  ;;  %v11993_v5 = vld [vmem:[%s20506_s13 + $0x28] sm:$0xff] }
0x17a4   :  { %v12058_v17 = vsel %vm12052_vm3, %v12023_v61, 0.0 }
0x17a5   :  { %v12059_v30 = vadd.f32 %v12058_v17, %v12057_v53  ;;  %v20261_v17 = vpop.f32.mrf.mxu2 }
0x17a7   :  { %v10546_v23 = vpop.f32.mrf.mxu3  ;;  %v11872_v8 = vpop.f32.mrf.mxu0 }
0x17a8   :  { %v10547_v40 = vadd.f32 %v10546_v23, %v10137_v20  ;;  %v11960_v27 = vadd.f32 %v11872_v8, %v20124_v43 }
0x17aa   :  { %v12024_v25 = vmul.f32 %v11992_v48, %v11960_v27  ;;  %15069 = vmatmul.msk.f32.gmra.mxu0 %vm10610_vm2, %v10547_v40  ;;  %v11994_v48 = vld [vmem:[%s20506_s13 + $0x30] sm:$0xff] }
0x17ac   :  { %v12060_v51 = vsel %vm12052_vm3, %v12024_v25, 0.0 }
0x17ad   :  { %v12061_v63 = vadd.f32 %v12060_v51, %v12059_v30 }
0x17af   :  { %v10548_v16 = vpop.f32.mrf.mxu3  ;;  %v11875_v53 = vpop.f32.mrf.mxu0 }
0x17b0   :  { %v10549_v10 = vadd.f32 %v10548_v16, %v10139_v13  ;;  %v11961_v61 = vadd.f32 %v11875_v53, %v20131_v4  ;;  %v10147_v13 = vpop.f32.mrf.mxu1  ;;  %v20270_v4 = vpop.f32.mrf.mxu2 }
0x17b1   :  { %v10863_v53 = vpop.permute.xlu2 %10862 }
0x17b2   :  { %v12025_v20 = vmul.f32 %v11993_v5, %v11961_v61  ;;  %15070 = vmatmul.msk.f32.gmra.mxu0 %vm10610_vm2, %v10549_v10  ;;  %v11995_v10 = vld [vmem:[%s20506_s13 + $0x38] sm:$0xff] }
0x17b4   :  { %v12062_v43 = vsel %vm12052_vm3, %v12025_v20, 0.0 }
0x17b5   :  { %v12063_v23 = vadd.f32 %v12062_v43, %v12061_v63 }
0x17b7   :  { %v10551_v8 = vpop.f32.mrf.mxu3  ;;  %v11878_v30 = vpop.f32.mrf.mxu0 }
0x17b8   :  { %v10552_v40 = vadd.f32 %v10551_v8, %v10142_v37  ;;  %v11962_v27 = vadd.f32 %v11878_v30, %v20140_v47  ;;  %v10988_v37 = vadd.f32 %v10863_v53, %v19891_v59  ;;  %v10149_v8 = vpop.f32.mrf.mxu1 }
0x17ba   :  { %v12026_v25 = vmul.f32 %v11994_v48, %v11962_v27  ;;  %15071 = vmatmul.msk.f32.gmra.mxu0 %vm10610_vm2, %v10552_v40  ;;  %v11232_v20 = vadd.f32 %v19972_v54, %v10988_v37  ;;  %v10868_v40 = vpop.permute.xlu0 %10867  ;;  %v11996_v54 = vld [vmem:[%s20506_s13 + $0x40] sm:$0xff]  ;;  %v10873_v37 = vpop.permute.xlu1 %10872 }
0x17bc   :  { %v12064_v51 = vsel %vm12052_vm3, %v12026_v25, 0.0  ;;  %v20283_v25 = vpop.f32.mrf.mxu2 }
0x17bd   :  { %v12065_v16 = vadd.f32 %v12064_v51, %v12063_v23  ;;  %v11476_v23 = vadd.f32 %v20098_v26, %v11232_v20 }
0x17bf   :  { %v10553_v63 = vpop.f32.mrf.mxu3  ;;  %v11881_v5 = vpop.f32.mrf.mxu0  ;;  %v11720_v27 = vadd.f32 %v20231_v7, %v11476_v23 }
0x17c0   :  { %v10554_v61 = vadd.f32 %v10553_v63, %v10144_v2  ;;  %v11963_v47 = vadd.f32 %v11881_v5, %v20149_v49  ;;  %v10989_v49 = vadd.f32 %v10868_v40, %v19896_v42  ;;  %v10152_v5 = vpop.f32.mrf.mxu1  ;;  %v11997_v42 = vld [vmem:[%s20506_s13 + $0x48] sm:$0xff] }
0x17c2   :  { %v12027_v43 = vmul.f32 %v11995_v10, %v11963_v47  ;;  %15072 = vmatmul.msk.f32.gmra.mxu0 %vm10610_vm2, %v10554_v61  ;;  %v11233_v26 = vadd.f32 %v19977_v60, %v10989_v49  ;;  %v10990_v60 = vadd.f32 %v10873_v37, %v19908_v62 }
0x17c4   :  { %v12066_v30 = vsel %vm12052_vm3, %v12027_v43, 0.0 }
0x17c5   :  { %v12067_v48 = vadd.f32 %v12066_v30, %v12065_v16  ;;  %v11477_v16 = vadd.f32 %v20110_v52, %v11233_v26  ;;  %v11234_v52 = vadd.f32 %v19983_v34, %v10990_v60 }
0x17c7   :  { %v10556_v59 = vpop.f32.mrf.mxu3  ;;  %v11884_v2 = vpop.f32.mrf.mxu0  ;;  %v11721_v61 = vadd.f32 %v20241_v38, %v11477_v16 }
0x17c8   :  { %v10557_v51 = vadd.f32 %v10556_v59, %v10147_v13  ;;  %v11964_v53 = vadd.f32 %v11884_v2, %v11720_v27  ;;  %v20298_v13 = vpop.f32.mrf.mxu2  ;;  %v10878_v27 = vpop.permute.xlu2 %10877 }
0x17c9   :  { %v10154_v2 = vpop.f32.mrf.mxu1  ;;  %v10991_v34 = vadd.f32 %v10878_v27, %v19913_v6  ;;  %v11999_v6 = vld [vmem:[%s20506_s13 + $0x58] sm:$0xff] }
0x17ca   :  { %v12028_v63 = vmul.f32 %v11996_v54, %v11964_v53  ;;  %15073 = vmatmul.msk.f32.gmra.mxu0 %vm10610_vm2, %v10557_v51 }
0x17cb   :  { %v11235_v53 = vadd.f32 %v19990_v55, %v10991_v34 }
0x17cc   :  { %v12068_v7 = vsel %vm12052_vm3, %v12028_v63, 0.0 }
0x17cd   :  { %v12069_v10 = vadd.f32 %v12068_v7, %v12067_v48  ;;  %v11478_v48 = vadd.f32 %v20122_v41, %v11234_v52  ;;  %v10883_v7 = vpop.permute.xlu0 %10882  ;;  %v10888_v52 = vpop.permute.xlu1 %10887 }
0x17ce   :  { %v10992_v55 = vadd.f32 %v10883_v7, %v19918_v58 }
0x17cf   :  { %v10558_v47 = vpop.f32.mrf.mxu3  ;;  %v11887_v20 = vpop.f32.mrf.mxu0  ;;  %v11722_v59 = vadd.f32 %v20252_v21, %v11478_v48  ;;  %v11479_v21 = vadd.f32 %v20133_v18, %v11235_v53 }
0x17d0   :  { %v10559_v43 = vadd.f32 %v10558_v47, %v10149_v8  ;;  %v11965_v23 = vadd.f32 %v11887_v20, %v11721_v61  ;;  %v11998_v8 = vld [vmem:[%s20506_s13 + $0x50] sm:$0xff]  ;;  %v20310_v41 = vpop.f32.mrf.mxu2 }
0x17d1   :  { %v10157_v20 = vpop.f32.mrf.mxu1 }
0x17d2   :  { %v12029_v30 = vmul.f32 %v11997_v42, %v11965_v23  ;;  %15074 = vmatmul.msk.f32.gmra.mxu0 %vm10610_vm2, %v10559_v43  ;;  %v11236_v42 = vadd.f32 %v19995_v3, %v10992_v55  ;;  %v10993_v3 = vadd.f32 %v10888_v52, %v19923_v28  ;;  %v12001_v28 = vld [vmem:[%s20506_s13 + $0x68] sm:$0xff] }
0x17d4   :  { %v12070_v38 = vsel %vm12052_vm3, %v12029_v30, 0.0  ;;  %v11480_v60 = vadd.f32 %v20144_v32, %v11236_v42  ;;  %v11237_v32 = vadd.f32 %v20000_v39, %v10993_v3  ;;  %v20895_v3 = vld [vmem:[#allocation14_spill] sm:$0xff] }
0x17d5   :  { %v12071_v40 = vadd.f32 %v12070_v38, %v12069_v10  ;;  %v11723_v10 = vadd.f32 %v20261_v17, %v11479_v21  ;;  %v12000_v38 = vld [vmem:[%s20506_s13 + $0x60] sm:$0xff] }
0x17d6   :  { %v11724_v30 = vadd.f32 %v20270_v4, %v11480_v60 }
0x17d7   :  { %v10561_v54 = vpop.f32.mrf.mxu3  ;;  %v11890_v62 = vpop.f32.mrf.mxu0 }
0x17d8   :  { %v10562_v49 = vadd.f32 %v10561_v54, %v10152_v5  ;;  %v11966_v51 = vadd.f32 %v11890_v62, %v11722_v59  ;;  %v20323_v43 = vpop.f32.mrf.mxu2  ;;  %v11481_v54 = vadd.f32 %v20156_v9, %v11237_v32 }
0x17da   :  { %v12030_v26 = vmul.f32 %v11998_v8, %v11966_v51  ;;  %15075 = vmatmul.msk.f32.gmra.mxu0 %vm10610_vm2, %v10562_v49  ;;  %v10893_v8 = vpop.permute.xlu2 %10892  ;;  %v11725_v34 = vadd.f32 %v20283_v25, %v11481_v54 }
0x17db   :  { %v10994_v39 = vadd.f32 %v10893_v8, %v19927_v14  ;;  %v12002_v14 = vld [vmem:[%s20506_s13 + $0x70] sm:$0xff] }
0x17dc   :  { %v12072_v63 = vsel %vm12052_vm3, %v12030_v26, 0.0 }
0x17dd   :  { %v12073_v16 = vadd.f32 %v12072_v63, %v12071_v40  ;;  %v11238_v63 = vadd.f32 %v20006_v56, %v10994_v39 }
0x17df   :  { %v10563_v37 = vpop.f32.mrf.mxu3  ;;  %v11893_v61 = vpop.f32.mrf.mxu0 }
0x17e0   :  { %v10564_v5 = vadd.f32 %v10563_v37, %v10154_v2  ;;  %v11967_v47 = vadd.f32 %v11893_v61, %v11723_v10  ;;  %v10159_v2 = vpop.f32.mrf.mxu1  ;;  %v11667_v49 = vpop.f32.mrf.mxu2 }
0x17e1   :  { %v10898_v37 = vpop.permute.xlu0 %10897 }
0x17e2   :  { %v12031_v18 = vmul.f32 %v11999_v6, %v11967_v47  ;;  %15076 = vmatmul.msk.f32.gmra.mxu0 %vm10610_vm2, %v10564_v5  ;;  %v10995_v56 = vadd.f32 %v10898_v37, %v19930_v35  ;;  %v12003_v35 = vld [vmem:[%s20506_s13 + $0x78] sm:$0xff]  ;;  %v10908_v54 = vpop.permute.xlu2 %10907  ;;  %v20899_v37 = vld [vmem:[#allocation17_spill] sm:$0xff] }
0x17e4   :  { %v12074_v17 = vsel %vm12052_vm3, %v12031_v18, 0.0 }
0x17e5   :  { %v12075_v23 = vadd.f32 %v12074_v17, %v12073_v16  ;;  %v11482_v16 = vadd.f32 %v20160_v45, %v11238_v63  ;;  %v11239_v45 = vadd.f32 %v20011_v11, %v10995_v56  ;;  %v10903_v17 = vpop.permute.xlu1 %10902 }
0x17e6   :  { %v10996_v11 = vadd.f32 %v10903_v17, %v19933_v31  ;;  %v12004_v31 = vld [vmem:[%s20506_s13 + $0x80] sm:$0xff] }
0x17e7   :  { %v10566_v48 = vpop.f32.mrf.mxu3  ;;  %v11896_v58 = vpop.f32.mrf.mxu0  ;;  %v11726_v61 = vadd.f32 %v20298_v13, %v11482_v16  ;;  %v11483_v18 = vadd.f32 %v20163_v12, %v11239_v45  ;;  %v12005_v16 = vld [vmem:[%s20506_s13 + $0x88] sm:$0xff]  ;;  %v12006_v45 = vld [vmem:[%s20506_s13 + $0x90] sm:$0xff] }
0x17e8   :  { %v10567_v40 = vadd.f32 %v10566_v48, %v10157_v20  ;;  %v11968_v27 = vadd.f32 %v11896_v58, %v11724_v30  ;;  %v10162_v7 = vpop.f32.mrf.mxu1  ;;  %v11670_v20 = vpop.f32.mrf.mxu2 }
0x17ea   :  { %v12032_v59 = vmul.f32 %v12000_v38, %v11968_v27  ;;  %15077 = vmatmul.msk.f32.gmra.mxu0 %vm10610_vm2, %v10567_v40  ;;  %v11240_v40 = vadd.f32 %v20895_v3, %v10996_v11  ;;  %v12007_v11 = vld [vmem:[%s20506_s13 + $0x98] sm:$0xff] }
0x17ec   :  { %v12076_v4 = vsel %vm12052_vm3, %v12032_v59, 0.0  ;;  %v11484_v32 = vadd.f32 %v20169_v19, %v11240_v40 }
0x17ed   :  { %v12077_v62 = vadd.f32 %v12076_v4, %v12075_v23  ;;  %v11727_v23 = vadd.f32 %v20310_v41, %v11483_v18  ;;  %v10918_v56 = vpop.permute.xlu1 %10917 }
0x17ef   :  { %v10568_v51 = vpop.f32.mrf.mxu3  ;;  %v11899_v53 = vpop.f32.mrf.mxu0 }
0x17f0   :  { %v10569_v26 = vadd.f32 %v10568_v51, %v10159_v2  ;;  %v11969_v21 = vadd.f32 %v11899_v53, %v11725_v34  ;;  %v10164_v52 = vpop.f32.mrf.mxu1  ;;  %v11673_v27 = vpop.f32.mrf.mxu2  ;;  %v11728_v2 = vadd.f32 %v20323_v43, %v11484_v32  ;;  %v20897_v51 = vld [vmem:[#allocation11_spill] sm:$0xff] }
0x17f1   :  { %v10913_v43 = vpop.permute.xlu0 %10912 }
0x17f2   :  { %v12033_v9 = vmul.f32 %v12001_v28, %v11969_v21  ;;  %15078 = vmatmul.msk.f32.gmra.mxu0 %vm10610_vm2, %v10569_v26 }
0x17f4   :  { %v12078_v25 = vsel %vm12052_vm3, %v12033_v9, 0.0 }
0x17f5   :  { %v12079_v10 = vadd.f32 %v12078_v25, %v12077_v62  ;;  %v20896_v62 = vld [vmem:[#allocation44_spill] sm:$0xff] }
0x17f6   :  { %v10997_v8 = vadd.f32 %v10908_v54, %v20896_v62  ;;  %v20898_v25 = vld [vmem:[#allocation24_spill] sm:$0xff] }
0x17f7   :  { %v10571_v6 = vpop.f32.mrf.mxu3  ;;  %v11902_v55 = vpop.f32.mrf.mxu0 }
0x17f8   :  { %v10572_v5 = vadd.f32 %v10571_v6, %v10162_v7  ;;  %v11970_v47 = vadd.f32 %v11902_v55, %v11726_v61  ;;  %v11241_v53 = vadd.f32 %v20897_v51, %v10997_v8  ;;  %v11676_v26 = vpop.f32.mrf.mxu2  ;;  %v10998_v7 = vadd.f32 %v10913_v43, %v20898_v25 }
0x17f9   :  { %v10928_v43 = vpop.permute.xlu0 %10927 }
0x17fa   :  { %v12034_v42 = vmul.f32 %v12002_v14, %v11970_v47  ;;  %15079 = vmatmul.msk.f32.gmra.mxu0 %vm10610_vm2, %v10572_v5  ;;  %v11485_v39 = vadd.f32 %v20173_v15, %v11241_v53  ;;  %v11242_v61 = vadd.f32 %v20899_v37, %v10998_v7 }
0x17fc   :  { %v12080_v13 = vsel %vm12052_vm3, %v12034_v42, 0.0  ;;  %v11729_v63 = vadd.f32 %v11667_v49, %v11485_v39  ;;  %v11486_v55 = vadd.f32 %v20176_v29, %v11242_v61  ;;  %v20900_v42 = vld [vmem:[#allocation25_spill] sm:$0xff]  ;;  %v20904_v61 = vld [vmem:[#allocation71_spill] sm:$0xff] }
0x17fd   :  { %v12081_v60 = vadd.f32 %v12080_v13, %v12079_v10  ;;  %v10999_v18 = vadd.f32 %v10918_v56, %v20900_v42  ;;  %v20907_v42 = vld [vmem:[#allocation59_spill] sm:$0xff] }
0x17fe   :  { %v11730_v5 = vadd.f32 %v11670_v20, %v11486_v55 }
0x17ff   :  { %v10573_v30 = vpop.f32.mrf.mxu3  ;;  %v11905_v48 = vpop.f32.mrf.mxu0 }
0x1800   :  { %v10574_v58 = vadd.f32 %v10573_v30, %v10164_v52  ;;  %v11971_v38 = vadd.f32 %v11905_v48, %v11727_v23  ;;  %v11679_v49 = vpop.f32.mrf.mxu2 }
0x1802   :  { %v12035_v12 = vmul.f32 %v12003_v35, %v11971_v38  ;;  %15080 = vmatmul.msk.f32.gmra.mxu0 %vm10610_vm2, %v10574_v58  ;;  %v10923_v35 = vpop.permute.xlu2 %10922  ;;  %v20902_v58 = vld [vmem:[#allocation32_spill] sm:$0xff] }
0x1803   :  { %v11000_v38 = vadd.f32 %v10923_v35, %v20902_v58 }
0x1804   :  { %v12082_v41 = vsel %vm12052_vm3, %v12035_v12, 0.0  ;;  %v20903_v12 = vld [vmem:[#allocation78_spill] sm:$0xff] }
0x1805   :  { %v12083_v59 = vadd.f32 %v12082_v41, %v12081_v60  ;;  %v20901_v60 = vld [vmem:[#allocation18_spill] sm:$0xff]  ;;  %v11244_v32 = vadd.f32 %v20903_v12, %v11000_v38  ;;  %v20912_v38 = vld [vmem:[#allocation61_spill] sm:$0xff] }
0x1806   :  { %v11243_v17 = vadd.f32 %v20901_v60, %v10999_v18 }
0x1807   :  { %v11908_v4 = vpop.f32.mrf.mxu0 }
0x1808   :  { %v11972_v34 = vadd.f32 %v11908_v4, %v11728_v2  ;;  %v11487_v52 = vadd.f32 %v20179_v36, %v11243_v17  ;;  %v11682_v40 = vpop.f32.mrf.mxu2  ;;  %v12008_v4 = vld [vmem:[%s20506_s13 + $0xa0] sm:$0xff] }
0x180a   :  { %v12036_v28 = vmul.f32 %v12004_v31, %v11972_v34  ;;  %v11731_v48 = vadd.f32 %v11673_v27, %v11487_v52  ;;  %v10938_v7 = vpop.permute.xlu2 %10937  ;;  %v20909_v52 = vld [vmem:[#allocation65_spill] sm:$0xff] }
0x180b   :  { %v11003_v18 = vadd.f32 %v10938_v7, %v20907_v42  ;;  %v20918_v7 = vld [vmem:[#allocation63_spill] sm:$0xff] }
0x180c   :  { %v12084_v19 = vsel %vm12052_vm3, %v12036_v28, 0.0 }
0x180d   :  { %v12085_v21 = vadd.f32 %v12084_v19, %v12083_v59  ;;  %v11488_v59 = vadd.f32 %v20182_v22, %v11244_v32 }
0x180f   :  { %v11911_v9 = vpop.f32.mrf.mxu0  ;;  %v11732_v54 = vadd.f32 %v11676_v26, %v11488_v59  ;;  %v20913_v59 = vld [vmem:[#allocation10_spill] sm:$0xff] }
0x1810   :  { %v11973_v10 = vadd.f32 %v11911_v9, %v11729_v63  ;;  %v11685_v8 = vpop.f32.mrf.mxu2 }
0x1812   :  { %v12037_v6 = vmul.f32 %v12005_v16, %v11973_v10  ;;  %v10933_v16 = vpop.permute.xlu1 %10932  ;;  %v10943_v10 = vpop.permute.xlu0 %10942 }
0x1814   :  { %v12086_v15 = vsel %vm12052_vm3, %v12037_v6, 0.0  ;;  %v11001_v6 = vadd.f32 %v10928_v43, %v20904_v61 }
0x1815   :  { %v12087_v14 = vadd.f32 %v12086_v15, %v12085_v21 }
0x1817   :  { %v11914_v47 = vpop.f32.mrf.mxu0 }
0x1818   :  { %v11974_v13 = vadd.f32 %v11914_v47, %v11730_v5  ;;  %v11688_v28 = vpop.f32.mrf.mxu2  ;;  %v20906_v5 = vld [vmem:[#allocation26_spill] sm:$0xff] }
0x1819   :  { %v11245_v47 = vadd.f32 %v20906_v5, %v11001_v6  ;;  %v20920_v5 = vld [vmem:[#allocation27_spill] sm:$0xff] }
0x181a   :  { %v12038_v23 = vmul.f32 %v12006_v45, %v11974_v13  ;;  %v10948_v15 = vpop.permute.xlu1 %10947  ;;  %v10953_v45 = vpop.permute.xlu2 %10952  ;;  %v20908_v13 = vld [vmem:[#allocation36_spill] sm:$0xff] }
0x181b   :  { %v11489_v17 = vadd.f32 %v20186_v24, %v11245_v47  ;;  %v12009_v24 = vld [vmem:[%s20506_s13 + $0xa8] sm:$0xff] }
0x181c   :  { %v12088_v29 = vsel %vm12052_vm3, %v12038_v23, 0.0  ;;  %v10958_v23 = vpop.permute.xlu0 %10957 }
0x181d   :  { %v12089_v30 = vadd.f32 %v12088_v29, %v12087_v14  ;;  %v20905_v14 = vld [vmem:[#allocation38_spill] sm:$0xff]  ;;  %v11004_v29 = vadd.f32 %v10943_v10, %v20909_v52  ;;  %v20923_v52 = vld [vmem:[#allocation15_spill] sm:$0xff] }
0x181e   :  { %v11002_v56 = vadd.f32 %v10933_v16, %v20905_v14  ;;  %v20917_v16 = vld [vmem:[#allocation69_spill] sm:$0xff]  ;;  %v20919_v14 = vld [vmem:[#allocation64_spill] sm:$0xff] }
0x181f   :  { %v11917_v20 = vpop.f32.mrf.mxu0 }
0x1820   :  { %v11975_v3 = vadd.f32 %v11917_v20, %v11731_v48  ;;  %v11691_v22 = vpop.f32.mrf.mxu2  ;;  %v11246_v60 = vadd.f32 %v20908_v13, %v11002_v56  ;;  %v11733_v20 = vadd.f32 %v11679_v49, %v11489_v17  ;;  %v20922_v17 = vld [vmem:[#allocation67_spill] sm:$0xff] }
0x1822   :  { %v12039_v41 = vmul.f32 %v12007_v11, %v11975_v3  ;;  %v11490_v35 = vadd.f32 %v20189_v44, %v11246_v60  ;;  %v20911_v11 = vld [vmem:[#allocation46_spill] sm:$0xff]  ;;  %v11248_v3 = vadd.f32 %v20912_v38, %v11004_v29  ;;  %v12012_v29 = vld [vmem:[%s20506_s13 + $0xc0] sm:$0xff]  ;;  %v20925_v38 = vld [vmem:[#allocation19_spill] sm:$0xff] }
0x1823   :  { %v11005_v58 = vadd.f32 %v10948_v15, %v20911_v11  ;;  %v20915_v44 = vld [vmem:[#allocation54_spill] sm:$0xff] }
0x1824   :  { %v12090_v36 = vsel %vm12052_vm3, %v12039_v41, 0.0  ;;  %v11734_v32 = vadd.f32 %v11682_v40, %v11490_v35  ;;  %v11492_v49 = vadd.f32 %v20915_v44, %v11248_v3  ;;  %v12010_v40 = vld [vmem:[%s20506_s13 + $0xb0] sm:$0xff] }
0x1825   :  { %v12091_v2 = vadd.f32 %v12090_v36, %v12089_v30  ;;  %v20910_v30 = vld [vmem:[#allocation62_spill] sm:$0xff]  ;;  %v11006_v36 = vadd.f32 %v10953_v45, %v20913_v59  ;;  %v20921_v45 = vld [vmem:[#allocation57_spill] sm:$0xff] }
0x1826   :  { %v11247_v48 = vadd.f32 %v20910_v30, %v11003_v18  ;;  %v11736_v61 = vadd.f32 %v11688_v28, %v11492_v49  ;;  %v10973_v30 = vpop.permute.xlu0 %10972 }
0x1827   :  { %v11920_v27 = vpop.f32.mrf.mxu0 }
0x1828   :  { %v11976_v31 = vadd.f32 %v11920_v27, %v11732_v54  ;;  %v11694_v63 = vpop.f32.mrf.mxu2  ;;  %v11491_v12 = vadd.f32 %v20192_v46, %v11247_v48  ;;  %v20914_v27 = vld [vmem:[#allocation70_spill] sm:$0xff]  ;;  %v11250_v46 = vadd.f32 %v20917_v16, %v11006_v36  ;;  %v20926_v36 = vld [vmem:[#allocation37_spill] sm:$0xff] }
0x182a   :  { %v12040_v62 = vmul.f32 %v12008_v4, %v11976_v31  ;;  %v11249_v4 = vadd.f32 %v20914_v27, %v11005_v58  ;;  %v11735_v31 = vadd.f32 %v11685_v8, %v11491_v12  ;;  %v12011_v8 = vld [vmem:[%s20506_s13 + $0xb8] sm:$0xff]  ;;  %v11494_v42 = vadd.f32 %v20921_v45, %v11250_v46  ;;  %v20924_v58 = vld [vmem:[#allocation13_spill] sm:$0xff] }
0x182c   :  { %v12092_v34 = vsel %vm12052_vm3, %v12040_v62, 0.0  ;;  %v11493_v10 = vadd.f32 %v20918_v7, %v11249_v4  ;;  %v11738_v48 = vadd.f32 %v11694_v63, %v11494_v42 }
0x182d   :  { %v20395_v51 = vadd.f32 %v12092_v34, %v12091_v2  ;;  %v20916_v34 = vld [vmem:[#allocation35_spill] sm:$0xff] }
0x182e   :  { %v11007_v43 = vadd.f32 %v10958_v23, %v20916_v34  ;;  %v11737_v18 = vadd.f32 %v11691_v22, %v11493_v10  ;;  %v11010_v22 = vadd.f32 %v10973_v30, %v20924_v58 }
0x182f   :  { %v11923_v53 = vpop.f32.mrf.mxu0 }
0x1830   :  { %v20397_v9 = vpop.f32.mrf.mxu2  ;;  %v11977_v41 = vadd.f32 %v11923_v53, %v11733_v20  ;;  %v10963_v53 = vpop.permute.xlu1 %10962  ;;  %v11251_v47 = vadd.f32 %v20920_v5, %v11007_v43 }
0x1831   :  { %v11008_v56 = vadd.f32 %v10963_v53, %v20919_v14 }
0x1832   :  { %v12041_v6 = vmul.f32 %v12009_v24, %v11977_v41 }
0x1833   :  { %v11252_v28 = vadd.f32 %v20923_v52, %v11008_v56 }
0x1834   :  { %v12094_v35 = vsel %vm12052_vm3, %v12041_v6, 0.0  ;;  %v20927_v6 = vld [vmem:[#allocation52_spill] sm:$0xff] }
0x1835   :  { %v11496_v3 = vadd.f32 %v20208_v1, %v11252_v28  ;;  %v12095_v4 = vadd.f32 %v12094_v35, %v20395_v51  ;;  %v12014_v1 = vld [vmem:[%s20506_s13 + $0xd0] sm:$0xff] }
0x1837   :  { %v11926_v39 = vpop.f32.mrf.mxu0 }
0x1838   :  { %v20401_v37 = vpop.f32.mrf.mxu2  ;;  %v11978_v62 = vadd.f32 %v11926_v39, %v11734_v32  ;;  %v10968_v39 = vpop.permute.xlu2 %10967 }
0x1839   :  { %v11009_v23 = vadd.f32 %v10968_v39, %v20922_v17  ;;  %v11740_v44 = vadd.f32 %v20401_v37, %v11496_v3  ;;  %v12016_v37 = vld [vmem:[%s20506_s13 + $0xe0] sm:$0xff]  ;;  %v10978_v7 = vpop.permute.xlu1 %10977 }
0x183a   :  { %v12042_v13 = vmul.f32 %v12010_v40, %v11978_v62 }
0x183c   :  { %v12096_v41 = vsel %vm12052_vm3, %v12042_v13, 0.0 }
0x183d   :  { %v12097_v62 = vadd.f32 %v12096_v41, %v12095_v4  ;;  %v12122_v41 = vld [vmem:[%s20507_s14] sm:$0x3] }
0x183f   :  { %v11929_v19 = vpop.f32.mrf.mxu0 }
0x1840   :  { %v11703_v2 = vpop.f32.mrf.mxu2  ;;  %v11979_v15 = vadd.f32 %v11929_v19, %v11735_v31  ;;  %v11495_v19 = vadd.f32 %v20205_v33, %v11251_v47  ;;  %v12013_v33 = vld [vmem:[%s20506_s13 + $0xc8] sm:$0xff]  ;;  %v12018_v47 = vld [vmem:[%s20506_s13 + $0xf0] sm:$0xff] }
0x1842   :  { %v12043_v20 = vmul.f32 %v12011_v8, %v11979_v15  ;;  %v11739_v32 = vadd.f32 %v20397_v9, %v11495_v19  ;;  %v11011_v15 = vadd.f32 %v10978_v7, %v20927_v6  ;;  %v20928_v8 = vld [vmem:[#allocation22_spill] sm:$0xff] }
0x1844   :  { %v12098_v9 = vsel %vm12052_vm3, %v12043_v20, 0.0  ;;  %v11255_v39 = vadd.f32 %v20928_v8, %v11011_v15 }
0x1845   :  { %v12099_v46 = vadd.f32 %v12098_v9, %v12097_v62 }
0x1847   :  { %v11932_v21 = vpop.f32.mrf.mxu0 }
0x1848   :  { %v11980_v60 = vadd.f32 %v11932_v21, %v11736_v61  ;;  %v11253_v21 = vadd.f32 %v20925_v38, %v11009_v23  ;;  %v11706_v27 = vpop.f32.mrf.mxu2 }
0x184a   :  { %v12044_v63 = vmul.f32 %v12012_v29, %v11980_v60  ;;  %v11497_v24 = vadd.f32 %v20212_v50, %v11253_v21  ;;  %v12015_v50 = vld [vmem:[%s20506_s13 + $0xd8] sm:$0xff]  ;;  %v11499_v60 = vadd.f32 %v20218_v0, %v11255_v39 }
0x184c   :  { %v11741_v34 = vadd.f32 %v11703_v2, %v11497_v24  ;;  %v12100_v51 = vsel %vm12052_vm3, %v12044_v63, 0.0  ;;  %v12017_v2 = vld [vmem:[%s20506_s13 + $0xe8] sm:$0xff] }
0x184d   :  { %v12101_v10 = vadd.f32 %v12100_v51, %v12099_v46 }
0x184f   :  { %v11935_v26 = vpop.f32.mrf.mxu0 }
0x1850   :  { %v11981_v11 = vadd.f32 %v11935_v26, %v11737_v18  ;;  %v11254_v26 = vadd.f32 %v20926_v36, %v11010_v22  ;;  %v11709_v18 = vpop.f32.mrf.mxu2 }
0x1851   :  { %v11743_v28 = vadd.f32 %v11709_v18, %v11499_v60 }
0x1852   :  { %v12045_v49 = vmul.f32 %v12013_v33, %v11981_v11 }
0x1857   :  { %v20399_v25 = vpop.f32.mrf.mxu0 }
0x1858   :  { %v11982_v59 = vadd.f32 %v20399_v25, %v11738_v48  ;;  %v11498_v25 = vadd.f32 %v20215_v57, %v11254_v26  ;;  %v12019_v48 = vld [vmem:[%s20506_s13 + $0xf8] sm:$0xff]  ;;  %v15699_v26 = vld [vmem:[#allocation2] ss:$0 sm:$0xff] }
0x185a   :  { %v12046_v43 = vmul.f32 %v12014_v1, %v11982_v59  ;;  %v11742_v40 = vadd.f32 %v11706_v27, %v11498_v25 }
0x185f   :  { %v20404_v55 = vpop.f32.mrf.mxu0 }
0x1860   :  { %v11983_v31 = vadd.f32 %v20404_v55, %v11739_v32  ;;  %v12102_v55 = vsel %vm12052_vm3, %v12045_v49, 0.0 }
0x1861   :  { %v12103_v5 = vadd.f32 %v12102_v55, %v12101_v10 }
0x1862   :  { %v12047_v53 = vmul.f32 %v12015_v50, %v11983_v31 }
0x1864   :  { %v12106_v45 = vsel %vm12052_vm3, %v12047_v53, 0.0 }
0x1867   :  { %v11944_v54 = vpop.f32.mrf.mxu0 }
0x1868   :  { %v11984_v16 = vadd.f32 %v11944_v54, %v11740_v44  ;;  %v12104_v54 = vsel %vm12052_vm3, %v12046_v43, 0.0 }
0x1869   :  { %v12105_v13 = vadd.f32 %v12104_v54, %v12103_v5 }
0x186a   :  { %v12048_v14 = vmul.f32 %v12016_v37, %v11984_v16 }
0x186b   :  { %v12107_v52 = vadd.f32 %v12106_v45, %v12105_v13 }
0x186c   :  { %v12108_v17 = vsel %vm12052_vm3, %v12048_v14, 0.0 }
0x186d   :  { %v12109_v29 = vadd.f32 %v12108_v17, %v12107_v52 }
0x186f   :  { %v11947_v12 = vpop.f32.mrf.mxu0 }
0x1870   :  { %v11985_v57 = vadd.f32 %v11947_v12, %v11741_v34 }
0x1872   :  { %v12049_v42 = vmul.f32 %v12017_v2, %v11985_v57 }
0x1874   :  { %v12110_v19 = vsel %vm12052_vm3, %v12049_v42, 0.0 }
0x1875   :  { %v12111_v11 = vadd.f32 %v12110_v19, %v12109_v29 }
0x1877   :  { %v11950_v61 = vpop.f32.mrf.mxu0 }
0x1878   :  { %v11986_v56 = vadd.f32 %v11950_v61, %v11742_v40 }
0x187a   :  { %v12050_v23 = vmul.f32 %v12018_v47, %v11986_v56 }
0x187c   :  { %v12112_v35 = vsel %vm12052_vm3, %v12050_v23, 0.0 }
0x187d   :  { %v12113_v22 = vadd.f32 %v12112_v35, %v12111_v11 }
0x187f   :  { %v11953_v30 = vpop.f32.mrf.mxu0 }
0x1880   :  { %v11987_v20 = vadd.f32 %v11953_v30, %v11743_v28 }
0x1882   :  { %v12051_v58 = vmul.f32 %v12019_v48, %v11987_v20 }
0x1884   :  { %v12114_v0 = vsel %vm12052_vm3, %v12051_v58, 0.0 }
0x1885   :  { %v12115_v38 = vadd.f32 %v12114_v0, %v12113_v22 }
0x1887   :  { %v12116_v21 = vrot.slane %v12115_v38, 4 }
0x1889   :  { %v12117_v3 = vadd.f32 %v12116_v21, %v12115_v38 }
0x188b   :  { %v12118_v33 = vrot.slane %v12117_v3, 2 }
0x188d   :  { %v12119_v12 = vadd.f32 %v12118_v33, %v12117_v3 }
0x188f   :  { %v12120_v32 = vrot.slane %v12119_v12, 1 }
0x1891   :  { %v12121_v63 = vadd.f32 %v12120_v32, %v12119_v12 }
0x1893   :  { %v12123_v59 = vmul.f32 %v12122_v41, %v12121_v63 }
0x1895   :  { %v12125_v36 = vsel %vm12124_vm4, %v12123_v59, 0.0 }
0x1896   :  { %12126 = vadd.xlane.f32.xlu2 %v12125_v36 }
0x1909   :  { %v12127_v24 = vpop.xlane.xlu2 %12126 }
0x190a   :  { %v12132_v27 = vadd.f32 %v15699_v26, %v12127_v24 }
0x190c   :  { %v12133_v4 = vmul.f32 0.5, %v12132_v27 }
0x190e   :  { %15700 = vtanh.f32 %v12133_v4 }
0x1914   :  { %v15701_v1 = vpop.eup %15700 }
0x1915   :  { %v12135_v44 = vadd.f32 1.0, %v15701_v1 }
0x1917   :  { %v12136_v9 = vmul.f32 0.5, %v12135_v44 }
0x1919   :  { %12138 = vst.msk [vmem:[%s20509_s16] sm:$0x3] %vm12137_vm5, %v12136_v9 }
0x191a   :  { %12143 = vsyncpa [#allocation4], 1 }
0x191b   :  { %12144 = vsyncpa [#allocation6], 1 }

</bundles_post_ra>
